<compile_context>
chip_gen: v6e
topology: v6e:2x2x1
jax: 0.10.0
libtpu: 0.0.40
codegen_flags: <defaults>
</compile_context>

<pallas_src>
import functools
import math

import jax
import jax.numpy as jnp
from jax import lax
from jax.experimental import pallas as pl
from jax.experimental.pallas import tpu as pltpu


NEG_INF = -1e30   # finite "-inf": identical softmax result for partially-masked
                  # rows, but no NaN if a row is ever fully masked.
LN_EPS = 1e-5     # PyTorch LayerNorm default.


# ----------------------------- in-kernel helpers ------------------------------

def _layer_norm(x, g, b):
    """LayerNorm over last axis. x: (S, E); g, b: (1, E)."""
    mu = jnp.mean(x, axis=-1, keepdims=True)
    xc = x - mu
    var = jnp.mean(xc * xc, axis=-1, keepdims=True)
    return xc * lax.rsqrt(var + LN_EPS) * g + b


def _ffn(x, w1, b1, w2, b2):
    h = jnp.dot(x, w1, preferred_element_type=jnp.float32) + b1
    h = jnp.maximum(h, 0.0)
    return jnp.dot(h, w2, preferred_element_type=jnp.float32) + b2


def _mha(q_in, kv_in, in_w, in_b, out_w, out_b, bias, num_heads, is_self):
    """Multi-head attention for a single batch element.

    q_in: (Sq, E), kv_in: (Sk, E), in_w: (E, 3E), in_b: (1, 3E),
    out_w: (E, E), out_b: (1, E), bias: None or additive (.., Sk) mask.
    Heads are a static Python loop over lane slices; the output projection is
    accumulated per head (mathematically identical to concat + matmul).
    """
    E = q_in.shape[-1]
    H = num_heads
    Dh = E // H
    scale = jnp.float32(1.0 / math.sqrt(Dh))

    if is_self:
        qkv = jnp.dot(q_in, in_w, preferred_element_type=jnp.float32) + in_b
        q = qkv[:, :E]
        k = qkv[:, E:2 * E]
        v = qkv[:, 2 * E:]
    else:
        q = jnp.dot(q_in, in_w[:, :E], preferred_element_type=jnp.float32) + in_b[:, :E]
        kv = jnp.dot(kv_in, in_w[:, E:], preferred_element_type=jnp.float32) + in_b[:, E:]
        k = kv[:, :E]
        v = kv[:, E:]

    acc = jnp.zeros((q_in.shape[0], E), jnp.float32)
    for h in range(H):
        sl = slice(h * Dh, (h + 1) * Dh)
        qh = q[:, sl] * scale
        kh = k[:, sl]
        vh = v[:, sl]
        # scores = qh @ kh^T  (contract last dims; no explicit transpose)
        s = lax.dot_general(qh, kh, (((1,), (1,)), ((), ())),
                            preferred_element_type=jnp.float32)
        if bias is not None:
            s = s + bias
        m = jnp.max(s, axis=-1, keepdims=True)
        p = jnp.exp(s - m)
        denom = jnp.sum(p, axis=-1, keepdims=True)
        o = jnp.dot(p, vh, preferred_element_type=jnp.float32)
        o = o * pl.reciprocal(denom, approx=True)
        # fold this head's slice of the output projection in directly
        acc = acc + jnp.dot(o, out_w[sl, :], preferred_element_type=jnp.float32)
    return acc + out_b


# ------------------------------- fused kernel ---------------------------------

def _transformer_kernel(*refs, num_heads, n_enc, n_dec):
    it = iter(refs)
    nxt = lambda: next(it)

    src_ref, trg_ref, src_bias_ref = nxt(), nxt(), nxt()

    # encoder stacks (leading dim = layer)
    e_inw, e_inb, e_outw, e_outb = nxt(), nxt(), nxt(), nxt()
    e_l1w, e_l1b, e_l2w, e_l2b = nxt(), nxt(), nxt(), nxt()
    e_ln1g, e_ln1b, e_ln2g, e_ln2b = nxt(), nxt(), nxt(), nxt()
    enc_ng, enc_nb = nxt(), nxt()

    # decoder stacks
    d_sa_inw, d_sa_inb, d_sa_outw, d_sa_outb = nxt(), nxt(), nxt(), nxt()
    d_ca_inw, d_ca_inb, d_ca_outw, d_ca_outb = nxt(), nxt(), nxt(), nxt()
    d_l1w, d_l1b, d_l2w, d_l2b = nxt(), nxt(), nxt(), nxt()
    d_ln1g, d_ln1b, d_ln2g, d_ln2b, d_ln3g, d_ln3b = (
        nxt(), nxt(), nxt(), nxt(), nxt(), nxt())
    dec_ng, dec_nb = nxt(), nxt()
    fc_w, fc_b = nxt(), nxt()

    out_ref = nxt()

    x = src_ref[...].astype(jnp.float32)        # (Ssrc, E)
    y = trg_ref[...].astype(jnp.float32)        # (Strg, E)
    kpm_bias = src_bias_ref[...]                # (1, Ssrc) additive (0 / NEG_INF)

    # causal (subsequent) mask for decoder self-attention, built in-kernel
    St = y.shape[0]
    row = lax.broadcasted_iota(jnp.int32, (St, St), 0)
    col = lax.broadcasted_iota(jnp.int32, (St, St), 1)
    causal = jnp.where(col > row, jnp.float32(NEG_INF), jnp.float32(0.0))

    # ---------------- encoder (post-norm layers) ----------------
    for l in range(n_enc):
        attn = _mha(x, x, e_inw[l], e_inb[l], e_outw[l], e_outb[l],
                    kpm_bias, num_heads, is_self=True)
        x = _layer_norm(x + attn, e_ln1g[l], e_ln1b[l])
        ff = _ffn(x, e_l1w[l], e_l1b[l], e_l2w[l], e_l2b[l])
        x = _layer_norm(x + ff, e_ln2g[l], e_ln2b[l])
    memory = _layer_norm(x, enc_ng[...], enc_nb[...])

    # ---------------- decoder (post-norm layers) ----------------
    for l in range(n_dec):
        sa = _mha(y, y, d_sa_inw[l], d_sa_inb[l], d_sa_outw[l], d_sa_outb[l],
                  causal, num_heads, is_self=True)
        y = _layer_norm(y + sa, d_ln1g[l], d_ln1b[l])
        ca = _mha(y, memory, d_ca_inw[l], d_ca_inb[l], d_ca_outw[l], d_ca_outb[l],
                  None, num_heads, is_self=False)
        y = _layer_norm(y + ca, d_ln2g[l], d_ln2b[l])
        ff = _ffn(y, d_l1w[l], d_l1b[l], d_l2w[l], d_l2b[l])
        y = _layer_norm(y + ff, d_ln3g[l], d_ln3b[l])
    y = _layer_norm(y, dec_ng[...], dec_nb[...])

    # ---------------- fc head (lane-dense padded vocab) ----------------
    logits = jnp.dot(y, fc_w[...], preferred_element_type=jnp.float32) + fc_b[...]
    out_ref[...] = logits.astype(out_ref.dtype)


# ------------------------------- host wrapper ----------------------------------

def _round_up(x, m):
    return ((x + m - 1) // m) * m


def _pack_weights(params):
    enc = params["encoder_layers"]
    dec = params["decoder_layers"]

    def stack(layers, key):
        return jnp.stack([l[key] for l in layers])

    w = []
    w += [stack(enc, "attn_in_w"), stack(enc, "attn_in_b"),
          stack(enc, "attn_out_w"), stack(enc, "attn_out_b"),
          stack(enc, "lin1_w"), stack(enc, "lin1_b"),
          stack(enc, "lin2_w"), stack(enc, "lin2_b"),
          stack(enc, "ln1_g"), stack(enc, "ln1_b"),
          stack(enc, "ln2_g"), stack(enc, "ln2_b"),
          params["encoder_norm_g"], params["encoder_norm_b"]]
    w += [stack(dec, "sa_in_w"), stack(dec, "sa_in_b"),
          stack(dec, "sa_out_w"), stack(dec, "sa_out_b"),
          stack(dec, "ca_in_w"), stack(dec, "ca_in_b"),
          stack(dec, "ca_out_w"), stack(dec, "ca_out_b"),
          stack(dec, "lin1_w"), stack(dec, "lin1_b"),
          stack(dec, "lin2_w"), stack(dec, "lin2_b"),
          stack(dec, "ln1_g"), stack(dec, "ln1_b"),
          stack(dec, "ln2_g"), stack(dec, "ln2_b"),
          stack(dec, "ln3_g"), stack(dec, "ln3_b"),
          params["decoder_norm_g"], params["decoder_norm_b"],
          params["fc_w"], params["fc_b"]]
    return w


def network_forward(params, src, trg, cfg):
    E = cfg["embed_dim"]
    H = cfg["num_heads"]
    Ss, N = src.shape
    St, _ = trg.shape
    V = cfg["trg_vocab_size"]
    Vp = params["fc_w"].shape[1]

    # ---- plain-JAX glue: embedding gathers + mask construction ----
    src_pos = jnp.arange(Ss)
    trg_pos = jnp.arange(St)
    src_emb = (jnp.take(params["src_embed"], src, axis=0)
               + jnp.take(params["src_pos_embed"], src_pos, axis=0)[:, None, :])
    trg_emb = (jnp.take(params["trg_embed"], trg, axis=0)
               + jnp.take(params["trg_pos_embed"], trg_pos, axis=0)[:, None, :])
    # (dropout omitted: eval-mode identity)

    # batch-first for the kernel (lane-dense E on the last axis)
    src_emb = src_emb.transpose(1, 0, 2)                               # (N, Ss, E)
    trg_emb = trg_emb.transpose(1, 0, 2)                               # (N, St, E)
    src_bias = jnp.where(src.T == cfg["src_pad_index"],
                         NEG_INF, 0.0).astype(jnp.float32)[:, None, :]  # (N, 1, Ss)

    weights = _pack_weights(params)

    def per_batch_spec(a):
        nd = a.ndim
        return pl.BlockSpec((None,) + a.shape[1:],
                            lambda b, nd=nd: (b,) + (0,) * (nd - 1))

    def const_spec(a):
        nd = a.ndim
        return pl.BlockSpec(a.shape, lambda b, nd=nd: (0,) * nd)

    in_specs = [per_batch_spec(src_emb), per_batch_spec(trg_emb),
                per_batch_spec(src_bias)]
    in_specs += [const_spec(w) for w in weights]

    kernel = functools.partial(_transformer_kernel,
                               num_heads=H,
                               n_enc=cfg["num_encoder_layers"],
                               n_dec=cfg["num_decoder_layers"])

    out_pad = pl.pallas_call(
        kernel,
        out_shape=jax.ShapeDtypeStruct((N, St, Vp), jnp.float32),
        grid=(N,),
        in_specs=in_specs,
        out_specs=pl.BlockSpec((None, St, Vp), lambda b: (b, 0, 0)),
        compiler_params=pltpu.CompilerParams(
            dimension_semantics=("parallel",)),
    )(src_emb, trg_emb, src_bias, *weights)

    # slice padded vocab back, return seq-first like nn.Transformer output
    return out_pad[:, :, :V].transpose(1, 0, 2)                        # (St, N, V)


# --------------------------------- init -----------------------------------------

def init_params(key, cfg):
    E = cfg["embed_dim"]
    F = cfg["dim_feedforward"]
    V = cfg["trg_vocab_size"]
    Vp = _round_up(V, 128)
    keys = iter(jax.random.split(key, 512))

    def nrm(shape, scale=0.02):
        return (scale * jax.random.normal(next(keys), shape)).astype(jnp.float32)

    def zeros(shape):
        return jnp.zeros(shape, jnp.float32)

    def ones(shape):
        return jnp.ones(shape, jnp.float32)

    def enc_layer():
        return dict(
            attn_in_w=nrm((E, 3 * E)), attn_in_b=zeros((1, 3 * E)),
            attn_out_w=nrm((E, E)), attn_out_b=zeros((1, E)),
            lin1_w=nrm((E, F)), lin1_b=zeros((1, F)),
            lin2_w=nrm((F, E)), lin2_b=zeros((1, E)),
            ln1_g=ones((1, E)), ln1_b=zeros((1, E)),
            ln2_g=ones((1, E)), ln2_b=zeros((1, E)),
        )

    def dec_layer():
        return dict(
            sa_in_w=nrm((E, 3 * E)), sa_in_b=zeros((1, 3 * E)),
            sa_out_w=nrm((E, E)), sa_out_b=zeros((1, E)),
            ca_in_w=nrm((E, 3 * E)), ca_in_b=zeros((1, 3 * E)),
            ca_out_w=nrm((E, E)), ca_out_b=zeros((1, E)),
            lin1_w=nrm((E, F)), lin1_b=zeros((1, F)),
            lin2_w=nrm((F, E)), lin2_b=zeros((1, E)),
            ln1_g=ones((1, E)), ln1_b=zeros((1, E)),
            ln2_g=ones((1, E)), ln2_b=zeros((1, E)),
            ln3_g=ones((1, E)), ln3_b=zeros((1, E)),
        )

    # fc head weight stored pre-transposed (E, V) and zero-padded to 128 lanes
    fc_w = jnp.zeros((E, Vp), jnp.float32).at[:, :V].set(nrm((E, V)))
    fc_b = jnp.zeros((1, Vp), jnp.float32)

    return dict(
        src_embed=nrm((cfg["src_vocab_size"], E)),
        src_pos_embed=nrm((cfg["max_length"], E)),
        trg_embed=nrm((V, E)),
        trg_pos_embed=nrm((cfg["max_length"], E)),
        encoder_layers=[enc_layer() for _ in range(cfg["num_encoder_layers"])],
        decoder_layers=[dec_layer() for _ in range(cfg["num_decoder_layers"])],
        encoder_norm_g=ones((1, E)), encoder_norm_b=zeros((1, E)),
        decoder_norm_g=ones((1, E)), decoder_norm_b=zeros((1, E)),
        fc_w=fc_w, fc_b=fc_b,
    )


# --------------------------------- main ------------------------------------------

if __name__ == "__main__":
    cfg = dict(
        src_vocab_size=50,
        trg_vocab_size=60,
        embed_dim=32,
        max_length=16,
        num_heads=4,
        num_encoder_layers=3,
        num_decoder_layers=3,
        dim_feedforward=96,   # nn.Transformer dim_feedforward (forward_expansion arg)
        src_pad_index=1,
    )

    key = jax.random.PRNGKey(0)
    pkey, skey, tkey = jax.random.split(key, 3)
    params = init_params(pkey, cfg)

    src_len, trg_len, N = 10, 8, 2
    src = jax.random.randint(skey, (src_len, N), 0, cfg["src_vocab_size"], dtype=jnp.int32)
    src = src.at[-2:, 0].set(cfg["src_pad_index"])   # some padding (never a full column)
    trg = jax.random.randint(tkey, (trg_len, N), 0, cfg["trg_vocab_size"], dtype=jnp.int32)

    fwd = jax.jit(lambda p, s, t: network_forward(p, s, t, cfg))
    out = fwd(params, src, trg)
    out = jax.block_until_ready(out)

    assert out.shape == (trg_len, N, cfg["trg_vocab_size"]), out.shape
    assert bool(jnp.all(jnp.isfinite(out))), "non-finite output"
    print("KERNEL_OK")
</pallas_src>

<mosaic_0001>
module attributes {stable_mosaic.version = 11 : i64} {
  func.func @_transformer_kernel(%arg0: i32, %arg1: memref<1x10x32xf32, #tpu.memory_space<vmem>>, %arg2: memref<1x8x32xf32, #tpu.memory_space<vmem>>, %arg3: memref<1x1x10xf32, #tpu.memory_space<vmem>>, %arg4: memref<3x32x96xf32, #tpu.memory_space<vmem>>, %arg5: memref<3x1x96xf32, #tpu.memory_space<vmem>>, %arg6: memref<3x32x32xf32, #tpu.memory_space<vmem>>, %arg7: memref<3x1x32xf32, #tpu.memory_space<vmem>>, %arg8: memref<3x32x96xf32, #tpu.memory_space<vmem>>, %arg9: memref<3x1x96xf32, #tpu.memory_space<vmem>>, %arg10: memref<3x96x32xf32, #tpu.memory_space<vmem>>, %arg11: memref<3x1x32xf32, #tpu.memory_space<vmem>>, %arg12: memref<3x1x32xf32, #tpu.memory_space<vmem>>, %arg13: memref<3x1x32xf32, #tpu.memory_space<vmem>>, %arg14: memref<3x1x32xf32, #tpu.memory_space<vmem>>, %arg15: memref<3x1x32xf32, #tpu.memory_space<vmem>>, %arg16: memref<1x32xf32, #tpu.memory_space<vmem>>, %arg17: memref<1x32xf32, #tpu.memory_space<vmem>>, %arg18: memref<3x32x96xf32, #tpu.memory_space<vmem>>, %arg19: memref<3x1x96xf32, #tpu.memory_space<vmem>>, %arg20: memref<3x32x32xf32, #tpu.memory_space<vmem>>, %arg21: memref<3x1x32xf32, #tpu.memory_space<vmem>>, %arg22: memref<3x32x96xf32, #tpu.memory_space<vmem>>, %arg23: memref<3x1x96xf32, #tpu.memory_space<vmem>>, %arg24: memref<3x32x32xf32, #tpu.memory_space<vmem>>, %arg25: memref<3x1x32xf32, #tpu.memory_space<vmem>>, %arg26: memref<3x32x96xf32, #tpu.memory_space<vmem>>, %arg27: memref<3x1x96xf32, #tpu.memory_space<vmem>>, %arg28: memref<3x96x32xf32, #tpu.memory_space<vmem>>, %arg29: memref<3x1x32xf32, #tpu.memory_space<vmem>>, %arg30: memref<3x1x32xf32, #tpu.memory_space<vmem>>, %arg31: memref<3x1x32xf32, #tpu.memory_space<vmem>>, %arg32: memref<3x1x32xf32, #tpu.memory_space<vmem>>, %arg33: memref<3x1x32xf32, #tpu.memory_space<vmem>>, %arg34: memref<3x1x32xf32, #tpu.memory_space<vmem>>, %arg35: memref<3x1x32xf32, #tpu.memory_space<vmem>>, %arg36: memref<1x32xf32, #tpu.memory_space<vmem>>, %arg37: memref<1x32xf32, #tpu.memory_space<vmem>>, %arg38: memref<32x128xf32, #tpu.memory_space<vmem>>, %arg39: memref<1x128xf32, #tpu.memory_space<vmem>>, %arg40: memref<1x8x128xf32, #tpu.memory_space<vmem>>) attributes {dimension_semantics = [#tpu.dimension_semantics<parallel>], iteration_bounds = array<i64: 2>, scalar_prefetch = 0 : i64, scratch_operands = 0 : i64, tpu.core_type = #tpu.core_type<tc>, window_params = [{transform_indices = @transform_0, window_bounds = array<i64: 1, 10, 32>}, {transform_indices = @transform_1, window_bounds = array<i64: 1, 8, 32>}, {transform_indices = @transform_2, window_bounds = array<i64: 1, 1, 10>}, {pipeline_mode = #tpu.pipeline_mode<synchronous>, transform_indices = @transform_3, window_bounds = array<i64: 3, 32, 96>}, {pipeline_mode = #tpu.pipeline_mode<synchronous>, transform_indices = @transform_4, window_bounds = array<i64: 3, 1, 96>}, {pipeline_mode = #tpu.pipeline_mode<synchronous>, transform_indices = @transform_5, window_bounds = array<i64: 3, 32, 32>}, {pipeline_mode = #tpu.pipeline_mode<synchronous>, transform_indices = @transform_6, window_bounds = array<i64: 3, 1, 32>}, {pipeline_mode = #tpu.pipeline_mode<synchronous>, transform_indices = @transform_7, window_bounds = array<i64: 3, 32, 96>}, {pipeline_mode = #tpu.pipeline_mode<synchronous>, transform_indices = @transform_8, window_bounds = array<i64: 3, 1, 96>}, {pipeline_mode = #tpu.pipeline_mode<synchronous>, transform_indices = @transform_9, window_bounds = array<i64: 3, 96, 32>}, {pipeline_mode = #tpu.pipeline_mode<synchronous>, transform_indices = @transform_10, window_bounds = array<i64: 3, 1, 32>}, {pipeline_mode = #tpu.pipeline_mode<synchronous>, transform_indices = @transform_11, window_bounds = array<i64: 3, 1, 32>}, {pipeline_mode = #tpu.pipeline_mode<synchronous>, transform_indices = @transform_12, window_bounds = array<i64: 3, 1, 32>}, {pipeline_mode = #tpu.pipeline_mode<synchronous>, transform_indices = @transform_13, window_bounds = array<i64: 3, 1, 32>}, {pipeline_mode = #tpu.pipeline_mode<synchronous>, transform_indices = @transform_14, window_bounds = array<i64: 3, 1, 32>}, {pipeline_mode = #tpu.pipeline_mode<synchronous>, transform_indices = @transform_15, window_bounds = array<i64: 1, 32>}, {pipeline_mode = #tpu.pipeline_mode<synchronous>, transform_indices = @transform_16, window_bounds = array<i64: 1, 32>}, {pipeline_mode = #tpu.pipeline_mode<synchronous>, transform_indices = @transform_17, window_bounds = array<i64: 3, 32, 96>}, {pipeline_mode = #tpu.pipeline_mode<synchronous>, transform_indices = @transform_18, window_bounds = array<i64: 3, 1, 96>}, {pipeline_mode = #tpu.pipeline_mode<synchronous>, transform_indices = @transform_19, window_bounds = array<i64: 3, 32, 32>}, {pipeline_mode = #tpu.pipeline_mode<synchronous>, transform_indices = @transform_20, window_bounds = array<i64: 3, 1, 32>}, {pipeline_mode = #tpu.pipeline_mode<synchronous>, transform_indices = @transform_21, window_bounds = array<i64: 3, 32, 96>}, {pipeline_mode = #tpu.pipeline_mode<synchronous>, transform_indices = @transform_22, window_bounds = array<i64: 3, 1, 96>}, {pipeline_mode = #tpu.pipeline_mode<synchronous>, transform_indices = @transform_23, window_bounds = array<i64: 3, 32, 32>}, {pipeline_mode = #tpu.pipeline_mode<synchronous>, transform_indices = @transform_24, window_bounds = array<i64: 3, 1, 32>}, {pipeline_mode = #tpu.pipeline_mode<synchronous>, transform_indices = @transform_25, window_bounds = array<i64: 3, 32, 96>}, {pipeline_mode = #tpu.pipeline_mode<synchronous>, transform_indices = @transform_26, window_bounds = array<i64: 3, 1, 96>}, {pipeline_mode = #tpu.pipeline_mode<synchronous>, transform_indices = @transform_27, window_bounds = array<i64: 3, 96, 32>}, {pipeline_mode = #tpu.pipeline_mode<synchronous>, transform_indices = @transform_28, window_bounds = array<i64: 3, 1, 32>}, {pipeline_mode = #tpu.pipeline_mode<synchronous>, transform_indices = @transform_29, window_bounds = array<i64: 3, 1, 32>}, {pipeline_mode = #tpu.pipeline_mode<synchronous>, transform_indices = @transform_30, window_bounds = array<i64: 3, 1, 32>}, {pipeline_mode = #tpu.pipeline_mode<synchronous>, transform_indices = @transform_31, window_bounds = array<i64: 3, 1, 32>}, {pipeline_mode = #tpu.pipeline_mode<synchronous>, transform_indices = @transform_32, window_bounds = array<i64: 3, 1, 32>}, {pipeline_mode = #tpu.pipeline_mode<synchronous>, transform_indices = @transform_33, window_bounds = array<i64: 3, 1, 32>}, {pipeline_mode = #tpu.pipeline_mode<synchronous>, transform_indices = @transform_34, window_bounds = array<i64: 3, 1, 32>}, {pipeline_mode = #tpu.pipeline_mode<synchronous>, transform_indices = @transform_35, window_bounds = array<i64: 1, 32>}, {pipeline_mode = #tpu.pipeline_mode<synchronous>, transform_indices = @transform_36, window_bounds = array<i64: 1, 32>}, {pipeline_mode = #tpu.pipeline_mode<synchronous>, transform_indices = @transform_37, window_bounds = array<i64: 32, 128>}, {pipeline_mode = #tpu.pipeline_mode<synchronous>, transform_indices = @transform_38, window_bounds = array<i64: 1, 128>}, {transform_indices = @transform_39, window_bounds = array<i64: 1, 8, 128>}]} {
    %c0 = arith.constant 0 : index
    %c0_0 = arith.constant 0 : index
    %c0_1 = arith.constant 0 : index
    %0 = vector.load %arg1[%c0, %c0_0, %c0_1] : memref<1x10x32xf32, #tpu.memory_space<vmem>>, vector<1x10x32xf32>
    %1 = vector.shape_cast %0 : vector<1x10x32xf32> to vector<10x32xf32>
    %c0_2 = arith.constant 0 : index
    %c0_3 = arith.constant 0 : index
    %c0_4 = arith.constant 0 : index
    %2 = vector.load %arg2[%c0_2, %c0_3, %c0_4] : memref<1x8x32xf32, #tpu.memory_space<vmem>>, vector<1x8x32xf32>
    %3 = vector.shape_cast %2 : vector<1x8x32xf32> to vector<8x32xf32>
    %c0_5 = arith.constant 0 : index
    %c0_6 = arith.constant 0 : index
    %c0_7 = arith.constant 0 : index
    %4 = vector.load %arg3[%c0_5, %c0_6, %c0_7] : memref<1x1x10xf32, #tpu.memory_space<vmem>>, vector<1x1x10xf32>
    %5 = vector.shape_cast %4 : vector<1x1x10xf32> to vector<1x10xf32>
    %6 = tpu.iota {dimensions = array<i32: 0>} : vector<8x8xi32>
    %7 = tpu.iota {dimensions = array<i32: 1>} : vector<8x8xi32>
    %8 = arith.cmpi sgt, %7, %6 : vector<8x8xi32>
    %cst = arith.constant -1.000000e+30 : f32
    %cst_8 = arith.constant 0.000000e+00 : f32
    %9 = vector.broadcast %cst : f32 to vector<8x8xf32>
    %10 = vector.broadcast %cst_8 : f32 to vector<8x8xf32>
    %11 = arith.select %8, %9, %10 : vector<8x8xi1>, vector<8x8xf32>
    %c0_9 = arith.constant 0 : index
    %c0_10 = arith.constant 0 : index
    %c0_11 = arith.constant 0 : index
    %12 = vector.load %arg4[%c0_9, %c0_10, %c0_11] : memref<3x32x96xf32, #tpu.memory_space<vmem>>, vector<1x32x96xf32>
    %13 = vector.shape_cast %12 : vector<1x32x96xf32> to vector<32x96xf32>
    %c0_12 = arith.constant 0 : index
    %c0_13 = arith.constant 0 : index
    %c0_14 = arith.constant 0 : index
    %14 = vector.load %arg5[%c0_12, %c0_13, %c0_14] : memref<3x1x96xf32, #tpu.memory_space<vmem>>, vector<1x1x96xf32>
    %15 = vector.shape_cast %14 : vector<1x1x96xf32> to vector<1x96xf32>
    %c0_15 = arith.constant 0 : index
    %c0_16 = arith.constant 0 : index
    %c0_17 = arith.constant 0 : index
    %16 = vector.load %arg6[%c0_15, %c0_16, %c0_17] : memref<3x32x32xf32, #tpu.memory_space<vmem>>, vector<1x32x32xf32>
    %17 = vector.shape_cast %16 : vector<1x32x32xf32> to vector<32x32xf32>
    %c0_18 = arith.constant 0 : index
    %c0_19 = arith.constant 0 : index
    %c0_20 = arith.constant 0 : index
    %18 = vector.load %arg7[%c0_18, %c0_19, %c0_20] : memref<3x1x32xf32, #tpu.memory_space<vmem>>, vector<1x1x32xf32>
    %19 = vector.shape_cast %18 : vector<1x1x32xf32> to vector<1x32xf32>
    %cst_21 = arith.constant dense<0.000000e+00> : vector<10x96xf32>
    %20 = tpu.matmul %1, %13, %cst_21 {dimension_numbers = #tpu.dot_dimension_numbers<[1], [0], [0], [1], [0, 0, 1, 1], [], []>} : vector<10x32xf32>, vector<32x96xf32>, vector<10x96xf32> -> vector<10x96xf32>
    %21 = vector.broadcast %15 : vector<1x96xf32> to vector<10x96xf32>
    %22 = arith.addf %20, %21 : vector<10x96xf32>
    %23 = vector.extract_strided_slice %22 {offsets = [0, 0], sizes = [10, 32], strides = [1, 1]} : vector<10x96xf32> to vector<10x32xf32>
    %24 = vector.extract_strided_slice %22 {offsets = [0, 32], sizes = [10, 32], strides = [1, 1]} : vector<10x96xf32> to vector<10x32xf32>
    %25 = vector.extract_strided_slice %22 {offsets = [0, 64], sizes = [10, 32], strides = [1, 1]} : vector<10x96xf32> to vector<10x32xf32>
    %cst_22 = arith.constant 0.000000e+00 : f32
    %26 = vector.broadcast %cst_22 : f32 to vector<10x32xf32>
    %27 = vector.extract_strided_slice %23 {offsets = [0, 0], sizes = [10, 8], strides = [1, 1]} : vector<10x32xf32> to vector<10x8xf32>
    %cst_23 = arith.constant 0.353553385 : f32
    %28 = vector.broadcast %cst_23 : f32 to vector<10x8xf32>
    %29 = arith.mulf %27, %28 : vector<10x8xf32>
    %30 = vector.extract_strided_slice %24 {offsets = [0, 0], sizes = [10, 8], strides = [1, 1]} : vector<10x32xf32> to vector<10x8xf32>
    %31 = vector.extract_strided_slice %25 {offsets = [0, 0], sizes = [10, 8], strides = [1, 1]} : vector<10x32xf32> to vector<10x8xf32>
    %cst_24 = arith.constant dense<0.000000e+00> : vector<10x10xf32>
    %32 = tpu.matmul %29, %30, %cst_24 {dimension_numbers = #tpu.dot_dimension_numbers<[1], [1], [0], [0], [0, 0, 1, 0], [], []>} : vector<10x8xf32>, vector<10x8xf32>, vector<10x10xf32> -> vector<10x10xf32>
    %33 = vector.broadcast %5 : vector<1x10xf32> to vector<10x10xf32>
    %34 = arith.addf %32, %33 : vector<10x10xf32>
    %cst_25 = arith.constant dense<0xFF800000> : vector<10xf32>
    %35 = vector.multi_reduction <maximumf>, %34, %cst_25 [1] : vector<10x10xf32> to vector<10xf32>
    %36 = vector.shape_cast %35 : vector<10xf32> to vector<10x1xf32>
    %37 = vector.broadcast %36 : vector<10x1xf32> to vector<10x10xf32>
    %38 = arith.subf %34, %37 : vector<10x10xf32>
    %39 = math.exp %38 : vector<10x10xf32>
    %cst_26 = arith.constant dense<0.000000e+00> : vector<10xf32>
    %40 = vector.multi_reduction <add>, %39, %cst_26 [1] : vector<10x10xf32> to vector<10xf32>
    %41 = vector.shape_cast %40 : vector<10xf32> to vector<10x1xf32>
    %cst_27 = arith.constant dense<0.000000e+00> : vector<10x8xf32>
    %42 = tpu.matmul %39, %31, %cst_27 {dimension_numbers = #tpu.dot_dimension_numbers<[1], [0], [0], [1], [0, 0, 1, 1], [], []>} : vector<10x10xf32>, vector<10x8xf32>, vector<10x8xf32> -> vector<10x8xf32>
    %43 = tpu.reciprocal %41 {approx = true} : vector<10x1xf32> -> vector<10x1xf32>
    %44 = vector.broadcast %43 : vector<10x1xf32> to vector<10x8xf32>
    %45 = arith.mulf %42, %44 : vector<10x8xf32>
    %46 = vector.extract_strided_slice %17 {offsets = [0, 0], sizes = [8, 32], strides = [1, 1]} : vector<32x32xf32> to vector<8x32xf32>
    %cst_28 = arith.constant dense<0.000000e+00> : vector<10x32xf32>
    %47 = tpu.matmul %45, %46, %cst_28 {dimension_numbers = #tpu.dot_dimension_numbers<[1], [0], [0], [1], [0, 0, 1, 1], [], []>} : vector<10x8xf32>, vector<8x32xf32>, vector<10x32xf32> -> vector<10x32xf32>
    %48 = arith.addf %26, %47 : vector<10x32xf32>
    %49 = vector.extract_strided_slice %23 {offsets = [0, 8], sizes = [10, 8], strides = [1, 1]} : vector<10x32xf32> to vector<10x8xf32>
    %cst_29 = arith.constant 0.353553385 : f32
    %50 = vector.broadcast %cst_29 : f32 to vector<10x8xf32>
    %51 = arith.mulf %49, %50 : vector<10x8xf32>
    %52 = vector.extract_strided_slice %24 {offsets = [0, 8], sizes = [10, 8], strides = [1, 1]} : vector<10x32xf32> to vector<10x8xf32>
    %53 = vector.extract_strided_slice %25 {offsets = [0, 8], sizes = [10, 8], strides = [1, 1]} : vector<10x32xf32> to vector<10x8xf32>
    %cst_30 = arith.constant dense<0.000000e+00> : vector<10x10xf32>
    %54 = tpu.matmul %51, %52, %cst_30 {dimension_numbers = #tpu.dot_dimension_numbers<[1], [1], [0], [0], [0, 0, 1, 0], [], []>} : vector<10x8xf32>, vector<10x8xf32>, vector<10x10xf32> -> vector<10x10xf32>
    %55 = vector.broadcast %5 : vector<1x10xf32> to vector<10x10xf32>
    %56 = arith.addf %54, %55 : vector<10x10xf32>
    %cst_31 = arith.constant dense<0xFF800000> : vector<10xf32>
    %57 = vector.multi_reduction <maximumf>, %56, %cst_31 [1] : vector<10x10xf32> to vector<10xf32>
    %58 = vector.shape_cast %57 : vector<10xf32> to vector<10x1xf32>
    %59 = vector.broadcast %58 : vector<10x1xf32> to vector<10x10xf32>
    %60 = arith.subf %56, %59 : vector<10x10xf32>
    %61 = math.exp %60 : vector<10x10xf32>
    %cst_32 = arith.constant dense<0.000000e+00> : vector<10xf32>
    %62 = vector.multi_reduction <add>, %61, %cst_32 [1] : vector<10x10xf32> to vector<10xf32>
    %63 = vector.shape_cast %62 : vector<10xf32> to vector<10x1xf32>
    %cst_33 = arith.constant dense<0.000000e+00> : vector<10x8xf32>
    %64 = tpu.matmul %61, %53, %cst_33 {dimension_numbers = #tpu.dot_dimension_numbers<[1], [0], [0], [1], [0, 0, 1, 1], [], []>} : vector<10x10xf32>, vector<10x8xf32>, vector<10x8xf32> -> vector<10x8xf32>
    %65 = tpu.reciprocal %63 {approx = true} : vector<10x1xf32> -> vector<10x1xf32>
    %66 = vector.broadcast %65 : vector<10x1xf32> to vector<10x8xf32>
    %67 = arith.mulf %64, %66 : vector<10x8xf32>
    %68 = vector.extract_strided_slice %17 {offsets = [8, 0], sizes = [8, 32], strides = [1, 1]} : vector<32x32xf32> to vector<8x32xf32>
    %cst_34 = arith.constant dense<0.000000e+00> : vector<10x32xf32>
    %69 = tpu.matmul %67, %68, %cst_34 {dimension_numbers = #tpu.dot_dimension_numbers<[1], [0], [0], [1], [0, 0, 1, 1], [], []>} : vector<10x8xf32>, vector<8x32xf32>, vector<10x32xf32> -> vector<10x32xf32>
    %70 = arith.addf %48, %69 : vector<10x32xf32>
    %71 = vector.extract_strided_slice %23 {offsets = [0, 16], sizes = [10, 8], strides = [1, 1]} : vector<10x32xf32> to vector<10x8xf32>
    %cst_35 = arith.constant 0.353553385 : f32
    %72 = vector.broadcast %cst_35 : f32 to vector<10x8xf32>
    %73 = arith.mulf %71, %72 : vector<10x8xf32>
    %74 = vector.extract_strided_slice %24 {offsets = [0, 16], sizes = [10, 8], strides = [1, 1]} : vector<10x32xf32> to vector<10x8xf32>
    %75 = vector.extract_strided_slice %25 {offsets = [0, 16], sizes = [10, 8], strides = [1, 1]} : vector<10x32xf32> to vector<10x8xf32>
    %cst_36 = arith.constant dense<0.000000e+00> : vector<10x10xf32>
    %76 = tpu.matmul %73, %74, %cst_36 {dimension_numbers = #tpu.dot_dimension_numbers<[1], [1], [0], [0], [0, 0, 1, 0], [], []>} : vector<10x8xf32>, vector<10x8xf32>, vector<10x10xf32> -> vector<10x10xf32>
    %77 = vector.broadcast %5 : vector<1x10xf32> to vector<10x10xf32>
    %78 = arith.addf %76, %77 : vector<10x10xf32>
    %cst_37 = arith.constant dense<0xFF800000> : vector<10xf32>
    %79 = vector.multi_reduction <maximumf>, %78, %cst_37 [1] : vector<10x10xf32> to vector<10xf32>
    %80 = vector.shape_cast %79 : vector<10xf32> to vector<10x1xf32>
    %81 = vector.broadcast %80 : vector<10x1xf32> to vector<10x10xf32>
    %82 = arith.subf %78, %81 : vector<10x10xf32>
    %83 = math.exp %82 : vector<10x10xf32>
    %cst_38 = arith.constant dense<0.000000e+00> : vector<10xf32>
    %84 = vector.multi_reduction <add>, %83, %cst_38 [1] : vector<10x10xf32> to vector<10xf32>
    %85 = vector.shape_cast %84 : vector<10xf32> to vector<10x1xf32>
    %cst_39 = arith.constant dense<0.000000e+00> : vector<10x8xf32>
    %86 = tpu.matmul %83, %75, %cst_39 {dimension_numbers = #tpu.dot_dimension_numbers<[1], [0], [0], [1], [0, 0, 1, 1], [], []>} : vector<10x10xf32>, vector<10x8xf32>, vector<10x8xf32> -> vector<10x8xf32>
    %87 = tpu.reciprocal %85 {approx = true} : vector<10x1xf32> -> vector<10x1xf32>
    %88 = vector.broadcast %87 : vector<10x1xf32> to vector<10x8xf32>
    %89 = arith.mulf %86, %88 : vector<10x8xf32>
    %90 = vector.extract_strided_slice %17 {offsets = [16, 0], sizes = [8, 32], strides = [1, 1]} : vector<32x32xf32> to vector<8x32xf32>
    %cst_40 = arith.constant dense<0.000000e+00> : vector<10x32xf32>
    %91 = tpu.matmul %89, %90, %cst_40 {dimension_numbers = #tpu.dot_dimension_numbers<[1], [0], [0], [1], [0, 0, 1, 1], [], []>} : vector<10x8xf32>, vector<8x32xf32>, vector<10x32xf32> -> vector<10x32xf32>
    %92 = arith.addf %70, %91 : vector<10x32xf32>
    %93 = vector.extract_strided_slice %23 {offsets = [0, 24], sizes = [10, 8], strides = [1, 1]} : vector<10x32xf32> to vector<10x8xf32>
    %cst_41 = arith.constant 0.353553385 : f32
    %94 = vector.broadcast %cst_41 : f32 to vector<10x8xf32>
    %95 = arith.mulf %93, %94 : vector<10x8xf32>
    %96 = vector.extract_strided_slice %24 {offsets = [0, 24], sizes = [10, 8], strides = [1, 1]} : vector<10x32xf32> to vector<10x8xf32>
    %97 = vector.extract_strided_slice %25 {offsets = [0, 24], sizes = [10, 8], strides = [1, 1]} : vector<10x32xf32> to vector<10x8xf32>
    %cst_42 = arith.constant dense<0.000000e+00> : vector<10x10xf32>
    %98 = tpu.matmul %95, %96, %cst_42 {dimension_numbers = #tpu.dot_dimension_numbers<[1], [1], [0], [0], [0, 0, 1, 0], [], []>} : vector<10x8xf32>, vector<10x8xf32>, vector<10x10xf32> -> vector<10x10xf32>
    %99 = vector.broadcast %5 : vector<1x10xf32> to vector<10x10xf32>
    %100 = arith.addf %98, %99 : vector<10x10xf32>
    %cst_43 = arith.constant dense<0xFF800000> : vector<10xf32>
    %101 = vector.multi_reduction <maximumf>, %100, %cst_43 [1] : vector<10x10xf32> to vector<10xf32>
    %102 = vector.shape_cast %101 : vector<10xf32> to vector<10x1xf32>
    %103 = vector.broadcast %102 : vector<10x1xf32> to vector<10x10xf32>
    %104 = arith.subf %100, %103 : vector<10x10xf32>
    %105 = math.exp %104 : vector<10x10xf32>
    %cst_44 = arith.constant dense<0.000000e+00> : vector<10xf32>
    %106 = vector.multi_reduction <add>, %105, %cst_44 [1] : vector<10x10xf32> to vector<10xf32>
    %107 = vector.shape_cast %106 : vector<10xf32> to vector<10x1xf32>
    %cst_45 = arith.constant dense<0.000000e+00> : vector<10x8xf32>
    %108 = tpu.matmul %105, %97, %cst_45 {dimension_numbers = #tpu.dot_dimension_numbers<[1], [0], [0], [1], [0, 0, 1, 1], [], []>} : vector<10x10xf32>, vector<10x8xf32>, vector<10x8xf32> -> vector<10x8xf32>
    %109 = tpu.reciprocal %107 {approx = true} : vector<10x1xf32> -> vector<10x1xf32>
    %110 = vector.broadcast %109 : vector<10x1xf32> to vector<10x8xf32>
    %111 = arith.mulf %108, %110 : vector<10x8xf32>
    %112 = vector.extract_strided_slice %17 {offsets = [24, 0], sizes = [8, 32], strides = [1, 1]} : vector<32x32xf32> to vector<8x32xf32>
    %cst_46 = arith.constant dense<0.000000e+00> : vector<10x32xf32>
    %113 = tpu.matmul %111, %112, %cst_46 {dimension_numbers = #tpu.dot_dimension_numbers<[1], [0], [0], [1], [0, 0, 1, 1], [], []>} : vector<10x8xf32>, vector<8x32xf32>, vector<10x32xf32> -> vector<10x32xf32>
    %114 = arith.addf %92, %113 : vector<10x32xf32>
    %115 = vector.broadcast %19 : vector<1x32xf32> to vector<10x32xf32>
    %116 = arith.addf %114, %115 : vector<10x32xf32>
    %117 = arith.addf %1, %116 : vector<10x32xf32>
    %c0_47 = arith.constant 0 : index
    %c0_48 = arith.constant 0 : index
    %c0_49 = arith.constant 0 : index
    %118 = vector.load %arg12[%c0_47, %c0_48, %c0_49] : memref<3x1x32xf32, #tpu.memory_space<vmem>>, vector<1x1x32xf32>
    %119 = vector.shape_cast %118 : vector<1x1x32xf32> to vector<1x32xf32>
    %c0_50 = arith.constant 0 : index
    %c0_51 = arith.constant 0 : index
    %c0_52 = arith.constant 0 : index
    %120 = vector.load %arg13[%c0_50, %c0_51, %c0_52] : memref<3x1x32xf32, #tpu.memory_space<vmem>>, vector<1x1x32xf32>
    %121 = vector.shape_cast %120 : vector<1x1x32xf32> to vector<1x32xf32>
    %cst_53 = arith.constant dense<0.000000e+00> : vector<10xf32>
    %122 = vector.multi_reduction <add>, %117, %cst_53 [1] : vector<10x32xf32> to vector<10xf32>
    %123 = vector.shape_cast %122 : vector<10xf32> to vector<10x1xf32>
    %cst_54 = arith.constant 3.200000e+01 : f32
    %124 = vector.broadcast %cst_54 : f32 to vector<10x1xf32>
    %125 = arith.divf %123, %124 : vector<10x1xf32>
    %126 = vector.broadcast %125 : vector<10x1xf32> to vector<10x32xf32>
    %127 = arith.subf %117, %126 : vector<10x32xf32>
    %128 = arith.mulf %127, %127 : vector<10x32xf32>
    %cst_55 = arith.constant dense<0.000000e+00> : vector<10xf32>
    %129 = vector.multi_reduction <add>, %128, %cst_55 [1] : vector<10x32xf32> to vector<10xf32>
    %130 = vector.shape_cast %129 : vector<10xf32> to vector<10x1xf32>
    %cst_56 = arith.constant 3.200000e+01 : f32
    %131 = vector.broadcast %cst_56 : f32 to vector<10x1xf32>
    %132 = arith.divf %130, %131 : vector<10x1xf32>
    %cst_57 = arith.constant 9.99999974E-6 : f32
    %133 = vector.broadcast %cst_57 : f32 to vector<10x1xf32>
    %134 = arith.addf %132, %133 : vector<10x1xf32>
    %135 = math.rsqrt %134 : vector<10x1xf32>
    %136 = vector.broadcast %135 : vector<10x1xf32> to vector<10x32xf32>
    %137 = arith.mulf %127, %136 : vector<10x32xf32>
    %138 = vector.broadcast %119 : vector<1x32xf32> to vector<10x32xf32>
    %139 = arith.mulf %137, %138 : vector<10x32xf32>
    %140 = vector.broadcast %121 : vector<1x32xf32> to vector<10x32xf32>
    %141 = arith.addf %139, %140 : vector<10x32xf32>
    %c0_58 = arith.constant 0 : index
    %c0_59 = arith.constant 0 : index
    %c0_60 = arith.constant 0 : index
    %142 = vector.load %arg8[%c0_58, %c0_59, %c0_60] : memref<3x32x96xf32, #tpu.memory_space<vmem>>, vector<1x32x96xf32>
    %143 = vector.shape_cast %142 : vector<1x32x96xf32> to vector<32x96xf32>
    %c0_61 = arith.constant 0 : index
    %c0_62 = arith.constant 0 : index
    %c0_63 = arith.constant 0 : index
    %144 = vector.load %arg9[%c0_61, %c0_62, %c0_63] : memref<3x1x96xf32, #tpu.memory_space<vmem>>, vector<1x1x96xf32>
    %145 = vector.shape_cast %144 : vector<1x1x96xf32> to vector<1x96xf32>
    %c0_64 = arith.constant 0 : index
    %c0_65 = arith.constant 0 : index
    %c0_66 = arith.constant 0 : index
    %146 = vector.load %arg10[%c0_64, %c0_65, %c0_66] : memref<3x96x32xf32, #tpu.memory_space<vmem>>, vector<1x96x32xf32>
    %147 = vector.shape_cast %146 : vector<1x96x32xf32> to vector<96x32xf32>
    %c0_67 = arith.constant 0 : index
    %c0_68 = arith.constant 0 : index
    %c0_69 = arith.constant 0 : index
    %148 = vector.load %arg11[%c0_67, %c0_68, %c0_69] : memref<3x1x32xf32, #tpu.memory_space<vmem>>, vector<1x1x32xf32>
    %149 = vector.shape_cast %148 : vector<1x1x32xf32> to vector<1x32xf32>
    %cst_70 = arith.constant dense<0.000000e+00> : vector<10x96xf32>
    %150 = tpu.matmul %141, %143, %cst_70 {dimension_numbers = #tpu.dot_dimension_numbers<[1], [0], [0], [1], [0, 0, 1, 1], [], []>} : vector<10x32xf32>, vector<32x96xf32>, vector<10x96xf32> -> vector<10x96xf32>
    %151 = vector.broadcast %145 : vector<1x96xf32> to vector<10x96xf32>
    %152 = arith.addf %150, %151 : vector<10x96xf32>
    %cst_71 = arith.constant 0.000000e+00 : f32
    %153 = vector.broadcast %cst_71 : f32 to vector<10x96xf32>
    %154 = arith.maximumf %152, %153 : vector<10x96xf32>
    %cst_72 = arith.constant dense<0.000000e+00> : vector<10x32xf32>
    %155 = tpu.matmul %154, %147, %cst_72 {dimension_numbers = #tpu.dot_dimension_numbers<[1], [0], [0], [1], [0, 0, 1, 1], [], []>} : vector<10x96xf32>, vector<96x32xf32>, vector<10x32xf32> -> vector<10x32xf32>
    %156 = vector.broadcast %149 : vector<1x32xf32> to vector<10x32xf32>
    %157 = arith.addf %155, %156 : vector<10x32xf32>
    %158 = arith.addf %141, %157 : vector<10x32xf32>
    %c0_73 = arith.constant 0 : index
    %c0_74 = arith.constant 0 : index
    %c0_75 = arith.constant 0 : index
    %159 = vector.load %arg14[%c0_73, %c0_74, %c0_75] : memref<3x1x32xf32, #tpu.memory_space<vmem>>, vector<1x1x32xf32>
    %160 = vector.shape_cast %159 : vector<1x1x32xf32> to vector<1x32xf32>
    %c0_76 = arith.constant 0 : index
    %c0_77 = arith.constant 0 : index
    %c0_78 = arith.constant 0 : index
    %161 = vector.load %arg15[%c0_76, %c0_77, %c0_78] : memref<3x1x32xf32, #tpu.memory_space<vmem>>, vector<1x1x32xf32>
    %162 = vector.shape_cast %161 : vector<1x1x32xf32> to vector<1x32xf32>
    %cst_79 = arith.constant dense<0.000000e+00> : vector<10xf32>
    %163 = vector.multi_reduction <add>, %158, %cst_79 [1] : vector<10x32xf32> to vector<10xf32>
    %164 = vector.shape_cast %163 : vector<10xf32> to vector<10x1xf32>
    %cst_80 = arith.constant 3.200000e+01 : f32
    %165 = vector.broadcast %cst_80 : f32 to vector<10x1xf32>
    %166 = arith.divf %164, %165 : vector<10x1xf32>
    %167 = vector.broadcast %166 : vector<10x1xf32> to vector<10x32xf32>
    %168 = arith.subf %158, %167 : vector<10x32xf32>
    %169 = arith.mulf %168, %168 : vector<10x32xf32>
    %cst_81 = arith.constant dense<0.000000e+00> : vector<10xf32>
    %170 = vector.multi_reduction <add>, %169, %cst_81 [1] : vector<10x32xf32> to vector<10xf32>
    %171 = vector.shape_cast %170 : vector<10xf32> to vector<10x1xf32>
    %cst_82 = arith.constant 3.200000e+01 : f32
    %172 = vector.broadcast %cst_82 : f32 to vector<10x1xf32>
    %173 = arith.divf %171, %172 : vector<10x1xf32>
    %cst_83 = arith.constant 9.99999974E-6 : f32
    %174 = vector.broadcast %cst_83 : f32 to vector<10x1xf32>
    %175 = arith.addf %173, %174 : vector<10x1xf32>
    %176 = math.rsqrt %175 : vector<10x1xf32>
    %177 = vector.broadcast %176 : vector<10x1xf32> to vector<10x32xf32>
    %178 = arith.mulf %168, %177 : vector<10x32xf32>
    %179 = vector.broadcast %160 : vector<1x32xf32> to vector<10x32xf32>
    %180 = arith.mulf %178, %179 : vector<10x32xf32>
    %181 = vector.broadcast %162 : vector<1x32xf32> to vector<10x32xf32>
    %182 = arith.addf %180, %181 : vector<10x32xf32>
    %c1 = arith.constant 1 : index
    %c0_84 = arith.constant 0 : index
    %c0_85 = arith.constant 0 : index
    %183 = vector.load %arg4[%c1, %c0_84, %c0_85] : memref<3x32x96xf32, #tpu.memory_space<vmem>>, vector<1x32x96xf32>
    %184 = vector.shape_cast %183 : vector<1x32x96xf32> to vector<32x96xf32>
    %c1_86 = arith.constant 1 : index
    %c0_87 = arith.constant 0 : index
    %c0_88 = arith.constant 0 : index
    %185 = vector.load %arg5[%c1_86, %c0_87, %c0_88] : memref<3x1x96xf32, #tpu.memory_space<vmem>>, vector<1x1x96xf32>
    %186 = vector.shape_cast %185 : vector<1x1x96xf32> to vector<1x96xf32>
    %c1_89 = arith.constant 1 : index
    %c0_90 = arith.constant 0 : index
    %c0_91 = arith.constant 0 : index
    %187 = vector.load %arg6[%c1_89, %c0_90, %c0_91] : memref<3x32x32xf32, #tpu.memory_space<vmem>>, vector<1x32x32xf32>
    %188 = vector.shape_cast %187 : vector<1x32x32xf32> to vector<32x32xf32>
    %c1_92 = arith.constant 1 : index
    %c0_93 = arith.constant 0 : index
    %c0_94 = arith.constant 0 : index
    %189 = vector.load %arg7[%c1_92, %c0_93, %c0_94] : memref<3x1x32xf32, #tpu.memory_space<vmem>>, vector<1x1x32xf32>
    %190 = vector.shape_cast %189 : vector<1x1x32xf32> to vector<1x32xf32>
    %cst_95 = arith.constant dense<0.000000e+00> : vector<10x96xf32>
    %191 = tpu.matmul %182, %184, %cst_95 {dimension_numbers = #tpu.dot_dimension_numbers<[1], [0], [0], [1], [0, 0, 1, 1], [], []>} : vector<10x32xf32>, vector<32x96xf32>, vector<10x96xf32> -> vector<10x96xf32>
    %192 = vector.broadcast %186 : vector<1x96xf32> to vector<10x96xf32>
    %193 = arith.addf %191, %192 : vector<10x96xf32>
    %194 = vector.extract_strided_slice %193 {offsets = [0, 0], sizes = [10, 32], strides = [1, 1]} : vector<10x96xf32> to vector<10x32xf32>
    %195 = vector.extract_strided_slice %193 {offsets = [0, 32], sizes = [10, 32], strides = [1, 1]} : vector<10x96xf32> to vector<10x32xf32>
    %196 = vector.extract_strided_slice %193 {offsets = [0, 64], sizes = [10, 32], strides = [1, 1]} : vector<10x96xf32> to vector<10x32xf32>
    %cst_96 = arith.constant 0.000000e+00 : f32
    %197 = vector.broadcast %cst_96 : f32 to vector<10x32xf32>
    %198 = vector.extract_strided_slice %194 {offsets = [0, 0], sizes = [10, 8], strides = [1, 1]} : vector<10x32xf32> to vector<10x8xf32>
    %cst_97 = arith.constant 0.353553385 : f32
    %199 = vector.broadcast %cst_97 : f32 to vector<10x8xf32>
    %200 = arith.mulf %198, %199 : vector<10x8xf32>
    %201 = vector.extract_strided_slice %195 {offsets = [0, 0], sizes = [10, 8], strides = [1, 1]} : vector<10x32xf32> to vector<10x8xf32>
    %202 = vector.extract_strided_slice %196 {offsets = [0, 0], sizes = [10, 8], strides = [1, 1]} : vector<10x32xf32> to vector<10x8xf32>
    %cst_98 = arith.constant dense<0.000000e+00> : vector<10x10xf32>
    %203 = tpu.matmul %200, %201, %cst_98 {dimension_numbers = #tpu.dot_dimension_numbers<[1], [1], [0], [0], [0, 0, 1, 0], [], []>} : vector<10x8xf32>, vector<10x8xf32>, vector<10x10xf32> -> vector<10x10xf32>
    %204 = vector.broadcast %5 : vector<1x10xf32> to vector<10x10xf32>
    %205 = arith.addf %203, %204 : vector<10x10xf32>
    %cst_99 = arith.constant dense<0xFF800000> : vector<10xf32>
    %206 = vector.multi_reduction <maximumf>, %205, %cst_99 [1] : vector<10x10xf32> to vector<10xf32>
    %207 = vector.shape_cast %206 : vector<10xf32> to vector<10x1xf32>
    %208 = vector.broadcast %207 : vector<10x1xf32> to vector<10x10xf32>
    %209 = arith.subf %205, %208 : vector<10x10xf32>
    %210 = math.exp %209 : vector<10x10xf32>
    %cst_100 = arith.constant dense<0.000000e+00> : vector<10xf32>
    %211 = vector.multi_reduction <add>, %210, %cst_100 [1] : vector<10x10xf32> to vector<10xf32>
    %212 = vector.shape_cast %211 : vector<10xf32> to vector<10x1xf32>
    %cst_101 = arith.constant dense<0.000000e+00> : vector<10x8xf32>
    %213 = tpu.matmul %210, %202, %cst_101 {dimension_numbers = #tpu.dot_dimension_numbers<[1], [0], [0], [1], [0, 0, 1, 1], [], []>} : vector<10x10xf32>, vector<10x8xf32>, vector<10x8xf32> -> vector<10x8xf32>
    %214 = tpu.reciprocal %212 {approx = true} : vector<10x1xf32> -> vector<10x1xf32>
    %215 = vector.broadcast %214 : vector<10x1xf32> to vector<10x8xf32>
    %216 = arith.mulf %213, %215 : vector<10x8xf32>
    %217 = vector.extract_strided_slice %188 {offsets = [0, 0], sizes = [8, 32], strides = [1, 1]} : vector<32x32xf32> to vector<8x32xf32>
    %cst_102 = arith.constant dense<0.000000e+00> : vector<10x32xf32>
    %218 = tpu.matmul %216, %217, %cst_102 {dimension_numbers = #tpu.dot_dimension_numbers<[1], [0], [0], [1], [0, 0, 1, 1], [], []>} : vector<10x8xf32>, vector<8x32xf32>, vector<10x32xf32> -> vector<10x32xf32>
    %219 = arith.addf %197, %218 : vector<10x32xf32>
    %220 = vector.extract_strided_slice %194 {offsets = [0, 8], sizes = [10, 8], strides = [1, 1]} : vector<10x32xf32> to vector<10x8xf32>
    %cst_103 = arith.constant 0.353553385 : f32
    %221 = vector.broadcast %cst_103 : f32 to vector<10x8xf32>
    %222 = arith.mulf %220, %221 : vector<10x8xf32>
    %223 = vector.extract_strided_slice %195 {offsets = [0, 8], sizes = [10, 8], strides = [1, 1]} : vector<10x32xf32> to vector<10x8xf32>
    %224 = vector.extract_strided_slice %196 {offsets = [0, 8], sizes = [10, 8], strides = [1, 1]} : vector<10x32xf32> to vector<10x8xf32>
    %cst_104 = arith.constant dense<0.000000e+00> : vector<10x10xf32>
    %225 = tpu.matmul %222, %223, %cst_104 {dimension_numbers = #tpu.dot_dimension_numbers<[1], [1], [0], [0], [0, 0, 1, 0], [], []>} : vector<10x8xf32>, vector<10x8xf32>, vector<10x10xf32> -> vector<10x10xf32>
    %226 = vector.broadcast %5 : vector<1x10xf32> to vector<10x10xf32>
    %227 = arith.addf %225, %226 : vector<10x10xf32>
    %cst_105 = arith.constant dense<0xFF800000> : vector<10xf32>
    %228 = vector.multi_reduction <maximumf>, %227, %cst_105 [1] : vector<10x10xf32> to vector<10xf32>
    %229 = vector.shape_cast %228 : vector<10xf32> to vector<10x1xf32>
    %230 = vector.broadcast %229 : vector<10x1xf32> to vector<10x10xf32>
    %231 = arith.subf %227, %230 : vector<10x10xf32>
    %232 = math.exp %231 : vector<10x10xf32>
    %cst_106 = arith.constant dense<0.000000e+00> : vector<10xf32>
    %233 = vector.multi_reduction <add>, %232, %cst_106 [1] : vector<10x10xf32> to vector<10xf32>
    %234 = vector.shape_cast %233 : vector<10xf32> to vector<10x1xf32>
    %cst_107 = arith.constant dense<0.000000e+00> : vector<10x8xf32>
    %235 = tpu.matmul %232, %224, %cst_107 {dimension_numbers = #tpu.dot_dimension_numbers<[1], [0], [0], [1], [0, 0, 1, 1], [], []>} : vector<10x10xf32>, vector<10x8xf32>, vector<10x8xf32> -> vector<10x8xf32>
    %236 = tpu.reciprocal %234 {approx = true} : vector<10x1xf32> -> vector<10x1xf32>
    %237 = vector.broadcast %236 : vector<10x1xf32> to vector<10x8xf32>
    %238 = arith.mulf %235, %237 : vector<10x8xf32>
    %239 = vector.extract_strided_slice %188 {offsets = [8, 0], sizes = [8, 32], strides = [1, 1]} : vector<32x32xf32> to vector<8x32xf32>
    %cst_108 = arith.constant dense<0.000000e+00> : vector<10x32xf32>
    %240 = tpu.matmul %238, %239, %cst_108 {dimension_numbers = #tpu.dot_dimension_numbers<[1], [0], [0], [1], [0, 0, 1, 1], [], []>} : vector<10x8xf32>, vector<8x32xf32>, vector<10x32xf32> -> vector<10x32xf32>
    %241 = arith.addf %219, %240 : vector<10x32xf32>
    %242 = vector.extract_strided_slice %194 {offsets = [0, 16], sizes = [10, 8], strides = [1, 1]} : vector<10x32xf32> to vector<10x8xf32>
    %cst_109 = arith.constant 0.353553385 : f32
    %243 = vector.broadcast %cst_109 : f32 to vector<10x8xf32>
    %244 = arith.mulf %242, %243 : vector<10x8xf32>
    %245 = vector.extract_strided_slice %195 {offsets = [0, 16], sizes = [10, 8], strides = [1, 1]} : vector<10x32xf32> to vector<10x8xf32>
    %246 = vector.extract_strided_slice %196 {offsets = [0, 16], sizes = [10, 8], strides = [1, 1]} : vector<10x32xf32> to vector<10x8xf32>
    %cst_110 = arith.constant dense<0.000000e+00> : vector<10x10xf32>
    %247 = tpu.matmul %244, %245, %cst_110 {dimension_numbers = #tpu.dot_dimension_numbers<[1], [1], [0], [0], [0, 0, 1, 0], [], []>} : vector<10x8xf32>, vector<10x8xf32>, vector<10x10xf32> -> vector<10x10xf32>
    %248 = vector.broadcast %5 : vector<1x10xf32> to vector<10x10xf32>
    %249 = arith.addf %247, %248 : vector<10x10xf32>
    %cst_111 = arith.constant dense<0xFF800000> : vector<10xf32>
    %250 = vector.multi_reduction <maximumf>, %249, %cst_111 [1] : vector<10x10xf32> to vector<10xf32>
    %251 = vector.shape_cast %250 : vector<10xf32> to vector<10x1xf32>
    %252 = vector.broadcast %251 : vector<10x1xf32> to vector<10x10xf32>
    %253 = arith.subf %249, %252 : vector<10x10xf32>
    %254 = math.exp %253 : vector<10x10xf32>
    %cst_112 = arith.constant dense<0.000000e+00> : vector<10xf32>
    %255 = vector.multi_reduction <add>, %254, %cst_112 [1] : vector<10x10xf32> to vector<10xf32>
    %256 = vector.shape_cast %255 : vector<10xf32> to vector<10x1xf32>
    %cst_113 = arith.constant dense<0.000000e+00> : vector<10x8xf32>
    %257 = tpu.matmul %254, %246, %cst_113 {dimension_numbers = #tpu.dot_dimension_numbers<[1], [0], [0], [1], [0, 0, 1, 1], [], []>} : vector<10x10xf32>, vector<10x8xf32>, vector<10x8xf32> -> vector<10x8xf32>
    %258 = tpu.reciprocal %256 {approx = true} : vector<10x1xf32> -> vector<10x1xf32>
    %259 = vector.broadcast %258 : vector<10x1xf32> to vector<10x8xf32>
    %260 = arith.mulf %257, %259 : vector<10x8xf32>
    %261 = vector.extract_strided_slice %188 {offsets = [16, 0], sizes = [8, 32], strides = [1, 1]} : vector<32x32xf32> to vector<8x32xf32>
    %cst_114 = arith.constant dense<0.000000e+00> : vector<10x32xf32>
    %262 = tpu.matmul %260, %261, %cst_114 {dimension_numbers = #tpu.dot_dimension_numbers<[1], [0], [0], [1], [0, 0, 1, 1], [], []>} : vector<10x8xf32>, vector<8x32xf32>, vector<10x32xf32> -> vector<10x32xf32>
    %263 = arith.addf %241, %262 : vector<10x32xf32>
    %264 = vector.extract_strided_slice %194 {offsets = [0, 24], sizes = [10, 8], strides = [1, 1]} : vector<10x32xf32> to vector<10x8xf32>
    %cst_115 = arith.constant 0.353553385 : f32
    %265 = vector.broadcast %cst_115 : f32 to vector<10x8xf32>
    %266 = arith.mulf %264, %265 : vector<10x8xf32>
    %267 = vector.extract_strided_slice %195 {offsets = [0, 24], sizes = [10, 8], strides = [1, 1]} : vector<10x32xf32> to vector<10x8xf32>
    %268 = vector.extract_strided_slice %196 {offsets = [0, 24], sizes = [10, 8], strides = [1, 1]} : vector<10x32xf32> to vector<10x8xf32>
    %cst_116 = arith.constant dense<0.000000e+00> : vector<10x10xf32>
    %269 = tpu.matmul %266, %267, %cst_116 {dimension_numbers = #tpu.dot_dimension_numbers<[1], [1], [0], [0], [0, 0, 1, 0], [], []>} : vector<10x8xf32>, vector<10x8xf32>, vector<10x10xf32> -> vector<10x10xf32>
    %270 = vector.broadcast %5 : vector<1x10xf32> to vector<10x10xf32>
    %271 = arith.addf %269, %270 : vector<10x10xf32>
    %cst_117 = arith.constant dense<0xFF800000> : vector<10xf32>
    %272 = vector.multi_reduction <maximumf>, %271, %cst_117 [1] : vector<10x10xf32> to vector<10xf32>
    %273 = vector.shape_cast %272 : vector<10xf32> to vector<10x1xf32>
    %274 = vector.broadcast %273 : vector<10x1xf32> to vector<10x10xf32>
    %275 = arith.subf %271, %274 : vector<10x10xf32>
    %276 = math.exp %275 : vector<10x10xf32>
    %cst_118 = arith.constant dense<0.000000e+00> : vector<10xf32>
    %277 = vector.multi_reduction <add>, %276, %cst_118 [1] : vector<10x10xf32> to vector<10xf32>
    %278 = vector.shape_cast %277 : vector<10xf32> to vector<10x1xf32>
    %cst_119 = arith.constant dense<0.000000e+00> : vector<10x8xf32>
    %279 = tpu.matmul %276, %268, %cst_119 {dimension_numbers = #tpu.dot_dimension_numbers<[1], [0], [0], [1], [0, 0, 1, 1], [], []>} : vector<10x10xf32>, vector<10x8xf32>, vector<10x8xf32> -> vector<10x8xf32>
    %280 = tpu.reciprocal %278 {approx = true} : vector<10x1xf32> -> vector<10x1xf32>
    %281 = vector.broadcast %280 : vector<10x1xf32> to vector<10x8xf32>
    %282 = arith.mulf %279, %281 : vector<10x8xf32>
    %283 = vector.extract_strided_slice %188 {offsets = [24, 0], sizes = [8, 32], strides = [1, 1]} : vector<32x32xf32> to vector<8x32xf32>
    %cst_120 = arith.constant dense<0.000000e+00> : vector<10x32xf32>
    %284 = tpu.matmul %282, %283, %cst_120 {dimension_numbers = #tpu.dot_dimension_numbers<[1], [0], [0], [1], [0, 0, 1, 1], [], []>} : vector<10x8xf32>, vector<8x32xf32>, vector<10x32xf32> -> vector<10x32xf32>
    %285 = arith.addf %263, %284 : vector<10x32xf32>
    %286 = vector.broadcast %190 : vector<1x32xf32> to vector<10x32xf32>
    %287 = arith.addf %285, %286 : vector<10x32xf32>
    %288 = arith.addf %182, %287 : vector<10x32xf32>
    %c1_121 = arith.constant 1 : index
    %c0_122 = arith.constant 0 : index
    %c0_123 = arith.constant 0 : index
    %289 = vector.load %arg12[%c1_121, %c0_122, %c0_123] : memref<3x1x32xf32, #tpu.memory_space<vmem>>, vector<1x1x32xf32>
    %290 = vector.shape_cast %289 : vector<1x1x32xf32> to vector<1x32xf32>
    %c1_124 = arith.constant 1 : index
    %c0_125 = arith.constant 0 : index
    %c0_126 = arith.constant 0 : index
    %291 = vector.load %arg13[%c1_124, %c0_125, %c0_126] : memref<3x1x32xf32, #tpu.memory_space<vmem>>, vector<1x1x32xf32>
    %292 = vector.shape_cast %291 : vector<1x1x32xf32> to vector<1x32xf32>
    %cst_127 = arith.constant dense<0.000000e+00> : vector<10xf32>
    %293 = vector.multi_reduction <add>, %288, %cst_127 [1] : vector<10x32xf32> to vector<10xf32>
    %294 = vector.shape_cast %293 : vector<10xf32> to vector<10x1xf32>
    %cst_128 = arith.constant 3.200000e+01 : f32
    %295 = vector.broadcast %cst_128 : f32 to vector<10x1xf32>
    %296 = arith.divf %294, %295 : vector<10x1xf32>
    %297 = vector.broadcast %296 : vector<10x1xf32> to vector<10x32xf32>
    %298 = arith.subf %288, %297 : vector<10x32xf32>
    %299 = arith.mulf %298, %298 : vector<10x32xf32>
    %cst_129 = arith.constant dense<0.000000e+00> : vector<10xf32>
    %300 = vector.multi_reduction <add>, %299, %cst_129 [1] : vector<10x32xf32> to vector<10xf32>
    %301 = vector.shape_cast %300 : vector<10xf32> to vector<10x1xf32>
    %cst_130 = arith.constant 3.200000e+01 : f32
    %302 = vector.broadcast %cst_130 : f32 to vector<10x1xf32>
    %303 = arith.divf %301, %302 : vector<10x1xf32>
    %cst_131 = arith.constant 9.99999974E-6 : f32
    %304 = vector.broadcast %cst_131 : f32 to vector<10x1xf32>
    %305 = arith.addf %303, %304 : vector<10x1xf32>
    %306 = math.rsqrt %305 : vector<10x1xf32>
    %307 = vector.broadcast %306 : vector<10x1xf32> to vector<10x32xf32>
    %308 = arith.mulf %298, %307 : vector<10x32xf32>
    %309 = vector.broadcast %290 : vector<1x32xf32> to vector<10x32xf32>
    %310 = arith.mulf %308, %309 : vector<10x32xf32>
    %311 = vector.broadcast %292 : vector<1x32xf32> to vector<10x32xf32>
    %312 = arith.addf %310, %311 : vector<10x32xf32>
    %c1_132 = arith.constant 1 : index
    %c0_133 = arith.constant 0 : index
    %c0_134 = arith.constant 0 : index
    %313 = vector.load %arg8[%c1_132, %c0_133, %c0_134] : memref<3x32x96xf32, #tpu.memory_space<vmem>>, vector<1x32x96xf32>
    %314 = vector.shape_cast %313 : vector<1x32x96xf32> to vector<32x96xf32>
    %c1_135 = arith.constant 1 : index
    %c0_136 = arith.constant 0 : index
    %c0_137 = arith.constant 0 : index
    %315 = vector.load %arg9[%c1_135, %c0_136, %c0_137] : memref<3x1x96xf32, #tpu.memory_space<vmem>>, vector<1x1x96xf32>
    %316 = vector.shape_cast %315 : vector<1x1x96xf32> to vector<1x96xf32>
    %c1_138 = arith.constant 1 : index
    %c0_139 = arith.constant 0 : index
    %c0_140 = arith.constant 0 : index
    %317 = vector.load %arg10[%c1_138, %c0_139, %c0_140] : memref<3x96x32xf32, #tpu.memory_space<vmem>>, vector<1x96x32xf32>
    %318 = vector.shape_cast %317 : vector<1x96x32xf32> to vector<96x32xf32>
    %c1_141 = arith.constant 1 : index
    %c0_142 = arith.constant 0 : index
    %c0_143 = arith.constant 0 : index
    %319 = vector.load %arg11[%c1_141, %c0_142, %c0_143] : memref<3x1x32xf32, #tpu.memory_space<vmem>>, vector<1x1x32xf32>
    %320 = vector.shape_cast %319 : vector<1x1x32xf32> to vector<1x32xf32>
    %cst_144 = arith.constant dense<0.000000e+00> : vector<10x96xf32>
    %321 = tpu.matmul %312, %314, %cst_144 {dimension_numbers = #tpu.dot_dimension_numbers<[1], [0], [0], [1], [0, 0, 1, 1], [], []>} : vector<10x32xf32>, vector<32x96xf32>, vector<10x96xf32> -> vector<10x96xf32>
    %322 = vector.broadcast %316 : vector<1x96xf32> to vector<10x96xf32>
    %323 = arith.addf %321, %322 : vector<10x96xf32>
    %cst_145 = arith.constant 0.000000e+00 : f32
    %324 = vector.broadcast %cst_145 : f32 to vector<10x96xf32>
    %325 = arith.maximumf %323, %324 : vector<10x96xf32>
    %cst_146 = arith.constant dense<0.000000e+00> : vector<10x32xf32>
    %326 = tpu.matmul %325, %318, %cst_146 {dimension_numbers = #tpu.dot_dimension_numbers<[1], [0], [0], [1], [0, 0, 1, 1], [], []>} : vector<10x96xf32>, vector<96x32xf32>, vector<10x32xf32> -> vector<10x32xf32>
    %327 = vector.broadcast %320 : vector<1x32xf32> to vector<10x32xf32>
    %328 = arith.addf %326, %327 : vector<10x32xf32>
    %329 = arith.addf %312, %328 : vector<10x32xf32>
    %c1_147 = arith.constant 1 : index
    %c0_148 = arith.constant 0 : index
    %c0_149 = arith.constant 0 : index
    %330 = vector.load %arg14[%c1_147, %c0_148, %c0_149] : memref<3x1x32xf32, #tpu.memory_space<vmem>>, vector<1x1x32xf32>
    %331 = vector.shape_cast %330 : vector<1x1x32xf32> to vector<1x32xf32>
    %c1_150 = arith.constant 1 : index
    %c0_151 = arith.constant 0 : index
    %c0_152 = arith.constant 0 : index
    %332 = vector.load %arg15[%c1_150, %c0_151, %c0_152] : memref<3x1x32xf32, #tpu.memory_space<vmem>>, vector<1x1x32xf32>
    %333 = vector.shape_cast %332 : vector<1x1x32xf32> to vector<1x32xf32>
    %cst_153 = arith.constant dense<0.000000e+00> : vector<10xf32>
    %334 = vector.multi_reduction <add>, %329, %cst_153 [1] : vector<10x32xf32> to vector<10xf32>
    %335 = vector.shape_cast %334 : vector<10xf32> to vector<10x1xf32>
    %cst_154 = arith.constant 3.200000e+01 : f32
    %336 = vector.broadcast %cst_154 : f32 to vector<10x1xf32>
    %337 = arith.divf %335, %336 : vector<10x1xf32>
    %338 = vector.broadcast %337 : vector<10x1xf32> to vector<10x32xf32>
    %339 = arith.subf %329, %338 : vector<10x32xf32>
    %340 = arith.mulf %339, %339 : vector<10x32xf32>
    %cst_155 = arith.constant dense<0.000000e+00> : vector<10xf32>
    %341 = vector.multi_reduction <add>, %340, %cst_155 [1] : vector<10x32xf32> to vector<10xf32>
    %342 = vector.shape_cast %341 : vector<10xf32> to vector<10x1xf32>
    %cst_156 = arith.constant 3.200000e+01 : f32
    %343 = vector.broadcast %cst_156 : f32 to vector<10x1xf32>
    %344 = arith.divf %342, %343 : vector<10x1xf32>
    %cst_157 = arith.constant 9.99999974E-6 : f32
    %345 = vector.broadcast %cst_157 : f32 to vector<10x1xf32>
    %346 = arith.addf %344, %345 : vector<10x1xf32>
    %347 = math.rsqrt %346 : vector<10x1xf32>
    %348 = vector.broadcast %347 : vector<10x1xf32> to vector<10x32xf32>
    %349 = arith.mulf %339, %348 : vector<10x32xf32>
    %350 = vector.broadcast %331 : vector<1x32xf32> to vector<10x32xf32>
    %351 = arith.mulf %349, %350 : vector<10x32xf32>
    %352 = vector.broadcast %333 : vector<1x32xf32> to vector<10x32xf32>
    %353 = arith.addf %351, %352 : vector<10x32xf32>
    %c2 = arith.constant 2 : index
    %c0_158 = arith.constant 0 : index
    %c0_159 = arith.constant 0 : index
    %354 = vector.load %arg4[%c2, %c0_158, %c0_159] : memref<3x32x96xf32, #tpu.memory_space<vmem>>, vector<1x32x96xf32>
    %355 = vector.shape_cast %354 : vector<1x32x96xf32> to vector<32x96xf32>
    %c2_160 = arith.constant 2 : index
    %c0_161 = arith.constant 0 : index
    %c0_162 = arith.constant 0 : index
    %356 = vector.load %arg5[%c2_160, %c0_161, %c0_162] : memref<3x1x96xf32, #tpu.memory_space<vmem>>, vector<1x1x96xf32>
    %357 = vector.shape_cast %356 : vector<1x1x96xf32> to vector<1x96xf32>
    %c2_163 = arith.constant 2 : index
    %c0_164 = arith.constant 0 : index
    %c0_165 = arith.constant 0 : index
    %358 = vector.load %arg6[%c2_163, %c0_164, %c0_165] : memref<3x32x32xf32, #tpu.memory_space<vmem>>, vector<1x32x32xf32>
    %359 = vector.shape_cast %358 : vector<1x32x32xf32> to vector<32x32xf32>
    %c2_166 = arith.constant 2 : index
    %c0_167 = arith.constant 0 : index
    %c0_168 = arith.constant 0 : index
    %360 = vector.load %arg7[%c2_166, %c0_167, %c0_168] : memref<3x1x32xf32, #tpu.memory_space<vmem>>, vector<1x1x32xf32>
    %361 = vector.shape_cast %360 : vector<1x1x32xf32> to vector<1x32xf32>
    %cst_169 = arith.constant dense<0.000000e+00> : vector<10x96xf32>
    %362 = tpu.matmul %353, %355, %cst_169 {dimension_numbers = #tpu.dot_dimension_numbers<[1], [0], [0], [1], [0, 0, 1, 1], [], []>} : vector<10x32xf32>, vector<32x96xf32>, vector<10x96xf32> -> vector<10x96xf32>
    %363 = vector.broadcast %357 : vector<1x96xf32> to vector<10x96xf32>
    %364 = arith.addf %362, %363 : vector<10x96xf32>
    %365 = vector.extract_strided_slice %364 {offsets = [0, 0], sizes = [10, 32], strides = [1, 1]} : vector<10x96xf32> to vector<10x32xf32>
    %366 = vector.extract_strided_slice %364 {offsets = [0, 32], sizes = [10, 32], strides = [1, 1]} : vector<10x96xf32> to vector<10x32xf32>
    %367 = vector.extract_strided_slice %364 {offsets = [0, 64], sizes = [10, 32], strides = [1, 1]} : vector<10x96xf32> to vector<10x32xf32>
    %cst_170 = arith.constant 0.000000e+00 : f32
    %368 = vector.broadcast %cst_170 : f32 to vector<10x32xf32>
    %369 = vector.extract_strided_slice %365 {offsets = [0, 0], sizes = [10, 8], strides = [1, 1]} : vector<10x32xf32> to vector<10x8xf32>
    %cst_171 = arith.constant 0.353553385 : f32
    %370 = vector.broadcast %cst_171 : f32 to vector<10x8xf32>
    %371 = arith.mulf %369, %370 : vector<10x8xf32>
    %372 = vector.extract_strided_slice %366 {offsets = [0, 0], sizes = [10, 8], strides = [1, 1]} : vector<10x32xf32> to vector<10x8xf32>
    %373 = vector.extract_strided_slice %367 {offsets = [0, 0], sizes = [10, 8], strides = [1, 1]} : vector<10x32xf32> to vector<10x8xf32>
    %cst_172 = arith.constant dense<0.000000e+00> : vector<10x10xf32>
    %374 = tpu.matmul %371, %372, %cst_172 {dimension_numbers = #tpu.dot_dimension_numbers<[1], [1], [0], [0], [0, 0, 1, 0], [], []>} : vector<10x8xf32>, vector<10x8xf32>, vector<10x10xf32> -> vector<10x10xf32>
    %375 = vector.broadcast %5 : vector<1x10xf32> to vector<10x10xf32>
    %376 = arith.addf %374, %375 : vector<10x10xf32>
    %cst_173 = arith.constant dense<0xFF800000> : vector<10xf32>
    %377 = vector.multi_reduction <maximumf>, %376, %cst_173 [1] : vector<10x10xf32> to vector<10xf32>
    %378 = vector.shape_cast %377 : vector<10xf32> to vector<10x1xf32>
    %379 = vector.broadcast %378 : vector<10x1xf32> to vector<10x10xf32>
    %380 = arith.subf %376, %379 : vector<10x10xf32>
    %381 = math.exp %380 : vector<10x10xf32>
    %cst_174 = arith.constant dense<0.000000e+00> : vector<10xf32>
    %382 = vector.multi_reduction <add>, %381, %cst_174 [1] : vector<10x10xf32> to vector<10xf32>
    %383 = vector.shape_cast %382 : vector<10xf32> to vector<10x1xf32>
    %cst_175 = arith.constant dense<0.000000e+00> : vector<10x8xf32>
    %384 = tpu.matmul %381, %373, %cst_175 {dimension_numbers = #tpu.dot_dimension_numbers<[1], [0], [0], [1], [0, 0, 1, 1], [], []>} : vector<10x10xf32>, vector<10x8xf32>, vector<10x8xf32> -> vector<10x8xf32>
    %385 = tpu.reciprocal %383 {approx = true} : vector<10x1xf32> -> vector<10x1xf32>
    %386 = vector.broadcast %385 : vector<10x1xf32> to vector<10x8xf32>
    %387 = arith.mulf %384, %386 : vector<10x8xf32>
    %388 = vector.extract_strided_slice %359 {offsets = [0, 0], sizes = [8, 32], strides = [1, 1]} : vector<32x32xf32> to vector<8x32xf32>
    %cst_176 = arith.constant dense<0.000000e+00> : vector<10x32xf32>
    %389 = tpu.matmul %387, %388, %cst_176 {dimension_numbers = #tpu.dot_dimension_numbers<[1], [0], [0], [1], [0, 0, 1, 1], [], []>} : vector<10x8xf32>, vector<8x32xf32>, vector<10x32xf32> -> vector<10x32xf32>
    %390 = arith.addf %368, %389 : vector<10x32xf32>
    %391 = vector.extract_strided_slice %365 {offsets = [0, 8], sizes = [10, 8], strides = [1, 1]} : vector<10x32xf32> to vector<10x8xf32>
    %cst_177 = arith.constant 0.353553385 : f32
    %392 = vector.broadcast %cst_177 : f32 to vector<10x8xf32>
    %393 = arith.mulf %391, %392 : vector<10x8xf32>
    %394 = vector.extract_strided_slice %366 {offsets = [0, 8], sizes = [10, 8], strides = [1, 1]} : vector<10x32xf32> to vector<10x8xf32>
    %395 = vector.extract_strided_slice %367 {offsets = [0, 8], sizes = [10, 8], strides = [1, 1]} : vector<10x32xf32> to vector<10x8xf32>
    %cst_178 = arith.constant dense<0.000000e+00> : vector<10x10xf32>
    %396 = tpu.matmul %393, %394, %cst_178 {dimension_numbers = #tpu.dot_dimension_numbers<[1], [1], [0], [0], [0, 0, 1, 0], [], []>} : vector<10x8xf32>, vector<10x8xf32>, vector<10x10xf32> -> vector<10x10xf32>
    %397 = vector.broadcast %5 : vector<1x10xf32> to vector<10x10xf32>
    %398 = arith.addf %396, %397 : vector<10x10xf32>
    %cst_179 = arith.constant dense<0xFF800000> : vector<10xf32>
    %399 = vector.multi_reduction <maximumf>, %398, %cst_179 [1] : vector<10x10xf32> to vector<10xf32>
    %400 = vector.shape_cast %399 : vector<10xf32> to vector<10x1xf32>
    %401 = vector.broadcast %400 : vector<10x1xf32> to vector<10x10xf32>
    %402 = arith.subf %398, %401 : vector<10x10xf32>
    %403 = math.exp %402 : vector<10x10xf32>
    %cst_180 = arith.constant dense<0.000000e+00> : vector<10xf32>
    %404 = vector.multi_reduction <add>, %403, %cst_180 [1] : vector<10x10xf32> to vector<10xf32>
    %405 = vector.shape_cast %404 : vector<10xf32> to vector<10x1xf32>
    %cst_181 = arith.constant dense<0.000000e+00> : vector<10x8xf32>
    %406 = tpu.matmul %403, %395, %cst_181 {dimension_numbers = #tpu.dot_dimension_numbers<[1], [0], [0], [1], [0, 0, 1, 1], [], []>} : vector<10x10xf32>, vector<10x8xf32>, vector<10x8xf32> -> vector<10x8xf32>
    %407 = tpu.reciprocal %405 {approx = true} : vector<10x1xf32> -> vector<10x1xf32>
    %408 = vector.broadcast %407 : vector<10x1xf32> to vector<10x8xf32>
    %409 = arith.mulf %406, %408 : vector<10x8xf32>
    %410 = vector.extract_strided_slice %359 {offsets = [8, 0], sizes = [8, 32], strides = [1, 1]} : vector<32x32xf32> to vector<8x32xf32>
    %cst_182 = arith.constant dense<0.000000e+00> : vector<10x32xf32>
    %411 = tpu.matmul %409, %410, %cst_182 {dimension_numbers = #tpu.dot_dimension_numbers<[1], [0], [0], [1], [0, 0, 1, 1], [], []>} : vector<10x8xf32>, vector<8x32xf32>, vector<10x32xf32> -> vector<10x32xf32>
    %412 = arith.addf %390, %411 : vector<10x32xf32>
    %413 = vector.extract_strided_slice %365 {offsets = [0, 16], sizes = [10, 8], strides = [1, 1]} : vector<10x32xf32> to vector<10x8xf32>
    %cst_183 = arith.constant 0.353553385 : f32
    %414 = vector.broadcast %cst_183 : f32 to vector<10x8xf32>
    %415 = arith.mulf %413, %414 : vector<10x8xf32>
    %416 = vector.extract_strided_slice %366 {offsets = [0, 16], sizes = [10, 8], strides = [1, 1]} : vector<10x32xf32> to vector<10x8xf32>
    %417 = vector.extract_strided_slice %367 {offsets = [0, 16], sizes = [10, 8], strides = [1, 1]} : vector<10x32xf32> to vector<10x8xf32>
    %cst_184 = arith.constant dense<0.000000e+00> : vector<10x10xf32>
    %418 = tpu.matmul %415, %416, %cst_184 {dimension_numbers = #tpu.dot_dimension_numbers<[1], [1], [0], [0], [0, 0, 1, 0], [], []>} : vector<10x8xf32>, vector<10x8xf32>, vector<10x10xf32> -> vector<10x10xf32>
    %419 = vector.broadcast %5 : vector<1x10xf32> to vector<10x10xf32>
    %420 = arith.addf %418, %419 : vector<10x10xf32>
    %cst_185 = arith.constant dense<0xFF800000> : vector<10xf32>
    %421 = vector.multi_reduction <maximumf>, %420, %cst_185 [1] : vector<10x10xf32> to vector<10xf32>
    %422 = vector.shape_cast %421 : vector<10xf32> to vector<10x1xf32>
    %423 = vector.broadcast %422 : vector<10x1xf32> to vector<10x10xf32>
    %424 = arith.subf %420, %423 : vector<10x10xf32>
    %425 = math.exp %424 : vector<10x10xf32>
    %cst_186 = arith.constant dense<0.000000e+00> : vector<10xf32>
    %426 = vector.multi_reduction <add>, %425, %cst_186 [1] : vector<10x10xf32> to vector<10xf32>
    %427 = vector.shape_cast %426 : vector<10xf32> to vector<10x1xf32>
    %cst_187 = arith.constant dense<0.000000e+00> : vector<10x8xf32>
    %428 = tpu.matmul %425, %417, %cst_187 {dimension_numbers = #tpu.dot_dimension_numbers<[1], [0], [0], [1], [0, 0, 1, 1], [], []>} : vector<10x10xf32>, vector<10x8xf32>, vector<10x8xf32> -> vector<10x8xf32>
    %429 = tpu.reciprocal %427 {approx = true} : vector<10x1xf32> -> vector<10x1xf32>
    %430 = vector.broadcast %429 : vector<10x1xf32> to vector<10x8xf32>
    %431 = arith.mulf %428, %430 : vector<10x8xf32>
    %432 = vector.extract_strided_slice %359 {offsets = [16, 0], sizes = [8, 32], strides = [1, 1]} : vector<32x32xf32> to vector<8x32xf32>
    %cst_188 = arith.constant dense<0.000000e+00> : vector<10x32xf32>
    %433 = tpu.matmul %431, %432, %cst_188 {dimension_numbers = #tpu.dot_dimension_numbers<[1], [0], [0], [1], [0, 0, 1, 1], [], []>} : vector<10x8xf32>, vector<8x32xf32>, vector<10x32xf32> -> vector<10x32xf32>
    %434 = arith.addf %412, %433 : vector<10x32xf32>
    %435 = vector.extract_strided_slice %365 {offsets = [0, 24], sizes = [10, 8], strides = [1, 1]} : vector<10x32xf32> to vector<10x8xf32>
    %cst_189 = arith.constant 0.353553385 : f32
    %436 = vector.broadcast %cst_189 : f32 to vector<10x8xf32>
    %437 = arith.mulf %435, %436 : vector<10x8xf32>
    %438 = vector.extract_strided_slice %366 {offsets = [0, 24], sizes = [10, 8], strides = [1, 1]} : vector<10x32xf32> to vector<10x8xf32>
    %439 = vector.extract_strided_slice %367 {offsets = [0, 24], sizes = [10, 8], strides = [1, 1]} : vector<10x32xf32> to vector<10x8xf32>
    %cst_190 = arith.constant dense<0.000000e+00> : vector<10x10xf32>
    %440 = tpu.matmul %437, %438, %cst_190 {dimension_numbers = #tpu.dot_dimension_numbers<[1], [1], [0], [0], [0, 0, 1, 0], [], []>} : vector<10x8xf32>, vector<10x8xf32>, vector<10x10xf32> -> vector<10x10xf32>
    %441 = vector.broadcast %5 : vector<1x10xf32> to vector<10x10xf32>
    %442 = arith.addf %440, %441 : vector<10x10xf32>
    %cst_191 = arith.constant dense<0xFF800000> : vector<10xf32>
    %443 = vector.multi_reduction <maximumf>, %442, %cst_191 [1] : vector<10x10xf32> to vector<10xf32>
    %444 = vector.shape_cast %443 : vector<10xf32> to vector<10x1xf32>
    %445 = vector.broadcast %444 : vector<10x1xf32> to vector<10x10xf32>
    %446 = arith.subf %442, %445 : vector<10x10xf32>
    %447 = math.exp %446 : vector<10x10xf32>
    %cst_192 = arith.constant dense<0.000000e+00> : vector<10xf32>
    %448 = vector.multi_reduction <add>, %447, %cst_192 [1] : vector<10x10xf32> to vector<10xf32>
    %449 = vector.shape_cast %448 : vector<10xf32> to vector<10x1xf32>
    %cst_193 = arith.constant dense<0.000000e+00> : vector<10x8xf32>
    %450 = tpu.matmul %447, %439, %cst_193 {dimension_numbers = #tpu.dot_dimension_numbers<[1], [0], [0], [1], [0, 0, 1, 1], [], []>} : vector<10x10xf32>, vector<10x8xf32>, vector<10x8xf32> -> vector<10x8xf32>
    %451 = tpu.reciprocal %449 {approx = true} : vector<10x1xf32> -> vector<10x1xf32>
    %452 = vector.broadcast %451 : vector<10x1xf32> to vector<10x8xf32>
    %453 = arith.mulf %450, %452 : vector<10x8xf32>
    %454 = vector.extract_strided_slice %359 {offsets = [24, 0], sizes = [8, 32], strides = [1, 1]} : vector<32x32xf32> to vector<8x32xf32>
    %cst_194 = arith.constant dense<0.000000e+00> : vector<10x32xf32>
    %455 = tpu.matmul %453, %454, %cst_194 {dimension_numbers = #tpu.dot_dimension_numbers<[1], [0], [0], [1], [0, 0, 1, 1], [], []>} : vector<10x8xf32>, vector<8x32xf32>, vector<10x32xf32> -> vector<10x32xf32>
    %456 = arith.addf %434, %455 : vector<10x32xf32>
    %457 = vector.broadcast %361 : vector<1x32xf32> to vector<10x32xf32>
    %458 = arith.addf %456, %457 : vector<10x32xf32>
    %459 = arith.addf %353, %458 : vector<10x32xf32>
    %c2_195 = arith.constant 2 : index
    %c0_196 = arith.constant 0 : index
    %c0_197 = arith.constant 0 : index
    %460 = vector.load %arg12[%c2_195, %c0_196, %c0_197] : memref<3x1x32xf32, #tpu.memory_space<vmem>>, vector<1x1x32xf32>
    %461 = vector.shape_cast %460 : vector<1x1x32xf32> to vector<1x32xf32>
    %c2_198 = arith.constant 2 : index
    %c0_199 = arith.constant 0 : index
    %c0_200 = arith.constant 0 : index
    %462 = vector.load %arg13[%c2_198, %c0_199, %c0_200] : memref<3x1x32xf32, #tpu.memory_space<vmem>>, vector<1x1x32xf32>
    %463 = vector.shape_cast %462 : vector<1x1x32xf32> to vector<1x32xf32>
    %cst_201 = arith.constant dense<0.000000e+00> : vector<10xf32>
    %464 = vector.multi_reduction <add>, %459, %cst_201 [1] : vector<10x32xf32> to vector<10xf32>
    %465 = vector.shape_cast %464 : vector<10xf32> to vector<10x1xf32>
    %cst_202 = arith.constant 3.200000e+01 : f32
    %466 = vector.broadcast %cst_202 : f32 to vector<10x1xf32>
    %467 = arith.divf %465, %466 : vector<10x1xf32>
    %468 = vector.broadcast %467 : vector<10x1xf32> to vector<10x32xf32>
    %469 = arith.subf %459, %468 : vector<10x32xf32>
    %470 = arith.mulf %469, %469 : vector<10x32xf32>
    %cst_203 = arith.constant dense<0.000000e+00> : vector<10xf32>
    %471 = vector.multi_reduction <add>, %470, %cst_203 [1] : vector<10x32xf32> to vector<10xf32>
    %472 = vector.shape_cast %471 : vector<10xf32> to vector<10x1xf32>
    %cst_204 = arith.constant 3.200000e+01 : f32
    %473 = vector.broadcast %cst_204 : f32 to vector<10x1xf32>
    %474 = arith.divf %472, %473 : vector<10x1xf32>
    %cst_205 = arith.constant 9.99999974E-6 : f32
    %475 = vector.broadcast %cst_205 : f32 to vector<10x1xf32>
    %476 = arith.addf %474, %475 : vector<10x1xf32>
    %477 = math.rsqrt %476 : vector<10x1xf32>
    %478 = vector.broadcast %477 : vector<10x1xf32> to vector<10x32xf32>
    %479 = arith.mulf %469, %478 : vector<10x32xf32>
    %480 = vector.broadcast %461 : vector<1x32xf32> to vector<10x32xf32>
    %481 = arith.mulf %479, %480 : vector<10x32xf32>
    %482 = vector.broadcast %463 : vector<1x32xf32> to vector<10x32xf32>
    %483 = arith.addf %481, %482 : vector<10x32xf32>
    %c2_206 = arith.constant 2 : index
    %c0_207 = arith.constant 0 : index
    %c0_208 = arith.constant 0 : index
    %484 = vector.load %arg8[%c2_206, %c0_207, %c0_208] : memref<3x32x96xf32, #tpu.memory_space<vmem>>, vector<1x32x96xf32>
    %485 = vector.shape_cast %484 : vector<1x32x96xf32> to vector<32x96xf32>
    %c2_209 = arith.constant 2 : index
    %c0_210 = arith.constant 0 : index
    %c0_211 = arith.constant 0 : index
    %486 = vector.load %arg9[%c2_209, %c0_210, %c0_211] : memref<3x1x96xf32, #tpu.memory_space<vmem>>, vector<1x1x96xf32>
    %487 = vector.shape_cast %486 : vector<1x1x96xf32> to vector<1x96xf32>
    %c2_212 = arith.constant 2 : index
    %c0_213 = arith.constant 0 : index
    %c0_214 = arith.constant 0 : index
    %488 = vector.load %arg10[%c2_212, %c0_213, %c0_214] : memref<3x96x32xf32, #tpu.memory_space<vmem>>, vector<1x96x32xf32>
    %489 = vector.shape_cast %488 : vector<1x96x32xf32> to vector<96x32xf32>
    %c2_215 = arith.constant 2 : index
    %c0_216 = arith.constant 0 : index
    %c0_217 = arith.constant 0 : index
    %490 = vector.load %arg11[%c2_215, %c0_216, %c0_217] : memref<3x1x32xf32, #tpu.memory_space<vmem>>, vector<1x1x32xf32>
    %491 = vector.shape_cast %490 : vector<1x1x32xf32> to vector<1x32xf32>
    %cst_218 = arith.constant dense<0.000000e+00> : vector<10x96xf32>
    %492 = tpu.matmul %483, %485, %cst_218 {dimension_numbers = #tpu.dot_dimension_numbers<[1], [0], [0], [1], [0, 0, 1, 1], [], []>} : vector<10x32xf32>, vector<32x96xf32>, vector<10x96xf32> -> vector<10x96xf32>
    %493 = vector.broadcast %487 : vector<1x96xf32> to vector<10x96xf32>
    %494 = arith.addf %492, %493 : vector<10x96xf32>
    %cst_219 = arith.constant 0.000000e+00 : f32
    %495 = vector.broadcast %cst_219 : f32 to vector<10x96xf32>
    %496 = arith.maximumf %494, %495 : vector<10x96xf32>
    %cst_220 = arith.constant dense<0.000000e+00> : vector<10x32xf32>
    %497 = tpu.matmul %496, %489, %cst_220 {dimension_numbers = #tpu.dot_dimension_numbers<[1], [0], [0], [1], [0, 0, 1, 1], [], []>} : vector<10x96xf32>, vector<96x32xf32>, vector<10x32xf32> -> vector<10x32xf32>
    %498 = vector.broadcast %491 : vector<1x32xf32> to vector<10x32xf32>
    %499 = arith.addf %497, %498 : vector<10x32xf32>
    %500 = arith.addf %483, %499 : vector<10x32xf32>
    %c2_221 = arith.constant 2 : index
    %c0_222 = arith.constant 0 : index
    %c0_223 = arith.constant 0 : index
    %501 = vector.load %arg14[%c2_221, %c0_222, %c0_223] : memref<3x1x32xf32, #tpu.memory_space<vmem>>, vector<1x1x32xf32>
    %502 = vector.shape_cast %501 : vector<1x1x32xf32> to vector<1x32xf32>
    %c2_224 = arith.constant 2 : index
    %c0_225 = arith.constant 0 : index
    %c0_226 = arith.constant 0 : index
    %503 = vector.load %arg15[%c2_224, %c0_225, %c0_226] : memref<3x1x32xf32, #tpu.memory_space<vmem>>, vector<1x1x32xf32>
    %504 = vector.shape_cast %503 : vector<1x1x32xf32> to vector<1x32xf32>
    %cst_227 = arith.constant dense<0.000000e+00> : vector<10xf32>
    %505 = vector.multi_reduction <add>, %500, %cst_227 [1] : vector<10x32xf32> to vector<10xf32>
    %506 = vector.shape_cast %505 : vector<10xf32> to vector<10x1xf32>
    %cst_228 = arith.constant 3.200000e+01 : f32
    %507 = vector.broadcast %cst_228 : f32 to vector<10x1xf32>
    %508 = arith.divf %506, %507 : vector<10x1xf32>
    %509 = vector.broadcast %508 : vector<10x1xf32> to vector<10x32xf32>
    %510 = arith.subf %500, %509 : vector<10x32xf32>
    %511 = arith.mulf %510, %510 : vector<10x32xf32>
    %cst_229 = arith.constant dense<0.000000e+00> : vector<10xf32>
    %512 = vector.multi_reduction <add>, %511, %cst_229 [1] : vector<10x32xf32> to vector<10xf32>
    %513 = vector.shape_cast %512 : vector<10xf32> to vector<10x1xf32>
    %cst_230 = arith.constant 3.200000e+01 : f32
    %514 = vector.broadcast %cst_230 : f32 to vector<10x1xf32>
    %515 = arith.divf %513, %514 : vector<10x1xf32>
    %cst_231 = arith.constant 9.99999974E-6 : f32
    %516 = vector.broadcast %cst_231 : f32 to vector<10x1xf32>
    %517 = arith.addf %515, %516 : vector<10x1xf32>
    %518 = math.rsqrt %517 : vector<10x1xf32>
    %519 = vector.broadcast %518 : vector<10x1xf32> to vector<10x32xf32>
    %520 = arith.mulf %510, %519 : vector<10x32xf32>
    %521 = vector.broadcast %502 : vector<1x32xf32> to vector<10x32xf32>
    %522 = arith.mulf %520, %521 : vector<10x32xf32>
    %523 = vector.broadcast %504 : vector<1x32xf32> to vector<10x32xf32>
    %524 = arith.addf %522, %523 : vector<10x32xf32>
    %c0_232 = arith.constant 0 : index
    %c0_233 = arith.constant 0 : index
    %525 = vector.load %arg16[%c0_232, %c0_233] : memref<1x32xf32, #tpu.memory_space<vmem>>, vector<1x32xf32>
    %c0_234 = arith.constant 0 : index
    %c0_235 = arith.constant 0 : index
    %526 = vector.load %arg17[%c0_234, %c0_235] : memref<1x32xf32, #tpu.memory_space<vmem>>, vector<1x32xf32>
    %cst_236 = arith.constant dense<0.000000e+00> : vector<10xf32>
    %527 = vector.multi_reduction <add>, %524, %cst_236 [1] : vector<10x32xf32> to vector<10xf32>
    %528 = vector.shape_cast %527 : vector<10xf32> to vector<10x1xf32>
    %cst_237 = arith.constant 3.200000e+01 : f32
    %529 = vector.broadcast %cst_237 : f32 to vector<10x1xf32>
    %530 = arith.divf %528, %529 : vector<10x1xf32>
    %531 = vector.broadcast %530 : vector<10x1xf32> to vector<10x32xf32>
    %532 = arith.subf %524, %531 : vector<10x32xf32>
    %533 = arith.mulf %532, %532 : vector<10x32xf32>
    %cst_238 = arith.constant dense<0.000000e+00> : vector<10xf32>
    %534 = vector.multi_reduction <add>, %533, %cst_238 [1] : vector<10x32xf32> to vector<10xf32>
    %535 = vector.shape_cast %534 : vector<10xf32> to vector<10x1xf32>
    %cst_239 = arith.constant 3.200000e+01 : f32
    %536 = vector.broadcast %cst_239 : f32 to vector<10x1xf32>
    %537 = arith.divf %535, %536 : vector<10x1xf32>
    %cst_240 = arith.constant 9.99999974E-6 : f32
    %538 = vector.broadcast %cst_240 : f32 to vector<10x1xf32>
    %539 = arith.addf %537, %538 : vector<10x1xf32>
    %540 = math.rsqrt %539 : vector<10x1xf32>
    %541 = vector.broadcast %540 : vector<10x1xf32> to vector<10x32xf32>
    %542 = arith.mulf %532, %541 : vector<10x32xf32>
    %543 = vector.broadcast %525 : vector<1x32xf32> to vector<10x32xf32>
    %544 = arith.mulf %542, %543 : vector<10x32xf32>
    %545 = vector.broadcast %526 : vector<1x32xf32> to vector<10x32xf32>
    %546 = arith.addf %544, %545 : vector<10x32xf32>
    %c0_241 = arith.constant 0 : index
    %c0_242 = arith.constant 0 : index
    %c0_243 = arith.constant 0 : index
    %547 = vector.load %arg18[%c0_241, %c0_242, %c0_243] : memref<3x32x96xf32, #tpu.memory_space<vmem>>, vector<1x32x96xf32>
    %548 = vector.shape_cast %547 : vector<1x32x96xf32> to vector<32x96xf32>
    %c0_244 = arith.constant 0 : index
    %c0_245 = arith.constant 0 : index
    %c0_246 = arith.constant 0 : index
    %549 = vector.load %arg19[%c0_244, %c0_245, %c0_246] : memref<3x1x96xf32, #tpu.memory_space<vmem>>, vector<1x1x96xf32>
    %550 = vector.shape_cast %549 : vector<1x1x96xf32> to vector<1x96xf32>
    %c0_247 = arith.constant 0 : index
    %c0_248 = arith.constant 0 : index
    %c0_249 = arith.constant 0 : index
    %551 = vector.load %arg20[%c0_247, %c0_248, %c0_249] : memref<3x32x32xf32, #tpu.memory_space<vmem>>, vector<1x32x32xf32>
    %552 = vector.shape_cast %551 : vector<1x32x32xf32> to vector<32x32xf32>
    %c0_250 = arith.constant 0 : index
    %c0_251 = arith.constant 0 : index
    %c0_252 = arith.constant 0 : index
    %553 = vector.load %arg21[%c0_250, %c0_251, %c0_252] : memref<3x1x32xf32, #tpu.memory_space<vmem>>, vector<1x1x32xf32>
    %554 = vector.shape_cast %553 : vector<1x1x32xf32> to vector<1x32xf32>
    %cst_253 = arith.constant dense<0.000000e+00> : vector<8x96xf32>
    %555 = tpu.matmul %3, %548, %cst_253 {dimension_numbers = #tpu.dot_dimension_numbers<[1], [0], [0], [1], [0, 0, 1, 1], [], []>} : vector<8x32xf32>, vector<32x96xf32>, vector<8x96xf32> -> vector<8x96xf32>
    %556 = vector.broadcast %550 : vector<1x96xf32> to vector<8x96xf32>
    %557 = arith.addf %555, %556 : vector<8x96xf32>
    %558 = vector.extract_strided_slice %557 {offsets = [0, 0], sizes = [8, 32], strides = [1, 1]} : vector<8x96xf32> to vector<8x32xf32>
    %559 = vector.extract_strided_slice %557 {offsets = [0, 32], sizes = [8, 32], strides = [1, 1]} : vector<8x96xf32> to vector<8x32xf32>
    %560 = vector.extract_strided_slice %557 {offsets = [0, 64], sizes = [8, 32], strides = [1, 1]} : vector<8x96xf32> to vector<8x32xf32>
    %cst_254 = arith.constant 0.000000e+00 : f32
    %561 = vector.broadcast %cst_254 : f32 to vector<8x32xf32>
    %562 = vector.extract_strided_slice %558 {offsets = [0, 0], sizes = [8, 8], strides = [1, 1]} : vector<8x32xf32> to vector<8x8xf32>
    %cst_255 = arith.constant 0.353553385 : f32
    %563 = vector.broadcast %cst_255 : f32 to vector<8x8xf32>
    %564 = arith.mulf %562, %563 : vector<8x8xf32>
    %565 = vector.extract_strided_slice %559 {offsets = [0, 0], sizes = [8, 8], strides = [1, 1]} : vector<8x32xf32> to vector<8x8xf32>
    %566 = vector.extract_strided_slice %560 {offsets = [0, 0], sizes = [8, 8], strides = [1, 1]} : vector<8x32xf32> to vector<8x8xf32>
    %cst_256 = arith.constant dense<0.000000e+00> : vector<8x8xf32>
    %567 = tpu.matmul %564, %565, %cst_256 {dimension_numbers = #tpu.dot_dimension_numbers<[1], [1], [0], [0], [0, 0, 1, 0], [], []>} : vector<8x8xf32>, vector<8x8xf32>, vector<8x8xf32> -> vector<8x8xf32>
    %568 = arith.addf %567, %11 : vector<8x8xf32>
    %cst_257 = arith.constant dense<0xFF800000> : vector<8xf32>
    %569 = vector.multi_reduction <maximumf>, %568, %cst_257 [1] : vector<8x8xf32> to vector<8xf32>
    %570 = vector.shape_cast %569 : vector<8xf32> to vector<8x1xf32>
    %571 = vector.broadcast %570 : vector<8x1xf32> to vector<8x8xf32>
    %572 = arith.subf %568, %571 : vector<8x8xf32>
    %573 = math.exp %572 : vector<8x8xf32>
    %cst_258 = arith.constant dense<0.000000e+00> : vector<8xf32>
    %574 = vector.multi_reduction <add>, %573, %cst_258 [1] : vector<8x8xf32> to vector<8xf32>
    %575 = vector.shape_cast %574 : vector<8xf32> to vector<8x1xf32>
    %cst_259 = arith.constant dense<0.000000e+00> : vector<8x8xf32>
    %576 = tpu.matmul %573, %566, %cst_259 {dimension_numbers = #tpu.dot_dimension_numbers<[1], [0], [0], [1], [0, 0, 1, 1], [], []>} : vector<8x8xf32>, vector<8x8xf32>, vector<8x8xf32> -> vector<8x8xf32>
    %577 = tpu.reciprocal %575 {approx = true} : vector<8x1xf32> -> vector<8x1xf32>
    %578 = vector.broadcast %577 : vector<8x1xf32> to vector<8x8xf32>
    %579 = arith.mulf %576, %578 : vector<8x8xf32>
    %580 = vector.extract_strided_slice %552 {offsets = [0, 0], sizes = [8, 32], strides = [1, 1]} : vector<32x32xf32> to vector<8x32xf32>
    %cst_260 = arith.constant dense<0.000000e+00> : vector<8x32xf32>
    %581 = tpu.matmul %579, %580, %cst_260 {dimension_numbers = #tpu.dot_dimension_numbers<[1], [0], [0], [1], [0, 0, 1, 1], [], []>} : vector<8x8xf32>, vector<8x32xf32>, vector<8x32xf32> -> vector<8x32xf32>
    %582 = arith.addf %561, %581 : vector<8x32xf32>
    %583 = vector.extract_strided_slice %558 {offsets = [0, 8], sizes = [8, 8], strides = [1, 1]} : vector<8x32xf32> to vector<8x8xf32>
    %cst_261 = arith.constant 0.353553385 : f32
    %584 = vector.broadcast %cst_261 : f32 to vector<8x8xf32>
    %585 = arith.mulf %583, %584 : vector<8x8xf32>
    %586 = vector.extract_strided_slice %559 {offsets = [0, 8], sizes = [8, 8], strides = [1, 1]} : vector<8x32xf32> to vector<8x8xf32>
    %587 = vector.extract_strided_slice %560 {offsets = [0, 8], sizes = [8, 8], strides = [1, 1]} : vector<8x32xf32> to vector<8x8xf32>
    %cst_262 = arith.constant dense<0.000000e+00> : vector<8x8xf32>
    %588 = tpu.matmul %585, %586, %cst_262 {dimension_numbers = #tpu.dot_dimension_numbers<[1], [1], [0], [0], [0, 0, 1, 0], [], []>} : vector<8x8xf32>, vector<8x8xf32>, vector<8x8xf32> -> vector<8x8xf32>
    %589 = arith.addf %588, %11 : vector<8x8xf32>
    %cst_263 = arith.constant dense<0xFF800000> : vector<8xf32>
    %590 = vector.multi_reduction <maximumf>, %589, %cst_263 [1] : vector<8x8xf32> to vector<8xf32>
    %591 = vector.shape_cast %590 : vector<8xf32> to vector<8x1xf32>
    %592 = vector.broadcast %591 : vector<8x1xf32> to vector<8x8xf32>
    %593 = arith.subf %589, %592 : vector<8x8xf32>
    %594 = math.exp %593 : vector<8x8xf32>
    %cst_264 = arith.constant dense<0.000000e+00> : vector<8xf32>
    %595 = vector.multi_reduction <add>, %594, %cst_264 [1] : vector<8x8xf32> to vector<8xf32>
    %596 = vector.shape_cast %595 : vector<8xf32> to vector<8x1xf32>
    %cst_265 = arith.constant dense<0.000000e+00> : vector<8x8xf32>
    %597 = tpu.matmul %594, %587, %cst_265 {dimension_numbers = #tpu.dot_dimension_numbers<[1], [0], [0], [1], [0, 0, 1, 1], [], []>} : vector<8x8xf32>, vector<8x8xf32>, vector<8x8xf32> -> vector<8x8xf32>
    %598 = tpu.reciprocal %596 {approx = true} : vector<8x1xf32> -> vector<8x1xf32>
    %599 = vector.broadcast %598 : vector<8x1xf32> to vector<8x8xf32>
    %600 = arith.mulf %597, %599 : vector<8x8xf32>
    %601 = vector.extract_strided_slice %552 {offsets = [8, 0], sizes = [8, 32], strides = [1, 1]} : vector<32x32xf32> to vector<8x32xf32>
    %cst_266 = arith.constant dense<0.000000e+00> : vector<8x32xf32>
    %602 = tpu.matmul %600, %601, %cst_266 {dimension_numbers = #tpu.dot_dimension_numbers<[1], [0], [0], [1], [0, 0, 1, 1], [], []>} : vector<8x8xf32>, vector<8x32xf32>, vector<8x32xf32> -> vector<8x32xf32>
    %603 = arith.addf %582, %602 : vector<8x32xf32>
    %604 = vector.extract_strided_slice %558 {offsets = [0, 16], sizes = [8, 8], strides = [1, 1]} : vector<8x32xf32> to vector<8x8xf32>
    %cst_267 = arith.constant 0.353553385 : f32
    %605 = vector.broadcast %cst_267 : f32 to vector<8x8xf32>
    %606 = arith.mulf %604, %605 : vector<8x8xf32>
    %607 = vector.extract_strided_slice %559 {offsets = [0, 16], sizes = [8, 8], strides = [1, 1]} : vector<8x32xf32> to vector<8x8xf32>
    %608 = vector.extract_strided_slice %560 {offsets = [0, 16], sizes = [8, 8], strides = [1, 1]} : vector<8x32xf32> to vector<8x8xf32>
    %cst_268 = arith.constant dense<0.000000e+00> : vector<8x8xf32>
    %609 = tpu.matmul %606, %607, %cst_268 {dimension_numbers = #tpu.dot_dimension_numbers<[1], [1], [0], [0], [0, 0, 1, 0], [], []>} : vector<8x8xf32>, vector<8x8xf32>, vector<8x8xf32> -> vector<8x8xf32>
    %610 = arith.addf %609, %11 : vector<8x8xf32>
    %cst_269 = arith.constant dense<0xFF800000> : vector<8xf32>
    %611 = vector.multi_reduction <maximumf>, %610, %cst_269 [1] : vector<8x8xf32> to vector<8xf32>
    %612 = vector.shape_cast %611 : vector<8xf32> to vector<8x1xf32>
    %613 = vector.broadcast %612 : vector<8x1xf32> to vector<8x8xf32>
    %614 = arith.subf %610, %613 : vector<8x8xf32>
    %615 = math.exp %614 : vector<8x8xf32>
    %cst_270 = arith.constant dense<0.000000e+00> : vector<8xf32>
    %616 = vector.multi_reduction <add>, %615, %cst_270 [1] : vector<8x8xf32> to vector<8xf32>
    %617 = vector.shape_cast %616 : vector<8xf32> to vector<8x1xf32>
    %cst_271 = arith.constant dense<0.000000e+00> : vector<8x8xf32>
    %618 = tpu.matmul %615, %608, %cst_271 {dimension_numbers = #tpu.dot_dimension_numbers<[1], [0], [0], [1], [0, 0, 1, 1], [], []>} : vector<8x8xf32>, vector<8x8xf32>, vector<8x8xf32> -> vector<8x8xf32>
    %619 = tpu.reciprocal %617 {approx = true} : vector<8x1xf32> -> vector<8x1xf32>
    %620 = vector.broadcast %619 : vector<8x1xf32> to vector<8x8xf32>
    %621 = arith.mulf %618, %620 : vector<8x8xf32>
    %622 = vector.extract_strided_slice %552 {offsets = [16, 0], sizes = [8, 32], strides = [1, 1]} : vector<32x32xf32> to vector<8x32xf32>
    %cst_272 = arith.constant dense<0.000000e+00> : vector<8x32xf32>
    %623 = tpu.matmul %621, %622, %cst_272 {dimension_numbers = #tpu.dot_dimension_numbers<[1], [0], [0], [1], [0, 0, 1, 1], [], []>} : vector<8x8xf32>, vector<8x32xf32>, vector<8x32xf32> -> vector<8x32xf32>
    %624 = arith.addf %603, %623 : vector<8x32xf32>
    %625 = vector.extract_strided_slice %558 {offsets = [0, 24], sizes = [8, 8], strides = [1, 1]} : vector<8x32xf32> to vector<8x8xf32>
    %cst_273 = arith.constant 0.353553385 : f32
    %626 = vector.broadcast %cst_273 : f32 to vector<8x8xf32>
    %627 = arith.mulf %625, %626 : vector<8x8xf32>
    %628 = vector.extract_strided_slice %559 {offsets = [0, 24], sizes = [8, 8], strides = [1, 1]} : vector<8x32xf32> to vector<8x8xf32>
    %629 = vector.extract_strided_slice %560 {offsets = [0, 24], sizes = [8, 8], strides = [1, 1]} : vector<8x32xf32> to vector<8x8xf32>
    %cst_274 = arith.constant dense<0.000000e+00> : vector<8x8xf32>
    %630 = tpu.matmul %627, %628, %cst_274 {dimension_numbers = #tpu.dot_dimension_numbers<[1], [1], [0], [0], [0, 0, 1, 0], [], []>} : vector<8x8xf32>, vector<8x8xf32>, vector<8x8xf32> -> vector<8x8xf32>
    %631 = arith.addf %630, %11 : vector<8x8xf32>
    %cst_275 = arith.constant dense<0xFF800000> : vector<8xf32>
    %632 = vector.multi_reduction <maximumf>, %631, %cst_275 [1] : vector<8x8xf32> to vector<8xf32>
    %633 = vector.shape_cast %632 : vector<8xf32> to vector<8x1xf32>
    %634 = vector.broadcast %633 : vector<8x1xf32> to vector<8x8xf32>
    %635 = arith.subf %631, %634 : vector<8x8xf32>
    %636 = math.exp %635 : vector<8x8xf32>
    %cst_276 = arith.constant dense<0.000000e+00> : vector<8xf32>
    %637 = vector.multi_reduction <add>, %636, %cst_276 [1] : vector<8x8xf32> to vector<8xf32>
    %638 = vector.shape_cast %637 : vector<8xf32> to vector<8x1xf32>
    %cst_277 = arith.constant dense<0.000000e+00> : vector<8x8xf32>
    %639 = tpu.matmul %636, %629, %cst_277 {dimension_numbers = #tpu.dot_dimension_numbers<[1], [0], [0], [1], [0, 0, 1, 1], [], []>} : vector<8x8xf32>, vector<8x8xf32>, vector<8x8xf32> -> vector<8x8xf32>
    %640 = tpu.reciprocal %638 {approx = true} : vector<8x1xf32> -> vector<8x1xf32>
    %641 = vector.broadcast %640 : vector<8x1xf32> to vector<8x8xf32>
    %642 = arith.mulf %639, %641 : vector<8x8xf32>
    %643 = vector.extract_strided_slice %552 {offsets = [24, 0], sizes = [8, 32], strides = [1, 1]} : vector<32x32xf32> to vector<8x32xf32>
    %cst_278 = arith.constant dense<0.000000e+00> : vector<8x32xf32>
    %644 = tpu.matmul %642, %643, %cst_278 {dimension_numbers = #tpu.dot_dimension_numbers<[1], [0], [0], [1], [0, 0, 1, 1], [], []>} : vector<8x8xf32>, vector<8x32xf32>, vector<8x32xf32> -> vector<8x32xf32>
    %645 = arith.addf %624, %644 : vector<8x32xf32>
    %646 = vector.broadcast %554 : vector<1x32xf32> to vector<8x32xf32>
    %647 = arith.addf %645, %646 : vector<8x32xf32>
    %648 = arith.addf %3, %647 : vector<8x32xf32>
    %c0_279 = arith.constant 0 : index
    %c0_280 = arith.constant 0 : index
    %c0_281 = arith.constant 0 : index
    %649 = vector.load %arg30[%c0_279, %c0_280, %c0_281] : memref<3x1x32xf32, #tpu.memory_space<vmem>>, vector<1x1x32xf32>
    %650 = vector.shape_cast %649 : vector<1x1x32xf32> to vector<1x32xf32>
    %c0_282 = arith.constant 0 : index
    %c0_283 = arith.constant 0 : index
    %c0_284 = arith.constant 0 : index
    %651 = vector.load %arg31[%c0_282, %c0_283, %c0_284] : memref<3x1x32xf32, #tpu.memory_space<vmem>>, vector<1x1x32xf32>
    %652 = vector.shape_cast %651 : vector<1x1x32xf32> to vector<1x32xf32>
    %cst_285 = arith.constant dense<0.000000e+00> : vector<8xf32>
    %653 = vector.multi_reduction <add>, %648, %cst_285 [1] : vector<8x32xf32> to vector<8xf32>
    %654 = vector.shape_cast %653 : vector<8xf32> to vector<8x1xf32>
    %cst_286 = arith.constant 3.200000e+01 : f32
    %655 = vector.broadcast %cst_286 : f32 to vector<8x1xf32>
    %656 = arith.divf %654, %655 : vector<8x1xf32>
    %657 = vector.broadcast %656 : vector<8x1xf32> to vector<8x32xf32>
    %658 = arith.subf %648, %657 : vector<8x32xf32>
    %659 = arith.mulf %658, %658 : vector<8x32xf32>
    %cst_287 = arith.constant dense<0.000000e+00> : vector<8xf32>
    %660 = vector.multi_reduction <add>, %659, %cst_287 [1] : vector<8x32xf32> to vector<8xf32>
    %661 = vector.shape_cast %660 : vector<8xf32> to vector<8x1xf32>
    %cst_288 = arith.constant 3.200000e+01 : f32
    %662 = vector.broadcast %cst_288 : f32 to vector<8x1xf32>
    %663 = arith.divf %661, %662 : vector<8x1xf32>
    %cst_289 = arith.constant 9.99999974E-6 : f32
    %664 = vector.broadcast %cst_289 : f32 to vector<8x1xf32>
    %665 = arith.addf %663, %664 : vector<8x1xf32>
    %666 = math.rsqrt %665 : vector<8x1xf32>
    %667 = vector.broadcast %666 : vector<8x1xf32> to vector<8x32xf32>
    %668 = arith.mulf %658, %667 : vector<8x32xf32>
    %669 = vector.broadcast %650 : vector<1x32xf32> to vector<8x32xf32>
    %670 = arith.mulf %668, %669 : vector<8x32xf32>
    %671 = vector.broadcast %652 : vector<1x32xf32> to vector<8x32xf32>
    %672 = arith.addf %670, %671 : vector<8x32xf32>
    %c0_290 = arith.constant 0 : index
    %c0_291 = arith.constant 0 : index
    %c0_292 = arith.constant 0 : index
    %673 = vector.load %arg22[%c0_290, %c0_291, %c0_292] : memref<3x32x96xf32, #tpu.memory_space<vmem>>, vector<1x32x96xf32>
    %674 = vector.shape_cast %673 : vector<1x32x96xf32> to vector<32x96xf32>
    %c0_293 = arith.constant 0 : index
    %c0_294 = arith.constant 0 : index
    %c0_295 = arith.constant 0 : index
    %675 = vector.load %arg23[%c0_293, %c0_294, %c0_295] : memref<3x1x96xf32, #tpu.memory_space<vmem>>, vector<1x1x96xf32>
    %676 = vector.shape_cast %675 : vector<1x1x96xf32> to vector<1x96xf32>
    %c0_296 = arith.constant 0 : index
    %c0_297 = arith.constant 0 : index
    %c0_298 = arith.constant 0 : index
    %677 = vector.load %arg24[%c0_296, %c0_297, %c0_298] : memref<3x32x32xf32, #tpu.memory_space<vmem>>, vector<1x32x32xf32>
    %678 = vector.shape_cast %677 : vector<1x32x32xf32> to vector<32x32xf32>
    %c0_299 = arith.constant 0 : index
    %c0_300 = arith.constant 0 : index
    %c0_301 = arith.constant 0 : index
    %679 = vector.load %arg25[%c0_299, %c0_300, %c0_301] : memref<3x1x32xf32, #tpu.memory_space<vmem>>, vector<1x1x32xf32>
    %680 = vector.shape_cast %679 : vector<1x1x32xf32> to vector<1x32xf32>
    %681 = vector.extract_strided_slice %674 {offsets = [0, 0], sizes = [32, 32], strides = [1, 1]} : vector<32x96xf32> to vector<32x32xf32>
    %cst_302 = arith.constant dense<0.000000e+00> : vector<8x32xf32>
    %682 = tpu.matmul %672, %681, %cst_302 {dimension_numbers = #tpu.dot_dimension_numbers<[1], [0], [0], [1], [0, 0, 1, 1], [], []>} : vector<8x32xf32>, vector<32x32xf32>, vector<8x32xf32> -> vector<8x32xf32>
    %683 = vector.extract_strided_slice %676 {offsets = [0, 0], sizes = [1, 32], strides = [1, 1]} : vector<1x96xf32> to vector<1x32xf32>
    %684 = vector.broadcast %683 : vector<1x32xf32> to vector<8x32xf32>
    %685 = arith.addf %682, %684 : vector<8x32xf32>
    %686 = vector.extract_strided_slice %674 {offsets = [0, 32], sizes = [32, 64], strides = [1, 1]} : vector<32x96xf32> to vector<32x64xf32>
    %cst_303 = arith.constant dense<0.000000e+00> : vector<10x64xf32>
    %687 = tpu.matmul %546, %686, %cst_303 {dimension_numbers = #tpu.dot_dimension_numbers<[1], [0], [0], [1], [0, 0, 1, 1], [], []>} : vector<10x32xf32>, vector<32x64xf32>, vector<10x64xf32> -> vector<10x64xf32>
    %688 = vector.extract_strided_slice %676 {offsets = [0, 32], sizes = [1, 64], strides = [1, 1]} : vector<1x96xf32> to vector<1x64xf32>
    %689 = vector.broadcast %688 : vector<1x64xf32> to vector<10x64xf32>
    %690 = arith.addf %687, %689 : vector<10x64xf32>
    %691 = vector.extract_strided_slice %690 {offsets = [0, 0], sizes = [10, 32], strides = [1, 1]} : vector<10x64xf32> to vector<10x32xf32>
    %692 = vector.extract_strided_slice %690 {offsets = [0, 32], sizes = [10, 32], strides = [1, 1]} : vector<10x64xf32> to vector<10x32xf32>
    %cst_304 = arith.constant 0.000000e+00 : f32
    %693 = vector.broadcast %cst_304 : f32 to vector<8x32xf32>
    %694 = vector.extract_strided_slice %685 {offsets = [0, 0], sizes = [8, 8], strides = [1, 1]} : vector<8x32xf32> to vector<8x8xf32>
    %cst_305 = arith.constant 0.353553385 : f32
    %695 = vector.broadcast %cst_305 : f32 to vector<8x8xf32>
    %696 = arith.mulf %694, %695 : vector<8x8xf32>
    %697 = vector.extract_strided_slice %691 {offsets = [0, 0], sizes = [10, 8], strides = [1, 1]} : vector<10x32xf32> to vector<10x8xf32>
    %698 = vector.extract_strided_slice %692 {offsets = [0, 0], sizes = [10, 8], strides = [1, 1]} : vector<10x32xf32> to vector<10x8xf32>
    %cst_306 = arith.constant dense<0.000000e+00> : vector<8x10xf32>
    %699 = tpu.matmul %696, %697, %cst_306 {dimension_numbers = #tpu.dot_dimension_numbers<[1], [1], [0], [0], [0, 0, 1, 0], [], []>} : vector<8x8xf32>, vector<10x8xf32>, vector<8x10xf32> -> vector<8x10xf32>
    %cst_307 = arith.constant dense<0xFF800000> : vector<8xf32>
    %700 = vector.multi_reduction <maximumf>, %699, %cst_307 [1] : vector<8x10xf32> to vector<8xf32>
    %701 = vector.shape_cast %700 : vector<8xf32> to vector<8x1xf32>
    %702 = vector.broadcast %701 : vector<8x1xf32> to vector<8x10xf32>
    %703 = arith.subf %699, %702 : vector<8x10xf32>
    %704 = math.exp %703 : vector<8x10xf32>
    %cst_308 = arith.constant dense<0.000000e+00> : vector<8xf32>
    %705 = vector.multi_reduction <add>, %704, %cst_308 [1] : vector<8x10xf32> to vector<8xf32>
    %706 = vector.shape_cast %705 : vector<8xf32> to vector<8x1xf32>
    %cst_309 = arith.constant dense<0.000000e+00> : vector<8x8xf32>
    %707 = tpu.matmul %704, %698, %cst_309 {dimension_numbers = #tpu.dot_dimension_numbers<[1], [0], [0], [1], [0, 0, 1, 1], [], []>} : vector<8x10xf32>, vector<10x8xf32>, vector<8x8xf32> -> vector<8x8xf32>
    %708 = tpu.reciprocal %706 {approx = true} : vector<8x1xf32> -> vector<8x1xf32>
    %709 = vector.broadcast %708 : vector<8x1xf32> to vector<8x8xf32>
    %710 = arith.mulf %707, %709 : vector<8x8xf32>
    %711 = vector.extract_strided_slice %678 {offsets = [0, 0], sizes = [8, 32], strides = [1, 1]} : vector<32x32xf32> to vector<8x32xf32>
    %cst_310 = arith.constant dense<0.000000e+00> : vector<8x32xf32>
    %712 = tpu.matmul %710, %711, %cst_310 {dimension_numbers = #tpu.dot_dimension_numbers<[1], [0], [0], [1], [0, 0, 1, 1], [], []>} : vector<8x8xf32>, vector<8x32xf32>, vector<8x32xf32> -> vector<8x32xf32>
    %713 = arith.addf %693, %712 : vector<8x32xf32>
    %714 = vector.extract_strided_slice %685 {offsets = [0, 8], sizes = [8, 8], strides = [1, 1]} : vector<8x32xf32> to vector<8x8xf32>
    %cst_311 = arith.constant 0.353553385 : f32
    %715 = vector.broadcast %cst_311 : f32 to vector<8x8xf32>
    %716 = arith.mulf %714, %715 : vector<8x8xf32>
    %717 = vector.extract_strided_slice %691 {offsets = [0, 8], sizes = [10, 8], strides = [1, 1]} : vector<10x32xf32> to vector<10x8xf32>
    %718 = vector.extract_strided_slice %692 {offsets = [0, 8], sizes = [10, 8], strides = [1, 1]} : vector<10x32xf32> to vector<10x8xf32>
    %cst_312 = arith.constant dense<0.000000e+00> : vector<8x10xf32>
    %719 = tpu.matmul %716, %717, %cst_312 {dimension_numbers = #tpu.dot_dimension_numbers<[1], [1], [0], [0], [0, 0, 1, 0], [], []>} : vector<8x8xf32>, vector<10x8xf32>, vector<8x10xf32> -> vector<8x10xf32>
    %cst_313 = arith.constant dense<0xFF800000> : vector<8xf32>
    %720 = vector.multi_reduction <maximumf>, %719, %cst_313 [1] : vector<8x10xf32> to vector<8xf32>
    %721 = vector.shape_cast %720 : vector<8xf32> to vector<8x1xf32>
    %722 = vector.broadcast %721 : vector<8x1xf32> to vector<8x10xf32>
    %723 = arith.subf %719, %722 : vector<8x10xf32>
    %724 = math.exp %723 : vector<8x10xf32>
    %cst_314 = arith.constant dense<0.000000e+00> : vector<8xf32>
    %725 = vector.multi_reduction <add>, %724, %cst_314 [1] : vector<8x10xf32> to vector<8xf32>
    %726 = vector.shape_cast %725 : vector<8xf32> to vector<8x1xf32>
    %cst_315 = arith.constant dense<0.000000e+00> : vector<8x8xf32>
    %727 = tpu.matmul %724, %718, %cst_315 {dimension_numbers = #tpu.dot_dimension_numbers<[1], [0], [0], [1], [0, 0, 1, 1], [], []>} : vector<8x10xf32>, vector<10x8xf32>, vector<8x8xf32> -> vector<8x8xf32>
    %728 = tpu.reciprocal %726 {approx = true} : vector<8x1xf32> -> vector<8x1xf32>
    %729 = vector.broadcast %728 : vector<8x1xf32> to vector<8x8xf32>
    %730 = arith.mulf %727, %729 : vector<8x8xf32>
    %731 = vector.extract_strided_slice %678 {offsets = [8, 0], sizes = [8, 32], strides = [1, 1]} : vector<32x32xf32> to vector<8x32xf32>
    %cst_316 = arith.constant dense<0.000000e+00> : vector<8x32xf32>
    %732 = tpu.matmul %730, %731, %cst_316 {dimension_numbers = #tpu.dot_dimension_numbers<[1], [0], [0], [1], [0, 0, 1, 1], [], []>} : vector<8x8xf32>, vector<8x32xf32>, vector<8x32xf32> -> vector<8x32xf32>
    %733 = arith.addf %713, %732 : vector<8x32xf32>
    %734 = vector.extract_strided_slice %685 {offsets = [0, 16], sizes = [8, 8], strides = [1, 1]} : vector<8x32xf32> to vector<8x8xf32>
    %cst_317 = arith.constant 0.353553385 : f32
    %735 = vector.broadcast %cst_317 : f32 to vector<8x8xf32>
    %736 = arith.mulf %734, %735 : vector<8x8xf32>
    %737 = vector.extract_strided_slice %691 {offsets = [0, 16], sizes = [10, 8], strides = [1, 1]} : vector<10x32xf32> to vector<10x8xf32>
    %738 = vector.extract_strided_slice %692 {offsets = [0, 16], sizes = [10, 8], strides = [1, 1]} : vector<10x32xf32> to vector<10x8xf32>
    %cst_318 = arith.constant dense<0.000000e+00> : vector<8x10xf32>
    %739 = tpu.matmul %736, %737, %cst_318 {dimension_numbers = #tpu.dot_dimension_numbers<[1], [1], [0], [0], [0, 0, 1, 0], [], []>} : vector<8x8xf32>, vector<10x8xf32>, vector<8x10xf32> -> vector<8x10xf32>
    %cst_319 = arith.constant dense<0xFF800000> : vector<8xf32>
    %740 = vector.multi_reduction <maximumf>, %739, %cst_319 [1] : vector<8x10xf32> to vector<8xf32>
    %741 = vector.shape_cast %740 : vector<8xf32> to vector<8x1xf32>
    %742 = vector.broadcast %741 : vector<8x1xf32> to vector<8x10xf32>
    %743 = arith.subf %739, %742 : vector<8x10xf32>
    %744 = math.exp %743 : vector<8x10xf32>
    %cst_320 = arith.constant dense<0.000000e+00> : vector<8xf32>
    %745 = vector.multi_reduction <add>, %744, %cst_320 [1] : vector<8x10xf32> to vector<8xf32>
    %746 = vector.shape_cast %745 : vector<8xf32> to vector<8x1xf32>
    %cst_321 = arith.constant dense<0.000000e+00> : vector<8x8xf32>
    %747 = tpu.matmul %744, %738, %cst_321 {dimension_numbers = #tpu.dot_dimension_numbers<[1], [0], [0], [1], [0, 0, 1, 1], [], []>} : vector<8x10xf32>, vector<10x8xf32>, vector<8x8xf32> -> vector<8x8xf32>
    %748 = tpu.reciprocal %746 {approx = true} : vector<8x1xf32> -> vector<8x1xf32>
    %749 = vector.broadcast %748 : vector<8x1xf32> to vector<8x8xf32>
    %750 = arith.mulf %747, %749 : vector<8x8xf32>
    %751 = vector.extract_strided_slice %678 {offsets = [16, 0], sizes = [8, 32], strides = [1, 1]} : vector<32x32xf32> to vector<8x32xf32>
    %cst_322 = arith.constant dense<0.000000e+00> : vector<8x32xf32>
    %752 = tpu.matmul %750, %751, %cst_322 {dimension_numbers = #tpu.dot_dimension_numbers<[1], [0], [0], [1], [0, 0, 1, 1], [], []>} : vector<8x8xf32>, vector<8x32xf32>, vector<8x32xf32> -> vector<8x32xf32>
    %753 = arith.addf %733, %752 : vector<8x32xf32>
    %754 = vector.extract_strided_slice %685 {offsets = [0, 24], sizes = [8, 8], strides = [1, 1]} : vector<8x32xf32> to vector<8x8xf32>
    %cst_323 = arith.constant 0.353553385 : f32
    %755 = vector.broadcast %cst_323 : f32 to vector<8x8xf32>
    %756 = arith.mulf %754, %755 : vector<8x8xf32>
    %757 = vector.extract_strided_slice %691 {offsets = [0, 24], sizes = [10, 8], strides = [1, 1]} : vector<10x32xf32> to vector<10x8xf32>
    %758 = vector.extract_strided_slice %692 {offsets = [0, 24], sizes = [10, 8], strides = [1, 1]} : vector<10x32xf32> to vector<10x8xf32>
    %cst_324 = arith.constant dense<0.000000e+00> : vector<8x10xf32>
    %759 = tpu.matmul %756, %757, %cst_324 {dimension_numbers = #tpu.dot_dimension_numbers<[1], [1], [0], [0], [0, 0, 1, 0], [], []>} : vector<8x8xf32>, vector<10x8xf32>, vector<8x10xf32> -> vector<8x10xf32>
    %cst_325 = arith.constant dense<0xFF800000> : vector<8xf32>
    %760 = vector.multi_reduction <maximumf>, %759, %cst_325 [1] : vector<8x10xf32> to vector<8xf32>
    %761 = vector.shape_cast %760 : vector<8xf32> to vector<8x1xf32>
    %762 = vector.broadcast %761 : vector<8x1xf32> to vector<8x10xf32>
    %763 = arith.subf %759, %762 : vector<8x10xf32>
    %764 = math.exp %763 : vector<8x10xf32>
    %cst_326 = arith.constant dense<0.000000e+00> : vector<8xf32>
    %765 = vector.multi_reduction <add>, %764, %cst_326 [1] : vector<8x10xf32> to vector<8xf32>
    %766 = vector.shape_cast %765 : vector<8xf32> to vector<8x1xf32>
    %cst_327 = arith.constant dense<0.000000e+00> : vector<8x8xf32>
    %767 = tpu.matmul %764, %758, %cst_327 {dimension_numbers = #tpu.dot_dimension_numbers<[1], [0], [0], [1], [0, 0, 1, 1], [], []>} : vector<8x10xf32>, vector<10x8xf32>, vector<8x8xf32> -> vector<8x8xf32>
    %768 = tpu.reciprocal %766 {approx = true} : vector<8x1xf32> -> vector<8x1xf32>
    %769 = vector.broadcast %768 : vector<8x1xf32> to vector<8x8xf32>
    %770 = arith.mulf %767, %769 : vector<8x8xf32>
    %771 = vector.extract_strided_slice %678 {offsets = [24, 0], sizes = [8, 32], strides = [1, 1]} : vector<32x32xf32> to vector<8x32xf32>
    %cst_328 = arith.constant dense<0.000000e+00> : vector<8x32xf32>
    %772 = tpu.matmul %770, %771, %cst_328 {dimension_numbers = #tpu.dot_dimension_numbers<[1], [0], [0], [1], [0, 0, 1, 1], [], []>} : vector<8x8xf32>, vector<8x32xf32>, vector<8x32xf32> -> vector<8x32xf32>
    %773 = arith.addf %753, %772 : vector<8x32xf32>
    %774 = vector.broadcast %680 : vector<1x32xf32> to vector<8x32xf32>
    %775 = arith.addf %773, %774 : vector<8x32xf32>
    %776 = arith.addf %672, %775 : vector<8x32xf32>
    %c0_329 = arith.constant 0 : index
    %c0_330 = arith.constant 0 : index
    %c0_331 = arith.constant 0 : index
    %777 = vector.load %arg32[%c0_329, %c0_330, %c0_331] : memref<3x1x32xf32, #tpu.memory_space<vmem>>, vector<1x1x32xf32>
    %778 = vector.shape_cast %777 : vector<1x1x32xf32> to vector<1x32xf32>
    %c0_332 = arith.constant 0 : index
    %c0_333 = arith.constant 0 : index
    %c0_334 = arith.constant 0 : index
    %779 = vector.load %arg33[%c0_332, %c0_333, %c0_334] : memref<3x1x32xf32, #tpu.memory_space<vmem>>, vector<1x1x32xf32>
    %780 = vector.shape_cast %779 : vector<1x1x32xf32> to vector<1x32xf32>
    %cst_335 = arith.constant dense<0.000000e+00> : vector<8xf32>
    %781 = vector.multi_reduction <add>, %776, %cst_335 [1] : vector<8x32xf32> to vector<8xf32>
    %782 = vector.shape_cast %781 : vector<8xf32> to vector<8x1xf32>
    %cst_336 = arith.constant 3.200000e+01 : f32
    %783 = vector.broadcast %cst_336 : f32 to vector<8x1xf32>
    %784 = arith.divf %782, %783 : vector<8x1xf32>
    %785 = vector.broadcast %784 : vector<8x1xf32> to vector<8x32xf32>
    %786 = arith.subf %776, %785 : vector<8x32xf32>
    %787 = arith.mulf %786, %786 : vector<8x32xf32>
    %cst_337 = arith.constant dense<0.000000e+00> : vector<8xf32>
    %788 = vector.multi_reduction <add>, %787, %cst_337 [1] : vector<8x32xf32> to vector<8xf32>
    %789 = vector.shape_cast %788 : vector<8xf32> to vector<8x1xf32>
    %cst_338 = arith.constant 3.200000e+01 : f32
    %790 = vector.broadcast %cst_338 : f32 to vector<8x1xf32>
    %791 = arith.divf %789, %790 : vector<8x1xf32>
    %cst_339 = arith.constant 9.99999974E-6 : f32
    %792 = vector.broadcast %cst_339 : f32 to vector<8x1xf32>
    %793 = arith.addf %791, %792 : vector<8x1xf32>
    %794 = math.rsqrt %793 : vector<8x1xf32>
    %795 = vector.broadcast %794 : vector<8x1xf32> to vector<8x32xf32>
    %796 = arith.mulf %786, %795 : vector<8x32xf32>
    %797 = vector.broadcast %778 : vector<1x32xf32> to vector<8x32xf32>
    %798 = arith.mulf %796, %797 : vector<8x32xf32>
    %799 = vector.broadcast %780 : vector<1x32xf32> to vector<8x32xf32>
    %800 = arith.addf %798, %799 : vector<8x32xf32>
    %c0_340 = arith.constant 0 : index
    %c0_341 = arith.constant 0 : index
    %c0_342 = arith.constant 0 : index
    %801 = vector.load %arg26[%c0_340, %c0_341, %c0_342] : memref<3x32x96xf32, #tpu.memory_space<vmem>>, vector<1x32x96xf32>
    %802 = vector.shape_cast %801 : vector<1x32x96xf32> to vector<32x96xf32>
    %c0_343 = arith.constant 0 : index
    %c0_344 = arith.constant 0 : index
    %c0_345 = arith.constant 0 : index
    %803 = vector.load %arg27[%c0_343, %c0_344, %c0_345] : memref<3x1x96xf32, #tpu.memory_space<vmem>>, vector<1x1x96xf32>
    %804 = vector.shape_cast %803 : vector<1x1x96xf32> to vector<1x96xf32>
    %c0_346 = arith.constant 0 : index
    %c0_347 = arith.constant 0 : index
    %c0_348 = arith.constant 0 : index
    %805 = vector.load %arg28[%c0_346, %c0_347, %c0_348] : memref<3x96x32xf32, #tpu.memory_space<vmem>>, vector<1x96x32xf32>
    %806 = vector.shape_cast %805 : vector<1x96x32xf32> to vector<96x32xf32>
    %c0_349 = arith.constant 0 : index
    %c0_350 = arith.constant 0 : index
    %c0_351 = arith.constant 0 : index
    %807 = vector.load %arg29[%c0_349, %c0_350, %c0_351] : memref<3x1x32xf32, #tpu.memory_space<vmem>>, vector<1x1x32xf32>
    %808 = vector.shape_cast %807 : vector<1x1x32xf32> to vector<1x32xf32>
    %cst_352 = arith.constant dense<0.000000e+00> : vector<8x96xf32>
    %809 = tpu.matmul %800, %802, %cst_352 {dimension_numbers = #tpu.dot_dimension_numbers<[1], [0], [0], [1], [0, 0, 1, 1], [], []>} : vector<8x32xf32>, vector<32x96xf32>, vector<8x96xf32> -> vector<8x96xf32>
    %810 = vector.broadcast %804 : vector<1x96xf32> to vector<8x96xf32>
    %811 = arith.addf %809, %810 : vector<8x96xf32>
    %cst_353 = arith.constant 0.000000e+00 : f32
    %812 = vector.broadcast %cst_353 : f32 to vector<8x96xf32>
    %813 = arith.maximumf %811, %812 : vector<8x96xf32>
    %cst_354 = arith.constant dense<0.000000e+00> : vector<8x32xf32>
    %814 = tpu.matmul %813, %806, %cst_354 {dimension_numbers = #tpu.dot_dimension_numbers<[1], [0], [0], [1], [0, 0, 1, 1], [], []>} : vector<8x96xf32>, vector<96x32xf32>, vector<8x32xf32> -> vector<8x32xf32>
    %815 = vector.broadcast %808 : vector<1x32xf32> to vector<8x32xf32>
    %816 = arith.addf %814, %815 : vector<8x32xf32>
    %817 = arith.addf %800, %816 : vector<8x32xf32>
    %c0_355 = arith.constant 0 : index
    %c0_356 = arith.constant 0 : index
    %c0_357 = arith.constant 0 : index
    %818 = vector.load %arg34[%c0_355, %c0_356, %c0_357] : memref<3x1x32xf32, #tpu.memory_space<vmem>>, vector<1x1x32xf32>
    %819 = vector.shape_cast %818 : vector<1x1x32xf32> to vector<1x32xf32>
    %c0_358 = arith.constant 0 : index
    %c0_359 = arith.constant 0 : index
    %c0_360 = arith.constant 0 : index
    %820 = vector.load %arg35[%c0_358, %c0_359, %c0_360] : memref<3x1x32xf32, #tpu.memory_space<vmem>>, vector<1x1x32xf32>
    %821 = vector.shape_cast %820 : vector<1x1x32xf32> to vector<1x32xf32>
    %cst_361 = arith.constant dense<0.000000e+00> : vector<8xf32>
    %822 = vector.multi_reduction <add>, %817, %cst_361 [1] : vector<8x32xf32> to vector<8xf32>
    %823 = vector.shape_cast %822 : vector<8xf32> to vector<8x1xf32>
    %cst_362 = arith.constant 3.200000e+01 : f32
    %824 = vector.broadcast %cst_362 : f32 to vector<8x1xf32>
    %825 = arith.divf %823, %824 : vector<8x1xf32>
    %826 = vector.broadcast %825 : vector<8x1xf32> to vector<8x32xf32>
    %827 = arith.subf %817, %826 : vector<8x32xf32>
    %828 = arith.mulf %827, %827 : vector<8x32xf32>
    %cst_363 = arith.constant dense<0.000000e+00> : vector<8xf32>
    %829 = vector.multi_reduction <add>, %828, %cst_363 [1] : vector<8x32xf32> to vector<8xf32>
    %830 = vector.shape_cast %829 : vector<8xf32> to vector<8x1xf32>
    %cst_364 = arith.constant 3.200000e+01 : f32
    %831 = vector.broadcast %cst_364 : f32 to vector<8x1xf32>
    %832 = arith.divf %830, %831 : vector<8x1xf32>
    %cst_365 = arith.constant 9.99999974E-6 : f32
    %833 = vector.broadcast %cst_365 : f32 to vector<8x1xf32>
    %834 = arith.addf %832, %833 : vector<8x1xf32>
    %835 = math.rsqrt %834 : vector<8x1xf32>
    %836 = vector.broadcast %835 : vector<8x1xf32> to vector<8x32xf32>
    %837 = arith.mulf %827, %836 : vector<8x32xf32>
    %838 = vector.broadcast %819 : vector<1x32xf32> to vector<8x32xf32>
    %839 = arith.mulf %837, %838 : vector<8x32xf32>
    %840 = vector.broadcast %821 : vector<1x32xf32> to vector<8x32xf32>
    %841 = arith.addf %839, %840 : vector<8x32xf32>
    %c1_366 = arith.constant 1 : index
    %c0_367 = arith.constant 0 : index
    %c0_368 = arith.constant 0 : index
    %842 = vector.load %arg18[%c1_366, %c0_367, %c0_368] : memref<3x32x96xf32, #tpu.memory_space<vmem>>, vector<1x32x96xf32>
    %843 = vector.shape_cast %842 : vector<1x32x96xf32> to vector<32x96xf32>
    %c1_369 = arith.constant 1 : index
    %c0_370 = arith.constant 0 : index
    %c0_371 = arith.constant 0 : index
    %844 = vector.load %arg19[%c1_369, %c0_370, %c0_371] : memref<3x1x96xf32, #tpu.memory_space<vmem>>, vector<1x1x96xf32>
    %845 = vector.shape_cast %844 : vector<1x1x96xf32> to vector<1x96xf32>
    %c1_372 = arith.constant 1 : index
    %c0_373 = arith.constant 0 : index
    %c0_374 = arith.constant 0 : index
    %846 = vector.load %arg20[%c1_372, %c0_373, %c0_374] : memref<3x32x32xf32, #tpu.memory_space<vmem>>, vector<1x32x32xf32>
    %847 = vector.shape_cast %846 : vector<1x32x32xf32> to vector<32x32xf32>
    %c1_375 = arith.constant 1 : index
    %c0_376 = arith.constant 0 : index
    %c0_377 = arith.constant 0 : index
    %848 = vector.load %arg21[%c1_375, %c0_376, %c0_377] : memref<3x1x32xf32, #tpu.memory_space<vmem>>, vector<1x1x32xf32>
    %849 = vector.shape_cast %848 : vector<1x1x32xf32> to vector<1x32xf32>
    %cst_378 = arith.constant dense<0.000000e+00> : vector<8x96xf32>
    %850 = tpu.matmul %841, %843, %cst_378 {dimension_numbers = #tpu.dot_dimension_numbers<[1], [0], [0], [1], [0, 0, 1, 1], [], []>} : vector<8x32xf32>, vector<32x96xf32>, vector<8x96xf32> -> vector<8x96xf32>
    %851 = vector.broadcast %845 : vector<1x96xf32> to vector<8x96xf32>
    %852 = arith.addf %850, %851 : vector<8x96xf32>
    %853 = vector.extract_strided_slice %852 {offsets = [0, 0], sizes = [8, 32], strides = [1, 1]} : vector<8x96xf32> to vector<8x32xf32>
    %854 = vector.extract_strided_slice %852 {offsets = [0, 32], sizes = [8, 32], strides = [1, 1]} : vector<8x96xf32> to vector<8x32xf32>
    %855 = vector.extract_strided_slice %852 {offsets = [0, 64], sizes = [8, 32], strides = [1, 1]} : vector<8x96xf32> to vector<8x32xf32>
    %cst_379 = arith.constant 0.000000e+00 : f32
    %856 = vector.broadcast %cst_379 : f32 to vector<8x32xf32>
    %857 = vector.extract_strided_slice %853 {offsets = [0, 0], sizes = [8, 8], strides = [1, 1]} : vector<8x32xf32> to vector<8x8xf32>
    %cst_380 = arith.constant 0.353553385 : f32
    %858 = vector.broadcast %cst_380 : f32 to vector<8x8xf32>
    %859 = arith.mulf %857, %858 : vector<8x8xf32>
    %860 = vector.extract_strided_slice %854 {offsets = [0, 0], sizes = [8, 8], strides = [1, 1]} : vector<8x32xf32> to vector<8x8xf32>
    %861 = vector.extract_strided_slice %855 {offsets = [0, 0], sizes = [8, 8], strides = [1, 1]} : vector<8x32xf32> to vector<8x8xf32>
    %cst_381 = arith.constant dense<0.000000e+00> : vector<8x8xf32>
    %862 = tpu.matmul %859, %860, %cst_381 {dimension_numbers = #tpu.dot_dimension_numbers<[1], [1], [0], [0], [0, 0, 1, 0], [], []>} : vector<8x8xf32>, vector<8x8xf32>, vector<8x8xf32> -> vector<8x8xf32>
    %863 = arith.addf %862, %11 : vector<8x8xf32>
    %cst_382 = arith.constant dense<0xFF800000> : vector<8xf32>
    %864 = vector.multi_reduction <maximumf>, %863, %cst_382 [1] : vector<8x8xf32> to vector<8xf32>
    %865 = vector.shape_cast %864 : vector<8xf32> to vector<8x1xf32>
    %866 = vector.broadcast %865 : vector<8x1xf32> to vector<8x8xf32>
    %867 = arith.subf %863, %866 : vector<8x8xf32>
    %868 = math.exp %867 : vector<8x8xf32>
    %cst_383 = arith.constant dense<0.000000e+00> : vector<8xf32>
    %869 = vector.multi_reduction <add>, %868, %cst_383 [1] : vector<8x8xf32> to vector<8xf32>
    %870 = vector.shape_cast %869 : vector<8xf32> to vector<8x1xf32>
    %cst_384 = arith.constant dense<0.000000e+00> : vector<8x8xf32>
    %871 = tpu.matmul %868, %861, %cst_384 {dimension_numbers = #tpu.dot_dimension_numbers<[1], [0], [0], [1], [0, 0, 1, 1], [], []>} : vector<8x8xf32>, vector<8x8xf32>, vector<8x8xf32> -> vector<8x8xf32>
    %872 = tpu.reciprocal %870 {approx = true} : vector<8x1xf32> -> vector<8x1xf32>
    %873 = vector.broadcast %872 : vector<8x1xf32> to vector<8x8xf32>
    %874 = arith.mulf %871, %873 : vector<8x8xf32>
    %875 = vector.extract_strided_slice %847 {offsets = [0, 0], sizes = [8, 32], strides = [1, 1]} : vector<32x32xf32> to vector<8x32xf32>
    %cst_385 = arith.constant dense<0.000000e+00> : vector<8x32xf32>
    %876 = tpu.matmul %874, %875, %cst_385 {dimension_numbers = #tpu.dot_dimension_numbers<[1], [0], [0], [1], [0, 0, 1, 1], [], []>} : vector<8x8xf32>, vector<8x32xf32>, vector<8x32xf32> -> vector<8x32xf32>
    %877 = arith.addf %856, %876 : vector<8x32xf32>
    %878 = vector.extract_strided_slice %853 {offsets = [0, 8], sizes = [8, 8], strides = [1, 1]} : vector<8x32xf32> to vector<8x8xf32>
    %cst_386 = arith.constant 0.353553385 : f32
    %879 = vector.broadcast %cst_386 : f32 to vector<8x8xf32>
    %880 = arith.mulf %878, %879 : vector<8x8xf32>
    %881 = vector.extract_strided_slice %854 {offsets = [0, 8], sizes = [8, 8], strides = [1, 1]} : vector<8x32xf32> to vector<8x8xf32>
    %882 = vector.extract_strided_slice %855 {offsets = [0, 8], sizes = [8, 8], strides = [1, 1]} : vector<8x32xf32> to vector<8x8xf32>
    %cst_387 = arith.constant dense<0.000000e+00> : vector<8x8xf32>
    %883 = tpu.matmul %880, %881, %cst_387 {dimension_numbers = #tpu.dot_dimension_numbers<[1], [1], [0], [0], [0, 0, 1, 0], [], []>} : vector<8x8xf32>, vector<8x8xf32>, vector<8x8xf32> -> vector<8x8xf32>
    %884 = arith.addf %883, %11 : vector<8x8xf32>
    %cst_388 = arith.constant dense<0xFF800000> : vector<8xf32>
    %885 = vector.multi_reduction <maximumf>, %884, %cst_388 [1] : vector<8x8xf32> to vector<8xf32>
    %886 = vector.shape_cast %885 : vector<8xf32> to vector<8x1xf32>
    %887 = vector.broadcast %886 : vector<8x1xf32> to vector<8x8xf32>
    %888 = arith.subf %884, %887 : vector<8x8xf32>
    %889 = math.exp %888 : vector<8x8xf32>
    %cst_389 = arith.constant dense<0.000000e+00> : vector<8xf32>
    %890 = vector.multi_reduction <add>, %889, %cst_389 [1] : vector<8x8xf32> to vector<8xf32>
    %891 = vector.shape_cast %890 : vector<8xf32> to vector<8x1xf32>
    %cst_390 = arith.constant dense<0.000000e+00> : vector<8x8xf32>
    %892 = tpu.matmul %889, %882, %cst_390 {dimension_numbers = #tpu.dot_dimension_numbers<[1], [0], [0], [1], [0, 0, 1, 1], [], []>} : vector<8x8xf32>, vector<8x8xf32>, vector<8x8xf32> -> vector<8x8xf32>
    %893 = tpu.reciprocal %891 {approx = true} : vector<8x1xf32> -> vector<8x1xf32>
    %894 = vector.broadcast %893 : vector<8x1xf32> to vector<8x8xf32>
    %895 = arith.mulf %892, %894 : vector<8x8xf32>
    %896 = vector.extract_strided_slice %847 {offsets = [8, 0], sizes = [8, 32], strides = [1, 1]} : vector<32x32xf32> to vector<8x32xf32>
    %cst_391 = arith.constant dense<0.000000e+00> : vector<8x32xf32>
    %897 = tpu.matmul %895, %896, %cst_391 {dimension_numbers = #tpu.dot_dimension_numbers<[1], [0], [0], [1], [0, 0, 1, 1], [], []>} : vector<8x8xf32>, vector<8x32xf32>, vector<8x32xf32> -> vector<8x32xf32>
    %898 = arith.addf %877, %897 : vector<8x32xf32>
    %899 = vector.extract_strided_slice %853 {offsets = [0, 16], sizes = [8, 8], strides = [1, 1]} : vector<8x32xf32> to vector<8x8xf32>
    %cst_392 = arith.constant 0.353553385 : f32
    %900 = vector.broadcast %cst_392 : f32 to vector<8x8xf32>
    %901 = arith.mulf %899, %900 : vector<8x8xf32>
    %902 = vector.extract_strided_slice %854 {offsets = [0, 16], sizes = [8, 8], strides = [1, 1]} : vector<8x32xf32> to vector<8x8xf32>
    %903 = vector.extract_strided_slice %855 {offsets = [0, 16], sizes = [8, 8], strides = [1, 1]} : vector<8x32xf32> to vector<8x8xf32>
    %cst_393 = arith.constant dense<0.000000e+00> : vector<8x8xf32>
    %904 = tpu.matmul %901, %902, %cst_393 {dimension_numbers = #tpu.dot_dimension_numbers<[1], [1], [0], [0], [0, 0, 1, 0], [], []>} : vector<8x8xf32>, vector<8x8xf32>, vector<8x8xf32> -> vector<8x8xf32>
    %905 = arith.addf %904, %11 : vector<8x8xf32>
    %cst_394 = arith.constant dense<0xFF800000> : vector<8xf32>
    %906 = vector.multi_reduction <maximumf>, %905, %cst_394 [1] : vector<8x8xf32> to vector<8xf32>
    %907 = vector.shape_cast %906 : vector<8xf32> to vector<8x1xf32>
    %908 = vector.broadcast %907 : vector<8x1xf32> to vector<8x8xf32>
    %909 = arith.subf %905, %908 : vector<8x8xf32>
    %910 = math.exp %909 : vector<8x8xf32>
    %cst_395 = arith.constant dense<0.000000e+00> : vector<8xf32>
    %911 = vector.multi_reduction <add>, %910, %cst_395 [1] : vector<8x8xf32> to vector<8xf32>
    %912 = vector.shape_cast %911 : vector<8xf32> to vector<8x1xf32>
    %cst_396 = arith.constant dense<0.000000e+00> : vector<8x8xf32>
    %913 = tpu.matmul %910, %903, %cst_396 {dimension_numbers = #tpu.dot_dimension_numbers<[1], [0], [0], [1], [0, 0, 1, 1], [], []>} : vector<8x8xf32>, vector<8x8xf32>, vector<8x8xf32> -> vector<8x8xf32>
    %914 = tpu.reciprocal %912 {approx = true} : vector<8x1xf32> -> vector<8x1xf32>
    %915 = vector.broadcast %914 : vector<8x1xf32> to vector<8x8xf32>
    %916 = arith.mulf %913, %915 : vector<8x8xf32>
    %917 = vector.extract_strided_slice %847 {offsets = [16, 0], sizes = [8, 32], strides = [1, 1]} : vector<32x32xf32> to vector<8x32xf32>
    %cst_397 = arith.constant dense<0.000000e+00> : vector<8x32xf32>
    %918 = tpu.matmul %916, %917, %cst_397 {dimension_numbers = #tpu.dot_dimension_numbers<[1], [0], [0], [1], [0, 0, 1, 1], [], []>} : vector<8x8xf32>, vector<8x32xf32>, vector<8x32xf32> -> vector<8x32xf32>
    %919 = arith.addf %898, %918 : vector<8x32xf32>
    %920 = vector.extract_strided_slice %853 {offsets = [0, 24], sizes = [8, 8], strides = [1, 1]} : vector<8x32xf32> to vector<8x8xf32>
    %cst_398 = arith.constant 0.353553385 : f32
    %921 = vector.broadcast %cst_398 : f32 to vector<8x8xf32>
    %922 = arith.mulf %920, %921 : vector<8x8xf32>
    %923 = vector.extract_strided_slice %854 {offsets = [0, 24], sizes = [8, 8], strides = [1, 1]} : vector<8x32xf32> to vector<8x8xf32>
    %924 = vector.extract_strided_slice %855 {offsets = [0, 24], sizes = [8, 8], strides = [1, 1]} : vector<8x32xf32> to vector<8x8xf32>
    %cst_399 = arith.constant dense<0.000000e+00> : vector<8x8xf32>
    %925 = tpu.matmul %922, %923, %cst_399 {dimension_numbers = #tpu.dot_dimension_numbers<[1], [1], [0], [0], [0, 0, 1, 0], [], []>} : vector<8x8xf32>, vector<8x8xf32>, vector<8x8xf32> -> vector<8x8xf32>
    %926 = arith.addf %925, %11 : vector<8x8xf32>
    %cst_400 = arith.constant dense<0xFF800000> : vector<8xf32>
    %927 = vector.multi_reduction <maximumf>, %926, %cst_400 [1] : vector<8x8xf32> to vector<8xf32>
    %928 = vector.shape_cast %927 : vector<8xf32> to vector<8x1xf32>
    %929 = vector.broadcast %928 : vector<8x1xf32> to vector<8x8xf32>
    %930 = arith.subf %926, %929 : vector<8x8xf32>
    %931 = math.exp %930 : vector<8x8xf32>
    %cst_401 = arith.constant dense<0.000000e+00> : vector<8xf32>
    %932 = vector.multi_reduction <add>, %931, %cst_401 [1] : vector<8x8xf32> to vector<8xf32>
    %933 = vector.shape_cast %932 : vector<8xf32> to vector<8x1xf32>
    %cst_402 = arith.constant dense<0.000000e+00> : vector<8x8xf32>
    %934 = tpu.matmul %931, %924, %cst_402 {dimension_numbers = #tpu.dot_dimension_numbers<[1], [0], [0], [1], [0, 0, 1, 1], [], []>} : vector<8x8xf32>, vector<8x8xf32>, vector<8x8xf32> -> vector<8x8xf32>
    %935 = tpu.reciprocal %933 {approx = true} : vector<8x1xf32> -> vector<8x1xf32>
    %936 = vector.broadcast %935 : vector<8x1xf32> to vector<8x8xf32>
    %937 = arith.mulf %934, %936 : vector<8x8xf32>
    %938 = vector.extract_strided_slice %847 {offsets = [24, 0], sizes = [8, 32], strides = [1, 1]} : vector<32x32xf32> to vector<8x32xf32>
    %cst_403 = arith.constant dense<0.000000e+00> : vector<8x32xf32>
    %939 = tpu.matmul %937, %938, %cst_403 {dimension_numbers = #tpu.dot_dimension_numbers<[1], [0], [0], [1], [0, 0, 1, 1], [], []>} : vector<8x8xf32>, vector<8x32xf32>, vector<8x32xf32> -> vector<8x32xf32>
    %940 = arith.addf %919, %939 : vector<8x32xf32>
    %941 = vector.broadcast %849 : vector<1x32xf32> to vector<8x32xf32>
    %942 = arith.addf %940, %941 : vector<8x32xf32>
    %943 = arith.addf %841, %942 : vector<8x32xf32>
    %c1_404 = arith.constant 1 : index
    %c0_405 = arith.constant 0 : index
    %c0_406 = arith.constant 0 : index
    %944 = vector.load %arg30[%c1_404, %c0_405, %c0_406] : memref<3x1x32xf32, #tpu.memory_space<vmem>>, vector<1x1x32xf32>
    %945 = vector.shape_cast %944 : vector<1x1x32xf32> to vector<1x32xf32>
    %c1_407 = arith.constant 1 : index
    %c0_408 = arith.constant 0 : index
    %c0_409 = arith.constant 0 : index
    %946 = vector.load %arg31[%c1_407, %c0_408, %c0_409] : memref<3x1x32xf32, #tpu.memory_space<vmem>>, vector<1x1x32xf32>
    %947 = vector.shape_cast %946 : vector<1x1x32xf32> to vector<1x32xf32>
    %cst_410 = arith.constant dense<0.000000e+00> : vector<8xf32>
    %948 = vector.multi_reduction <add>, %943, %cst_410 [1] : vector<8x32xf32> to vector<8xf32>
    %949 = vector.shape_cast %948 : vector<8xf32> to vector<8x1xf32>
    %cst_411 = arith.constant 3.200000e+01 : f32
    %950 = vector.broadcast %cst_411 : f32 to vector<8x1xf32>
    %951 = arith.divf %949, %950 : vector<8x1xf32>
    %952 = vector.broadcast %951 : vector<8x1xf32> to vector<8x32xf32>
    %953 = arith.subf %943, %952 : vector<8x32xf32>
    %954 = arith.mulf %953, %953 : vector<8x32xf32>
    %cst_412 = arith.constant dense<0.000000e+00> : vector<8xf32>
    %955 = vector.multi_reduction <add>, %954, %cst_412 [1] : vector<8x32xf32> to vector<8xf32>
    %956 = vector.shape_cast %955 : vector<8xf32> to vector<8x1xf32>
    %cst_413 = arith.constant 3.200000e+01 : f32
    %957 = vector.broadcast %cst_413 : f32 to vector<8x1xf32>
    %958 = arith.divf %956, %957 : vector<8x1xf32>
    %cst_414 = arith.constant 9.99999974E-6 : f32
    %959 = vector.broadcast %cst_414 : f32 to vector<8x1xf32>
    %960 = arith.addf %958, %959 : vector<8x1xf32>
    %961 = math.rsqrt %960 : vector<8x1xf32>
    %962 = vector.broadcast %961 : vector<8x1xf32> to vector<8x32xf32>
    %963 = arith.mulf %953, %962 : vector<8x32xf32>
    %964 = vector.broadcast %945 : vector<1x32xf32> to vector<8x32xf32>
    %965 = arith.mulf %963, %964 : vector<8x32xf32>
    %966 = vector.broadcast %947 : vector<1x32xf32> to vector<8x32xf32>
    %967 = arith.addf %965, %966 : vector<8x32xf32>
    %c1_415 = arith.constant 1 : index
    %c0_416 = arith.constant 0 : index
    %c0_417 = arith.constant 0 : index
    %968 = vector.load %arg22[%c1_415, %c0_416, %c0_417] : memref<3x32x96xf32, #tpu.memory_space<vmem>>, vector<1x32x96xf32>
    %969 = vector.shape_cast %968 : vector<1x32x96xf32> to vector<32x96xf32>
    %c1_418 = arith.constant 1 : index
    %c0_419 = arith.constant 0 : index
    %c0_420 = arith.constant 0 : index
    %970 = vector.load %arg23[%c1_418, %c0_419, %c0_420] : memref<3x1x96xf32, #tpu.memory_space<vmem>>, vector<1x1x96xf32>
    %971 = vector.shape_cast %970 : vector<1x1x96xf32> to vector<1x96xf32>
    %c1_421 = arith.constant 1 : index
    %c0_422 = arith.constant 0 : index
    %c0_423 = arith.constant 0 : index
    %972 = vector.load %arg24[%c1_421, %c0_422, %c0_423] : memref<3x32x32xf32, #tpu.memory_space<vmem>>, vector<1x32x32xf32>
    %973 = vector.shape_cast %972 : vector<1x32x32xf32> to vector<32x32xf32>
    %c1_424 = arith.constant 1 : index
    %c0_425 = arith.constant 0 : index
    %c0_426 = arith.constant 0 : index
    %974 = vector.load %arg25[%c1_424, %c0_425, %c0_426] : memref<3x1x32xf32, #tpu.memory_space<vmem>>, vector<1x1x32xf32>
    %975 = vector.shape_cast %974 : vector<1x1x32xf32> to vector<1x32xf32>
    %976 = vector.extract_strided_slice %969 {offsets = [0, 0], sizes = [32, 32], strides = [1, 1]} : vector<32x96xf32> to vector<32x32xf32>
    %cst_427 = arith.constant dense<0.000000e+00> : vector<8x32xf32>
    %977 = tpu.matmul %967, %976, %cst_427 {dimension_numbers = #tpu.dot_dimension_numbers<[1], [0], [0], [1], [0, 0, 1, 1], [], []>} : vector<8x32xf32>, vector<32x32xf32>, vector<8x32xf32> -> vector<8x32xf32>
    %978 = vector.extract_strided_slice %971 {offsets = [0, 0], sizes = [1, 32], strides = [1, 1]} : vector<1x96xf32> to vector<1x32xf32>
    %979 = vector.broadcast %978 : vector<1x32xf32> to vector<8x32xf32>
    %980 = arith.addf %977, %979 : vector<8x32xf32>
    %981 = vector.extract_strided_slice %969 {offsets = [0, 32], sizes = [32, 64], strides = [1, 1]} : vector<32x96xf32> to vector<32x64xf32>
    %cst_428 = arith.constant dense<0.000000e+00> : vector<10x64xf32>
    %982 = tpu.matmul %546, %981, %cst_428 {dimension_numbers = #tpu.dot_dimension_numbers<[1], [0], [0], [1], [0, 0, 1, 1], [], []>} : vector<10x32xf32>, vector<32x64xf32>, vector<10x64xf32> -> vector<10x64xf32>
    %983 = vector.extract_strided_slice %971 {offsets = [0, 32], sizes = [1, 64], strides = [1, 1]} : vector<1x96xf32> to vector<1x64xf32>
    %984 = vector.broadcast %983 : vector<1x64xf32> to vector<10x64xf32>
    %985 = arith.addf %982, %984 : vector<10x64xf32>
    %986 = vector.extract_strided_slice %985 {offsets = [0, 0], sizes = [10, 32], strides = [1, 1]} : vector<10x64xf32> to vector<10x32xf32>
    %987 = vector.extract_strided_slice %985 {offsets = [0, 32], sizes = [10, 32], strides = [1, 1]} : vector<10x64xf32> to vector<10x32xf32>
    %cst_429 = arith.constant 0.000000e+00 : f32
    %988 = vector.broadcast %cst_429 : f32 to vector<8x32xf32>
    %989 = vector.extract_strided_slice %980 {offsets = [0, 0], sizes = [8, 8], strides = [1, 1]} : vector<8x32xf32> to vector<8x8xf32>
    %cst_430 = arith.constant 0.353553385 : f32
    %990 = vector.broadcast %cst_430 : f32 to vector<8x8xf32>
    %991 = arith.mulf %989, %990 : vector<8x8xf32>
    %992 = vector.extract_strided_slice %986 {offsets = [0, 0], sizes = [10, 8], strides = [1, 1]} : vector<10x32xf32> to vector<10x8xf32>
    %993 = vector.extract_strided_slice %987 {offsets = [0, 0], sizes = [10, 8], strides = [1, 1]} : vector<10x32xf32> to vector<10x8xf32>
    %cst_431 = arith.constant dense<0.000000e+00> : vector<8x10xf32>
    %994 = tpu.matmul %991, %992, %cst_431 {dimension_numbers = #tpu.dot_dimension_numbers<[1], [1], [0], [0], [0, 0, 1, 0], [], []>} : vector<8x8xf32>, vector<10x8xf32>, vector<8x10xf32> -> vector<8x10xf32>
    %cst_432 = arith.constant dense<0xFF800000> : vector<8xf32>
    %995 = vector.multi_reduction <maximumf>, %994, %cst_432 [1] : vector<8x10xf32> to vector<8xf32>
    %996 = vector.shape_cast %995 : vector<8xf32> to vector<8x1xf32>
    %997 = vector.broadcast %996 : vector<8x1xf32> to vector<8x10xf32>
    %998 = arith.subf %994, %997 : vector<8x10xf32>
    %999 = math.exp %998 : vector<8x10xf32>
    %cst_433 = arith.constant dense<0.000000e+00> : vector<8xf32>
    %1000 = vector.multi_reduction <add>, %999, %cst_433 [1] : vector<8x10xf32> to vector<8xf32>
    %1001 = vector.shape_cast %1000 : vector<8xf32> to vector<8x1xf32>
    %cst_434 = arith.constant dense<0.000000e+00> : vector<8x8xf32>
    %1002 = tpu.matmul %999, %993, %cst_434 {dimension_numbers = #tpu.dot_dimension_numbers<[1], [0], [0], [1], [0, 0, 1, 1], [], []>} : vector<8x10xf32>, vector<10x8xf32>, vector<8x8xf32> -> vector<8x8xf32>
    %1003 = tpu.reciprocal %1001 {approx = true} : vector<8x1xf32> -> vector<8x1xf32>
    %1004 = vector.broadcast %1003 : vector<8x1xf32> to vector<8x8xf32>
    %1005 = arith.mulf %1002, %1004 : vector<8x8xf32>
    %1006 = vector.extract_strided_slice %973 {offsets = [0, 0], sizes = [8, 32], strides = [1, 1]} : vector<32x32xf32> to vector<8x32xf32>
    %cst_435 = arith.constant dense<0.000000e+00> : vector<8x32xf32>
    %1007 = tpu.matmul %1005, %1006, %cst_435 {dimension_numbers = #tpu.dot_dimension_numbers<[1], [0], [0], [1], [0, 0, 1, 1], [], []>} : vector<8x8xf32>, vector<8x32xf32>, vector<8x32xf32> -> vector<8x32xf32>
    %1008 = arith.addf %988, %1007 : vector<8x32xf32>
    %1009 = vector.extract_strided_slice %980 {offsets = [0, 8], sizes = [8, 8], strides = [1, 1]} : vector<8x32xf32> to vector<8x8xf32>
    %cst_436 = arith.constant 0.353553385 : f32
    %1010 = vector.broadcast %cst_436 : f32 to vector<8x8xf32>
    %1011 = arith.mulf %1009, %1010 : vector<8x8xf32>
    %1012 = vector.extract_strided_slice %986 {offsets = [0, 8], sizes = [10, 8], strides = [1, 1]} : vector<10x32xf32> to vector<10x8xf32>
    %1013 = vector.extract_strided_slice %987 {offsets = [0, 8], sizes = [10, 8], strides = [1, 1]} : vector<10x32xf32> to vector<10x8xf32>
    %cst_437 = arith.constant dense<0.000000e+00> : vector<8x10xf32>
    %1014 = tpu.matmul %1011, %1012, %cst_437 {dimension_numbers = #tpu.dot_dimension_numbers<[1], [1], [0], [0], [0, 0, 1, 0], [], []>} : vector<8x8xf32>, vector<10x8xf32>, vector<8x10xf32> -> vector<8x10xf32>
    %cst_438 = arith.constant dense<0xFF800000> : vector<8xf32>
    %1015 = vector.multi_reduction <maximumf>, %1014, %cst_438 [1] : vector<8x10xf32> to vector<8xf32>
    %1016 = vector.shape_cast %1015 : vector<8xf32> to vector<8x1xf32>
    %1017 = vector.broadcast %1016 : vector<8x1xf32> to vector<8x10xf32>
    %1018 = arith.subf %1014, %1017 : vector<8x10xf32>
    %1019 = math.exp %1018 : vector<8x10xf32>
    %cst_439 = arith.constant dense<0.000000e+00> : vector<8xf32>
    %1020 = vector.multi_reduction <add>, %1019, %cst_439 [1] : vector<8x10xf32> to vector<8xf32>
    %1021 = vector.shape_cast %1020 : vector<8xf32> to vector<8x1xf32>
    %cst_440 = arith.constant dense<0.000000e+00> : vector<8x8xf32>
    %1022 = tpu.matmul %1019, %1013, %cst_440 {dimension_numbers = #tpu.dot_dimension_numbers<[1], [0], [0], [1], [0, 0, 1, 1], [], []>} : vector<8x10xf32>, vector<10x8xf32>, vector<8x8xf32> -> vector<8x8xf32>
    %1023 = tpu.reciprocal %1021 {approx = true} : vector<8x1xf32> -> vector<8x1xf32>
    %1024 = vector.broadcast %1023 : vector<8x1xf32> to vector<8x8xf32>
    %1025 = arith.mulf %1022, %1024 : vector<8x8xf32>
    %1026 = vector.extract_strided_slice %973 {offsets = [8, 0], sizes = [8, 32], strides = [1, 1]} : vector<32x32xf32> to vector<8x32xf32>
    %cst_441 = arith.constant dense<0.000000e+00> : vector<8x32xf32>
    %1027 = tpu.matmul %1025, %1026, %cst_441 {dimension_numbers = #tpu.dot_dimension_numbers<[1], [0], [0], [1], [0, 0, 1, 1], [], []>} : vector<8x8xf32>, vector<8x32xf32>, vector<8x32xf32> -> vector<8x32xf32>
    %1028 = arith.addf %1008, %1027 : vector<8x32xf32>
    %1029 = vector.extract_strided_slice %980 {offsets = [0, 16], sizes = [8, 8], strides = [1, 1]} : vector<8x32xf32> to vector<8x8xf32>
    %cst_442 = arith.constant 0.353553385 : f32
    %1030 = vector.broadcast %cst_442 : f32 to vector<8x8xf32>
    %1031 = arith.mulf %1029, %1030 : vector<8x8xf32>
    %1032 = vector.extract_strided_slice %986 {offsets = [0, 16], sizes = [10, 8], strides = [1, 1]} : vector<10x32xf32> to vector<10x8xf32>
    %1033 = vector.extract_strided_slice %987 {offsets = [0, 16], sizes = [10, 8], strides = [1, 1]} : vector<10x32xf32> to vector<10x8xf32>
    %cst_443 = arith.constant dense<0.000000e+00> : vector<8x10xf32>
    %1034 = tpu.matmul %1031, %1032, %cst_443 {dimension_numbers = #tpu.dot_dimension_numbers<[1], [1], [0], [0], [0, 0, 1, 0], [], []>} : vector<8x8xf32>, vector<10x8xf32>, vector<8x10xf32> -> vector<8x10xf32>
    %cst_444 = arith.constant dense<0xFF800000> : vector<8xf32>
    %1035 = vector.multi_reduction <maximumf>, %1034, %cst_444 [1] : vector<8x10xf32> to vector<8xf32>
    %1036 = vector.shape_cast %1035 : vector<8xf32> to vector<8x1xf32>
    %1037 = vector.broadcast %1036 : vector<8x1xf32> to vector<8x10xf32>
    %1038 = arith.subf %1034, %1037 : vector<8x10xf32>
    %1039 = math.exp %1038 : vector<8x10xf32>
    %cst_445 = arith.constant dense<0.000000e+00> : vector<8xf32>
    %1040 = vector.multi_reduction <add>, %1039, %cst_445 [1] : vector<8x10xf32> to vector<8xf32>
    %1041 = vector.shape_cast %1040 : vector<8xf32> to vector<8x1xf32>
    %cst_446 = arith.constant dense<0.000000e+00> : vector<8x8xf32>
    %1042 = tpu.matmul %1039, %1033, %cst_446 {dimension_numbers = #tpu.dot_dimension_numbers<[1], [0], [0], [1], [0, 0, 1, 1], [], []>} : vector<8x10xf32>, vector<10x8xf32>, vector<8x8xf32> -> vector<8x8xf32>
    %1043 = tpu.reciprocal %1041 {approx = true} : vector<8x1xf32> -> vector<8x1xf32>
    %1044 = vector.broadcast %1043 : vector<8x1xf32> to vector<8x8xf32>
    %1045 = arith.mulf %1042, %1044 : vector<8x8xf32>
    %1046 = vector.extract_strided_slice %973 {offsets = [16, 0], sizes = [8, 32], strides = [1, 1]} : vector<32x32xf32> to vector<8x32xf32>
    %cst_447 = arith.constant dense<0.000000e+00> : vector<8x32xf32>
    %1047 = tpu.matmul %1045, %1046, %cst_447 {dimension_numbers = #tpu.dot_dimension_numbers<[1], [0], [0], [1], [0, 0, 1, 1], [], []>} : vector<8x8xf32>, vector<8x32xf32>, vector<8x32xf32> -> vector<8x32xf32>
    %1048 = arith.addf %1028, %1047 : vector<8x32xf32>
    %1049 = vector.extract_strided_slice %980 {offsets = [0, 24], sizes = [8, 8], strides = [1, 1]} : vector<8x32xf32> to vector<8x8xf32>
    %cst_448 = arith.constant 0.353553385 : f32
    %1050 = vector.broadcast %cst_448 : f32 to vector<8x8xf32>
    %1051 = arith.mulf %1049, %1050 : vector<8x8xf32>
    %1052 = vector.extract_strided_slice %986 {offsets = [0, 24], sizes = [10, 8], strides = [1, 1]} : vector<10x32xf32> to vector<10x8xf32>
    %1053 = vector.extract_strided_slice %987 {offsets = [0, 24], sizes = [10, 8], strides = [1, 1]} : vector<10x32xf32> to vector<10x8xf32>
    %cst_449 = arith.constant dense<0.000000e+00> : vector<8x10xf32>
    %1054 = tpu.matmul %1051, %1052, %cst_449 {dimension_numbers = #tpu.dot_dimension_numbers<[1], [1], [0], [0], [0, 0, 1, 0], [], []>} : vector<8x8xf32>, vector<10x8xf32>, vector<8x10xf32> -> vector<8x10xf32>
    %cst_450 = arith.constant dense<0xFF800000> : vector<8xf32>
    %1055 = vector.multi_reduction <maximumf>, %1054, %cst_450 [1] : vector<8x10xf32> to vector<8xf32>
    %1056 = vector.shape_cast %1055 : vector<8xf32> to vector<8x1xf32>
    %1057 = vector.broadcast %1056 : vector<8x1xf32> to vector<8x10xf32>
    %1058 = arith.subf %1054, %1057 : vector<8x10xf32>
    %1059 = math.exp %1058 : vector<8x10xf32>
    %cst_451 = arith.constant dense<0.000000e+00> : vector<8xf32>
    %1060 = vector.multi_reduction <add>, %1059, %cst_451 [1] : vector<8x10xf32> to vector<8xf32>
    %1061 = vector.shape_cast %1060 : vector<8xf32> to vector<8x1xf32>
    %cst_452 = arith.constant dense<0.000000e+00> : vector<8x8xf32>
    %1062 = tpu.matmul %1059, %1053, %cst_452 {dimension_numbers = #tpu.dot_dimension_numbers<[1], [0], [0], [1], [0, 0, 1, 1], [], []>} : vector<8x10xf32>, vector<10x8xf32>, vector<8x8xf32> -> vector<8x8xf32>
    %1063 = tpu.reciprocal %1061 {approx = true} : vector<8x1xf32> -> vector<8x1xf32>
    %1064 = vector.broadcast %1063 : vector<8x1xf32> to vector<8x8xf32>
    %1065 = arith.mulf %1062, %1064 : vector<8x8xf32>
    %1066 = vector.extract_strided_slice %973 {offsets = [24, 0], sizes = [8, 32], strides = [1, 1]} : vector<32x32xf32> to vector<8x32xf32>
    %cst_453 = arith.constant dense<0.000000e+00> : vector<8x32xf32>
    %1067 = tpu.matmul %1065, %1066, %cst_453 {dimension_numbers = #tpu.dot_dimension_numbers<[1], [0], [0], [1], [0, 0, 1, 1], [], []>} : vector<8x8xf32>, vector<8x32xf32>, vector<8x32xf32> -> vector<8x32xf32>
    %1068 = arith.addf %1048, %1067 : vector<8x32xf32>
    %1069 = vector.broadcast %975 : vector<1x32xf32> to vector<8x32xf32>
    %1070 = arith.addf %1068, %1069 : vector<8x32xf32>
    %1071 = arith.addf %967, %1070 : vector<8x32xf32>
    %c1_454 = arith.constant 1 : index
    %c0_455 = arith.constant 0 : index
    %c0_456 = arith.constant 0 : index
    %1072 = vector.load %arg32[%c1_454, %c0_455, %c0_456] : memref<3x1x32xf32, #tpu.memory_space<vmem>>, vector<1x1x32xf32>
    %1073 = vector.shape_cast %1072 : vector<1x1x32xf32> to vector<1x32xf32>
    %c1_457 = arith.constant 1 : index
    %c0_458 = arith.constant 0 : index
    %c0_459 = arith.constant 0 : index
    %1074 = vector.load %arg33[%c1_457, %c0_458, %c0_459] : memref<3x1x32xf32, #tpu.memory_space<vmem>>, vector<1x1x32xf32>
    %1075 = vector.shape_cast %1074 : vector<1x1x32xf32> to vector<1x32xf32>
    %cst_460 = arith.constant dense<0.000000e+00> : vector<8xf32>
    %1076 = vector.multi_reduction <add>, %1071, %cst_460 [1] : vector<8x32xf32> to vector<8xf32>
    %1077 = vector.shape_cast %1076 : vector<8xf32> to vector<8x1xf32>
    %cst_461 = arith.constant 3.200000e+01 : f32
    %1078 = vector.broadcast %cst_461 : f32 to vector<8x1xf32>
    %1079 = arith.divf %1077, %1078 : vector<8x1xf32>
    %1080 = vector.broadcast %1079 : vector<8x1xf32> to vector<8x32xf32>
    %1081 = arith.subf %1071, %1080 : vector<8x32xf32>
    %1082 = arith.mulf %1081, %1081 : vector<8x32xf32>
    %cst_462 = arith.constant dense<0.000000e+00> : vector<8xf32>
    %1083 = vector.multi_reduction <add>, %1082, %cst_462 [1] : vector<8x32xf32> to vector<8xf32>
    %1084 = vector.shape_cast %1083 : vector<8xf32> to vector<8x1xf32>
    %cst_463 = arith.constant 3.200000e+01 : f32
    %1085 = vector.broadcast %cst_463 : f32 to vector<8x1xf32>
    %1086 = arith.divf %1084, %1085 : vector<8x1xf32>
    %cst_464 = arith.constant 9.99999974E-6 : f32
    %1087 = vector.broadcast %cst_464 : f32 to vector<8x1xf32>
    %1088 = arith.addf %1086, %1087 : vector<8x1xf32>
    %1089 = math.rsqrt %1088 : vector<8x1xf32>
    %1090 = vector.broadcast %1089 : vector<8x1xf32> to vector<8x32xf32>
    %1091 = arith.mulf %1081, %1090 : vector<8x32xf32>
    %1092 = vector.broadcast %1073 : vector<1x32xf32> to vector<8x32xf32>
    %1093 = arith.mulf %1091, %1092 : vector<8x32xf32>
    %1094 = vector.broadcast %1075 : vector<1x32xf32> to vector<8x32xf32>
    %1095 = arith.addf %1093, %1094 : vector<8x32xf32>
    %c1_465 = arith.constant 1 : index
    %c0_466 = arith.constant 0 : index
    %c0_467 = arith.constant 0 : index
    %1096 = vector.load %arg26[%c1_465, %c0_466, %c0_467] : memref<3x32x96xf32, #tpu.memory_space<vmem>>, vector<1x32x96xf32>
    %1097 = vector.shape_cast %1096 : vector<1x32x96xf32> to vector<32x96xf32>
    %c1_468 = arith.constant 1 : index
    %c0_469 = arith.constant 0 : index
    %c0_470 = arith.constant 0 : index
    %1098 = vector.load %arg27[%c1_468, %c0_469, %c0_470] : memref<3x1x96xf32, #tpu.memory_space<vmem>>, vector<1x1x96xf32>
    %1099 = vector.shape_cast %1098 : vector<1x1x96xf32> to vector<1x96xf32>
    %c1_471 = arith.constant 1 : index
    %c0_472 = arith.constant 0 : index
    %c0_473 = arith.constant 0 : index
    %1100 = vector.load %arg28[%c1_471, %c0_472, %c0_473] : memref<3x96x32xf32, #tpu.memory_space<vmem>>, vector<1x96x32xf32>
    %1101 = vector.shape_cast %1100 : vector<1x96x32xf32> to vector<96x32xf32>
    %c1_474 = arith.constant 1 : index
    %c0_475 = arith.constant 0 : index
    %c0_476 = arith.constant 0 : index
    %1102 = vector.load %arg29[%c1_474, %c0_475, %c0_476] : memref<3x1x32xf32, #tpu.memory_space<vmem>>, vector<1x1x32xf32>
    %1103 = vector.shape_cast %1102 : vector<1x1x32xf32> to vector<1x32xf32>
    %cst_477 = arith.constant dense<0.000000e+00> : vector<8x96xf32>
    %1104 = tpu.matmul %1095, %1097, %cst_477 {dimension_numbers = #tpu.dot_dimension_numbers<[1], [0], [0], [1], [0, 0, 1, 1], [], []>} : vector<8x32xf32>, vector<32x96xf32>, vector<8x96xf32> -> vector<8x96xf32>
    %1105 = vector.broadcast %1099 : vector<1x96xf32> to vector<8x96xf32>
    %1106 = arith.addf %1104, %1105 : vector<8x96xf32>
    %cst_478 = arith.constant 0.000000e+00 : f32
    %1107 = vector.broadcast %cst_478 : f32 to vector<8x96xf32>
    %1108 = arith.maximumf %1106, %1107 : vector<8x96xf32>
    %cst_479 = arith.constant dense<0.000000e+00> : vector<8x32xf32>
    %1109 = tpu.matmul %1108, %1101, %cst_479 {dimension_numbers = #tpu.dot_dimension_numbers<[1], [0], [0], [1], [0, 0, 1, 1], [], []>} : vector<8x96xf32>, vector<96x32xf32>, vector<8x32xf32> -> vector<8x32xf32>
    %1110 = vector.broadcast %1103 : vector<1x32xf32> to vector<8x32xf32>
    %1111 = arith.addf %1109, %1110 : vector<8x32xf32>
    %1112 = arith.addf %1095, %1111 : vector<8x32xf32>
    %c1_480 = arith.constant 1 : index
    %c0_481 = arith.constant 0 : index
    %c0_482 = arith.constant 0 : index
    %1113 = vector.load %arg34[%c1_480, %c0_481, %c0_482] : memref<3x1x32xf32, #tpu.memory_space<vmem>>, vector<1x1x32xf32>
    %1114 = vector.shape_cast %1113 : vector<1x1x32xf32> to vector<1x32xf32>
    %c1_483 = arith.constant 1 : index
    %c0_484 = arith.constant 0 : index
    %c0_485 = arith.constant 0 : index
    %1115 = vector.load %arg35[%c1_483, %c0_484, %c0_485] : memref<3x1x32xf32, #tpu.memory_space<vmem>>, vector<1x1x32xf32>
    %1116 = vector.shape_cast %1115 : vector<1x1x32xf32> to vector<1x32xf32>
    %cst_486 = arith.constant dense<0.000000e+00> : vector<8xf32>
    %1117 = vector.multi_reduction <add>, %1112, %cst_486 [1] : vector<8x32xf32> to vector<8xf32>
    %1118 = vector.shape_cast %1117 : vector<8xf32> to vector<8x1xf32>
    %cst_487 = arith.constant 3.200000e+01 : f32
    %1119 = vector.broadcast %cst_487 : f32 to vector<8x1xf32>
    %1120 = arith.divf %1118, %1119 : vector<8x1xf32>
    %1121 = vector.broadcast %1120 : vector<8x1xf32> to vector<8x32xf32>
    %1122 = arith.subf %1112, %1121 : vector<8x32xf32>
    %1123 = arith.mulf %1122, %1122 : vector<8x32xf32>
    %cst_488 = arith.constant dense<0.000000e+00> : vector<8xf32>
    %1124 = vector.multi_reduction <add>, %1123, %cst_488 [1] : vector<8x32xf32> to vector<8xf32>
    %1125 = vector.shape_cast %1124 : vector<8xf32> to vector<8x1xf32>
    %cst_489 = arith.constant 3.200000e+01 : f32
    %1126 = vector.broadcast %cst_489 : f32 to vector<8x1xf32>
    %1127 = arith.divf %1125, %1126 : vector<8x1xf32>
    %cst_490 = arith.constant 9.99999974E-6 : f32
    %1128 = vector.broadcast %cst_490 : f32 to vector<8x1xf32>
    %1129 = arith.addf %1127, %1128 : vector<8x1xf32>
    %1130 = math.rsqrt %1129 : vector<8x1xf32>
    %1131 = vector.broadcast %1130 : vector<8x1xf32> to vector<8x32xf32>
    %1132 = arith.mulf %1122, %1131 : vector<8x32xf32>
    %1133 = vector.broadcast %1114 : vector<1x32xf32> to vector<8x32xf32>
    %1134 = arith.mulf %1132, %1133 : vector<8x32xf32>
    %1135 = vector.broadcast %1116 : vector<1x32xf32> to vector<8x32xf32>
    %1136 = arith.addf %1134, %1135 : vector<8x32xf32>
    %c2_491 = arith.constant 2 : index
    %c0_492 = arith.constant 0 : index
    %c0_493 = arith.constant 0 : index
    %1137 = vector.load %arg18[%c2_491, %c0_492, %c0_493] : memref<3x32x96xf32, #tpu.memory_space<vmem>>, vector<1x32x96xf32>
    %1138 = vector.shape_cast %1137 : vector<1x32x96xf32> to vector<32x96xf32>
    %c2_494 = arith.constant 2 : index
    %c0_495 = arith.constant 0 : index
    %c0_496 = arith.constant 0 : index
    %1139 = vector.load %arg19[%c2_494, %c0_495, %c0_496] : memref<3x1x96xf32, #tpu.memory_space<vmem>>, vector<1x1x96xf32>
    %1140 = vector.shape_cast %1139 : vector<1x1x96xf32> to vector<1x96xf32>
    %c2_497 = arith.constant 2 : index
    %c0_498 = arith.constant 0 : index
    %c0_499 = arith.constant 0 : index
    %1141 = vector.load %arg20[%c2_497, %c0_498, %c0_499] : memref<3x32x32xf32, #tpu.memory_space<vmem>>, vector<1x32x32xf32>
    %1142 = vector.shape_cast %1141 : vector<1x32x32xf32> to vector<32x32xf32>
    %c2_500 = arith.constant 2 : index
    %c0_501 = arith.constant 0 : index
    %c0_502 = arith.constant 0 : index
    %1143 = vector.load %arg21[%c2_500, %c0_501, %c0_502] : memref<3x1x32xf32, #tpu.memory_space<vmem>>, vector<1x1x32xf32>
    %1144 = vector.shape_cast %1143 : vector<1x1x32xf32> to vector<1x32xf32>
    %cst_503 = arith.constant dense<0.000000e+00> : vector<8x96xf32>
    %1145 = tpu.matmul %1136, %1138, %cst_503 {dimension_numbers = #tpu.dot_dimension_numbers<[1], [0], [0], [1], [0, 0, 1, 1], [], []>} : vector<8x32xf32>, vector<32x96xf32>, vector<8x96xf32> -> vector<8x96xf32>
    %1146 = vector.broadcast %1140 : vector<1x96xf32> to vector<8x96xf32>
    %1147 = arith.addf %1145, %1146 : vector<8x96xf32>
    %1148 = vector.extract_strided_slice %1147 {offsets = [0, 0], sizes = [8, 32], strides = [1, 1]} : vector<8x96xf32> to vector<8x32xf32>
    %1149 = vector.extract_strided_slice %1147 {offsets = [0, 32], sizes = [8, 32], strides = [1, 1]} : vector<8x96xf32> to vector<8x32xf32>
    %1150 = vector.extract_strided_slice %1147 {offsets = [0, 64], sizes = [8, 32], strides = [1, 1]} : vector<8x96xf32> to vector<8x32xf32>
    %cst_504 = arith.constant 0.000000e+00 : f32
    %1151 = vector.broadcast %cst_504 : f32 to vector<8x32xf32>
    %1152 = vector.extract_strided_slice %1148 {offsets = [0, 0], sizes = [8, 8], strides = [1, 1]} : vector<8x32xf32> to vector<8x8xf32>
    %cst_505 = arith.constant 0.353553385 : f32
    %1153 = vector.broadcast %cst_505 : f32 to vector<8x8xf32>
    %1154 = arith.mulf %1152, %1153 : vector<8x8xf32>
    %1155 = vector.extract_strided_slice %1149 {offsets = [0, 0], sizes = [8, 8], strides = [1, 1]} : vector<8x32xf32> to vector<8x8xf32>
    %1156 = vector.extract_strided_slice %1150 {offsets = [0, 0], sizes = [8, 8], strides = [1, 1]} : vector<8x32xf32> to vector<8x8xf32>
    %cst_506 = arith.constant dense<0.000000e+00> : vector<8x8xf32>
    %1157 = tpu.matmul %1154, %1155, %cst_506 {dimension_numbers = #tpu.dot_dimension_numbers<[1], [1], [0], [0], [0, 0, 1, 0], [], []>} : vector<8x8xf32>, vector<8x8xf32>, vector<8x8xf32> -> vector<8x8xf32>
    %1158 = arith.addf %1157, %11 : vector<8x8xf32>
    %cst_507 = arith.constant dense<0xFF800000> : vector<8xf32>
    %1159 = vector.multi_reduction <maximumf>, %1158, %cst_507 [1] : vector<8x8xf32> to vector<8xf32>
    %1160 = vector.shape_cast %1159 : vector<8xf32> to vector<8x1xf32>
    %1161 = vector.broadcast %1160 : vector<8x1xf32> to vector<8x8xf32>
    %1162 = arith.subf %1158, %1161 : vector<8x8xf32>
    %1163 = math.exp %1162 : vector<8x8xf32>
    %cst_508 = arith.constant dense<0.000000e+00> : vector<8xf32>
    %1164 = vector.multi_reduction <add>, %1163, %cst_508 [1] : vector<8x8xf32> to vector<8xf32>
    %1165 = vector.shape_cast %1164 : vector<8xf32> to vector<8x1xf32>
    %cst_509 = arith.constant dense<0.000000e+00> : vector<8x8xf32>
    %1166 = tpu.matmul %1163, %1156, %cst_509 {dimension_numbers = #tpu.dot_dimension_numbers<[1], [0], [0], [1], [0, 0, 1, 1], [], []>} : vector<8x8xf32>, vector<8x8xf32>, vector<8x8xf32> -> vector<8x8xf32>
    %1167 = tpu.reciprocal %1165 {approx = true} : vector<8x1xf32> -> vector<8x1xf32>
    %1168 = vector.broadcast %1167 : vector<8x1xf32> to vector<8x8xf32>
    %1169 = arith.mulf %1166, %1168 : vector<8x8xf32>
    %1170 = vector.extract_strided_slice %1142 {offsets = [0, 0], sizes = [8, 32], strides = [1, 1]} : vector<32x32xf32> to vector<8x32xf32>
    %cst_510 = arith.constant dense<0.000000e+00> : vector<8x32xf32>
    %1171 = tpu.matmul %1169, %1170, %cst_510 {dimension_numbers = #tpu.dot_dimension_numbers<[1], [0], [0], [1], [0, 0, 1, 1], [], []>} : vector<8x8xf32>, vector<8x32xf32>, vector<8x32xf32> -> vector<8x32xf32>
    %1172 = arith.addf %1151, %1171 : vector<8x32xf32>
    %1173 = vector.extract_strided_slice %1148 {offsets = [0, 8], sizes = [8, 8], strides = [1, 1]} : vector<8x32xf32> to vector<8x8xf32>
    %cst_511 = arith.constant 0.353553385 : f32
    %1174 = vector.broadcast %cst_511 : f32 to vector<8x8xf32>
    %1175 = arith.mulf %1173, %1174 : vector<8x8xf32>
    %1176 = vector.extract_strided_slice %1149 {offsets = [0, 8], sizes = [8, 8], strides = [1, 1]} : vector<8x32xf32> to vector<8x8xf32>
    %1177 = vector.extract_strided_slice %1150 {offsets = [0, 8], sizes = [8, 8], strides = [1, 1]} : vector<8x32xf32> to vector<8x8xf32>
    %cst_512 = arith.constant dense<0.000000e+00> : vector<8x8xf32>
    %1178 = tpu.matmul %1175, %1176, %cst_512 {dimension_numbers = #tpu.dot_dimension_numbers<[1], [1], [0], [0], [0, 0, 1, 0], [], []>} : vector<8x8xf32>, vector<8x8xf32>, vector<8x8xf32> -> vector<8x8xf32>
    %1179 = arith.addf %1178, %11 : vector<8x8xf32>
    %cst_513 = arith.constant dense<0xFF800000> : vector<8xf32>
    %1180 = vector.multi_reduction <maximumf>, %1179, %cst_513 [1] : vector<8x8xf32> to vector<8xf32>
    %1181 = vector.shape_cast %1180 : vector<8xf32> to vector<8x1xf32>
    %1182 = vector.broadcast %1181 : vector<8x1xf32> to vector<8x8xf32>
    %1183 = arith.subf %1179, %1182 : vector<8x8xf32>
    %1184 = math.exp %1183 : vector<8x8xf32>
    %cst_514 = arith.constant dense<0.000000e+00> : vector<8xf32>
    %1185 = vector.multi_reduction <add>, %1184, %cst_514 [1] : vector<8x8xf32> to vector<8xf32>
    %1186 = vector.shape_cast %1185 : vector<8xf32> to vector<8x1xf32>
    %cst_515 = arith.constant dense<0.000000e+00> : vector<8x8xf32>
    %1187 = tpu.matmul %1184, %1177, %cst_515 {dimension_numbers = #tpu.dot_dimension_numbers<[1], [0], [0], [1], [0, 0, 1, 1], [], []>} : vector<8x8xf32>, vector<8x8xf32>, vector<8x8xf32> -> vector<8x8xf32>
    %1188 = tpu.reciprocal %1186 {approx = true} : vector<8x1xf32> -> vector<8x1xf32>
    %1189 = vector.broadcast %1188 : vector<8x1xf32> to vector<8x8xf32>
    %1190 = arith.mulf %1187, %1189 : vector<8x8xf32>
    %1191 = vector.extract_strided_slice %1142 {offsets = [8, 0], sizes = [8, 32], strides = [1, 1]} : vector<32x32xf32> to vector<8x32xf32>
    %cst_516 = arith.constant dense<0.000000e+00> : vector<8x32xf32>
    %1192 = tpu.matmul %1190, %1191, %cst_516 {dimension_numbers = #tpu.dot_dimension_numbers<[1], [0], [0], [1], [0, 0, 1, 1], [], []>} : vector<8x8xf32>, vector<8x32xf32>, vector<8x32xf32> -> vector<8x32xf32>
    %1193 = arith.addf %1172, %1192 : vector<8x32xf32>
    %1194 = vector.extract_strided_slice %1148 {offsets = [0, 16], sizes = [8, 8], strides = [1, 1]} : vector<8x32xf32> to vector<8x8xf32>
    %cst_517 = arith.constant 0.353553385 : f32
    %1195 = vector.broadcast %cst_517 : f32 to vector<8x8xf32>
    %1196 = arith.mulf %1194, %1195 : vector<8x8xf32>
    %1197 = vector.extract_strided_slice %1149 {offsets = [0, 16], sizes = [8, 8], strides = [1, 1]} : vector<8x32xf32> to vector<8x8xf32>
    %1198 = vector.extract_strided_slice %1150 {offsets = [0, 16], sizes = [8, 8], strides = [1, 1]} : vector<8x32xf32> to vector<8x8xf32>
    %cst_518 = arith.constant dense<0.000000e+00> : vector<8x8xf32>
    %1199 = tpu.matmul %1196, %1197, %cst_518 {dimension_numbers = #tpu.dot_dimension_numbers<[1], [1], [0], [0], [0, 0, 1, 0], [], []>} : vector<8x8xf32>, vector<8x8xf32>, vector<8x8xf32> -> vector<8x8xf32>
    %1200 = arith.addf %1199, %11 : vector<8x8xf32>
    %cst_519 = arith.constant dense<0xFF800000> : vector<8xf32>
    %1201 = vector.multi_reduction <maximumf>, %1200, %cst_519 [1] : vector<8x8xf32> to vector<8xf32>
    %1202 = vector.shape_cast %1201 : vector<8xf32> to vector<8x1xf32>
    %1203 = vector.broadcast %1202 : vector<8x1xf32> to vector<8x8xf32>
    %1204 = arith.subf %1200, %1203 : vector<8x8xf32>
    %1205 = math.exp %1204 : vector<8x8xf32>
    %cst_520 = arith.constant dense<0.000000e+00> : vector<8xf32>
    %1206 = vector.multi_reduction <add>, %1205, %cst_520 [1] : vector<8x8xf32> to vector<8xf32>
    %1207 = vector.shape_cast %1206 : vector<8xf32> to vector<8x1xf32>
    %cst_521 = arith.constant dense<0.000000e+00> : vector<8x8xf32>
    %1208 = tpu.matmul %1205, %1198, %cst_521 {dimension_numbers = #tpu.dot_dimension_numbers<[1], [0], [0], [1], [0, 0, 1, 1], [], []>} : vector<8x8xf32>, vector<8x8xf32>, vector<8x8xf32> -> vector<8x8xf32>
    %1209 = tpu.reciprocal %1207 {approx = true} : vector<8x1xf32> -> vector<8x1xf32>
    %1210 = vector.broadcast %1209 : vector<8x1xf32> to vector<8x8xf32>
    %1211 = arith.mulf %1208, %1210 : vector<8x8xf32>
    %1212 = vector.extract_strided_slice %1142 {offsets = [16, 0], sizes = [8, 32], strides = [1, 1]} : vector<32x32xf32> to vector<8x32xf32>
    %cst_522 = arith.constant dense<0.000000e+00> : vector<8x32xf32>
    %1213 = tpu.matmul %1211, %1212, %cst_522 {dimension_numbers = #tpu.dot_dimension_numbers<[1], [0], [0], [1], [0, 0, 1, 1], [], []>} : vector<8x8xf32>, vector<8x32xf32>, vector<8x32xf32> -> vector<8x32xf32>
    %1214 = arith.addf %1193, %1213 : vector<8x32xf32>
    %1215 = vector.extract_strided_slice %1148 {offsets = [0, 24], sizes = [8, 8], strides = [1, 1]} : vector<8x32xf32> to vector<8x8xf32>
    %cst_523 = arith.constant 0.353553385 : f32
    %1216 = vector.broadcast %cst_523 : f32 to vector<8x8xf32>
    %1217 = arith.mulf %1215, %1216 : vector<8x8xf32>
    %1218 = vector.extract_strided_slice %1149 {offsets = [0, 24], sizes = [8, 8], strides = [1, 1]} : vector<8x32xf32> to vector<8x8xf32>
    %1219 = vector.extract_strided_slice %1150 {offsets = [0, 24], sizes = [8, 8], strides = [1, 1]} : vector<8x32xf32> to vector<8x8xf32>
    %cst_524 = arith.constant dense<0.000000e+00> : vector<8x8xf32>
    %1220 = tpu.matmul %1217, %1218, %cst_524 {dimension_numbers = #tpu.dot_dimension_numbers<[1], [1], [0], [0], [0, 0, 1, 0], [], []>} : vector<8x8xf32>, vector<8x8xf32>, vector<8x8xf32> -> vector<8x8xf32>
    %1221 = arith.addf %1220, %11 : vector<8x8xf32>
    %cst_525 = arith.constant dense<0xFF800000> : vector<8xf32>
    %1222 = vector.multi_reduction <maximumf>, %1221, %cst_525 [1] : vector<8x8xf32> to vector<8xf32>
    %1223 = vector.shape_cast %1222 : vector<8xf32> to vector<8x1xf32>
    %1224 = vector.broadcast %1223 : vector<8x1xf32> to vector<8x8xf32>
    %1225 = arith.subf %1221, %1224 : vector<8x8xf32>
    %1226 = math.exp %1225 : vector<8x8xf32>
    %cst_526 = arith.constant dense<0.000000e+00> : vector<8xf32>
    %1227 = vector.multi_reduction <add>, %1226, %cst_526 [1] : vector<8x8xf32> to vector<8xf32>
    %1228 = vector.shape_cast %1227 : vector<8xf32> to vector<8x1xf32>
    %cst_527 = arith.constant dense<0.000000e+00> : vector<8x8xf32>
    %1229 = tpu.matmul %1226, %1219, %cst_527 {dimension_numbers = #tpu.dot_dimension_numbers<[1], [0], [0], [1], [0, 0, 1, 1], [], []>} : vector<8x8xf32>, vector<8x8xf32>, vector<8x8xf32> -> vector<8x8xf32>
    %1230 = tpu.reciprocal %1228 {approx = true} : vector<8x1xf32> -> vector<8x1xf32>
    %1231 = vector.broadcast %1230 : vector<8x1xf32> to vector<8x8xf32>
    %1232 = arith.mulf %1229, %1231 : vector<8x8xf32>
    %1233 = vector.extract_strided_slice %1142 {offsets = [24, 0], sizes = [8, 32], strides = [1, 1]} : vector<32x32xf32> to vector<8x32xf32>
    %cst_528 = arith.constant dense<0.000000e+00> : vector<8x32xf32>
    %1234 = tpu.matmul %1232, %1233, %cst_528 {dimension_numbers = #tpu.dot_dimension_numbers<[1], [0], [0], [1], [0, 0, 1, 1], [], []>} : vector<8x8xf32>, vector<8x32xf32>, vector<8x32xf32> -> vector<8x32xf32>
    %1235 = arith.addf %1214, %1234 : vector<8x32xf32>
    %1236 = vector.broadcast %1144 : vector<1x32xf32> to vector<8x32xf32>
    %1237 = arith.addf %1235, %1236 : vector<8x32xf32>
    %1238 = arith.addf %1136, %1237 : vector<8x32xf32>
    %c2_529 = arith.constant 2 : index
    %c0_530 = arith.constant 0 : index
    %c0_531 = arith.constant 0 : index
    %1239 = vector.load %arg30[%c2_529, %c0_530, %c0_531] : memref<3x1x32xf32, #tpu.memory_space<vmem>>, vector<1x1x32xf32>
    %1240 = vector.shape_cast %1239 : vector<1x1x32xf32> to vector<1x32xf32>
    %c2_532 = arith.constant 2 : index
    %c0_533 = arith.constant 0 : index
    %c0_534 = arith.constant 0 : index
    %1241 = vector.load %arg31[%c2_532, %c0_533, %c0_534] : memref<3x1x32xf32, #tpu.memory_space<vmem>>, vector<1x1x32xf32>
    %1242 = vector.shape_cast %1241 : vector<1x1x32xf32> to vector<1x32xf32>
    %cst_535 = arith.constant dense<0.000000e+00> : vector<8xf32>
    %1243 = vector.multi_reduction <add>, %1238, %cst_535 [1] : vector<8x32xf32> to vector<8xf32>
    %1244 = vector.shape_cast %1243 : vector<8xf32> to vector<8x1xf32>
    %cst_536 = arith.constant 3.200000e+01 : f32
    %1245 = vector.broadcast %cst_536 : f32 to vector<8x1xf32>
    %1246 = arith.divf %1244, %1245 : vector<8x1xf32>
    %1247 = vector.broadcast %1246 : vector<8x1xf32> to vector<8x32xf32>
    %1248 = arith.subf %1238, %1247 : vector<8x32xf32>
    %1249 = arith.mulf %1248, %1248 : vector<8x32xf32>
    %cst_537 = arith.constant dense<0.000000e+00> : vector<8xf32>
    %1250 = vector.multi_reduction <add>, %1249, %cst_537 [1] : vector<8x32xf32> to vector<8xf32>
    %1251 = vector.shape_cast %1250 : vector<8xf32> to vector<8x1xf32>
    %cst_538 = arith.constant 3.200000e+01 : f32
    %1252 = vector.broadcast %cst_538 : f32 to vector<8x1xf32>
    %1253 = arith.divf %1251, %1252 : vector<8x1xf32>
    %cst_539 = arith.constant 9.99999974E-6 : f32
    %1254 = vector.broadcast %cst_539 : f32 to vector<8x1xf32>
    %1255 = arith.addf %1253, %1254 : vector<8x1xf32>
    %1256 = math.rsqrt %1255 : vector<8x1xf32>
    %1257 = vector.broadcast %1256 : vector<8x1xf32> to vector<8x32xf32>
    %1258 = arith.mulf %1248, %1257 : vector<8x32xf32>
    %1259 = vector.broadcast %1240 : vector<1x32xf32> to vector<8x32xf32>
    %1260 = arith.mulf %1258, %1259 : vector<8x32xf32>
    %1261 = vector.broadcast %1242 : vector<1x32xf32> to vector<8x32xf32>
    %1262 = arith.addf %1260, %1261 : vector<8x32xf32>
    %c2_540 = arith.constant 2 : index
    %c0_541 = arith.constant 0 : index
    %c0_542 = arith.constant 0 : index
    %1263 = vector.load %arg22[%c2_540, %c0_541, %c0_542] : memref<3x32x96xf32, #tpu.memory_space<vmem>>, vector<1x32x96xf32>
    %1264 = vector.shape_cast %1263 : vector<1x32x96xf32> to vector<32x96xf32>
    %c2_543 = arith.constant 2 : index
    %c0_544 = arith.constant 0 : index
    %c0_545 = arith.constant 0 : index
    %1265 = vector.load %arg23[%c2_543, %c0_544, %c0_545] : memref<3x1x96xf32, #tpu.memory_space<vmem>>, vector<1x1x96xf32>
    %1266 = vector.shape_cast %1265 : vector<1x1x96xf32> to vector<1x96xf32>
    %c2_546 = arith.constant 2 : index
    %c0_547 = arith.constant 0 : index
    %c0_548 = arith.constant 0 : index
    %1267 = vector.load %arg24[%c2_546, %c0_547, %c0_548] : memref<3x32x32xf32, #tpu.memory_space<vmem>>, vector<1x32x32xf32>
    %1268 = vector.shape_cast %1267 : vector<1x32x32xf32> to vector<32x32xf32>
    %c2_549 = arith.constant 2 : index
    %c0_550 = arith.constant 0 : index
    %c0_551 = arith.constant 0 : index
    %1269 = vector.load %arg25[%c2_549, %c0_550, %c0_551] : memref<3x1x32xf32, #tpu.memory_space<vmem>>, vector<1x1x32xf32>
    %1270 = vector.shape_cast %1269 : vector<1x1x32xf32> to vector<1x32xf32>
    %1271 = vector.extract_strided_slice %1264 {offsets = [0, 0], sizes = [32, 32], strides = [1, 1]} : vector<32x96xf32> to vector<32x32xf32>
    %cst_552 = arith.constant dense<0.000000e+00> : vector<8x32xf32>
    %1272 = tpu.matmul %1262, %1271, %cst_552 {dimension_numbers = #tpu.dot_dimension_numbers<[1], [0], [0], [1], [0, 0, 1, 1], [], []>} : vector<8x32xf32>, vector<32x32xf32>, vector<8x32xf32> -> vector<8x32xf32>
    %1273 = vector.extract_strided_slice %1266 {offsets = [0, 0], sizes = [1, 32], strides = [1, 1]} : vector<1x96xf32> to vector<1x32xf32>
    %1274 = vector.broadcast %1273 : vector<1x32xf32> to vector<8x32xf32>
    %1275 = arith.addf %1272, %1274 : vector<8x32xf32>
    %1276 = vector.extract_strided_slice %1264 {offsets = [0, 32], sizes = [32, 64], strides = [1, 1]} : vector<32x96xf32> to vector<32x64xf32>
    %cst_553 = arith.constant dense<0.000000e+00> : vector<10x64xf32>
    %1277 = tpu.matmul %546, %1276, %cst_553 {dimension_numbers = #tpu.dot_dimension_numbers<[1], [0], [0], [1], [0, 0, 1, 1], [], []>} : vector<10x32xf32>, vector<32x64xf32>, vector<10x64xf32> -> vector<10x64xf32>
    %1278 = vector.extract_strided_slice %1266 {offsets = [0, 32], sizes = [1, 64], strides = [1, 1]} : vector<1x96xf32> to vector<1x64xf32>
    %1279 = vector.broadcast %1278 : vector<1x64xf32> to vector<10x64xf32>
    %1280 = arith.addf %1277, %1279 : vector<10x64xf32>
    %1281 = vector.extract_strided_slice %1280 {offsets = [0, 0], sizes = [10, 32], strides = [1, 1]} : vector<10x64xf32> to vector<10x32xf32>
    %1282 = vector.extract_strided_slice %1280 {offsets = [0, 32], sizes = [10, 32], strides = [1, 1]} : vector<10x64xf32> to vector<10x32xf32>
    %cst_554 = arith.constant 0.000000e+00 : f32
    %1283 = vector.broadcast %cst_554 : f32 to vector<8x32xf32>
    %1284 = vector.extract_strided_slice %1275 {offsets = [0, 0], sizes = [8, 8], strides = [1, 1]} : vector<8x32xf32> to vector<8x8xf32>
    %cst_555 = arith.constant 0.353553385 : f32
    %1285 = vector.broadcast %cst_555 : f32 to vector<8x8xf32>
    %1286 = arith.mulf %1284, %1285 : vector<8x8xf32>
    %1287 = vector.extract_strided_slice %1281 {offsets = [0, 0], sizes = [10, 8], strides = [1, 1]} : vector<10x32xf32> to vector<10x8xf32>
    %1288 = vector.extract_strided_slice %1282 {offsets = [0, 0], sizes = [10, 8], strides = [1, 1]} : vector<10x32xf32> to vector<10x8xf32>
    %cst_556 = arith.constant dense<0.000000e+00> : vector<8x10xf32>
    %1289 = tpu.matmul %1286, %1287, %cst_556 {dimension_numbers = #tpu.dot_dimension_numbers<[1], [1], [0], [0], [0, 0, 1, 0], [], []>} : vector<8x8xf32>, vector<10x8xf32>, vector<8x10xf32> -> vector<8x10xf32>
    %cst_557 = arith.constant dense<0xFF800000> : vector<8xf32>
    %1290 = vector.multi_reduction <maximumf>, %1289, %cst_557 [1] : vector<8x10xf32> to vector<8xf32>
    %1291 = vector.shape_cast %1290 : vector<8xf32> to vector<8x1xf32>
    %1292 = vector.broadcast %1291 : vector<8x1xf32> to vector<8x10xf32>
    %1293 = arith.subf %1289, %1292 : vector<8x10xf32>
    %1294 = math.exp %1293 : vector<8x10xf32>
    %cst_558 = arith.constant dense<0.000000e+00> : vector<8xf32>
    %1295 = vector.multi_reduction <add>, %1294, %cst_558 [1] : vector<8x10xf32> to vector<8xf32>
    %1296 = vector.shape_cast %1295 : vector<8xf32> to vector<8x1xf32>
    %cst_559 = arith.constant dense<0.000000e+00> : vector<8x8xf32>
    %1297 = tpu.matmul %1294, %1288, %cst_559 {dimension_numbers = #tpu.dot_dimension_numbers<[1], [0], [0], [1], [0, 0, 1, 1], [], []>} : vector<8x10xf32>, vector<10x8xf32>, vector<8x8xf32> -> vector<8x8xf32>
    %1298 = tpu.reciprocal %1296 {approx = true} : vector<8x1xf32> -> vector<8x1xf32>
    %1299 = vector.broadcast %1298 : vector<8x1xf32> to vector<8x8xf32>
    %1300 = arith.mulf %1297, %1299 : vector<8x8xf32>
    %1301 = vector.extract_strided_slice %1268 {offsets = [0, 0], sizes = [8, 32], strides = [1, 1]} : vector<32x32xf32> to vector<8x32xf32>
    %cst_560 = arith.constant dense<0.000000e+00> : vector<8x32xf32>
    %1302 = tpu.matmul %1300, %1301, %cst_560 {dimension_numbers = #tpu.dot_dimension_numbers<[1], [0], [0], [1], [0, 0, 1, 1], [], []>} : vector<8x8xf32>, vector<8x32xf32>, vector<8x32xf32> -> vector<8x32xf32>
    %1303 = arith.addf %1283, %1302 : vector<8x32xf32>
    %1304 = vector.extract_strided_slice %1275 {offsets = [0, 8], sizes = [8, 8], strides = [1, 1]} : vector<8x32xf32> to vector<8x8xf32>
    %cst_561 = arith.constant 0.353553385 : f32
    %1305 = vector.broadcast %cst_561 : f32 to vector<8x8xf32>
    %1306 = arith.mulf %1304, %1305 : vector<8x8xf32>
    %1307 = vector.extract_strided_slice %1281 {offsets = [0, 8], sizes = [10, 8], strides = [1, 1]} : vector<10x32xf32> to vector<10x8xf32>
    %1308 = vector.extract_strided_slice %1282 {offsets = [0, 8], sizes = [10, 8], strides = [1, 1]} : vector<10x32xf32> to vector<10x8xf32>
    %cst_562 = arith.constant dense<0.000000e+00> : vector<8x10xf32>
    %1309 = tpu.matmul %1306, %1307, %cst_562 {dimension_numbers = #tpu.dot_dimension_numbers<[1], [1], [0], [0], [0, 0, 1, 0], [], []>} : vector<8x8xf32>, vector<10x8xf32>, vector<8x10xf32> -> vector<8x10xf32>
    %cst_563 = arith.constant dense<0xFF800000> : vector<8xf32>
    %1310 = vector.multi_reduction <maximumf>, %1309, %cst_563 [1] : vector<8x10xf32> to vector<8xf32>
    %1311 = vector.shape_cast %1310 : vector<8xf32> to vector<8x1xf32>
    %1312 = vector.broadcast %1311 : vector<8x1xf32> to vector<8x10xf32>
    %1313 = arith.subf %1309, %1312 : vector<8x10xf32>
    %1314 = math.exp %1313 : vector<8x10xf32>
    %cst_564 = arith.constant dense<0.000000e+00> : vector<8xf32>
    %1315 = vector.multi_reduction <add>, %1314, %cst_564 [1] : vector<8x10xf32> to vector<8xf32>
    %1316 = vector.shape_cast %1315 : vector<8xf32> to vector<8x1xf32>
    %cst_565 = arith.constant dense<0.000000e+00> : vector<8x8xf32>
    %1317 = tpu.matmul %1314, %1308, %cst_565 {dimension_numbers = #tpu.dot_dimension_numbers<[1], [0], [0], [1], [0, 0, 1, 1], [], []>} : vector<8x10xf32>, vector<10x8xf32>, vector<8x8xf32> -> vector<8x8xf32>
    %1318 = tpu.reciprocal %1316 {approx = true} : vector<8x1xf32> -> vector<8x1xf32>
    %1319 = vector.broadcast %1318 : vector<8x1xf32> to vector<8x8xf32>
    %1320 = arith.mulf %1317, %1319 : vector<8x8xf32>
    %1321 = vector.extract_strided_slice %1268 {offsets = [8, 0], sizes = [8, 32], strides = [1, 1]} : vector<32x32xf32> to vector<8x32xf32>
    %cst_566 = arith.constant dense<0.000000e+00> : vector<8x32xf32>
    %1322 = tpu.matmul %1320, %1321, %cst_566 {dimension_numbers = #tpu.dot_dimension_numbers<[1], [0], [0], [1], [0, 0, 1, 1], [], []>} : vector<8x8xf32>, vector<8x32xf32>, vector<8x32xf32> -> vector<8x32xf32>
    %1323 = arith.addf %1303, %1322 : vector<8x32xf32>
    %1324 = vector.extract_strided_slice %1275 {offsets = [0, 16], sizes = [8, 8], strides = [1, 1]} : vector<8x32xf32> to vector<8x8xf32>
    %cst_567 = arith.constant 0.353553385 : f32
    %1325 = vector.broadcast %cst_567 : f32 to vector<8x8xf32>
    %1326 = arith.mulf %1324, %1325 : vector<8x8xf32>
    %1327 = vector.extract_strided_slice %1281 {offsets = [0, 16], sizes = [10, 8], strides = [1, 1]} : vector<10x32xf32> to vector<10x8xf32>
    %1328 = vector.extract_strided_slice %1282 {offsets = [0, 16], sizes = [10, 8], strides = [1, 1]} : vector<10x32xf32> to vector<10x8xf32>
    %cst_568 = arith.constant dense<0.000000e+00> : vector<8x10xf32>
    %1329 = tpu.matmul %1326, %1327, %cst_568 {dimension_numbers = #tpu.dot_dimension_numbers<[1], [1], [0], [0], [0, 0, 1, 0], [], []>} : vector<8x8xf32>, vector<10x8xf32>, vector<8x10xf32> -> vector<8x10xf32>
    %cst_569 = arith.constant dense<0xFF800000> : vector<8xf32>
    %1330 = vector.multi_reduction <maximumf>, %1329, %cst_569 [1] : vector<8x10xf32> to vector<8xf32>
    %1331 = vector.shape_cast %1330 : vector<8xf32> to vector<8x1xf32>
    %1332 = vector.broadcast %1331 : vector<8x1xf32> to vector<8x10xf32>
    %1333 = arith.subf %1329, %1332 : vector<8x10xf32>
    %1334 = math.exp %1333 : vector<8x10xf32>
    %cst_570 = arith.constant dense<0.000000e+00> : vector<8xf32>
    %1335 = vector.multi_reduction <add>, %1334, %cst_570 [1] : vector<8x10xf32> to vector<8xf32>
    %1336 = vector.shape_cast %1335 : vector<8xf32> to vector<8x1xf32>
    %cst_571 = arith.constant dense<0.000000e+00> : vector<8x8xf32>
    %1337 = tpu.matmul %1334, %1328, %cst_571 {dimension_numbers = #tpu.dot_dimension_numbers<[1], [0], [0], [1], [0, 0, 1, 1], [], []>} : vector<8x10xf32>, vector<10x8xf32>, vector<8x8xf32> -> vector<8x8xf32>
    %1338 = tpu.reciprocal %1336 {approx = true} : vector<8x1xf32> -> vector<8x1xf32>
    %1339 = vector.broadcast %1338 : vector<8x1xf32> to vector<8x8xf32>
    %1340 = arith.mulf %1337, %1339 : vector<8x8xf32>
    %1341 = vector.extract_strided_slice %1268 {offsets = [16, 0], sizes = [8, 32], strides = [1, 1]} : vector<32x32xf32> to vector<8x32xf32>
    %cst_572 = arith.constant dense<0.000000e+00> : vector<8x32xf32>
    %1342 = tpu.matmul %1340, %1341, %cst_572 {dimension_numbers = #tpu.dot_dimension_numbers<[1], [0], [0], [1], [0, 0, 1, 1], [], []>} : vector<8x8xf32>, vector<8x32xf32>, vector<8x32xf32> -> vector<8x32xf32>
    %1343 = arith.addf %1323, %1342 : vector<8x32xf32>
    %1344 = vector.extract_strided_slice %1275 {offsets = [0, 24], sizes = [8, 8], strides = [1, 1]} : vector<8x32xf32> to vector<8x8xf32>
    %cst_573 = arith.constant 0.353553385 : f32
    %1345 = vector.broadcast %cst_573 : f32 to vector<8x8xf32>
    %1346 = arith.mulf %1344, %1345 : vector<8x8xf32>
    %1347 = vector.extract_strided_slice %1281 {offsets = [0, 24], sizes = [10, 8], strides = [1, 1]} : vector<10x32xf32> to vector<10x8xf32>
    %1348 = vector.extract_strided_slice %1282 {offsets = [0, 24], sizes = [10, 8], strides = [1, 1]} : vector<10x32xf32> to vector<10x8xf32>
    %cst_574 = arith.constant dense<0.000000e+00> : vector<8x10xf32>
    %1349 = tpu.matmul %1346, %1347, %cst_574 {dimension_numbers = #tpu.dot_dimension_numbers<[1], [1], [0], [0], [0, 0, 1, 0], [], []>} : vector<8x8xf32>, vector<10x8xf32>, vector<8x10xf32> -> vector<8x10xf32>
    %cst_575 = arith.constant dense<0xFF800000> : vector<8xf32>
    %1350 = vector.multi_reduction <maximumf>, %1349, %cst_575 [1] : vector<8x10xf32> to vector<8xf32>
    %1351 = vector.shape_cast %1350 : vector<8xf32> to vector<8x1xf32>
    %1352 = vector.broadcast %1351 : vector<8x1xf32> to vector<8x10xf32>
    %1353 = arith.subf %1349, %1352 : vector<8x10xf32>
    %1354 = math.exp %1353 : vector<8x10xf32>
    %cst_576 = arith.constant dense<0.000000e+00> : vector<8xf32>
    %1355 = vector.multi_reduction <add>, %1354, %cst_576 [1] : vector<8x10xf32> to vector<8xf32>
    %1356 = vector.shape_cast %1355 : vector<8xf32> to vector<8x1xf32>
    %cst_577 = arith.constant dense<0.000000e+00> : vector<8x8xf32>
    %1357 = tpu.matmul %1354, %1348, %cst_577 {dimension_numbers = #tpu.dot_dimension_numbers<[1], [0], [0], [1], [0, 0, 1, 1], [], []>} : vector<8x10xf32>, vector<10x8xf32>, vector<8x8xf32> -> vector<8x8xf32>
    %1358 = tpu.reciprocal %1356 {approx = true} : vector<8x1xf32> -> vector<8x1xf32>
    %1359 = vector.broadcast %1358 : vector<8x1xf32> to vector<8x8xf32>
    %1360 = arith.mulf %1357, %1359 : vector<8x8xf32>
    %1361 = vector.extract_strided_slice %1268 {offsets = [24, 0], sizes = [8, 32], strides = [1, 1]} : vector<32x32xf32> to vector<8x32xf32>
    %cst_578 = arith.constant dense<0.000000e+00> : vector<8x32xf32>
    %1362 = tpu.matmul %1360, %1361, %cst_578 {dimension_numbers = #tpu.dot_dimension_numbers<[1], [0], [0], [1], [0, 0, 1, 1], [], []>} : vector<8x8xf32>, vector<8x32xf32>, vector<8x32xf32> -> vector<8x32xf32>
    %1363 = arith.addf %1343, %1362 : vector<8x32xf32>
    %1364 = vector.broadcast %1270 : vector<1x32xf32> to vector<8x32xf32>
    %1365 = arith.addf %1363, %1364 : vector<8x32xf32>
    %1366 = arith.addf %1262, %1365 : vector<8x32xf32>
    %c2_579 = arith.constant 2 : index
    %c0_580 = arith.constant 0 : index
    %c0_581 = arith.constant 0 : index
    %1367 = vector.load %arg32[%c2_579, %c0_580, %c0_581] : memref<3x1x32xf32, #tpu.memory_space<vmem>>, vector<1x1x32xf32>
    %1368 = vector.shape_cast %1367 : vector<1x1x32xf32> to vector<1x32xf32>
    %c2_582 = arith.constant 2 : index
    %c0_583 = arith.constant 0 : index
    %c0_584 = arith.constant 0 : index
    %1369 = vector.load %arg33[%c2_582, %c0_583, %c0_584] : memref<3x1x32xf32, #tpu.memory_space<vmem>>, vector<1x1x32xf32>
    %1370 = vector.shape_cast %1369 : vector<1x1x32xf32> to vector<1x32xf32>
    %cst_585 = arith.constant dense<0.000000e+00> : vector<8xf32>
    %1371 = vector.multi_reduction <add>, %1366, %cst_585 [1] : vector<8x32xf32> to vector<8xf32>
    %1372 = vector.shape_cast %1371 : vector<8xf32> to vector<8x1xf32>
    %cst_586 = arith.constant 3.200000e+01 : f32
    %1373 = vector.broadcast %cst_586 : f32 to vector<8x1xf32>
    %1374 = arith.divf %1372, %1373 : vector<8x1xf32>
    %1375 = vector.broadcast %1374 : vector<8x1xf32> to vector<8x32xf32>
    %1376 = arith.subf %1366, %1375 : vector<8x32xf32>
    %1377 = arith.mulf %1376, %1376 : vector<8x32xf32>
    %cst_587 = arith.constant dense<0.000000e+00> : vector<8xf32>
    %1378 = vector.multi_reduction <add>, %1377, %cst_587 [1] : vector<8x32xf32> to vector<8xf32>
    %1379 = vector.shape_cast %1378 : vector<8xf32> to vector<8x1xf32>
    %cst_588 = arith.constant 3.200000e+01 : f32
    %1380 = vector.broadcast %cst_588 : f32 to vector<8x1xf32>
    %1381 = arith.divf %1379, %1380 : vector<8x1xf32>
    %cst_589 = arith.constant 9.99999974E-6 : f32
    %1382 = vector.broadcast %cst_589 : f32 to vector<8x1xf32>
    %1383 = arith.addf %1381, %1382 : vector<8x1xf32>
    %1384 = math.rsqrt %1383 : vector<8x1xf32>
    %1385 = vector.broadcast %1384 : vector<8x1xf32> to vector<8x32xf32>
    %1386 = arith.mulf %1376, %1385 : vector<8x32xf32>
    %1387 = vector.broadcast %1368 : vector<1x32xf32> to vector<8x32xf32>
    %1388 = arith.mulf %1386, %1387 : vector<8x32xf32>
    %1389 = vector.broadcast %1370 : vector<1x32xf32> to vector<8x32xf32>
    %1390 = arith.addf %1388, %1389 : vector<8x32xf32>
    %c2_590 = arith.constant 2 : index
    %c0_591 = arith.constant 0 : index
    %c0_592 = arith.constant 0 : index
    %1391 = vector.load %arg26[%c2_590, %c0_591, %c0_592] : memref<3x32x96xf32, #tpu.memory_space<vmem>>, vector<1x32x96xf32>
    %1392 = vector.shape_cast %1391 : vector<1x32x96xf32> to vector<32x96xf32>
    %c2_593 = arith.constant 2 : index
    %c0_594 = arith.constant 0 : index
    %c0_595 = arith.constant 0 : index
    %1393 = vector.load %arg27[%c2_593, %c0_594, %c0_595] : memref<3x1x96xf32, #tpu.memory_space<vmem>>, vector<1x1x96xf32>
    %1394 = vector.shape_cast %1393 : vector<1x1x96xf32> to vector<1x96xf32>
    %c2_596 = arith.constant 2 : index
    %c0_597 = arith.constant 0 : index
    %c0_598 = arith.constant 0 : index
    %1395 = vector.load %arg28[%c2_596, %c0_597, %c0_598] : memref<3x96x32xf32, #tpu.memory_space<vmem>>, vector<1x96x32xf32>
    %1396 = vector.shape_cast %1395 : vector<1x96x32xf32> to vector<96x32xf32>
    %c2_599 = arith.constant 2 : index
    %c0_600 = arith.constant 0 : index
    %c0_601 = arith.constant 0 : index
    %1397 = vector.load %arg29[%c2_599, %c0_600, %c0_601] : memref<3x1x32xf32, #tpu.memory_space<vmem>>, vector<1x1x32xf32>
    %1398 = vector.shape_cast %1397 : vector<1x1x32xf32> to vector<1x32xf32>
    %cst_602 = arith.constant dense<0.000000e+00> : vector<8x96xf32>
    %1399 = tpu.matmul %1390, %1392, %cst_602 {dimension_numbers = #tpu.dot_dimension_numbers<[1], [0], [0], [1], [0, 0, 1, 1], [], []>} : vector<8x32xf32>, vector<32x96xf32>, vector<8x96xf32> -> vector<8x96xf32>
    %1400 = vector.broadcast %1394 : vector<1x96xf32> to vector<8x96xf32>
    %1401 = arith.addf %1399, %1400 : vector<8x96xf32>
    %cst_603 = arith.constant 0.000000e+00 : f32
    %1402 = vector.broadcast %cst_603 : f32 to vector<8x96xf32>
    %1403 = arith.maximumf %1401, %1402 : vector<8x96xf32>
    %cst_604 = arith.constant dense<0.000000e+00> : vector<8x32xf32>
    %1404 = tpu.matmul %1403, %1396, %cst_604 {dimension_numbers = #tpu.dot_dimension_numbers<[1], [0], [0], [1], [0, 0, 1, 1], [], []>} : vector<8x96xf32>, vector<96x32xf32>, vector<8x32xf32> -> vector<8x32xf32>
    %1405 = vector.broadcast %1398 : vector<1x32xf32> to vector<8x32xf32>
    %1406 = arith.addf %1404, %1405 : vector<8x32xf32>
    %1407 = arith.addf %1390, %1406 : vector<8x32xf32>
    %c2_605 = arith.constant 2 : index
    %c0_606 = arith.constant 0 : index
    %c0_607 = arith.constant 0 : index
    %1408 = vector.load %arg34[%c2_605, %c0_606, %c0_607] : memref<3x1x32xf32, #tpu.memory_space<vmem>>, vector<1x1x32xf32>
    %1409 = vector.shape_cast %1408 : vector<1x1x32xf32> to vector<1x32xf32>
    %c2_608 = arith.constant 2 : index
    %c0_609 = arith.constant 0 : index
    %c0_610 = arith.constant 0 : index
    %1410 = vector.load %arg35[%c2_608, %c0_609, %c0_610] : memref<3x1x32xf32, #tpu.memory_space<vmem>>, vector<1x1x32xf32>
    %1411 = vector.shape_cast %1410 : vector<1x1x32xf32> to vector<1x32xf32>
    %cst_611 = arith.constant dense<0.000000e+00> : vector<8xf32>
    %1412 = vector.multi_reduction <add>, %1407, %cst_611 [1] : vector<8x32xf32> to vector<8xf32>
    %1413 = vector.shape_cast %1412 : vector<8xf32> to vector<8x1xf32>
    %cst_612 = arith.constant 3.200000e+01 : f32
    %1414 = vector.broadcast %cst_612 : f32 to vector<8x1xf32>
    %1415 = arith.divf %1413, %1414 : vector<8x1xf32>
    %1416 = vector.broadcast %1415 : vector<8x1xf32> to vector<8x32xf32>
    %1417 = arith.subf %1407, %1416 : vector<8x32xf32>
    %1418 = arith.mulf %1417, %1417 : vector<8x32xf32>
    %cst_613 = arith.constant dense<0.000000e+00> : vector<8xf32>
    %1419 = vector.multi_reduction <add>, %1418, %cst_613 [1] : vector<8x32xf32> to vector<8xf32>
    %1420 = vector.shape_cast %1419 : vector<8xf32> to vector<8x1xf32>
    %cst_614 = arith.constant 3.200000e+01 : f32
    %1421 = vector.broadcast %cst_614 : f32 to vector<8x1xf32>
    %1422 = arith.divf %1420, %1421 : vector<8x1xf32>
    %cst_615 = arith.constant 9.99999974E-6 : f32
    %1423 = vector.broadcast %cst_615 : f32 to vector<8x1xf32>
    %1424 = arith.addf %1422, %1423 : vector<8x1xf32>
    %1425 = math.rsqrt %1424 : vector<8x1xf32>
    %1426 = vector.broadcast %1425 : vector<8x1xf32> to vector<8x32xf32>
    %1427 = arith.mulf %1417, %1426 : vector<8x32xf32>
    %1428 = vector.broadcast %1409 : vector<1x32xf32> to vector<8x32xf32>
    %1429 = arith.mulf %1427, %1428 : vector<8x32xf32>
    %1430 = vector.broadcast %1411 : vector<1x32xf32> to vector<8x32xf32>
    %1431 = arith.addf %1429, %1430 : vector<8x32xf32>
    %c0_616 = arith.constant 0 : index
    %c0_617 = arith.constant 0 : index
    %1432 = vector.load %arg36[%c0_616, %c0_617] : memref<1x32xf32, #tpu.memory_space<vmem>>, vector<1x32xf32>
    %c0_618 = arith.constant 0 : index
    %c0_619 = arith.constant 0 : index
    %1433 = vector.load %arg37[%c0_618, %c0_619] : memref<1x32xf32, #tpu.memory_space<vmem>>, vector<1x32xf32>
    %cst_620 = arith.constant dense<0.000000e+00> : vector<8xf32>
    %1434 = vector.multi_reduction <add>, %1431, %cst_620 [1] : vector<8x32xf32> to vector<8xf32>
    %1435 = vector.shape_cast %1434 : vector<8xf32> to vector<8x1xf32>
    %cst_621 = arith.constant 3.200000e+01 : f32
    %1436 = vector.broadcast %cst_621 : f32 to vector<8x1xf32>
    %1437 = arith.divf %1435, %1436 : vector<8x1xf32>
    %1438 = vector.broadcast %1437 : vector<8x1xf32> to vector<8x32xf32>
    %1439 = arith.subf %1431, %1438 : vector<8x32xf32>
    %1440 = arith.mulf %1439, %1439 : vector<8x32xf32>
    %cst_622 = arith.constant dense<0.000000e+00> : vector<8xf32>
    %1441 = vector.multi_reduction <add>, %1440, %cst_622 [1] : vector<8x32xf32> to vector<8xf32>
    %1442 = vector.shape_cast %1441 : vector<8xf32> to vector<8x1xf32>
    %cst_623 = arith.constant 3.200000e+01 : f32
    %1443 = vector.broadcast %cst_623 : f32 to vector<8x1xf32>
    %1444 = arith.divf %1442, %1443 : vector<8x1xf32>
    %cst_624 = arith.constant 9.99999974E-6 : f32
    %1445 = vector.broadcast %cst_624 : f32 to vector<8x1xf32>
    %1446 = arith.addf %1444, %1445 : vector<8x1xf32>
    %1447 = math.rsqrt %1446 : vector<8x1xf32>
    %1448 = vector.broadcast %1447 : vector<8x1xf32> to vector<8x32xf32>
    %1449 = arith.mulf %1439, %1448 : vector<8x32xf32>
    %1450 = vector.broadcast %1432 : vector<1x32xf32> to vector<8x32xf32>
    %1451 = arith.mulf %1449, %1450 : vector<8x32xf32>
    %1452 = vector.broadcast %1433 : vector<1x32xf32> to vector<8x32xf32>
    %1453 = arith.addf %1451, %1452 : vector<8x32xf32>
    %c0_625 = arith.constant 0 : index
    %c0_626 = arith.constant 0 : index
    %1454 = vector.load %arg38[%c0_625, %c0_626] : memref<32x128xf32, #tpu.memory_space<vmem>>, vector<32x128xf32>
    %cst_627 = arith.constant dense<0.000000e+00> : vector<8x128xf32>
    %1455 = tpu.matmul %1453, %1454, %cst_627 {dimension_numbers = #tpu.dot_dimension_numbers<[1], [0], [0], [1], [0, 0, 1, 1], [], []>} : vector<8x32xf32>, vector<32x128xf32>, vector<8x128xf32> -> vector<8x128xf32>
    %c0_628 = arith.constant 0 : index
    %c0_629 = arith.constant 0 : index
    %1456 = vector.load %arg39[%c0_628, %c0_629] : memref<1x128xf32, #tpu.memory_space<vmem>>, vector<1x128xf32>
    %1457 = vector.broadcast %1456 : vector<1x128xf32> to vector<8x128xf32>
    %1458 = arith.addf %1455, %1457 : vector<8x128xf32>
    %c0_630 = arith.constant 0 : index
    %c0_631 = arith.constant 0 : index
    %c0_632 = arith.constant 0 : index
    %1459 = vector.load %arg40[%c0_630, %c0_631, %c0_632] : memref<1x8x128xf32, #tpu.memory_space<vmem>>, vector<1x8x128xf32>
    %1460 = vector.shape_cast %1459 : vector<1x8x128xf32> to vector<8x128xf32>
    %1461 = vector.shape_cast %1458 : vector<8x128xf32> to vector<1x8x128xf32>
    tpu.vector_store %arg40[%c0_630, %c0_631, %c0_632], %1461 {strides = array<i32>} : memref<1x8x128xf32, #tpu.memory_space<vmem>>, vector<1x8x128xf32>,
    return
  }
  func.func @transform_0(%arg0: i32) -> (i32, i32, i32) {
    %c0_i32 = arith.constant 0 : i32
    %c0_i32_0 = arith.constant 0 : i32
    %c0_i32_1 = arith.constant 0 : i32
    return %arg0, %c0_i32, %c0_i32_0 : i32, i32, i32
  }
  func.func @transform_1(%arg0: i32) -> (i32, i32, i32) {
    %c0_i32 = arith.constant 0 : i32
    %c0_i32_0 = arith.constant 0 : i32
    %c0_i32_1 = arith.constant 0 : i32
    return %arg0, %c0_i32, %c0_i32_0 : i32, i32, i32
  }
  func.func @transform_2(%arg0: i32) -> (i32, i32, i32) {
    %c0_i32 = arith.constant 0 : i32
    %c0_i32_0 = arith.constant 0 : i32
    %c0_i32_1 = arith.constant 0 : i32
    return %arg0, %c0_i32, %c0_i32_0 : i32, i32, i32
  }
  func.func @transform_3(%arg0: i32) -> (i32, i32, i32) {
    %c0_i32 = arith.constant 0 : i32
    %c0_i32_0 = arith.constant 0 : i32
    %c0_i32_1 = arith.constant 0 : i32
    %c0_i32_2 = arith.constant 0 : i32
    return %c0_i32, %c0_i32_0, %c0_i32_1 : i32, i32, i32
  }
  func.func @transform_4(%arg0: i32) -> (i32, i32, i32) {
    %c0_i32 = arith.constant 0 : i32
    %c0_i32_0 = arith.constant 0 : i32
    %c0_i32_1 = arith.constant 0 : i32
    %c0_i32_2 = arith.constant 0 : i32
    return %c0_i32, %c0_i32_0, %c0_i32_1 : i32, i32, i32
  }
  func.func @transform_5(%arg0: i32) -> (i32, i32, i32) {
    %c0_i32 = arith.constant 0 : i32
    %c0_i32_0 = arith.constant 0 : i32
    %c0_i32_1 = arith.constant 0 : i32
    %c0_i32_2 = arith.constant 0 : i32
    return %c0_i32, %c0_i32_0, %c0_i32_1 : i32, i32, i32
  }
  func.func @transform_6(%arg0: i32) -> (i32, i32, i32) {
    %c0_i32 = arith.constant 0 : i32
    %c0_i32_0 = arith.constant 0 : i32
    %c0_i32_1 = arith.constant 0 : i32
    %c0_i32_2 = arith.constant 0 : i32
    return %c0_i32, %c0_i32_0, %c0_i32_1 : i32, i32, i32
  }
  func.func @transform_7(%arg0: i32) -> (i32, i32, i32) {
    %c0_i32 = arith.constant 0 : i32
    %c0_i32_0 = arith.constant 0 : i32
    %c0_i32_1 = arith.constant 0 : i32
    %c0_i32_2 = arith.constant 0 : i32
    return %c0_i32, %c0_i32_0, %c0_i32_1 : i32, i32, i32
  }
  func.func @transform_8(%arg0: i32) -> (i32, i32, i32) {
    %c0_i32 = arith.constant 0 : i32
    %c0_i32_0 = arith.constant 0 : i32
    %c0_i32_1 = arith.constant 0 : i32
    %c0_i32_2 = arith.constant 0 : i32
    return %c0_i32, %c0_i32_0, %c0_i32_1 : i32, i32, i32
  }
  func.func @transform_9(%arg0: i32) -> (i32, i32, i32) {
    %c0_i32 = arith.constant 0 : i32
    %c0_i32_0 = arith.constant 0 : i32
    %c0_i32_1 = arith.constant 0 : i32
    %c0_i32_2 = arith.constant 0 : i32
    return %c0_i32, %c0_i32_0, %c0_i32_1 : i32, i32, i32
  }
  func.func @transform_10(%arg0: i32) -> (i32, i32, i32) {
    %c0_i32 = arith.constant 0 : i32
    %c0_i32_0 = arith.constant 0 : i32
    %c0_i32_1 = arith.constant 0 : i32
    %c0_i32_2 = arith.constant 0 : i32
    return %c0_i32, %c0_i32_0, %c0_i32_1 : i32, i32, i32
  }
  func.func @transform_11(%arg0: i32) -> (i32, i32, i32) {
    %c0_i32 = arith.constant 0 : i32
    %c0_i32_0 = arith.constant 0 : i32
    %c0_i32_1 = arith.constant 0 : i32
    %c0_i32_2 = arith.constant 0 : i32
    return %c0_i32, %c0_i32_0, %c0_i32_1 : i32, i32, i32
  }
  func.func @transform_12(%arg0: i32) -> (i32, i32, i32) {
    %c0_i32 = arith.constant 0 : i32
    %c0_i32_0 = arith.constant 0 : i32
    %c0_i32_1 = arith.constant 0 : i32
    %c0_i32_2 = arith.constant 0 : i32
    return %c0_i32, %c0_i32_0, %c0_i32_1 : i32, i32, i32
  }
  func.func @transform_13(%arg0: i32) -> (i32, i32, i32) {
    %c0_i32 = arith.constant 0 : i32
    %c0_i32_0 = arith.constant 0 : i32
    %c0_i32_1 = arith.constant 0 : i32
    %c0_i32_2 = arith.constant 0 : i32
    return %c0_i32, %c0_i32_0, %c0_i32_1 : i32, i32, i32
  }
  func.func @transform_14(%arg0: i32) -> (i32, i32, i32) {
    %c0_i32 = arith.constant 0 : i32
    %c0_i32_0 = arith.constant 0 : i32
    %c0_i32_1 = arith.constant 0 : i32
    %c0_i32_2 = arith.constant 0 : i32
    return %c0_i32, %c0_i32_0, %c0_i32_1 : i32, i32, i32
  }
  func.func @transform_15(%arg0: i32) -> (i32, i32) {
    %c0_i32 = arith.constant 0 : i32
    %c0_i32_0 = arith.constant 0 : i32
    %c0_i32_1 = arith.constant 0 : i32
    return %c0_i32, %c0_i32_0 : i32, i32
  }
  func.func @transform_16(%arg0: i32) -> (i32, i32) {
    %c0_i32 = arith.constant 0 : i32
    %c0_i32_0 = arith.constant 0 : i32
    %c0_i32_1 = arith.constant 0 : i32
    return %c0_i32, %c0_i32_0 : i32, i32
  }
  func.func @transform_17(%arg0: i32) -> (i32, i32, i32) {
    %c0_i32 = arith.constant 0 : i32
    %c0_i32_0 = arith.constant 0 : i32
    %c0_i32_1 = arith.constant 0 : i32
    %c0_i32_2 = arith.constant 0 : i32
    return %c0_i32, %c0_i32_0, %c0_i32_1 : i32, i32, i32
  }
  func.func @transform_18(%arg0: i32) -> (i32, i32, i32) {
    %c0_i32 = arith.constant 0 : i32
    %c0_i32_0 = arith.constant 0 : i32
    %c0_i32_1 = arith.constant 0 : i32
    %c0_i32_2 = arith.constant 0 : i32
    return %c0_i32, %c0_i32_0, %c0_i32_1 : i32, i32, i32
  }
  func.func @transform_19(%arg0: i32) -> (i32, i32, i32) {
    %c0_i32 = arith.constant 0 : i32
    %c0_i32_0 = arith.constant 0 : i32
    %c0_i32_1 = arith.constant 0 : i32
    %c0_i32_2 = arith.constant 0 : i32
    return %c0_i32, %c0_i32_0, %c0_i32_1 : i32, i32, i32
  }
  func.func @transform_20(%arg0: i32) -> (i32, i32, i32) {
    %c0_i32 = arith.constant 0 : i32
    %c0_i32_0 = arith.constant 0 : i32
    %c0_i32_1 = arith.constant 0 : i32
    %c0_i32_2 = arith.constant 0 : i32
    return %c0_i32, %c0_i32_0, %c0_i32_1 : i32, i32, i32
  }
  func.func @transform_21(%arg0: i32) -> (i32, i32, i32) {
    %c0_i32 = arith.constant 0 : i32
    %c0_i32_0 = arith.constant 0 : i32
    %c0_i32_1 = arith.constant 0 : i32
    %c0_i32_2 = arith.constant 0 : i32
    return %c0_i32, %c0_i32_0, %c0_i32_1 : i32, i32, i32
  }
  func.func @transform_22(%arg0: i32) -> (i32, i32, i32) {
    %c0_i32 = arith.constant 0 : i32
    %c0_i32_0 = arith.constant 0 : i32
    %c0_i32_1 = arith.constant 0 : i32
    %c0_i32_2 = arith.constant 0 : i32
    return %c0_i32, %c0_i32_0, %c0_i32_1 : i32, i32, i32
  }
  func.func @transform_23(%arg0: i32) -> (i32, i32, i32) {
    %c0_i32 = arith.constant 0 : i32
    %c0_i32_0 = arith.constant 0 : i32
    %c0_i32_1 = arith.constant 0 : i32
    %c0_i32_2 = arith.constant 0 : i32
    return %c0_i32, %c0_i32_0, %c0_i32_1 : i32, i32, i32
  }
  func.func @transform_24(%arg0: i32) -> (i32, i32, i32) {
    %c0_i32 = arith.constant 0 : i32
    %c0_i32_0 = arith.constant 0 : i32
    %c0_i32_1 = arith.constant 0 : i32
    %c0_i32_2 = arith.constant 0 : i32
    return %c0_i32, %c0_i32_0, %c0_i32_1 : i32, i32, i32
  }
  func.func @transform_25(%arg0: i32) -> (i32, i32, i32) {
    %c0_i32 = arith.constant 0 : i32
    %c0_i32_0 = arith.constant 0 : i32
    %c0_i32_1 = arith.constant 0 : i32
    %c0_i32_2 = arith.constant 0 : i32
    return %c0_i32, %c0_i32_0, %c0_i32_1 : i32, i32, i32
  }
  func.func @transform_26(%arg0: i32) -> (i32, i32, i32) {
    %c0_i32 = arith.constant 0 : i32
    %c0_i32_0 = arith.constant 0 : i32
    %c0_i32_1 = arith.constant 0 : i32
    %c0_i32_2 = arith.constant 0 : i32
    return %c0_i32, %c0_i32_0, %c0_i32_1 : i32, i32, i32
  }
  func.func @transform_27(%arg0: i32) -> (i32, i32, i32) {
    %c0_i32 = arith.constant 0 : i32
    %c0_i32_0 = arith.constant 0 : i32
    %c0_i32_1 = arith.constant 0 : i32
    %c0_i32_2 = arith.constant 0 : i32
    return %c0_i32, %c0_i32_0, %c0_i32_1 : i32, i32, i32
  }
  func.func @transform_28(%arg0: i32) -> (i32, i32, i32) {
    %c0_i32 = arith.constant 0 : i32
    %c0_i32_0 = arith.constant 0 : i32
    %c0_i32_1 = arith.constant 0 : i32
    %c0_i32_2 = arith.constant 0 : i32
    return %c0_i32, %c0_i32_0, %c0_i32_1 : i32, i32, i32
  }
  func.func @transform_29(%arg0: i32) -> (i32, i32, i32) {
    %c0_i32 = arith.constant 0 : i32
    %c0_i32_0 = arith.constant 0 : i32
    %c0_i32_1 = arith.constant 0 : i32
    %c0_i32_2 = arith.constant 0 : i32
    return %c0_i32, %c0_i32_0, %c0_i32_1 : i32, i32, i32
  }
  func.func @transform_30(%arg0: i32) -> (i32, i32, i32) {
    %c0_i32 = arith.constant 0 : i32
    %c0_i32_0 = arith.constant 0 : i32
    %c0_i32_1 = arith.constant 0 : i32
    %c0_i32_2 = arith.constant 0 : i32
    return %c0_i32, %c0_i32_0, %c0_i32_1 : i32, i32, i32
  }
  func.func @transform_31(%arg0: i32) -> (i32, i32, i32) {
    %c0_i32 = arith.constant 0 : i32
    %c0_i32_0 = arith.constant 0 : i32
    %c0_i32_1 = arith.constant 0 : i32
    %c0_i32_2 = arith.constant 0 : i32
    return %c0_i32, %c0_i32_0, %c0_i32_1 : i32, i32, i32
  }
  func.func @transform_32(%arg0: i32) -> (i32, i32, i32) {
    %c0_i32 = arith.constant 0 : i32
    %c0_i32_0 = arith.constant 0 : i32
    %c0_i32_1 = arith.constant 0 : i32
    %c0_i32_2 = arith.constant 0 : i32
    return %c0_i32, %c0_i32_0, %c0_i32_1 : i32, i32, i32
  }
  func.func @transform_33(%arg0: i32) -> (i32, i32, i32) {
    %c0_i32 = arith.constant 0 : i32
    %c0_i32_0 = arith.constant 0 : i32
    %c0_i32_1 = arith.constant 0 : i32
    %c0_i32_2 = arith.constant 0 : i32
    return %c0_i32, %c0_i32_0, %c0_i32_1 : i32, i32, i32
  }
  func.func @transform_34(%arg0: i32) -> (i32, i32, i32) {
    %c0_i32 = arith.constant 0 : i32
    %c0_i32_0 = arith.constant 0 : i32
    %c0_i32_1 = arith.constant 0 : i32
    %c0_i32_2 = arith.constant 0 : i32
    return %c0_i32, %c0_i32_0, %c0_i32_1 : i32, i32, i32
  }
  func.func @transform_35(%arg0: i32) -> (i32, i32) {
    %c0_i32 = arith.constant 0 : i32
    %c0_i32_0 = arith.constant 0 : i32
    %c0_i32_1 = arith.constant 0 : i32
    return %c0_i32, %c0_i32_0 : i32, i32
  }
  func.func @transform_36(%arg0: i32) -> (i32, i32) {
    %c0_i32 = arith.constant 0 : i32
    %c0_i32_0 = arith.constant 0 : i32
    %c0_i32_1 = arith.constant 0 : i32
    return %c0_i32, %c0_i32_0 : i32, i32
  }
  func.func @transform_37(%arg0: i32) -> (i32, i32) {
    %c0_i32 = arith.constant 0 : i32
    %c0_i32_0 = arith.constant 0 : i32
    %c0_i32_1 = arith.constant 0 : i32
    return %c0_i32, %c0_i32_0 : i32, i32
  }
  func.func @transform_38(%arg0: i32) -> (i32, i32) {
    %c0_i32 = arith.constant 0 : i32
    %c0_i32_0 = arith.constant 0 : i32
    %c0_i32_1 = arith.constant 0 : i32
    return %c0_i32, %c0_i32_0 : i32, i32
  }
  func.func @transform_39(%arg0: i32) -> (i32, i32, i32) {
    %c0_i32 = arith.constant 0 : i32
    %c0_i32_0 = arith.constant 0 : i32
    %c0_i32_1 = arith.constant 0 : i32
    return %arg0, %c0_i32, %c0_i32_0 : i32, i32, i32
  }
}

</mosaic_0001>

<bundles_post_ra>
// kernel: _lambda_.1
= control target key start
LH: loop header
LB: loop body
LE: loop exit
PB: predicated region body
PF: predicated region fallthrough
CT: control target
= control target key end

     0   :  { %s15920_s6 = smov 1   ;;  %s15921_s10 = smov 2   ;;  %s17731_s0 = inlined_call_operand.smem [shape: u32[40], index: -1, kind: input, shape index: {}] }
   0x1   :  { %s15980_s5 = sld [smem:[%s17731_s0]]   ;;  %s15922_s14 = smov 3  }
   0x2   :  { %s15985_s9 = sld [smem:[%s17731_s0 + %s15920_s6]]   ;;  %s15923_s18 = smov 4  }
   0x3   :  { %s15990_s13 = sld [smem:[%s17731_s0 + %s15921_s10]]   ;;  %s15924_s22 = smov 5  }
   0x4   :  { %s15995_s17 = sld [smem:[%s17731_s0 + %s15922_s14]]   ;;  %s15925_s26 = smov 6  }
   0x5   :  { %s16000_s21 = sld [smem:[%s17731_s0 + %s15923_s18]]   ;;  %s15926_s30 = smov 7  }
   0x6   :  { %s16005_s25 = sld [smem:[%s17731_s0 + %s15924_s22]]   ;;  %s15927_s4 = smov 8  }
   0x7   :  { %17787 = sst [smem:[#allocation2_spill]] %s15980_s5  ;;  %s15928_s10 = smov 9  }
   0x8   :  { %17788 = sst [smem:[#allocation3_spill]] %s15985_s9  ;;  %s15929_s15 = smov 10  }
   0x9   :  { %17789 = sst [smem:[#allocation4_spill]] %s15990_s13  ;;  %s15930_s20 = smov 11  }
   0xa   :  { %17790 = sst [smem:[#allocation5_spill]] %s15995_s17  ;;  %s15932_s1 = smov 13  }
   0xb   :  { %17791 = sst [smem:[#allocation6_spill]] %s16000_s21  ;;  %s15933_s7 = smov 14  }
   0xc   :  { %17792 = sst [smem:[#allocation7_spill]] %s16005_s25  ;;  %s15935_s22 = smov 16  }
   0xd   :  { %s16010_s29 = sld [smem:[%s17731_s0 + %s15925_s26]]   ;;  %s15931_s26 = smov 12  }
   0xe   :  { %s16015_s3 = sld [smem:[%s17731_s0 + %s15926_s30]]   ;;  %s15936_s28 = smov 17  }
   0xf   :  { %s16020_s8 = sld [smem:[%s17731_s0 + %s15927_s4]]  }
  0x10   :  { %s16025_s14 = sld [smem:[%s17731_s0 + %s15928_s10]]  }
  0x11   :  { %s16030_s19 = sld [smem:[%s17731_s0 + %s15929_s15]]   ;;  %s15934_s15 = smov 15  }
  0x12   :  { %s16035_s24 = sld [smem:[%s17731_s0 + %s15930_s20]]  }
  0x13   :  { %17793 = sst [smem:[#allocation8_spill]] %s16010_s29 }
  0x14   :  { %17794 = sst [smem:[#allocation9_spill]] %s16015_s3 }
  0x15   :  { %17795 = sst [smem:[#allocation10_spill]] %s16020_s8 }
  0x16   :  { %17796 = sst [smem:[#allocation11_spill]] %s16025_s14 }
  0x17   :  { %17797 = sst [smem:[#allocation12_spill]] %s16030_s19 }
  0x18   :  { %17798 = sst [smem:[#allocation13_spill]] %s16035_s24 }
  0x19   :  { %s16040_s30 = sld [smem:[%s17731_s0 + %s15931_s26]]  }
  0x1a   :  { %s16045_s6 = sld [smem:[%s17731_s0 + %s15932_s1]]  }
  0x1b   :  { %s16050_s12 = sld [smem:[%s17731_s0 + %s15933_s7]]   ;;  %s15937_s7 = smov 18  }
  0x1c   :  { %s16055_s20 = sld [smem:[%s17731_s0 + %s15934_s15]]   ;;  %s15938_s15 = smov 19  }
  0x1d   :  { %s16060_s27 = sld [smem:[%s17731_s0 + %s15935_s22]]   ;;  %s15939_s22 = smov 20  }
  0x1e   :  { %s16065_s4 = sld [smem:[%s17731_s0 + %s15936_s28]]   ;;  %s15940_s28 = smov 21  }
  0x1f   :  { %17799 = sst [smem:[#allocation14_spill]] %s16040_s30 }
  0x20   :  { %17800 = sst [smem:[#allocation15_spill]] %s16045_s6 }
  0x21   :  { %17801 = sst [smem:[#allocation16_spill]] %s16050_s12 }
  0x22   :  { %17802 = sst [smem:[#allocation17_spill]] %s16055_s20 }
  0x23   :  { %17803 = sst [smem:[#allocation18_spill]] %s16060_s27 }
  0x24   :  { %17804 = sst [smem:[#allocation19_spill]] %s16065_s4 }
  0x25   :  { %s16070_s9 = sld [smem:[%s17731_s0 + %s15937_s7]]   ;;  %s15941_s7 = smov 22  }
  0x26   :  { %s16075_s20 = sld [smem:[%s17731_s0 + %s15938_s15]]   ;;  %s15942_s15 = smov 23  }
  0x27   :  { %s16080_s27 = sld [smem:[%s17731_s0 + %s15939_s22]]   ;;  %s15943_s22 = smov 24  }
  0x28   :  { %s16085_s4 = sld [smem:[%s17731_s0 + %s15940_s28]]   ;;  %s15944_s28 = smov 25  }
  0x2b   :  { %17805 = sst [smem:[#allocation20_spill]] %s16070_s9 }
  0x2c   :  { %17806 = sst [smem:[#allocation21_spill]] %s16075_s20 }
  0x2d   :  { %17807 = sst [smem:[#allocation22_spill]] %s16080_s27 }
  0x2e   :  { %17808 = sst [smem:[#allocation23_spill]] %s16085_s4 }
  0x2f   :  { %s16090_s9 = sld [smem:[%s17731_s0 + %s15941_s7]]   ;;  %s15945_s7 = smov 26  }
  0x30   :  { %s16095_s20 = sld [smem:[%s17731_s0 + %s15942_s15]]   ;;  %s15946_s15 = smov 27  }
  0x31   :  { %s16100_s27 = sld [smem:[%s17731_s0 + %s15943_s22]]   ;;  %s15947_s22 = smov 28  }
  0x32   :  { %s16105_s4 = sld [smem:[%s17731_s0 + %s15944_s28]]   ;;  %s15948_s28 = smov 29  }
  0x35   :  { %17809 = sst [smem:[#allocation24_spill]] %s16090_s9 }
  0x36   :  { %17810 = sst [smem:[#allocation25_spill]] %s16095_s20 }
  0x37   :  { %17811 = sst [smem:[#allocation26_spill]] %s16100_s27 }
  0x38   :  { %17812 = sst [smem:[#allocation27_spill]] %s16105_s4 }
  0x39   :  { %s16110_s9 = sld [smem:[%s17731_s0 + %s15945_s7]]   ;;  %s15949_s7 = smov 30  }
  0x3a   :  { %s16115_s20 = sld [smem:[%s17731_s0 + %s15946_s15]]   ;;  %s15950_s15 = smov 31  }
  0x3b   :  { %s16120_s27 = sld [smem:[%s17731_s0 + %s15947_s22]]   ;;  %s15951_s22 = smov 32  }
  0x3c   :  { %s16125_s4 = sld [smem:[%s17731_s0 + %s15948_s28]]   ;;  %s15952_s28 = smov 33  }
  0x3f   :  { %17813 = sst [smem:[#allocation28_spill]] %s16110_s9 }
  0x40   :  { %17814 = sst [smem:[#allocation29_spill]] %s16115_s20 }
  0x41   :  { %17815 = sst [smem:[#allocation30_spill]] %s16120_s27 }
  0x42   :  { %17816 = sst [smem:[#allocation31_spill]] %s16125_s4 }
  0x43   :  { %s16130_s9 = sld [smem:[%s17731_s0 + %s15949_s7]]   ;;  %s15953_s7 = smov 34  }
  0x44   :  { %s16135_s20 = sld [smem:[%s17731_s0 + %s15950_s15]]   ;;  %s15954_s15 = smov 35  }
  0x45   :  { %s16140_s27 = sld [smem:[%s17731_s0 + %s15951_s22]]   ;;  %s15955_s22 = smov 36  }
  0x46   :  { %s16145_s4 = sld [smem:[%s17731_s0 + %s15952_s28]]   ;;  %s15956_s28 = smov 37  }
  0x49   :  { %17817 = sst [smem:[#allocation32_spill]] %s16130_s9 }
  0x4a   :  { %17818 = sst [smem:[#allocation33_spill]] %s16135_s20 }
  0x4b   :  { %17819 = sst [smem:[#allocation34_spill]] %s16140_s27 }
  0x4c   :  { %17820 = sst [smem:[#allocation35_spill]] %s16145_s4 }
  0x4d   :  { %s16150_s9 = sld [smem:[%s17731_s0 + %s15953_s7]]   ;;  %s15957_s7 = smov 38  }
  0x4e   :  { %s16155_s20 = sld [smem:[%s17731_s0 + %s15954_s15]]   ;;  %s15958_s15 = smov 39  }
  0x4f   :  { %s16160_s27 = sld [smem:[%s17731_s0 + %s15955_s22]]   ;;  %s16177_s22 = smov 0  }
  0x50   :  { %s16165_s4 = sld [smem:[%s17731_s0 + %s15956_s28]]  }
  0x53   :  { %17821 = sst [smem:[#allocation36_spill]] %s16150_s9 }
  0x54   :  { %17822 = sst [smem:[#allocation37_spill]] %s16155_s20 }
  0x55   :  { %s16170_s9 = sld [smem:[%s17731_s0 + %s15957_s7]]  }
  0x56   :  { %s16175_s20 = sld [smem:[%s17731_s0 + %s15958_s15]]  }
  0x5b   :  { %17823 = sst [smem:[#allocation38_spill]] %s16170_s9 }
  0x5c   :  { %17824 = sst [smem:[#allocation39_spill]] %s16175_s20 }
  0x5d LB: > { %s17825_s30 = sld [smem:[#allocation14_spill]]  ;;  %s13624_s23 = sadd.s32 4294967295, %s15918_s22   ;;  %s15918_s22 = sphi %s16177_s22, %s89_s22  }
  0x5e   : > { %s17826_s29 = sld [smem:[#allocation8_spill]]  ;;  %p13628_p0 = scmp.ge.s32.totalorder %s15918_s22, 1 }
  0x5f   : > { %s17827_s25 = sld [smem:[#allocation7_spill]]  ;;  %p1094_p1 = scmp.lt.s32.totalorder %s15918_s22, 3 }
  0x60   : > { %s17828_s24 = sld [smem:[#allocation13_spill]] }
  0x61   : > { %s17829_s21 = sld [smem:[#allocation6_spill]]  ;;  %p1095_p2 = pnand %p13628_p0, %p1094_p1 }
  0x62   : > { %s17830_s19 = sld [smem:[#allocation12_spill]] }
  0x63   : > { %s17831_s17 = sld [smem:[#allocation5_spill]] }
  0x64   : > { %s17832_s14 = sld [smem:[#allocation11_spill]] }
  0x65   : > { %s17833_s12 = sld [smem:[#allocation16_spill]]  ;;  %1098 = sbr.rel (%p1095_p2) target bundleno = 25586 (0x63f2), region = 176 }
  0x66   : > { %s17834_s8 = sld [smem:[#allocation10_spill]] }
  0x67   : > { %s17835_s6 = sld [smem:[#allocation15_spill]] }
  0x68   : > { %s17836_s3 = sld [smem:[#allocation9_spill]] }
  0x69   : > { %17837 = sst [smem:[#allocation40_spill]] %s15918_s22 }
  0x6a   : > { %s17838_s5 = sld [smem:[#allocation2_spill]]  ;;  %v1225_v0 = vld [vmem:[%s17831_s17 + $0x18] sm:$0xff]  ;;  %v1224_v1 = vld [vmem:[%s17831_s17 + $0x10] sm:$0xff]  ;;  %p1196_p3 = scmp.lt.s32.totalorder %s13624_s23, 1  ;;  %v1223_v2 = vld [vmem:[%s17831_s17 + $0x8] sm:$0xff]  ;;  %vm1238_vm0 = vcmask 261120  }
  0x6b   : > { %14604 = vmatprep.subr.mxu0 %v1225_v0  ;;  %v1222_v3 = vld [vmem:[%s17831_s17] sm:$0xff]  ;;  %s17767_s28 = smov 88   ;;  %s17771_s1 = smov 96   ;;  %vm1334_vm1 = vcmask 64512   ;;  %vm1451_vm2 = vcmask 1041408   ;;  %vm1424_vm3 = vcmask 74752  }
  0x6c   : > { %14605 = vmatpush3.msra.mxu0 %v1225_v0  ;;  %s17882_s23 = smov (!%p1196_p3, %s13624_s23), 1  ;;  %v13633_v6 = vld [vmem:[%s17829_s21] ss:$0 sm:$0xff]  ;;  %s17769_s2 = smov 120   ;;  %vm1420_vm4 = vcmask 80896   ;;  %v1228_v56 = vld [vmem:[%s17827_s25 + $0x8] sm:$0xff] }
  0x6d   : > { %17839 = sst [smem:[#allocation41_spill]] %s17882_s23  ;;  %14606 = vmatprep.subr.mxu0 %v1224_v1  ;;  %s14118_s0 = sshll.u32 %s17882_s23, 4  ;;  %v1227_v57 = vld [vmem:[%s17827_s25] sm:$0xff]  ;;  %vm2479_vm5 = vcmask 254976   ;;  %vm2633_vm6 = vcmask 785408   ;;  %vm15971_vm7 = vmmov 0  }
  0x6e   : > { %14607 = vmatpush3.msra.mxu0 %v1224_v1  ;;  %s17763_s7 = smov 64   ;;  %s17840_s13 = sld [smem:[#allocation4_spill]] }
  0x6f   : > { %14608 = vmatprep.subr.mxu0 %v1223_v2  ;;  %s17752_s11 = smov 56   ;;  %s17765_s15 = smov 80  }
  0x70   : > { %s1200_s26 = scalar_lea.vmem %s17838_s5, %s14118_s0  ;;  %14609 = vmatpush3.msra.mxu0 %v1223_v2  ;;  %s17758_s16 = smov 112  }
  0x71   : > { %v16193_v4 = vld [vmem:[%s1200_s26] sm:$0xff]  ;;  %v16195_v5 = vld [vmem:[%s1200_s26 + $0x8] sm:$0x3]  ;;  %14610 = vmatprep.subr.mxu0 %v1222_v3  ;;  %s17756_s18 = smov 72   ;;  %s17760_s0 = smov 104  }
  0x72   : > { %14612 = vmatprep.mubr.msk.f32.mxu0 %vm1238_vm0, %v16193_v4  ;;  %14611 = vmatpush3.msra.mxu0 %v1222_v3  ;;  %s17750_s26 = smov 48   ;;  %s17854_s5 = sld [smem:[#allocation24_spill]] }
  0x73   : > { %14613 = vmatmul.mubr.msk.f32.vlgmr.msra.gmra.mxu0 %vm1238_vm0, %v16195_v5  ;;  %s17869_s22 = sld [smem:[#allocation30_spill]] }
  0x74   : > { %s16244_s10 = scalar_lea.vmem %s17840_s13, %s17882_s23  ;;  %s17858_s13 = sld [smem:[#allocation32_spill]] }
  0x75   : > { %v16247_v20 = vld [vmem:[%s16244_s10] ss:$0 sm:$0xff] }
  0x79   : > { %s17870_s20 = smov %s17869_s22 }
 0x133   : > { %v14614_v7 = vpop.f32.mrf.mxu0 }
 0x134   : > { %v16202_v8 = vadd.f32 %v14614_v7, %v13633_v6 }
 0x135   : > { %v1311_v9 = vpop.f32.mrf.mxu0 }
 0x136   : > { %v16204_v10 = vadd.f32 %v13633_v6, %v1311_v9  ;;  %1539 = vrot.lane.b32.xlu1 %v16202_v8, %s17767_s28  ;;  %1332 = vrot.lane.b32.xlu0 %v16202_v8, %s17771_s1  ;;  %v16220_v12 = vmul.f32 0.35355338, %v16202_v8 }
 0x138   : > { %v16211_v11 = vmul.f32 0.35355338, %v16204_v10 }
 0x13a   : > { %1537 = vrot.lane.b32.xlu1 %v16204_v10, %s17767_s28  ;;  %1330 = vrot.lane.b32.xlu0 %v16204_v10, %s17771_s1 }
 0x13b   : > { %14619 = vmatprep.mubr.msk.f32.mxu1 %vm1334_vm1, %v16211_v11 }
 0x13e   : > { %1535 = vrot.lane.b32.xlu1 %v16220_v12, %s17769_s2  ;;  %1533 = vrot.lane.b32.xlu0 %v16211_v11, %s17769_s2 }
 0x142   : > { %1442 = vrot.lane.b32.xlu1 %v16202_v8, %s17763_s7 }
 0x1a8   : > { %v1540_v13 = vpop.permute.xlu1 %1539  ;;  %v1333_v14 = vpop.permute.xlu0 %1332 }
 0x1a9   : > { %14615 = vmatprep.subr.msk.mxu1 %vm1334_vm1, %v1333_v14 }
 0x1aa   : > { %14616 = vmatpush3.xpose.msk.msra.mxu1 %vm1334_vm1, %v1333_v14 }
 0x1ac   : > { %v1538_v15 = vpop.permute.xlu1 %1537  ;;  %v1331_v16 = vpop.permute.xlu0 %1330 }
 0x1ad   : > { %14617 = vmatprep.subr.msk.mxu1 %vm1334_vm1, %v1331_v16 }
 0x1ae   : > { %14618 = vmatpush3.xpose.msk.msra.mxu1 %vm1334_vm1, %v1331_v16 }
 0x1af   : > { %14629 = vmatprep.subr.msk.mxu1 %vm1334_vm1, %v1540_v13 }
 0x1b0   : > { %v1536_v17 = vpop.permute.xlu1 %1535  ;;  %v1534_v18 = vpop.permute.xlu0 %1533 }
 0x1b1   : > { %14620 = vmatmul.mubr.msk.f32.vlgmr.msra.gmra.mxu1 %vm1334_vm1, %v16220_v12 }
 0x1b2   : > { %14630 = vmatpush3.xpose.msk.msra.mxu1 %vm1334_vm1, %v1540_v13  ;;  %14633 = vmatprep.mubr.msk.f32.mxu1 %vm1334_vm1, %v1534_v18 }
 0x1b3   : > { %14631 = vmatprep.subr.msk.mxu1 %vm1334_vm1, %v1538_v15 }
 0x1b4   : > { %v1443_v19 = vpop.permute.xlu1 %1442 }
 0x1b5   : > { %14622 = vmatprep.subr.msk.mxu0 %vm1451_vm2, %v1443_v19 }
 0x1b6   : > { %14623 = vmatpush3.msk.msra.mxu0 %vm1451_vm2, %v1443_v19  ;;  %14632 = vmatpush3.xpose.msk.msra.mxu1 %vm1334_vm1, %v1538_v15 }
 0x1b9   : > { %14634 = vmatmul.mubr.msk.f32.vlgmr.msra.gmra.mxu1 %vm1334_vm1, %v1536_v17 }
 0x271   : > { %v14621_v21 = vpop.f32.mrf.mxu1 }
 0x272   : > { %v1417_v22 = vadd.f32 %v14621_v21, %v16247_v20 }
 0x273   : > { %v1411_v23 = vpop.f32.mrf.mxu1 }
 0x274   : > { %v1412_v24 = vadd.f32 %v16247_v20, %v1411_v23  ;;  %v1425_v25 = vsel %vm1424_vm3, %v1417_v22, -inf }
 0x275   : > { %1426 = vmax.xlane.f32.xlu1 %v1425_v25 }
 0x276   : > { %v1421_v26 = vsel %vm1420_vm4, %v1412_v24, -inf }
 0x277   : > { %1422 = vmax.xlane.f32.xlu0 %v1421_v26 }
 0x279   : > { %v14635_v27 = vpop.f32.mrf.mxu1 }
 0x27a   : > { %v1621_v28 = vadd.f32 %v14635_v27, %v16247_v20 }
 0x27b   : > { %v1615_v29 = vpop.f32.mrf.mxu1 }
 0x27c   : > { %v1616_v30 = vadd.f32 %v16247_v20, %v1615_v29  ;;  %v1627_v31 = vsel %vm1424_vm3, %v1621_v28, -inf }
 0x27d   : > { %1628 = vmax.xlane.f32.xlu0 %v1627_v31 }
 0x27e   : > { %v1624_v32 = vsel %vm1420_vm4, %v1616_v30, -inf }
 0x281   : > { %1625 = vmax.xlane.f32.xlu0 %v1624_v32 }
 0x286   : > { %1644 = vrot.lane.b32.xlu1 %v16202_v8, %s17752_s11 }
 0x28a   : > { %1642 = vrot.lane.b32.xlu1 %v16204_v10, %s17752_s11 }
 0x297   : > { %1440 = vrot.lane.b32.xlu0 %v16204_v10, %s17763_s7 }
 0x2fe   : > { %v1427_v33 = vpop.xlane.xlu1 %1426 }
 0x2ff   : > { %v1429_v34 = vsub.f32 %v1417_v22, %v1427_v33 }
 0x300   : > { %v1423_v35 = vpop.xlane.xlu0 %1422 }
 0x301   : > { %v1428_v36 = vsub.f32 %v1412_v24, %v1423_v35  ;;  %v1432_v37 = vmul.f32 1.442695, %v1429_v34 }
 0x302   : > { %v1645_v46 = vpop.permute.xlu1 %1644 }
 0x303   : > { %v1430_v38 = vmul.f32 1.442695, %v1428_v36 }
 0x305   : > { %15671 = vpow2.f32 %v1430_v38 }
 0x306   : > { %15673 = vpow2.f32 %v1432_v37  ;;  %v1629_v39 = vpop.xlane.xlu0 %1628  ;;  %v1643_v49 = vpop.permute.xlu1 %1642 }
 0x307   : > { %v1631_v40 = vsub.f32 %v1621_v28, %v1629_v39 }
 0x309   : > { %v1634_v41 = vmul.f32 1.442695, %v1631_v40 }
 0x30a   : > { %v1626_v42 = vpop.xlane.xlu0 %1625 }
 0x30b   : > { %15675 = vpow2.f32 %v1634_v41  ;;  %v1630_v43 = vsub.f32 %v1616_v30, %v1626_v42 }
 0x30d   : > { %v1632_v44 = vmul.f32 1.442695, %v1630_v43 }
 0x30e   : > { %v1441_v45 = vpop.permute.xlu0 %1440 }
 0x30f   : > { %15677 = vpow2.f32 %v1632_v44  ;;  %14624 = vmatprep.subr.mxu0 %v1441_v45 }
 0x310   : > { %14625 = vmatpush3.msra.mxu0 %v1441_v45 }
 0x311   : > { %14636 = vmatprep.subr.msk.mxu0 %vm1451_vm2, %v1645_v46 }
 0x312   : > { %v15672_v47 = vpop.eup %15671 }
 0x313   : > { %v15674_v48 = vpop.eup %15673  ;;  %14626 = vmatprep.mubr.msk.f32.mxu0 %vm1420_vm4, %v15672_v47  ;;  %v1434_v54 = vsel %vm1420_vm4, %v15672_v47, 0.0 }
 0x314   : > { %14627 = vmatmul.mubr.msk.f32.vlgmr.msra.gmra.mxu0 %vm1420_vm4, %v15674_v48  ;;  %v1437_v55 = vsel %vm1424_vm3, %v15674_v48, 0.0 }
 0x315   : > { %14637 = vmatpush3.msk.msra.mxu0 %vm1451_vm2, %v1645_v46 }
 0x316   : > { %14638 = vmatprep.subr.mxu0 %v1643_v49 }
 0x317   : > { %14639 = vmatpush3.msra.mxu0 %v1643_v49 }
 0x318   : > { %v15676_v50 = vpop.eup %15675  ;;  %14643 = vmatprep.subr.mxu0 %v1228_v56 }
 0x319   : > { %v1639_v51 = vsel %vm1424_vm3, %v15676_v50, 0.0 }
 0x31a   : > { %1640 = vadd.xlane.f32.xlu1 %v1639_v51 }
 0x31c   : > { %v15678_v52 = vpop.eup %15677 }
 0x31d   : > { %14640 = vmatprep.mubr.msk.f32.mxu0 %vm1420_vm4, %v15678_v52  ;;  %v1636_v53 = vsel %vm1420_vm4, %v15678_v52, 0.0  ;;  %v1229_v52 = vld [vmem:[%s17827_s25 + $0x10] sm:$0xff] }
 0x31e   : > { %1637 = vadd.xlane.f32.xlu0 %v1636_v53  ;;  %14641 = vmatmul.mubr.msk.f32.vlgmr.msra.gmra.mxu0 %vm1420_vm4, %v15676_v50 }
 0x31f   : > { %14644 = vmatpush3.msra.mxu0 %v1228_v56 }
 0x320   : > { %14648 = vmatprep.subr.mxu0 %v1227_v57 }
 0x322   : > { %1435 = vadd.xlane.f32.xlu0 %v1434_v54 }
 0x326   : > { %1438 = vadd.xlane.f32.xlu0 %v1437_v55 }
 0x32b   : > { %1902 = vrot.lane.b32.xlu1 %v16202_v8, %s17765_s15 }
 0x32f   : > { %1896 = vrot.lane.b32.xlu1 %v16211_v11, %s17758_s16 }
 0x333   : > { %1898 = vrot.lane.b32.xlu1 %v16220_v12, %s17758_s16 }
 0x337   : > { %2184 = vrot.lane.b32.xlu1 %v16204_v10, %s17756_s18 }
 0x33b   : > { %2182 = vrot.lane.b32.xlu1 %v16220_v12, %s17760_s0 }
 0x33c   : > { %1900 = vrot.lane.b32.xlu0 %v16204_v10, %s17765_s15 }
 0x340   : > { %2186 = vrot.lane.b32.xlu0 %v16202_v8, %s17756_s18 }
 0x344   : > { %2180 = vrot.lane.b32.xlu0 %v16211_v11, %s17760_s0 }
 0x3a3   : > { %v1641_v60 = vpop.xlane.xlu1 %1640 }
 0x3a7   : > { %v1638_v58 = vpop.xlane.xlu0 %1637  ;;  %v1903_v1 = vpop.permute.xlu1 %1902 }
 0x3a8   : > { %15679 = vrcp.f32 %v1638_v58 }
 0x3a9   : > { %15681 = vrcp.f32 %v1641_v60 }
 0x3ab   : > { %v1436_v59 = vpop.xlane.xlu0 %1435  ;;  %v1897_v15 = vpop.permute.xlu1 %1896 }
 0x3ac   : > { %15683 = vrcp.f32 %v1436_v59 }
 0x3af   : > { %v1439_v61 = vpop.xlane.xlu0 %1438  ;;  %v1899_v18 = vpop.permute.xlu1 %1898 }
 0x3b0   : > { %15685 = vrcp.f32 %v1439_v61 }
 0x3b3   : > { %v1901_v13 = vpop.permute.xlu0 %1900  ;;  %v2185_v21 = vpop.permute.xlu1 %2184 }
 0x3b5   : > { %v15680_v2 = vpop.eup %15679 }
 0x3b6   : > { %v15682_v6 = vpop.eup %15681 }
 0x3b7   : > { %v2187_v17 = vpop.permute.xlu0 %2186  ;;  %v2183_v22 = vpop.permute.xlu1 %2182 }
 0x3b9   : > { %v15684_v9 = vpop.eup %15683 }
 0x3bb   : > { %v2181_v19 = vpop.permute.xlu0 %2180 }
 0x3bd   : > { %v15686_v14 = vpop.eup %15685 }
 0x3d4   : > { %v14628_v62 = vpop.f32.mrf.mxu0 }
 0x3d5   : > { %v1532_v16 = vmul.f32 %v15686_v14, %v14628_v62 }
 0x3d6   : > { %v1520_v63 = vpop.f32.mrf.mxu0 }
 0x3d7   : > { %v1531_v12 = vmul.f32 %v15684_v9, %v1520_v63 }
 0x3de   : > { %v14642_v0 = vpop.f32.mrf.mxu0 }
 0x3df   : > { %v1733_v11 = vmul.f32 %v15682_v6, %v14642_v0 }
 0x3e0   : > { %v1721_v3 = vpop.f32.mrf.mxu0 }
 0x3e1   : > { %v1732_v7 = vmul.f32 %v15680_v2, %v1721_v3 }
 0x3e3   : > { %14645 = vmatprep.mubr.msk.f32.mxu0 %vm1334_vm1, %v1732_v7 }
 0x3e4   : > { %14646 = vmatmul.mubr.msk.f32.vlgmr.msra.gmra.mxu0 %vm1334_vm1, %v1733_v11  ;;  %v1230_v11 = vld [vmem:[%s17827_s25 + $0x18] sm:$0xff] }
 0x3e5   : > { %14649 = vmatpush3.msra.mxu0 %v1227_v57  ;;  %14650 = vmatprep.mubr.msk.f32.mxu0 %vm1334_vm1, %v1531_v12 }
 0x3e6   : > { %14653 = vmatprep.subr.msk.mxu0 %vm1334_vm1, %v1903_v1 }
 0x3e8   : > { %14651 = vmatmul.mubr.msk.f32.vlgmr.msra.gmra.mxu0 %vm1334_vm1, %v1532_v16 }
 0x3e9   : > { %14654 = vmatpush3.xpose.msk.msra.mxu0 %vm1334_vm1, %v1903_v1  ;;  %14657 = vmatprep.mubr.msk.f32.mxu0 %vm1334_vm1, %v1897_v15 }
 0x3ea   : > { %14655 = vmatprep.subr.msk.mxu0 %vm1334_vm1, %v1901_v13 }
 0x3ed   : > { %14656 = vmatpush3.xpose.msk.msra.mxu0 %vm1334_vm1, %v1901_v13 }
 0x3ee   : > { %14672 = vmatprep.subr.msk.mxu0 %vm1334_vm1, %v2187_v17 }
 0x3f0   : > { %14658 = vmatmul.mubr.msk.f32.vlgmr.msra.gmra.mxu0 %vm1334_vm1, %v1899_v18 }
 0x3f1   : > { %14673 = vmatpush3.xpose.msk.msra.mxu0 %vm1334_vm1, %v2187_v17  ;;  %14676 = vmatprep.mubr.msk.f32.mxu0 %vm1334_vm1, %v2181_v19 }
 0x3f2   : > { %14674 = vmatprep.subr.msk.mxu0 %vm1334_vm1, %v2185_v21 }
 0x3f5   : > { %14675 = vmatpush3.xpose.msk.msra.mxu0 %vm1334_vm1, %v2185_v21 }
 0x3f8   : > { %14677 = vmatmul.mubr.msk.f32.vlgmr.msra.gmra.mxu0 %vm1334_vm1, %v2183_v22 }
 0x4a4   : > { %v14647_v23 = vpop.f32.mrf.mxu0 }
 0x4a6   : > { %v16307_v24 = vpop.f32.mrf.mxu0 }
 0x4a8   : > { %v14652_v25 = vpop.f32.mrf.mxu0 }
 0x4a9   : > { %v16309_v26 = vadd.f32 %v14652_v25, %v14647_v23 }
 0x4aa   : > { %v16311_v27 = vpop.f32.mrf.mxu0 }
 0x4ab   : > { %v1888_v25 = vadd.f32 %v16311_v27, %v16307_v24 }
 0x4b0   : > { %v14659_v28 = vpop.f32.mrf.mxu0 }
 0x4b1   : > { %v1984_v29 = vadd.f32 %v14659_v28, %v16247_v20  ;;  %v13673_v28 = vld [vmem:[%s17826_s29] ss:$0 sm:$0xff] }
 0x4b2   : > { %v1978_v30 = vpop.f32.mrf.mxu0 }
 0x4b3   : > { %v1979_v31 = vadd.f32 %v16247_v20, %v1978_v30  ;;  %v1990_v32 = vsel %vm1424_vm3, %v1984_v29, -inf }
 0x4b4   : > { %1991 = vmax.xlane.f32.xlu1 %v1990_v32 }
 0x4b5   : > { %v1987_v33 = vsel %vm1420_vm4, %v1979_v31, -inf }
 0x4b6   : > { %1988 = vmax.xlane.f32.xlu0 %v1987_v33 }
 0x4b8   : > { %v14678_v34 = vpop.f32.mrf.mxu0 }
 0x4b9   : > { %v2268_v35 = vadd.f32 %v14678_v34, %v16247_v20 }
 0x4ba   : > { %v2262_v36 = vpop.f32.mrf.mxu0 }
 0x4bb   : > { %v2263_v37 = vadd.f32 %v16247_v20, %v2262_v36  ;;  %v2274_v38 = vsel %vm1424_vm3, %v2268_v35, -inf }
 0x4bd   : > { %v2271_v39 = vsel %vm1420_vm4, %v2263_v37, -inf }
 0x4c5   : > { %2005 = vrot.lane.b32.xlu1 %v16204_v10, %s17750_s26 }
 0x4cc   : > { %2007 = vrot.lane.b32.xlu0 %v16202_v8, %s17750_s26  ;;  %s17754_s26 = smov 40  }
 0x4eb   : > { %2275 = vmax.xlane.f32.xlu0 %v2274_v38 }
 0x4ef   : > { %2272 = vmax.xlane.f32.xlu0 %v2271_v39 }
 0x53d   : > { %v1992_v40 = vpop.xlane.xlu1 %1991 }
 0x53e   : > { %v1994_v41 = vsub.f32 %v1984_v29, %v1992_v40 }
 0x53f   : > { %v1989_v42 = vpop.xlane.xlu0 %1988 }
 0x540   : > { %v1997_v43 = vmul.f32 1.442695, %v1994_v41  ;;  %v1993_v44 = vsub.f32 %v1979_v31, %v1989_v42 }
 0x541   : > { %v2006_v47 = vpop.permute.xlu1 %2005 }
 0x542   : > { %15687 = vpow2.f32 %v1997_v43  ;;  %v1995_v45 = vmul.f32 1.442695, %v1993_v44 }
 0x543   : > { %v2008_v46 = vpop.permute.xlu0 %2007 }
 0x544   : > { %15689 = vpow2.f32 %v1995_v45  ;;  %14660 = vmatprep.subr.msk.mxu1 %vm1451_vm2, %v2008_v46  ;;  %v2523_v45 = vld [vmem:[%s17836_s3 + $0x18] sm:$0xff] }
 0x545   : > { %14661 = vmatpush3.msk.msra.mxu1 %vm1451_vm2, %v2008_v46  ;;  %v2522_v46 = vld [vmem:[%s17836_s3 + $0x10] sm:$0xff]  ;;  %14691 = vmatprep.subr.mxu0 %v2523_v45 }
 0x546   : > { %14662 = vmatprep.subr.mxu1 %v2006_v47  ;;  %14692 = vmatpush3.msra.mxu0 %v2523_v45 }
 0x547   : > { %14663 = vmatpush3.msra.mxu1 %v2006_v47  ;;  %v2521_v47 = vld [vmem:[%s17836_s3 + $0x8] sm:$0xff]  ;;  %14693 = vmatprep.subr.mxu0 %v2522_v46 }
 0x548   : > { %14667 = vmatprep.subr.mxu1 %v1229_v52  ;;  %14694 = vmatpush3.msra.mxu0 %v2522_v46 }
 0x549   : > { %14695 = vmatprep.subr.mxu0 %v2521_v47 }
 0x54a   : > { %14696 = vmatpush3.msra.mxu0 %v2521_v47 }
 0x54f   : > { %v15688_v48 = vpop.eup %15687 }
 0x550   : > { %v2002_v49 = vsel %vm1424_vm3, %v15688_v48, 0.0 }
 0x551   : > { %v15690_v50 = vpop.eup %15689  ;;  %2003 = vadd.xlane.f32.xlu1 %v2002_v49  ;;  %v2536_v49 = vld [vmem:[%s17832_s14 + $0x58] sm:$0xff] }
 0x552   : > { %14664 = vmatprep.mubr.msk.f32.mxu1 %vm1420_vm4, %v15690_v50  ;;  %v1999_v51 = vsel %vm1420_vm4, %v15690_v50, 0.0  ;;  %v2535_v50 = vld [vmem:[%s17832_s14 + $0x50] sm:$0xff] }
 0x553   : > { %2000 = vadd.xlane.f32.xlu0 %v1999_v51  ;;  %14665 = vmatmul.mubr.msk.f32.vlgmr.msra.gmra.mxu1 %vm1420_vm4, %v15688_v48  ;;  %v2520_v48 = vld [vmem:[%s17836_s3] sm:$0xff]  ;;  %v2534_v51 = vld [vmem:[%s17832_s14 + $0x48] sm:$0xff] }
 0x554   : > { %14668 = vmatpush3.msra.mxu1 %v1229_v52  ;;  %14697 = vmatprep.subr.mxu0 %v2520_v48  ;;  %v2533_v52 = vld [vmem:[%s17832_s14 + $0x40] sm:$0xff] }
 0x555   : > { %14698 = vmatpush3.msra.mxu0 %v2520_v48 }
 0x562   : > { %2291 = vrot.lane.b32.xlu1 %v16202_v8, %s17754_s26 }
 0x569   : > { %2289 = vrot.lane.b32.xlu0 %v16204_v10, %s17754_s26 }
 0x574   : > { %v2276_v53 = vpop.xlane.xlu0 %2275 }
 0x575   : > { %v2278_v54 = vsub.f32 %v2268_v35, %v2276_v53  ;;  %v2532_v53 = vld [vmem:[%s17832_s14 + $0x38] sm:$0xff] }
 0x577   : > { %v2281_v55 = vmul.f32 1.442695, %v2278_v54  ;;  %v2531_v54 = vld [vmem:[%s17832_s14 + $0x30] sm:$0xff] }
 0x578   : > { %v2273_v56 = vpop.xlane.xlu0 %2272 }
 0x579   : > { %15691 = vpow2.f32 %v2281_v55  ;;  %v2277_v57 = vsub.f32 %v2263_v37, %v2273_v56  ;;  %v2530_v55 = vld [vmem:[%s17832_s14 + $0x28] sm:$0xff]  ;;  %v2529_v56 = vld [vmem:[%s17832_s14 + $0x20] sm:$0xff] }
 0x57b   : > { %v2279_v58 = vmul.f32 1.442695, %v2277_v57 }
 0x57d   : > { %15693 = vpow2.f32 %v2279_v58 }
 0x586   : > { %v15692_v59 = vpop.eup %15691 }
 0x587   : > { %v2286_v60 = vsel %vm1424_vm3, %v15692_v59, 0.0 }
 0x588   : > { %2287 = vadd.xlane.f32.xlu0 %v2286_v60 }
 0x58a   : > { %v15694_v61 = vpop.eup %15693 }
 0x58b   : > { %v2283_v62 = vsel %vm1420_vm4, %v15694_v61, 0.0 }
 0x58c   : > { %2284 = vadd.xlane.f32.xlu1 %v2283_v62 }
 0x5da   : > { %v2004_v8 = vpop.xlane.xlu1 %2003 }
 0x5dc   : > { %v2001_v10 = vpop.xlane.xlu0 %2000 }
 0x5dd   : > { %15695 = vrcp.f32 %v2001_v10 }
 0x5de   : > { %v2292_v63 = vpop.permute.xlu1 %2291  ;;  %15697 = vrcp.f32 %v2004_v8 }
 0x5df   : > { %14679 = vmatprep.subr.msk.mxu1 %vm1451_vm2, %v2292_v63 }
 0x5e0   : > { %v2290_v9 = vpop.permute.xlu0 %2289 }
 0x5ea   : > { %v15696_v1 = vpop.eup %15695 }
 0x5eb   : > { %v15698_v3 = vpop.eup %15697 }
 0x611   : > { %v2288_v13 = vpop.xlane.xlu0 %2287 }
 0x613   : > { %v14666_v0 = vpop.f32.mrf.mxu1 }
 0x614   : > { %v2096_v7 = vmul.f32 %v15698_v3, %v14666_v0  ;;  %v13675_v3 = vld [vmem:[%s17825_s30] ss:$0 sm:$0xff] }
 0x615   : > { %v2084_v2 = vpop.f32.mrf.mxu1  ;;  %v2285_v12 = vpop.xlane.xlu1 %2284 }
 0x616   : > { %v2095_v6 = vmul.f32 %v15696_v1, %v2084_v2  ;;  %15699 = vrcp.f32 %v2285_v12  ;;  %v2527_v12 = vld [vmem:[%s17832_s14 + $0x10] sm:$0xff] }
 0x617   : > { %15701 = vrcp.f32 %v2288_v13  ;;  %v2526_v13 = vld [vmem:[%s17832_s14 + $0x8] sm:$0xff] }
 0x618   : > { %14669 = vmatprep.mubr.msk.f32.mxu1 %vm1334_vm1, %v2095_v6 }
 0x619   : > { %14670 = vmatmul.mubr.msk.f32.vlgmr.msra.gmra.mxu1 %vm1334_vm1, %v2096_v7 }
 0x61a   : > { %14680 = vmatpush3.msk.msra.mxu1 %vm1451_vm2, %v2292_v63  ;;  %14683 = vmatprep.mubr.msk.f32.mxu1 %vm1420_vm4, %v15694_v61  ;;  %v13674_v63 = vld [vmem:[%s17828_s24] ss:$0 sm:$0xff] }
 0x61b   : > { %14681 = vmatprep.subr.mxu1 %v2290_v9 }
 0x61c   : > { %14682 = vmatpush3.msra.mxu1 %v2290_v9 }
 0x61d   : > { %14684 = vmatmul.mubr.msk.f32.vlgmr.msra.gmra.mxu1 %vm1420_vm4, %v15692_v59  ;;  %14686 = vmatprep.subr.mxu1 %v1230_v11 }
 0x61e   : > { %14687 = vmatpush3.msra.mxu1 %v1230_v11  ;;  %v2528_v11 = vld [vmem:[%s17832_s14 + $0x18] sm:$0xff] }
 0x61f   : > { %14702 = vmatprep.subr.mxu1 %v2536_v49 }
 0x623   : > { %v15700_v18 = vpop.eup %15699 }
 0x624   : > { %v15702_v21 = vpop.eup %15701 }
 0x6d9   : > { %v14671_v14 = vpop.f32.mrf.mxu1 }
 0x6da   : > { %v2179_v15 = vadd.f32 %v14671_v14, %v16309_v26  ;;  %v2525_v14 = vld [vmem:[%s17832_s14] sm:$0xff] }
 0x6db   : > { %v2169_v16 = vpop.f32.mrf.mxu1 }
 0x6dc   : > { %v2178_v30 = vadd.f32 %v2169_v16, %v1888_v25 }
 0x6dd   : > { %v14685_v17 = vpop.f32.mrf.mxu1 }
 0x6de   : > { %v2380_v23 = vmul.f32 %v15702_v21, %v14685_v17 }
 0x6df   : > { %v2368_v19 = vpop.f32.mrf.mxu1 }
 0x6e0   : > { %v2379_v22 = vmul.f32 %v15700_v18, %v2368_v19 }
 0x6e2   : > { %14688 = vmatprep.mubr.msk.f32.mxu1 %vm1334_vm1, %v2379_v22 }
 0x6e3   : > { %14689 = vmatmul.mubr.msk.f32.vlgmr.msra.gmra.mxu1 %vm1334_vm1, %v2380_v23  ;;  %v13679_v23 = vld [vmem:[%s17830_s19] ss:$0 sm:$0xff] }
 0x6e4   : > { %14703 = vmatpush3.msra.mxu1 %v2536_v49 }
 0x6e5   : > { %14704 = vmatprep.subr.mxu1 %v2535_v50 }
 0x6e6   : > { %14705 = vmatpush3.msra.mxu1 %v2535_v50 }
 0x6e7   : > { %14706 = vmatprep.subr.mxu1 %v2534_v51 }
 0x6e8   : > { %14707 = vmatpush3.msra.mxu1 %v2534_v51  ;;  %v13682_v51 = vld [vmem:[%s17835_s6] ss:$0 sm:$0xff] }
 0x6e9   : > { %14708 = vmatprep.subr.mxu1 %v2533_v52 }
 0x6ea   : > { %14709 = vmatpush3.msra.mxu1 %v2533_v52 }
 0x6eb   : > { %14710 = vmatprep.subr.mxu1 %v2532_v53 }
 0x6ec   : > { %14711 = vmatpush3.msra.mxu1 %v2532_v53 }
 0x6ed   : > { %14712 = vmatprep.subr.mxu1 %v2531_v54 }
 0x6ee   : > { %14713 = vmatpush3.msra.mxu1 %v2531_v54 }
 0x6ef   : > { %14714 = vmatprep.subr.mxu1 %v2530_v55 }
 0x6f0   : > { %14715 = vmatpush3.msra.mxu1 %v2530_v55 }
 0x6f1   : > { %14716 = vmatprep.subr.mxu1 %v2529_v56 }
 0x6f2   : > { %14717 = vmatpush3.msra.mxu1 %v2529_v56  ;;  %v13683_v56 = vld [vmem:[%s17833_s12] ss:$0 sm:$0xff] }
 0x6f3   : > { %14718 = vmatprep.subr.mxu1 %v2528_v11 }
 0x6f4   : > { %14719 = vmatpush3.msra.mxu1 %v2528_v11 }
 0x6f5   : > { %14720 = vmatprep.subr.mxu1 %v2527_v12 }
 0x6f6   : > { %14721 = vmatpush3.msra.mxu1 %v2527_v12 }
 0x6f7   : > { %14722 = vmatprep.subr.mxu1 %v2526_v13 }
 0x6f8   : > { %14723 = vmatpush3.msra.mxu1 %v2526_v13 }
 0x6f9   : > { %14724 = vmatprep.subr.mxu1 %v2525_v14 }
 0x6fa   : > { %14725 = vmatpush3.msra.mxu1 %v2525_v14 }
 0x7a3   : > { %v14690_v29 = vpop.f32.mrf.mxu1 }
 0x7a4   : > { %v2463_v31 = vadd.f32 %v14690_v29, %v2179_v15  ;;  %v13676_v15 = vld [vmem:[%s17834_s8] ss:$0 sm:$0xff] }
 0x7a5   : > { %v2453_v32 = vpop.f32.mrf.mxu1 }
 0x7a6   : > { %v2471_v26 = vadd.f32 %v13673_v28, %v2463_v31  ;;  %v2462_v33 = vadd.f32 %v2453_v32, %v2178_v30 }
 0x7a8   : > { %v2470_v34 = vadd.f32 %v13673_v28, %v2462_v33  ;;  %v2473_v35 = vadd.f32 %v2471_v26, %v16195_v5 }
 0x7aa   : > { %v2480_v36 = vsel %vm2479_vm5, %v2473_v35, 0.0  ;;  %v2472_v37 = vadd.f32 %v2470_v34, %v16193_v4 }
 0x7ab   : > { %2481 = vadd.xlane.f32.xlu0 %v2480_v36 }
 0x7ac   : > { %v2476_v24 = vsel %vm1238_vm0, %v2472_v37, 0.0 }
 0x7ad   : > { %2477 = vadd.xlane.f32.xlu1 %v2476_v24 }
 0x834   : > { %v2482_v27 = vpop.xlane.xlu0 %2481 }
 0x835   : > { %v2485_v38 = vmul.f32 0.03125, %v2482_v27 }
 0x836   : > { %v2478_v39 = vpop.xlane.xlu1 %2477 }
 0x837   : > { %v2487_v40 = vsub.f32 %v2473_v35, %v2485_v38  ;;  %v2484_v41 = vmul.f32 0.03125, %v2478_v39 }
 0x839   : > { %v2486_v42 = vsub.f32 %v2472_v37, %v2484_v41  ;;  %v2489_v43 = vmul.f32 %v2487_v40, %v2487_v40 }
 0x83b   : > { %v2493_v5 = vsel %vm2479_vm5, %v2489_v43, 0.0  ;;  %v2488_v44 = vmul.f32 %v2486_v42, %v2486_v42  ;;  %v13686_v43 = vld [vmem:[%s17831_s17 + $0x30] sm:$0xff] }
 0x83c   : > { %2494 = vadd.xlane.f32.xlu0 %v2493_v5  ;;  %v13685_v5 = vld [vmem:[%s17831_s17 + $0x28] sm:$0xff] }
 0x83d   : > { %v2490_v4 = vsel %vm1238_vm0, %v2488_v44, 0.0  ;;  %v13684_v44 = vld [vmem:[%s17831_s17 + $0x20] sm:$0xff] }
 0x83e   : > { %2491 = vadd.xlane.f32.xlu1 %v2490_v4 }
 0x8c5   : > { %v2495_v57 = vpop.xlane.xlu0 %2494 }
 0x8c6   : > { %v2497_v58 = vmul.f32 0.03125, %v2495_v57 }
 0x8c7   : > { %v2492_v59 = vpop.xlane.xlu1 %2491 }
 0x8c8   : > { %v2499_v60 = vadd.f32 1e-05, %v2497_v58  ;;  %v2496_v61 = vmul.f32 0.03125, %v2492_v59 }
 0x8ca   : > { %15703 = vrsqrt.f32 %v2499_v60  ;;  %v2498_v62 = vadd.f32 1e-05, %v2496_v61  ;;  %v13694_v60 = vld [vmem:[%s17829_s21 + $0x1] ss:$0 sm:$0xff] }
 0x8cc   : > { %15705 = vrsqrt.f32 %v2498_v62 }
 0x8d7   : > { %v15704_v8 = vpop.eup %15703 }
 0x8d8   : > { %v2503_v10 = vmul.f32 %v15704_v8, %v2487_v40 }
 0x8d9   : > { %v15706_v0 = vpop.eup %15705 }
 0x8da   : > { %v2502_v1 = vmul.f32 %v15706_v0, %v2486_v42  ;;  %v2511_v2 = vmul.f32 %v13674_v63, %v2503_v10  ;;  %v13687_v42 = vld [vmem:[%s17831_s17 + $0x38] sm:$0xff] }
 0x8db   : > { %14729 = vmatprep.subr.mxu0 %v13687_v42 }
 0x8dc   : > { %v2510_v6 = vmul.f32 %v13674_v63, %v2502_v1  ;;  %v2519_v9 = vadd.f32 %v13675_v3, %v2511_v2 }
 0x8de   : > { %v2518_v7 = vadd.f32 %v13675_v3, %v2510_v6 }
 0x8e0   : > { %14699 = vmatprep.mubr.msk.f32.mxu0 %vm1238_vm0, %v2518_v7 }
 0x8e1   : > { %14700 = vmatmul.mubr.msk.f32.vlgmr.msra.gmra.mxu0 %vm1238_vm0, %v2519_v9 }
 0x8e2   : > { %14730 = vmatpush3.msra.mxu0 %v13687_v42 }
 0x8e3   : > { %14731 = vmatprep.subr.mxu0 %v13686_v43 }
 0x8e4   : > { %14732 = vmatpush3.msra.mxu0 %v13686_v43 }
 0x8e5   : > { %14733 = vmatprep.subr.mxu0 %v13685_v5 }
 0x8e6   : > { %14734 = vmatpush3.msra.mxu0 %v13685_v5 }
 0x8e7   : > { %14735 = vmatprep.subr.mxu0 %v13684_v44 }
 0x8e8   : > { %14736 = vmatpush3.msra.mxu0 %v13684_v44  ;;  %v13690_v44 = vld [vmem:[%s17827_s25 + $0x28] sm:$0xff] }
 0x9a1   : > { %v14701_v16 = vpop.f32.mrf.mxu0 }
 0x9a2   : > { %v2622_v17 = vadd.f32 %v14701_v16, %v13676_v15 }
 0x9a3   : > { %v2616_v18 = vpop.f32.mrf.mxu0 }
 0x9a4   : > { %v2617_v19 = vadd.f32 %v13676_v15, %v2616_v18  ;;  %v2626_v22 = vmax.f32 %v2622_v17, 0.0 }
 0x9a6   : > { %v2625_v21 = vmax.f32 %v2617_v19, 0.0 }
 0x9a8   : > { %14726 = vmatprep.mubr.msk.f32.mxu1 %vm2633_vm6, %v2625_v21 }
 0x9a9   : > { %14727 = vmatmul.mubr.msk.f32.vlgmr.msra.gmra.mxu1 %vm2633_vm6, %v2626_v22 }
 0xa69   : > { %v14728_v25 = vpop.f32.mrf.mxu1 }
 0xa6a   : > { %v2712_v28 = vadd.f32 %v14728_v25, %v13679_v23 }
 0xa6b   : > { %v2706_v29 = vpop.f32.mrf.mxu1 }
 0xa6c   : > { %v2707_v30 = vadd.f32 %v13679_v23, %v2706_v29  ;;  %v2716_v31 = vadd.f32 %v2712_v28, %v2519_v9 }
 0xa6e   : > { %v2722_v32 = vsel %vm2479_vm5, %v2716_v31, 0.0  ;;  %v2715_v26 = vadd.f32 %v2707_v30, %v2518_v7 }
 0xa6f   : > { %2723 = vadd.xlane.f32.xlu0 %v2722_v32 }
 0xa70   : > { %v2719_v33 = vsel %vm1238_vm0, %v2715_v26, 0.0 }
 0xa71   : > { %2720 = vadd.xlane.f32.xlu1 %v2719_v33 }
 0xaf8   : > { %v2724_v34 = vpop.xlane.xlu0 %2723 }
 0xaf9   : > { %v2726_v35 = vmul.f32 0.03125, %v2724_v34 }
 0xafa   : > { %v2721_v36 = vpop.xlane.xlu1 %2720 }
 0xafb   : > { %v2728_v37 = vsub.f32 %v2716_v31, %v2726_v35  ;;  %v2725_v24 = vmul.f32 0.03125, %v2721_v36 }
 0xafd   : > { %v2727_v27 = vsub.f32 %v2715_v26, %v2725_v24  ;;  %v2730_v38 = vmul.f32 %v2728_v37, %v2728_v37 }
 0xaff   : > { %v2734_v39 = vsel %vm2479_vm5, %v2730_v38, 0.0  ;;  %v2729_v40 = vmul.f32 %v2727_v27, %v2727_v27 }
 0xb00   : > { %2735 = vadd.xlane.f32.xlu0 %v2734_v39 }
 0xb01   : > { %v2731_v41 = vsel %vm1238_vm0, %v2729_v40, 0.0 }
 0xb02   : > { %2732 = vadd.xlane.f32.xlu1 %v2731_v41 }
 0xb89   : > { %v2736_v4 = vpop.xlane.xlu0 %2735 }
 0xb8a   : > { %v2738_v45 = vmul.f32 0.03125, %v2736_v4 }
 0xb8b   : > { %v2733_v46 = vpop.xlane.xlu1 %2732 }
 0xb8c   : > { %v2740_v47 = vadd.f32 1e-05, %v2738_v45  ;;  %v2737_v48 = vmul.f32 0.03125, %v2733_v46  ;;  %v13689_v46 = vld [vmem:[%s17827_s25 + $0x20] sm:$0xff] }
 0xb8e   : > { %15707 = vrsqrt.f32 %v2740_v47  ;;  %v2739_v49 = vadd.f32 1e-05, %v2737_v48 }
 0xb90   : > { %15709 = vrsqrt.f32 %v2739_v49 }
 0xb9b   : > { %v15708_v50 = vpop.eup %15707 }
 0xb9c   : > { %v2744_v52 = vmul.f32 %v15708_v50, %v2728_v37 }
 0xb9d   : > { %v15710_v53 = vpop.eup %15709 }
 0xb9e   : > { %v2743_v54 = vmul.f32 %v15710_v53, %v2727_v27  ;;  %v2752_v55 = vmul.f32 %v13682_v51, %v2744_v52 }
 0xba0   : > { %v2751_v57 = vmul.f32 %v13682_v51, %v2743_v54  ;;  %v16393_v59 = vadd.f32 %v13683_v56, %v2752_v55 }
 0xba2   : > { %v16391_v58 = vadd.f32 %v13683_v56, %v2751_v57 }
 0xba4   : > { %14737 = vmatprep.mubr.msk.f32.mxu0 %vm1238_vm0, %v16391_v58 }
 0xba5   : > { %14738 = vmatmul.mubr.msk.f32.vlgmr.msra.gmra.mxu0 %vm1238_vm0, %v16393_v59 }
 0xc65   : > { %v14739_v61 = vpop.f32.mrf.mxu0 }
 0xc66   : > { %v16400_v62 = vadd.f32 %v14739_v61, %v13694_v60 }
 0xc67   : > { %v2853_v8 = vpop.f32.mrf.mxu0 }
 0xc68   : > { %v16402_v63 = vadd.f32 %v13694_v60, %v2853_v8  ;;  %2868 = vrot.lane.b32.xlu1 %v16400_v62, %s17771_s1  ;;  %v16420_v0 = vmul.f32 0.35355338, %v16400_v62 }
 0xc6a   : > { %2866 = vrot.lane.b32.xlu0 %v16402_v63, %s17771_s1  ;;  %v16409_v10 = vmul.f32 0.35355338, %v16402_v63 }
 0xc6c   : > { %3071 = vrot.lane.b32.xlu1 %v16400_v62, %s17767_s28  ;;  %14744 = vmatprep.mubr.msk.f32.mxu0 %vm1334_vm1, %v16409_v10 }
 0xc6e   : > { %3065 = vrot.lane.b32.xlu0 %v16409_v10, %s17769_s2 }
 0xc70   : > { %3069 = vrot.lane.b32.xlu1 %v16402_v63, %s17767_s28 }
 0xc74   : > { %3067 = vrot.lane.b32.xlu1 %v16420_v0, %s17769_s2 }
 0xc78   : > { %2975 = vrot.lane.b32.xlu1 %v16400_v62, %s17763_s7 }
 0xcda   : > { %v2869_v1 = vpop.permute.xlu1 %2868 }
 0xcdb   : > { %14740 = vmatprep.subr.msk.mxu0 %vm1334_vm1, %v2869_v1 }
 0xcdc   : > { %14741 = vmatpush3.xpose.msk.msra.mxu0 %vm1334_vm1, %v2869_v1  ;;  %v2867_v2 = vpop.permute.xlu0 %2866 }
 0xcdd   : > { %14742 = vmatprep.subr.msk.mxu0 %vm1334_vm1, %v2867_v2 }
 0xcde   : > { %v3072_v3 = vpop.permute.xlu1 %3071 }
 0xcdf   : > { %14754 = vmatprep.subr.msk.mxu1 %vm1334_vm1, %v3072_v3 }
 0xce0   : > { %14743 = vmatpush3.xpose.msk.msra.mxu0 %vm1334_vm1, %v2867_v2  ;;  %14755 = vmatpush3.xpose.msk.msra.mxu1 %vm1334_vm1, %v3072_v3  ;;  %v3066_v6 = vpop.permute.xlu0 %3065 }
 0xce1   : > { %14758 = vmatprep.mubr.msk.f32.mxu1 %vm1334_vm1, %v3066_v6 }
 0xce2   : > { %v3070_v7 = vpop.permute.xlu1 %3069 }
 0xce3   : > { %14745 = vmatmul.mubr.msk.f32.vlgmr.msra.gmra.mxu0 %vm1334_vm1, %v16420_v0  ;;  %14756 = vmatprep.subr.msk.mxu1 %vm1334_vm1, %v3070_v7 }
 0xce4   : > { %14757 = vmatpush3.xpose.msk.msra.mxu1 %vm1334_vm1, %v3070_v7 }
 0xce5   : > { %14773 = vmatprep.subr.mxu1 %v13689_v46 }
 0xce6   : > { %v3068_v9 = vpop.permute.xlu1 %3067 }
 0xce7   : > { %14759 = vmatmul.mubr.msk.f32.vlgmr.msra.gmra.mxu1 %vm1334_vm1, %v3068_v9 }
 0xce8   : > { %14774 = vmatpush3.msra.mxu1 %v13689_v46 }
 0xcea   : > { %v2976_v11 = vpop.permute.xlu1 %2975 }
 0xceb   : > { %14747 = vmatprep.subr.msk.mxu0 %vm1451_vm2, %v2976_v11 }
 0xcec   : > { %14748 = vmatpush3.msk.msra.mxu0 %vm1451_vm2, %v2976_v11 }
 0xda3   : > { %v14746_v12 = vpop.f32.mrf.mxu0 }
 0xda4   : > { %v2952_v13 = vadd.f32 %v14746_v12, %v16247_v20 }
 0xda5   : > { %v2946_v15 = vpop.f32.mrf.mxu0 }
 0xda6   : > { %v2958_v14 = vsel %vm1424_vm3, %v2952_v13, -inf  ;;  %v2947_v18 = vadd.f32 %v16247_v20, %v2946_v15 }
 0xda7   : > { %v14760_v16 = vpop.f32.mrf.mxu1  ;;  %2959 = vmax.xlane.f32.xlu1 %v2958_v14 }
 0xda8   : > { %v3153_v17 = vadd.f32 %v14760_v16, %v16247_v20  ;;  %v2955_v23 = vsel %vm1420_vm4, %v2947_v18, -inf }
 0xda9   : > { %v3147_v21 = vpop.f32.mrf.mxu1 }
 0xdaa   : > { %v3159_v19 = vsel %vm1424_vm3, %v3153_v17, -inf  ;;  %v3148_v22 = vadd.f32 %v16247_v20, %v3147_v21 }
 0xdab   : > { %3160 = vmax.xlane.f32.xlu0 %v3159_v19 }
 0xdac   : > { %v3156_v25 = vsel %vm1420_vm4, %v3148_v22, -inf }
 0xdaf   : > { %2956 = vmax.xlane.f32.xlu0 %v2955_v23 }
 0xdb3   : > { %3157 = vmax.xlane.f32.xlu0 %v3156_v25 }
 0xdb8   : > { %3176 = vrot.lane.b32.xlu1 %v16400_v62, %s17752_s11 }
 0xdbc   : > { %3174 = vrot.lane.b32.xlu1 %v16402_v63, %s17752_s11  ;;  %s17841_s11 = smov 48  }
 0xdc9   : > { %2973 = vrot.lane.b32.xlu0 %v16402_v63, %s17763_s7 }
 0xe30   : > { %v2960_v28 = vpop.xlane.xlu1 %2959 }
 0xe31   : > { %v2962_v31 = vsub.f32 %v2952_v13, %v2960_v28 }
 0xe33   : > { %v2965_v33 = vmul.f32 1.442695, %v2962_v31 }
 0xe34   : > { %v3161_v29 = vpop.xlane.xlu0 %3160  ;;  %v3177_v27 = vpop.permute.xlu1 %3176 }
 0xe35   : > { %v3163_v30 = vsub.f32 %v3153_v17, %v3161_v29  ;;  %v16505_v17 = vld [vmem:[%s16244_s10] ss:$0 sm:$0xff]  ;;  %s17842_s10 = smov 56  }
 0xe37   : > { %v3166_v20 = vmul.f32 1.442695, %v3163_v30 }
 0xe38   : > { %v2957_v32 = vpop.xlane.xlu0 %2956  ;;  %v3175_v42 = vpop.permute.xlu1 %3174 }
 0xe39   : > { %15711 = vpow2.f32 %v3166_v20  ;;  %v2961_v26 = vsub.f32 %v2947_v18, %v2957_v32 }
 0xe3b   : > { %v2963_v34 = vmul.f32 1.442695, %v2961_v26 }
 0xe3c   : > { %v3158_v35 = vpop.xlane.xlu0 %3157 }
 0xe3d   : > { %15713 = vpow2.f32 %v2963_v34  ;;  %v3162_v36 = vsub.f32 %v3148_v22, %v3158_v35 }
 0xe3e   : > { %15715 = vpow2.f32 %v2965_v33 }
 0xe3f   : > { %v3164_v37 = vmul.f32 1.442695, %v3162_v36 }
 0xe40   : > { %v2974_v24 = vpop.permute.xlu0 %2973 }
 0xe41   : > { %15717 = vpow2.f32 %v3164_v37  ;;  %14749 = vmatprep.subr.mxu0 %v2974_v24 }
 0xe42   : > { %14750 = vmatpush3.msra.mxu0 %v2974_v24 }
 0xe43   : > { %14761 = vmatprep.subr.msk.mxu0 %vm1451_vm2, %v3177_v27 }
 0xe46   : > { %v15712_v38 = vpop.eup %15711 }
 0xe47   : > { %v3171_v39 = vsel %vm1424_vm3, %v15712_v38, 0.0 }
 0xe48   : > { %3172 = vadd.xlane.f32.xlu1 %v3171_v39 }
 0xe4a   : > { %v15714_v40 = vpop.eup %15713 }
 0xe4b   : > { %v15716_v41 = vpop.eup %15715  ;;  %14751 = vmatprep.mubr.msk.f32.mxu0 %vm1420_vm4, %v15714_v40  ;;  %v2967_v45 = vsel %vm1420_vm4, %v15714_v40, 0.0 }
 0xe4c   : > { %14752 = vmatmul.mubr.msk.f32.vlgmr.msra.gmra.mxu0 %vm1420_vm4, %v15716_v41  ;;  %v2970_v4 = vsel %vm1424_vm3, %v15716_v41, 0.0 }
 0xe4d   : > { %14762 = vmatpush3.msk.msra.mxu0 %vm1451_vm2, %v3177_v27 }
 0xe4e   : > { %v15718_v43 = vpop.eup %15717  ;;  %14763 = vmatprep.subr.mxu0 %v3175_v42 }
 0xe4f   : > { %14764 = vmatpush3.msra.mxu0 %v3175_v42  ;;  %14765 = vmatprep.mubr.msk.f32.mxu0 %vm1420_vm4, %v15718_v43  ;;  %v3168_v5 = vsel %vm1420_vm4, %v15718_v43, 0.0  ;;  %v13691_v42 = vld [vmem:[%s17827_s25 + $0x30] sm:$0xff] }
 0xe50   : > { %3169 = vadd.xlane.f32.xlu0 %v3168_v5  ;;  %14766 = vmatmul.mubr.msk.f32.vlgmr.msra.gmra.mxu0 %vm1420_vm4, %v15712_v38 }
 0xe51   : > { %14768 = vmatprep.subr.mxu0 %v13690_v44 }
 0xe52   : > { %14769 = vmatpush3.msra.mxu0 %v13690_v44 }
 0xe59   : > { %3432 = vrot.lane.b32.xlu1 %v16402_v63, %s17765_s15 }
 0xe5d   : > { %3430 = vrot.lane.b32.xlu1 %v16420_v0, %s17758_s16 }
 0xe61   : > { %3716 = vrot.lane.b32.xlu1 %v16402_v63, %s17756_s18 }
 0xe65   : > { %3714 = vrot.lane.b32.xlu1 %v16420_v0, %s17760_s0 }
 0xe66   : > { %3434 = vrot.lane.b32.xlu0 %v16400_v62, %s17765_s15 }
 0xe6a   : > { %3428 = vrot.lane.b32.xlu0 %v16409_v10, %s17758_s16 }
 0xe6e   : > { %3718 = vrot.lane.b32.xlu0 %v16400_v62, %s17756_s18 }
 0xe72   : > { %3712 = vrot.lane.b32.xlu0 %v16409_v10, %s17760_s0 }
 0xe89   : > { %2971 = vadd.xlane.f32.xlu1 %v2970_v4 }
 0xe91   : > { %2968 = vadd.xlane.f32.xlu0 %v2967_v45 }
 0xe9a   : > { %3539 = vrot.lane.b32.xlu1 %v16400_v62, %s17841_s11 }
 0xed1   : > { %v3173_v49 = vpop.xlane.xlu1 %3172 }
 0xed5   : > { %v3433_v50 = vpop.permute.xlu1 %3432 }
 0xed9   : > { %v3170_v47 = vpop.xlane.xlu0 %3169  ;;  %v3431_v51 = vpop.permute.xlu1 %3430 }
 0xeda   : > { %15719 = vrcp.f32 %v3170_v47 }
 0xedb   : > { %15721 = vrcp.f32 %v3173_v49 }
 0xedd   : > { %v3435_v48 = vpop.permute.xlu0 %3434  ;;  %v3717_v52 = vpop.permute.xlu1 %3716 }
 0xede   : > { %14778 = vmatprep.subr.msk.mxu0 %vm1334_vm1, %v3435_v48 }
 0xee1   : > { %v3429_v53 = vpop.permute.xlu0 %3428  ;;  %v3715_v55 = vpop.permute.xlu1 %3714 }
 0xee5   : > { %v3719_v57 = vpop.permute.xlu0 %3718 }
 0xee7   : > { %v15720_v61 = vpop.eup %15719 }
 0xee8   : > { %v15722_v0 = vpop.eup %15721 }
 0xee9   : > { %v3713_v3 = vpop.permute.xlu0 %3712 }
 0xf0c   : > { %v14753_v54 = vpop.f32.mrf.mxu0 }
 0xf0e   : > { %v3052_v56 = vpop.f32.mrf.mxu0 }
 0xf10   : > { %v14767_v60 = vpop.f32.mrf.mxu0 }
 0xf11   : > { %v3265_v2 = vmul.f32 %v15722_v0, %v14767_v60 }
 0xf12   : > { %v2972_v8 = vpop.xlane.xlu1 %2971  ;;  %v3253_v10 = vpop.f32.mrf.mxu0 }
 0xf13   : > { %v3264_v1 = vmul.f32 %v15720_v61, %v3253_v10  ;;  %15723 = vrcp.f32 %v2972_v8  ;;  %v13692_v8 = vld [vmem:[%s17827_s25 + $0x38] sm:$0xff] }
 0xf15   : > { %14770 = vmatprep.mubr.msk.f32.mxu0 %vm1334_vm1, %v3264_v1 }
 0xf16   : > { %v3540_v6 = vpop.permute.xlu1 %3539  ;;  %14771 = vmatmul.mubr.msk.f32.vlgmr.msra.gmra.mxu0 %vm1334_vm1, %v3265_v2 }
 0xf17   : > { %14779 = vmatpush3.xpose.msk.msra.mxu0 %vm1334_vm1, %v3435_v48  ;;  %14782 = vmatprep.mubr.msk.f32.mxu0 %vm1334_vm1, %v3429_v53 }
 0xf18   : > { %14780 = vmatprep.subr.msk.mxu0 %vm1334_vm1, %v3433_v50  ;;  %14785 = vmatprep.subr.msk.mxu1 %vm1451_vm2, %v3540_v6 }
 0xf1a   : > { %v2969_v7 = vpop.xlane.xlu0 %2968 }
 0xf1b   : > { %14781 = vmatpush3.xpose.msk.msra.mxu0 %vm1334_vm1, %v3433_v50  ;;  %15725 = vrcp.f32 %v2969_v7 }
 0xf1c   : > { %14797 = vmatprep.subr.msk.mxu0 %vm1334_vm1, %v3719_v57 }
 0xf1e   : > { %14783 = vmatmul.mubr.msk.f32.vlgmr.msra.gmra.mxu0 %vm1334_vm1, %v3431_v51 }
 0xf1f   : > { %14798 = vmatpush3.xpose.msk.msra.mxu0 %vm1334_vm1, %v3719_v57  ;;  %14801 = vmatprep.mubr.msk.f32.mxu0 %vm1334_vm1, %v3713_v3 }
 0xf20   : > { %14799 = vmatprep.subr.msk.mxu0 %vm1334_vm1, %v3717_v52  ;;  %v15724_v9 = vpop.eup %15723 }
 0xf21   : > { %v3064_v13 = vmul.f32 %v15724_v9, %v14753_v54 }
 0xf23   : > { %14800 = vmatpush3.xpose.msk.msra.mxu0 %vm1334_vm1, %v3717_v52 }
 0xf26   : > { %14802 = vmatmul.mubr.msk.f32.vlgmr.msra.gmra.mxu0 %vm1334_vm1, %v3715_v55 }
 0xf28   : > { %v15726_v11 = vpop.eup %15725 }
 0xf29   : > { %v3063_v12 = vmul.f32 %v15726_v11, %v3052_v56 }
 0xf2b   : > { %14775 = vmatprep.mubr.msk.f32.mxu1 %vm1334_vm1, %v3063_v12 }
 0xf2c   : > { %14776 = vmatmul.mubr.msk.f32.vlgmr.msra.gmra.mxu1 %vm1334_vm1, %v3064_v13 }
 0xf2d   : > { %14786 = vmatpush3.msk.msra.mxu1 %vm1451_vm2, %v3540_v6 }
 0xfd6   : > { %v14772_v14 = vpop.f32.mrf.mxu0 }
 0xfd8   : > { %v16502_v15 = vpop.f32.mrf.mxu0 }
 0xfde   : > { %v14784_v16 = vpop.f32.mrf.mxu0 }
 0xfdf   : > { %v3516_v18 = vadd.f32 %v16505_v17, %v14784_v16  ;;  %v13733_v16 = vld [vmem:[%s17826_s29 + $0x1] ss:$0 sm:$0xff] }
 0xfe0   : > { %v3510_v19 = vpop.f32.mrf.mxu0 }
 0xfe1   : > { %v3511_v21 = vadd.f32 %v16505_v17, %v3510_v19  ;;  %v3522_v22 = vsel %vm1424_vm3, %v3516_v18, -inf }
 0xfe2   : > { %3523 = vmax.xlane.f32.xlu0 %v3522_v22 }
 0xfe3   : > { %v3519_v23 = vsel %vm1420_vm4, %v3511_v21, -inf }
 0xfe6   : > { %3520 = vmax.xlane.f32.xlu0 %v3519_v23  ;;  %v14803_v25 = vpop.f32.mrf.mxu0 }
 0xfe7   : > { %v3800_v32 = vadd.f32 %v16505_v17, %v14803_v25 }
 0xfe8   : > { %v3794_v28 = vpop.f32.mrf.mxu0 }
 0xfe9   : > { %v3795_v29 = vadd.f32 %v16505_v17, %v3794_v28  ;;  %v3806_v26 = vsel %vm1424_vm3, %v3800_v32, -inf }
 0xfeb   : > { %v3803_v30 = vsel %vm1420_vm4, %v3795_v29, -inf }
 0xfec   : > { %3804 = vmax.xlane.f32.xlu1 %v3803_v30  ;;  %v14777_v31 = vpop.f32.mrf.mxu1 }
 0xfed   : > { %v16513_v20 = vadd.f32 %v14777_v31, %v14772_v14 }
 0xfee   : > { %v3419_v52 = vpop.f32.mrf.mxu1 }
 0xfef   : > { %v3420_v14 = vadd.f32 %v3419_v52, %v16502_v15 }
 0xffc   : > { %3537 = vrot.lane.b32.xlu0 %v16402_v63, %s17841_s11 }
0x101b   : > { %3807 = vmax.xlane.f32.xlu0 %v3806_v26 }
0x106b   : > { %v3524_v33 = vpop.xlane.xlu0 %3523 }
0x106c   : > { %v3526_v34 = vsub.f32 %v3516_v18, %v3524_v33 }
0x106e   : > { %v3529_v35 = vmul.f32 1.442695, %v3526_v34 }
0x106f   : > { %v3521_v36 = vpop.xlane.xlu0 %3520 }
0x1070   : > { %15727 = vpow2.f32 %v3529_v35  ;;  %v3525_v37 = vsub.f32 %v3511_v21, %v3521_v36 }
0x1072   : > { %v3527_v24 = vmul.f32 1.442695, %v3525_v37 }
0x1073   : > { %v3538_v27 = vpop.permute.xlu0 %3537 }
0x1074   : > { %15729 = vpow2.f32 %v3527_v24  ;;  %14787 = vmatprep.subr.mxu1 %v3538_v27  ;;  %v13741_v24 = vld [vmem:[%s17836_s3 + $0x38] sm:$0xff] }
0x1075   : > { %14788 = vmatpush3.msra.mxu1 %v3538_v27  ;;  %v3805_v43 = vpop.xlane.xlu1 %3804  ;;  %v13740_v27 = vld [vmem:[%s17836_s3 + $0x30] sm:$0xff]  ;;  %14816 = vmatprep.subr.mxu0 %v13741_v24 }
0x1076   : > { %14792 = vmatprep.subr.mxu1 %v13691_v42  ;;  %v3809_v5 = vsub.f32 %v3795_v29, %v3805_v43  ;;  %14817 = vmatpush3.msra.mxu0 %v13741_v24  ;;  %v13751_v43 = vld [vmem:[%s17832_s14 + $0xa0] sm:$0xff] }
0x1077   : > { %14818 = vmatprep.subr.mxu0 %v13740_v27 }
0x1078   : > { %v3811_v44 = vmul.f32 1.442695, %v3809_v5  ;;  %14819 = vmatpush3.msra.mxu0 %v13740_v27  ;;  %v13750_v5 = vld [vmem:[%s17832_s14 + $0x98] sm:$0xff] }
0x107a   : > { %15731 = vpow2.f32 %v3811_v44  ;;  %v13749_v44 = vld [vmem:[%s17832_s14 + $0x90] sm:$0xff] }
0x107d   : > { %v15728_v38 = vpop.eup %15727 }
0x107e   : > { %v3534_v39 = vsel %vm1424_vm3, %v15728_v38, 0.0 }
0x107f   : > { %3535 = vadd.xlane.f32.xlu0 %v3534_v39  ;;  %v13738_v39 = vld [vmem:[%s17836_s3 + $0x20] sm:$0xff] }
0x1081   : > { %v15730_v40 = vpop.eup %15729 }
0x1082   : > { %14789 = vmatprep.mubr.msk.f32.mxu1 %vm1420_vm4, %v15730_v40  ;;  %v3531_v41 = vsel %vm1420_vm4, %v15730_v40, 0.0  ;;  %v13754_v40 = vld [vmem:[%s17832_s14 + $0xb8] sm:$0xff] }
0x1083   : > { %3532 = vadd.xlane.f32.xlu1 %v3531_v41  ;;  %14790 = vmatmul.mubr.msk.f32.vlgmr.msra.gmra.mxu1 %vm1420_vm4, %v15728_v38  ;;  %v13739_v38 = vld [vmem:[%s17836_s3 + $0x28] sm:$0xff]  ;;  %v13753_v41 = vld [vmem:[%s17832_s14 + $0xb0] sm:$0xff] }
0x1084   : > { %14793 = vmatpush3.msra.mxu1 %v13691_v42  ;;  %14820 = vmatprep.subr.mxu0 %v13739_v38  ;;  %v13752_v42 = vld [vmem:[%s17832_s14 + $0xa8] sm:$0xff] }
0x1085   : > { %14821 = vmatpush3.msra.mxu0 %v13739_v38 }
0x1086   : > { %14822 = vmatprep.subr.mxu0 %v13738_v39 }
0x1087   : > { %v15732_v47 = vpop.eup %15731  ;;  %14823 = vmatpush3.msra.mxu0 %v13738_v39 }
0x1088   : > { %v3815_v49 = vsel %vm1420_vm4, %v15732_v47, 0.0 }
0x1094   : > { %3823 = vrot.lane.b32.xlu1 %v16400_v62, %s17754_s26 }
0x1095   : > { %3821 = vrot.lane.b32.xlu0 %v16402_v63, %s17754_s26 }
0x10a4   : > { %v3808_v4 = vpop.xlane.xlu0 %3807 }
0x10a5   : > { %v3810_v45 = vsub.f32 %v3800_v32, %v3808_v4  ;;  %v13748_v4 = vld [vmem:[%s17832_s14 + $0x88] sm:$0xff] }
0x10a7   : > { %v3813_v46 = vmul.f32 1.442695, %v3810_v45  ;;  %v13747_v45 = vld [vmem:[%s17832_s14 + $0x80] sm:$0xff] }
0x10a9   : > { %15733 = vpow2.f32 %v3813_v46 }
0x10b6   : > { %v15734_v48 = vpop.eup %15733 }
0x10b7   : > { %v3818_v50 = vsel %vm1424_vm3, %v15734_v48, 0.0 }
0x10b8   : > { %3816 = vadd.xlane.f32.xlu1 %v3815_v49  ;;  %3819 = vadd.xlane.f32.xlu0 %v3818_v50 }
0x1108   : > { %v3536_v63 = vpop.xlane.xlu0 %3535 }
0x110c   : > { %v3533_v62 = vpop.xlane.xlu1 %3532  ;;  %v3822_v61 = vpop.permute.xlu0 %3821 }
0x110d   : > { %15735 = vrcp.f32 %v3533_v62 }
0x110e   : > { %15737 = vrcp.f32 %v3536_v63  ;;  %v13736_v63 = vld [vmem:[%s17828_s24 + $0x1] ss:$0 sm:$0xff] }
0x1110   : > { %v3824_v51 = vpop.permute.xlu1 %3823 }
0x1111   : > { %14804 = vmatprep.subr.msk.mxu1 %vm1451_vm2, %v3824_v51 }
0x111a   : > { %v15736_v54 = vpop.eup %15735 }
0x111b   : > { %v15738_v56 = vpop.eup %15737 }
0x1141   : > { %v3817_v10 = vpop.xlane.xlu1 %3816  ;;  %v3820_v0 = vpop.xlane.xlu0 %3819 }
0x1142   : > { %15739 = vrcp.f32 %v3817_v10  ;;  %v13745_v10 = vld [vmem:[%s17832_s14 + $0x70] sm:$0xff] }
0x1143   : > { %v14791_v53 = vpop.f32.mrf.mxu1  ;;  %15741 = vrcp.f32 %v3820_v0  ;;  %v13744_v0 = vld [vmem:[%s17832_s14 + $0x68] sm:$0xff] }
0x1144   : > { %v3628_v60 = vmul.f32 %v15738_v56, %v14791_v53  ;;  %v13737_v56 = vld [vmem:[%s17825_s30 + $0x1] ss:$0 sm:$0xff] }
0x1145   : > { %v3616_v55 = vpop.f32.mrf.mxu1 }
0x1146   : > { %v3627_v57 = vmul.f32 %v15736_v54, %v3616_v55 }
0x1148   : > { %14794 = vmatprep.mubr.msk.f32.mxu1 %vm1334_vm1, %v3627_v57 }
0x1149   : > { %14795 = vmatmul.mubr.msk.f32.vlgmr.msra.gmra.mxu1 %vm1334_vm1, %v3628_v60 }
0x114a   : > { %14805 = vmatpush3.msk.msra.mxu1 %vm1451_vm2, %v3824_v51  ;;  %14808 = vmatprep.mubr.msk.f32.mxu1 %vm1420_vm4, %v15732_v47 }
0x114b   : > { %14806 = vmatprep.subr.mxu1 %v3822_v61 }
0x114c   : > { %14807 = vmatpush3.msra.mxu1 %v3822_v61 }
0x114d   : > { %14809 = vmatmul.mubr.msk.f32.vlgmr.msra.gmra.mxu1 %vm1420_vm4, %v15734_v48  ;;  %14811 = vmatprep.subr.mxu1 %v13692_v8 }
0x114e   : > { %14812 = vmatpush3.msra.mxu1 %v13692_v8  ;;  %v13746_v8 = vld [vmem:[%s17832_s14 + $0x78] sm:$0xff] }
0x114f   : > { %v15740_v7 = vpop.eup %15739  ;;  %14827 = vmatprep.subr.mxu1 %v13754_v40 }
0x1150   : > { %v15742_v11 = vpop.eup %15741 }
0x1209   : > { %v14796_v1 = vpop.f32.mrf.mxu1 }
0x120a   : > { %v3711_v2 = vadd.f32 %v14796_v1, %v16513_v20  ;;  %v13743_v1 = vld [vmem:[%s17832_s14 + $0x60] sm:$0xff] }
0x120b   : > { %v3701_v3 = vpop.f32.mrf.mxu1 }
0x120c   : > { %v3710_v19 = vadd.f32 %v3701_v3, %v3420_v14 }
0x120d   : > { %v14810_v6 = vpop.f32.mrf.mxu1 }
0x120e   : > { %v3912_v13 = vmul.f32 %v15742_v11, %v14810_v6 }
0x120f   : > { %v3900_v9 = vpop.f32.mrf.mxu1 }
0x1210   : > { %v3911_v12 = vmul.f32 %v15740_v7, %v3900_v9 }
0x1212   : > { %14813 = vmatprep.mubr.msk.f32.mxu1 %vm1334_vm1, %v3911_v12 }
0x1213   : > { %14814 = vmatmul.mubr.msk.f32.vlgmr.msra.gmra.mxu1 %vm1334_vm1, %v3912_v13  ;;  %v13759_v13 = vld [vmem:[%s17830_s19 + $0x1] ss:$0 sm:$0xff] }
0x1214   : > { %14828 = vmatpush3.msra.mxu1 %v13754_v40 }
0x1215   : > { %14829 = vmatprep.subr.mxu1 %v13753_v41 }
0x1216   : > { %14830 = vmatpush3.msra.mxu1 %v13753_v41 }
0x1217   : > { %14831 = vmatprep.subr.mxu1 %v13752_v42 }
0x1218   : > { %14832 = vmatpush3.msra.mxu1 %v13752_v42  ;;  %v13764_v42 = vld [vmem:[%s17835_s6 + $0x1] ss:$0 sm:$0xff] }
0x1219   : > { %14833 = vmatprep.subr.mxu1 %v13751_v43 }
0x121a   : > { %14834 = vmatpush3.msra.mxu1 %v13751_v43 }
0x121b   : > { %14835 = vmatprep.subr.mxu1 %v13750_v5 }
0x121c   : > { %14836 = vmatpush3.msra.mxu1 %v13750_v5 }
0x121d   : > { %14837 = vmatprep.subr.mxu1 %v13749_v44 }
0x121e   : > { %14838 = vmatpush3.msra.mxu1 %v13749_v44 }
0x121f   : > { %14839 = vmatprep.subr.mxu1 %v13748_v4 }
0x1220   : > { %14840 = vmatpush3.msra.mxu1 %v13748_v4 }
0x1221   : > { %14841 = vmatprep.subr.mxu1 %v13747_v45 }
0x1222   : > { %14842 = vmatpush3.msra.mxu1 %v13747_v45  ;;  %v13765_v45 = vld [vmem:[%s17833_s12 + $0x1] ss:$0 sm:$0xff] }
0x1223   : > { %14843 = vmatprep.subr.mxu1 %v13746_v8 }
0x1224   : > { %14844 = vmatpush3.msra.mxu1 %v13746_v8 }
0x1225   : > { %14845 = vmatprep.subr.mxu1 %v13745_v10 }
0x1226   : > { %14846 = vmatpush3.msra.mxu1 %v13745_v10 }
0x1227   : > { %14847 = vmatprep.subr.mxu1 %v13744_v0 }
0x1228   : > { %14848 = vmatpush3.msra.mxu1 %v13744_v0 }
0x1229   : > { %14849 = vmatprep.subr.mxu1 %v13743_v1 }
0x122a   : > { %14850 = vmatpush3.msra.mxu1 %v13743_v1 }
0x12d3   : > { %v14815_v18 = vpop.f32.mrf.mxu1 }
0x12d4   : > { %v3995_v21 = vadd.f32 %v14815_v18, %v3711_v2  ;;  %v13756_v2 = vld [vmem:[%s17834_s8 + $0x1] ss:$0 sm:$0xff] }
0x12d5   : > { %v3985_v22 = vpop.f32.mrf.mxu1 }
0x12d6   : > { %v4003_v23 = vadd.f32 %v13733_v16, %v3995_v21  ;;  %v3994_v25 = vadd.f32 %v3985_v22, %v3710_v19 }
0x12d8   : > { %v4002_v28 = vadd.f32 %v13733_v16, %v3994_v25  ;;  %v4005_v29 = vadd.f32 %v4003_v23, %v16393_v59 }
0x12da   : > { %v4013_v30 = vsel %vm2479_vm5, %v4005_v29, 0.0  ;;  %v4004_v31 = vadd.f32 %v4002_v28, %v16391_v58 }
0x12db   : > { %4014 = vadd.xlane.f32.xlu0 %v4013_v30 }
0x12dc   : > { %v4010_v20 = vsel %vm1238_vm0, %v4004_v31, 0.0 }
0x12dd   : > { %4011 = vadd.xlane.f32.xlu1 %v4010_v20 }
0x1364   : > { %v4015_v15 = vpop.xlane.xlu0 %4014 }
0x1365   : > { %v4017_v32 = vmul.f32 0.03125, %v4015_v15 }
0x1366   : > { %v4012_v26 = vpop.xlane.xlu1 %4011 }
0x1367   : > { %v4019_v33 = vsub.f32 %v4005_v29, %v4017_v32  ;;  %v4016_v34 = vmul.f32 0.03125, %v4012_v26 }
0x1369   : > { %v4018_v35 = vsub.f32 %v4004_v31, %v4016_v34  ;;  %v4021_v36 = vmul.f32 %v4019_v33, %v4019_v33 }
0x136b   : > { %v4025_v59 = vsel %vm2479_vm5, %v4021_v36, 0.0  ;;  %v4020_v37 = vmul.f32 %v4018_v35, %v4018_v35  ;;  %v13768_v36 = vld [vmem:[%s17831_s17 + $0x50] sm:$0xff] }
0x136c   : > { %4026 = vadd.xlane.f32.xlu0 %v4025_v59  ;;  %v13767_v59 = vld [vmem:[%s17831_s17 + $0x48] sm:$0xff] }
0x136d   : > { %v4022_v58 = vsel %vm1238_vm0, %v4020_v37, 0.0  ;;  %v13766_v37 = vld [vmem:[%s17831_s17 + $0x40] sm:$0xff] }
0x136e   : > { %4023 = vadd.xlane.f32.xlu1 %v4022_v58 }
0x13f5   : > { %v4027_v46 = vpop.xlane.xlu0 %4026 }
0x13f6   : > { %v4029_v47 = vmul.f32 0.03125, %v4027_v46 }
0x13f7   : > { %v4024_v48 = vpop.xlane.xlu1 %4023 }
0x13f8   : > { %v4031_v49 = vadd.f32 1e-05, %v4029_v47  ;;  %v4028_v50 = vmul.f32 0.03125, %v4024_v48 }
0x13fa   : > { %15743 = vrsqrt.f32 %v4031_v49  ;;  %v4030_v62 = vadd.f32 1e-05, %v4028_v50  ;;  %v13776_v49 = vld [vmem:[%s17829_s21 + $0x2] ss:$0 sm:$0xff]  ;;  %s17864_s21 = sld [smem:[#allocation27_spill]] }
0x13fc   : > { %15745 = vrsqrt.f32 %v4030_v62 }
0x1407   : > { %v15744_v51 = vpop.eup %15743 }
0x1408   : > { %v4035_v52 = vmul.f32 %v15744_v51, %v4019_v33 }
0x1409   : > { %v15746_v53 = vpop.eup %15745 }
0x140a   : > { %v4034_v54 = vmul.f32 %v15746_v53, %v4018_v35  ;;  %v4043_v55 = vmul.f32 %v13736_v63, %v4035_v52  ;;  %v13769_v35 = vld [vmem:[%s17831_s17 + $0x58] sm:$0xff]  ;;  %s17862_s17 = smov 80  }
0x140b   : > { %14854 = vmatprep.subr.mxu0 %v13769_v35 }
0x140c   : > { %v4042_v57 = vmul.f32 %v13736_v63, %v4034_v54  ;;  %v4051_v61 = vadd.f32 %v13737_v56, %v4043_v55 }
0x140e   : > { %v4050_v60 = vadd.f32 %v13737_v56, %v4042_v57 }
0x1410   : > { %14824 = vmatprep.mubr.msk.f32.mxu0 %vm1238_vm0, %v4050_v60 }
0x1411   : > { %14825 = vmatmul.mubr.msk.f32.vlgmr.msra.gmra.mxu0 %vm1238_vm0, %v4051_v61 }
0x1412   : > { %14855 = vmatpush3.msra.mxu0 %v13769_v35 }
0x1413   : > { %14856 = vmatprep.subr.mxu0 %v13768_v36 }
0x1414   : > { %14857 = vmatpush3.msra.mxu0 %v13768_v36 }
0x1415   : > { %14858 = vmatprep.subr.mxu0 %v13767_v59 }
0x1416   : > { %14859 = vmatpush3.msra.mxu0 %v13767_v59 }
0x1417   : > { %14860 = vmatprep.subr.mxu0 %v13766_v37 }
0x1418   : > { %14861 = vmatpush3.msra.mxu0 %v13766_v37 }
0x14d1   : > { %v14826_v3 = vpop.f32.mrf.mxu0 }
0x14d2   : > { %v4158_v6 = vadd.f32 %v14826_v3, %v13756_v2 }
0x14d3   : > { %v4152_v7 = vpop.f32.mrf.mxu0 }
0x14d4   : > { %v4153_v9 = vadd.f32 %v13756_v2, %v4152_v7  ;;  %v4162_v12 = vmax.f32 %v4158_v6, 0.0 }
0x14d6   : > { %v4161_v11 = vmax.f32 %v4153_v9, 0.0 }
0x14d8   : > { %14851 = vmatprep.mubr.msk.f32.mxu1 %vm2633_vm6, %v4161_v11 }
0x14d9   : > { %14852 = vmatmul.mubr.msk.f32.vlgmr.msra.gmra.mxu1 %vm2633_vm6, %v4162_v12 }
0x1599   : > { %v14853_v14 = vpop.f32.mrf.mxu1 }
0x159a   : > { %v4247_v16 = vadd.f32 %v14853_v14, %v13759_v13 }
0x159b   : > { %v4241_v18 = vpop.f32.mrf.mxu1 }
0x159c   : > { %v4242_v19 = vadd.f32 %v13759_v13, %v4241_v18  ;;  %v4251_v21 = vadd.f32 %v4247_v16, %v4051_v61 }
0x159e   : > { %v4259_v22 = vsel %vm2479_vm5, %v4251_v21, 0.0  ;;  %v4250_v23 = vadd.f32 %v4242_v19, %v4050_v60 }
0x159f   : > { %4260 = vadd.xlane.f32.xlu0 %v4259_v22 }
0x15a0   : > { %v4256_v25 = vsel %vm1238_vm0, %v4250_v23, 0.0 }
0x15a1   : > { %4257 = vadd.xlane.f32.xlu1 %v4256_v25 }
0x1628   : > { %v4261_v28 = vpop.xlane.xlu0 %4260 }
0x1629   : > { %v4263_v29 = vmul.f32 0.03125, %v4261_v28 }
0x162a   : > { %v4258_v30 = vpop.xlane.xlu1 %4257 }
0x162b   : > { %v4265_v31 = vsub.f32 %v4251_v21, %v4263_v29  ;;  %v4262_v20 = vmul.f32 0.03125, %v4258_v30 }
0x162d   : > { %v4264_v15 = vsub.f32 %v4250_v23, %v4262_v20  ;;  %v4267_v32 = vmul.f32 %v4265_v31, %v4265_v31 }
0x162f   : > { %v4271_v26 = vsel %vm2479_vm5, %v4267_v32, 0.0  ;;  %v4266_v33 = vmul.f32 %v4264_v15, %v4264_v15 }
0x1630   : > { %4272 = vadd.xlane.f32.xlu0 %v4271_v26 }
0x1631   : > { %v4268_v34 = vsel %vm1238_vm0, %v4266_v33, 0.0 }
0x1632   : > { %4269 = vadd.xlane.f32.xlu1 %v4268_v34 }
0x16b9   : > { %v4273_v58 = vpop.xlane.xlu0 %4272 }
0x16ba   : > { %v4275_v24 = vmul.f32 0.03125, %v4273_v58  ;;  %v13772_v58 = vld [vmem:[%s17827_s25 + $0x48] sm:$0xff] }
0x16bb   : > { %v4270_v27 = vpop.xlane.xlu1 %4269 }
0x16bc   : > { %v4277_v38 = vadd.f32 1e-05, %v4275_v24  ;;  %v4274_v39 = vmul.f32 0.03125, %v4270_v27 }
0x16be   : > { %15747 = vrsqrt.f32 %v4277_v38  ;;  %v4276_v40 = vadd.f32 1e-05, %v4274_v39  ;;  %v13771_v38 = vld [vmem:[%s17827_s25 + $0x40] sm:$0xff] }
0x16c0   : > { %15749 = vrsqrt.f32 %v4276_v40 }
0x16cb   : > { %v15748_v41 = vpop.eup %15747 }
0x16cc   : > { %v4281_v43 = vmul.f32 %v15748_v41, %v4265_v31 }
0x16cd   : > { %v15750_v5 = vpop.eup %15749 }
0x16ce   : > { %v4280_v44 = vmul.f32 %v15750_v5, %v4264_v15  ;;  %v4289_v4 = vmul.f32 %v13764_v42, %v4281_v43 }
0x16d0   : > { %v4288_v46 = vmul.f32 %v13764_v42, %v4280_v44  ;;  %v16584_v48 = vadd.f32 %v13765_v45, %v4289_v4 }
0x16d2   : > { %v16582_v47 = vadd.f32 %v13765_v45, %v4288_v46 }
0x16d4   : > { %14862 = vmatprep.mubr.msk.f32.mxu0 %vm1238_vm0, %v16582_v47 }
0x16d5   : > { %14863 = vmatmul.mubr.msk.f32.vlgmr.msra.gmra.mxu0 %vm1238_vm0, %v16584_v48 }
0x1795   : > { %v14864_v50 = vpop.f32.mrf.mxu0 }
0x1796   : > { %v16591_v62 = vadd.f32 %v14864_v50, %v13776_v49 }
0x1797   : > { %v4390_v51 = vpop.f32.mrf.mxu0 }
0x1798   : > { %v16593_v63 = vadd.f32 %v13776_v49, %v4390_v51  ;;  %4405 = vrot.lane.b32.xlu1 %v16591_v62, %s17771_s1  ;;  %v16611_v53 = vmul.f32 0.35355338, %v16591_v62 }
0x179a   : > { %4403 = vrot.lane.b32.xlu0 %v16593_v63, %s17771_s1  ;;  %v16600_v52 = vmul.f32 0.35355338, %v16593_v63 }
0x179c   : > { %4608 = vrot.lane.b32.xlu1 %v16591_v62, %s17767_s28  ;;  %14869 = vmatprep.mubr.msk.f32.mxu0 %vm1334_vm1, %v16600_v52 }
0x179e   : > { %4602 = vrot.lane.b32.xlu0 %v16600_v52, %s17769_s2 }
0x17a0   : > { %4606 = vrot.lane.b32.xlu1 %v16593_v63, %s17767_s28 }
0x17a4   : > { %4604 = vrot.lane.b32.xlu1 %v16611_v53, %s17769_s2 }
0x17a8   : > { %4512 = vrot.lane.b32.xlu1 %v16591_v62, %s17763_s7 }
0x180a   : > { %v4406_v54 = vpop.permute.xlu1 %4405 }
0x180b   : > { %14865 = vmatprep.subr.msk.mxu0 %vm1334_vm1, %v4406_v54 }
0x180c   : > { %14866 = vmatpush3.xpose.msk.msra.mxu0 %vm1334_vm1, %v4406_v54  ;;  %v4404_v55 = vpop.permute.xlu0 %4403 }
0x180d   : > { %14867 = vmatprep.subr.msk.mxu0 %vm1334_vm1, %v4404_v55 }
0x180e   : > { %v4609_v56 = vpop.permute.xlu1 %4608 }
0x180f   : > { %14879 = vmatprep.subr.msk.mxu1 %vm1334_vm1, %v4609_v56 }
0x1810   : > { %14868 = vmatpush3.xpose.msk.msra.mxu0 %vm1334_vm1, %v4404_v55  ;;  %14880 = vmatpush3.xpose.msk.msra.mxu1 %vm1334_vm1, %v4609_v56  ;;  %v4603_v57 = vpop.permute.xlu0 %4602 }
0x1811   : > { %14883 = vmatprep.mubr.msk.f32.mxu1 %vm1334_vm1, %v4603_v57 }
0x1812   : > { %v4607_v60 = vpop.permute.xlu1 %4606 }
0x1813   : > { %14870 = vmatmul.mubr.msk.f32.vlgmr.msra.gmra.mxu0 %vm1334_vm1, %v16611_v53  ;;  %14881 = vmatprep.subr.msk.mxu1 %vm1334_vm1, %v4607_v60 }
0x1814   : > { %14882 = vmatpush3.xpose.msk.msra.mxu1 %vm1334_vm1, %v4607_v60 }
0x1815   : > { %14898 = vmatprep.subr.mxu1 %v13771_v38 }
0x1816   : > { %v4605_v61 = vpop.permute.xlu1 %4604 }
0x1817   : > { %14884 = vmatmul.mubr.msk.f32.vlgmr.msra.gmra.mxu1 %vm1334_vm1, %v4605_v61 }
0x1818   : > { %14899 = vmatpush3.msra.mxu1 %v13771_v38 }
0x181a   : > { %v4513_v8 = vpop.permute.xlu1 %4512 }
0x181b   : > { %14872 = vmatprep.subr.msk.mxu0 %vm1451_vm2, %v4513_v8 }
0x181c   : > { %14873 = vmatpush3.msk.msra.mxu0 %vm1451_vm2, %v4513_v8 }
0x18d3   : > { %v14871_v10 = vpop.f32.mrf.mxu0 }
0x18d4   : > { %v4489_v0 = vadd.f32 %v16505_v17, %v14871_v10 }
0x18d5   : > { %v4483_v2 = vpop.f32.mrf.mxu0 }
0x18d6   : > { %v4495_v1 = vsel %vm1424_vm3, %v4489_v0, -inf  ;;  %v4484_v7 = vadd.f32 %v16505_v17, %v4483_v2 }
0x18d7   : > { %v14885_v3 = vpop.f32.mrf.mxu1  ;;  %4496 = vmax.xlane.f32.xlu1 %v4495_v1 }
0x18d8   : > { %v4690_v6 = vadd.f32 %v16505_v17, %v14885_v3  ;;  %v4492_v13 = vsel %vm1420_vm4, %v4484_v7, -inf }
0x18d9   : > { %v4684_v11 = vpop.f32.mrf.mxu1 }
0x18da   : > { %v4696_v9 = vsel %vm1424_vm3, %v4690_v6, -inf  ;;  %v4685_v12 = vadd.f32 %v16505_v17, %v4684_v11 }
0x18db   : > { %4697 = vmax.xlane.f32.xlu0 %v4696_v9 }
0x18dc   : > { %v4693_v14 = vsel %vm1420_vm4, %v4685_v12, -inf }
0x18df   : > { %4493 = vmax.xlane.f32.xlu0 %v4492_v13 }
0x18e3   : > { %4694 = vmax.xlane.f32.xlu0 %v4693_v14 }
0x18e8   : > { %4713 = vrot.lane.b32.xlu1 %v16591_v62, %s17842_s10 }
0x18ec   : > { %4711 = vrot.lane.b32.xlu1 %v16593_v63, %s17842_s10 }
0x18f9   : > { %4510 = vrot.lane.b32.xlu0 %v16593_v63, %s17763_s7 }
0x1960   : > { %v4497_v16 = vpop.xlane.xlu1 %4496 }
0x1961   : > { %v4499_v21 = vsub.f32 %v4489_v0, %v4497_v16 }
0x1963   : > { %v4502_v28 = vmul.f32 1.442695, %v4499_v21 }
0x1964   : > { %v4698_v18 = vpop.xlane.xlu0 %4697  ;;  %v4714_v32 = vpop.permute.xlu1 %4713 }
0x1965   : > { %v4700_v19 = vsub.f32 %v4690_v6, %v4698_v18 }
0x1967   : > { %v4703_v22 = vmul.f32 1.442695, %v4700_v19 }
0x1968   : > { %v4494_v23 = vpop.xlane.xlu0 %4493  ;;  %v4712_v36 = vpop.permute.xlu1 %4711 }
0x1969   : > { %15751 = vpow2.f32 %v4703_v22  ;;  %v4498_v25 = vsub.f32 %v4484_v7, %v4494_v23 }
0x196b   : > { %v4500_v29 = vmul.f32 1.442695, %v4498_v25 }
0x196c   : > { %v4695_v30 = vpop.xlane.xlu0 %4694 }
0x196d   : > { %15753 = vpow2.f32 %v4500_v29  ;;  %v4699_v31 = vsub.f32 %v4685_v12, %v4695_v30 }
0x196e   : > { %15755 = vpow2.f32 %v4502_v28 }
0x196f   : > { %v4701_v20 = vmul.f32 1.442695, %v4699_v31 }
0x1970   : > { %v4511_v15 = vpop.permute.xlu0 %4510 }
0x1971   : > { %15757 = vpow2.f32 %v4701_v20  ;;  %14874 = vmatprep.subr.mxu0 %v4511_v15 }
0x1972   : > { %14875 = vmatpush3.msra.mxu0 %v4511_v15 }
0x1973   : > { %14886 = vmatprep.subr.msk.mxu0 %vm1451_vm2, %v4714_v32 }
0x1976   : > { %v15752_v26 = vpop.eup %15751 }
0x1977   : > { %v4708_v33 = vsel %vm1424_vm3, %v15752_v26, 0.0 }
0x1978   : > { %4709 = vadd.xlane.f32.xlu1 %v4708_v33 }
0x197a   : > { %v15754_v34 = vpop.eup %15753 }
0x197b   : > { %v15756_v35 = vpop.eup %15755  ;;  %14876 = vmatprep.mubr.msk.f32.mxu0 %vm1420_vm4, %v15754_v34  ;;  %v4504_v27 = vsel %vm1420_vm4, %v15754_v34, 0.0 }
0x197c   : > { %14877 = vmatmul.mubr.msk.f32.vlgmr.msra.gmra.mxu0 %vm1420_vm4, %v15756_v35  ;;  %v4507_v24 = vsel %vm1424_vm3, %v15756_v35, 0.0  ;;  %v13773_v35 = vld [vmem:[%s17827_s25 + $0x50] sm:$0xff] }
0x197d   : > { %14887 = vmatpush3.msk.msra.mxu0 %vm1451_vm2, %v4714_v32 }
0x197e   : > { %v15758_v59 = vpop.eup %15757  ;;  %14888 = vmatprep.subr.mxu0 %v4712_v36 }
0x197f   : > { %14889 = vmatpush3.msra.mxu0 %v4712_v36  ;;  %14890 = vmatprep.mubr.msk.f32.mxu0 %vm1420_vm4, %v15758_v59  ;;  %v4705_v37 = vsel %vm1420_vm4, %v15758_v59, 0.0 }
0x1980   : > { %4706 = vadd.xlane.f32.xlu0 %v4705_v37  ;;  %14891 = vmatmul.mubr.msk.f32.vlgmr.msra.gmra.mxu0 %vm1420_vm4, %v15752_v26 }
0x1981   : > { %14893 = vmatprep.subr.mxu0 %v13772_v58 }
0x1982   : > { %14894 = vmatpush3.msra.mxu0 %v13772_v58 }
0x1989   : > { %4969 = vrot.lane.b32.xlu1 %v16593_v63, %s17765_s15 }
0x198d   : > { %4967 = vrot.lane.b32.xlu1 %v16611_v53, %s17758_s16 }
0x1991   : > { %5253 = vrot.lane.b32.xlu1 %v16593_v63, %s17756_s18 }
0x1995   : > { %5251 = vrot.lane.b32.xlu1 %v16611_v53, %s17760_s0 }
0x1996   : > { %4971 = vrot.lane.b32.xlu0 %v16591_v62, %s17765_s15 }
0x199a   : > { %4965 = vrot.lane.b32.xlu0 %v16600_v52, %s17758_s16  ;;  %s17762_s16 = sshll.u32 %s17882_s23, 3  ;;  %s17871_s23 = sld [smem:[#allocation35_spill]] }
0x199e   : > { %5255 = vrot.lane.b32.xlu0 %v16591_v62, %s17756_s18  ;;  %s17844_s18 = sld [smem:[#allocation3_spill]] }
0x19a2   : > { %5249 = vrot.lane.b32.xlu0 %v16600_v52, %s17760_s0 }
0x19a4   : > { %s1204_s0 = scalar_lea.vmem %s17844_s18, %s17762_s16  ;;  %s17845_s18 = sld [smem:[#allocation20_spill]] }
0x19a5   : > { %s17847_s16 = smov 104  }
0x19b9   : > { %4508 = vadd.xlane.f32.xlu1 %v4507_v24 }
0x19c1   : > { %4505 = vadd.xlane.f32.xlu0 %v4504_v27 }
0x19ca   : > { %5076 = vrot.lane.b32.xlu1 %v16591_v62, %s17841_s11 }
0x1a01   : > { %v4710_v41 = vpop.xlane.xlu1 %4709 }
0x1a05   : > { %v4970_v42 = vpop.permute.xlu1 %4969 }
0x1a09   : > { %v4707_v39 = vpop.xlane.xlu0 %4706  ;;  %v4968_v43 = vpop.permute.xlu1 %4967 }
0x1a0a   : > { %15759 = vrcp.f32 %v4707_v39 }
0x1a0b   : > { %15761 = vrcp.f32 %v4710_v41 }
0x1a0d   : > { %v4972_v40 = vpop.permute.xlu0 %4971  ;;  %v5254_v5 = vpop.permute.xlu1 %5253 }
0x1a0e   : > { %14903 = vmatprep.subr.msk.mxu0 %vm1334_vm1, %v4972_v40 }
0x1a11   : > { %v4966_v44 = vpop.permute.xlu0 %4965  ;;  %v5252_v45 = vpop.permute.xlu1 %5251 }
0x1a15   : > { %v5256_v49 = vpop.permute.xlu0 %5255 }
0x1a17   : > { %v15760_v51 = vpop.eup %15759 }
0x1a18   : > { %v15762_v54 = vpop.eup %15761 }
0x1a19   : > { %v5250_v57 = vpop.permute.xlu0 %5249 }
0x1a3c   : > { %v14878_v4 = vpop.f32.mrf.mxu0 }
0x1a3e   : > { %v4589_v46 = vpop.f32.mrf.mxu0 }
0x1a40   : > { %v14892_v50 = vpop.f32.mrf.mxu0 }
0x1a41   : > { %v4802_v56 = vmul.f32 %v15762_v54, %v14892_v50 }
0x1a42   : > { %v4509_v52 = vpop.xlane.xlu1 %4508  ;;  %v4790_v53 = vpop.f32.mrf.mxu0 }
0x1a43   : > { %v4801_v55 = vmul.f32 %v15760_v51, %v4790_v53  ;;  %15763 = vrcp.f32 %v4509_v52  ;;  %v13774_v51 = vld [vmem:[%s17827_s25 + $0x58] sm:$0xff]  ;;  %s17866_s25 = sld [smem:[#allocation33_spill]] }
0x1a45   : > { %14895 = vmatprep.mubr.msk.f32.mxu0 %vm1334_vm1, %v4801_v55 }
0x1a46   : > { %v5077_v60 = vpop.permute.xlu1 %5076  ;;  %14896 = vmatmul.mubr.msk.f32.vlgmr.msra.gmra.mxu0 %vm1334_vm1, %v4802_v56 }
0x1a47   : > { %14904 = vmatpush3.xpose.msk.msra.mxu0 %vm1334_vm1, %v4972_v40  ;;  %14907 = vmatprep.mubr.msk.f32.mxu0 %vm1334_vm1, %v4966_v44 }
0x1a48   : > { %14905 = vmatprep.subr.msk.mxu0 %vm1334_vm1, %v4970_v42  ;;  %14910 = vmatprep.subr.msk.mxu1 %vm1451_vm2, %v5077_v60 }
0x1a4a   : > { %v4506_v61 = vpop.xlane.xlu0 %4505 }
0x1a4b   : > { %14906 = vmatpush3.xpose.msk.msra.mxu0 %vm1334_vm1, %v4970_v42  ;;  %15765 = vrcp.f32 %v4506_v61 }
0x1a4c   : > { %14922 = vmatprep.subr.msk.mxu0 %vm1334_vm1, %v5256_v49 }
0x1a4e   : > { %14908 = vmatmul.mubr.msk.f32.vlgmr.msra.gmra.mxu0 %vm1334_vm1, %v4968_v43 }
0x1a4f   : > { %14923 = vmatpush3.xpose.msk.msra.mxu0 %vm1334_vm1, %v5256_v49  ;;  %14926 = vmatprep.mubr.msk.f32.mxu0 %vm1334_vm1, %v5250_v57 }
0x1a50   : > { %14924 = vmatprep.subr.msk.mxu0 %vm1334_vm1, %v5254_v5  ;;  %v15764_v8 = vpop.eup %15763 }
0x1a51   : > { %v4601_v1 = vmul.f32 %v15764_v8, %v14878_v4 }
0x1a53   : > { %14925 = vmatpush3.xpose.msk.msra.mxu0 %vm1334_vm1, %v5254_v5 }
0x1a56   : > { %14927 = vmatmul.mubr.msk.f32.vlgmr.msra.gmra.mxu0 %vm1334_vm1, %v5252_v45 }
0x1a58   : > { %v15766_v10 = vpop.eup %15765 }
0x1a59   : > { %v4600_v0 = vmul.f32 %v15766_v10, %v4589_v46 }
0x1a5b   : > { %14900 = vmatprep.mubr.msk.f32.mxu1 %vm1334_vm1, %v4600_v0 }
0x1a5c   : > { %14901 = vmatmul.mubr.msk.f32.vlgmr.msra.gmra.mxu1 %vm1334_vm1, %v4601_v1 }
0x1a5d   : > { %14911 = vmatpush3.msk.msra.mxu1 %vm1451_vm2, %v5077_v60 }
0x1b06   : > { %v14897_v2 = vpop.f32.mrf.mxu0 }
0x1b08   : > { %v16693_v3 = vpop.f32.mrf.mxu0 }
0x1b0e   : > { %v14909_v6 = vpop.f32.mrf.mxu0 }
0x1b0f   : > { %v5053_v7 = vadd.f32 %v16505_v17, %v14909_v6  ;;  %v13815_v6 = vld [vmem:[%s17826_s29 + $0x2] ss:$0 sm:$0xff]  ;;  %s17867_s29 = sld [smem:[#allocation34_spill]] }
0x1b10   : > { %v5047_v9 = vpop.f32.mrf.mxu0 }
0x1b11   : > { %v5048_v11 = vadd.f32 %v16505_v17, %v5047_v9  ;;  %v5059_v12 = vsel %vm1424_vm3, %v5053_v7, -inf }
0x1b12   : > { %5060 = vmax.xlane.f32.xlu0 %v5059_v12 }
0x1b13   : > { %v5056_v13 = vsel %vm1420_vm4, %v5048_v11, -inf }
0x1b16   : > { %5057 = vmax.xlane.f32.xlu0 %v5056_v13  ;;  %v14928_v14 = vpop.f32.mrf.mxu0 }
0x1b17   : > { %v5337_v23 = vadd.f32 %v16505_v17, %v14928_v14 }
0x1b18   : > { %v5331_v16 = vpop.f32.mrf.mxu0 }
0x1b19   : > { %v5332_v18 = vadd.f32 %v16505_v17, %v5331_v16  ;;  %v5343_v25 = vsel %vm1424_vm3, %v5337_v23, -inf }
0x1b1b   : > { %v5340_v19 = vsel %vm1420_vm4, %v5332_v18, -inf }
0x1b1c   : > { %5341 = vmax.xlane.f32.xlu1 %v5340_v19  ;;  %v14902_v21 = vpop.f32.mrf.mxu1 }
0x1b1d   : > { %v16701_v22 = vadd.f32 %v14902_v21, %v14897_v2 }
0x1b1e   : > { %v4956_v43 = vpop.f32.mrf.mxu1 }
0x1b1f   : > { %v4957_v55 = vadd.f32 %v4956_v43, %v16693_v3 }
0x1b2c   : > { %5074 = vrot.lane.b32.xlu0 %v16593_v63, %s17841_s11 }
0x1b4b   : > { %5344 = vmax.xlane.f32.xlu0 %v5343_v25 }
0x1b9b   : > { %v5061_v28 = vpop.xlane.xlu0 %5060 }
0x1b9c   : > { %v5063_v29 = vsub.f32 %v5053_v7, %v5061_v28 }
0x1b9e   : > { %v5066_v30 = vmul.f32 1.442695, %v5063_v29 }
0x1b9f   : > { %v5058_v31 = vpop.xlane.xlu0 %5057 }
0x1ba0   : > { %15767 = vpow2.f32 %v5066_v30  ;;  %v5062_v20 = vsub.f32 %v5048_v11, %v5058_v31 }
0x1ba2   : > { %v5064_v15 = vmul.f32 1.442695, %v5062_v20  ;;  %v13823_v20 = vld [vmem:[%s17836_s3 + $0x58] sm:$0xff] }
0x1ba3   : > { %v5075_v32 = vpop.permute.xlu0 %5074  ;;  %14941 = vmatprep.subr.mxu0 %v13823_v20 }
0x1ba4   : > { %15769 = vpow2.f32 %v5064_v15  ;;  %14912 = vmatprep.subr.mxu1 %v5075_v32  ;;  %v13822_v15 = vld [vmem:[%s17836_s3 + $0x50] sm:$0xff]  ;;  %14942 = vmatpush3.msra.mxu0 %v13823_v20 }
0x1ba5   : > { %14913 = vmatpush3.msra.mxu1 %v5075_v32  ;;  %v5342_v36 = vpop.xlane.xlu1 %5341  ;;  %v13821_v32 = vld [vmem:[%s17836_s3 + $0x48] sm:$0xff]  ;;  %14943 = vmatprep.subr.mxu0 %v13822_v15 }
0x1ba6   : > { %14917 = vmatprep.subr.mxu1 %v13773_v35  ;;  %v5346_v59 = vsub.f32 %v5332_v18, %v5342_v36  ;;  %14944 = vmatpush3.msra.mxu0 %v13822_v15  ;;  %v13833_v36 = vld [vmem:[%s17832_s14 + $0x100] sm:$0xff] }
0x1ba7   : > { %14945 = vmatprep.subr.mxu0 %v13821_v32 }
0x1ba8   : > { %v5348_v37 = vmul.f32 1.442695, %v5346_v59  ;;  %14946 = vmatpush3.msra.mxu0 %v13821_v32  ;;  %v13832_v59 = vld [vmem:[%s17832_s14 + $0xf8] sm:$0xff] }
0x1baa   : > { %15771 = vpow2.f32 %v5348_v37  ;;  %v13831_v37 = vld [vmem:[%s17832_s14 + $0xf0] sm:$0xff] }
0x1bad   : > { %v15768_v26 = vpop.eup %15767 }
0x1bae   : > { %v5071_v33 = vsel %vm1424_vm3, %v15768_v26, 0.0 }
0x1baf   : > { %5072 = vadd.xlane.f32.xlu0 %v5071_v33  ;;  %v15970_v33 = vmov 0.0  }
0x1bb1   : > { %v15770_v17 = vpop.eup %15769 }
0x1bb2   : > { %14914 = vmatprep.mubr.msk.f32.mxu1 %vm1420_vm4, %v15770_v17  ;;  %v5068_v34 = vsel %vm1420_vm4, %v15770_v17, 0.0  ;;  %v13836_v17 = vld [vmem:[%s17832_s14 + $0x118] sm:$0xff] }
0x1bb3   : > { %5069 = vadd.xlane.f32.xlu1 %v5068_v34  ;;  %14915 = vmatmul.mubr.msk.f32.vlgmr.msra.gmra.mxu1 %vm1420_vm4, %v15768_v26  ;;  %v13820_v26 = vld [vmem:[%s17836_s3 + $0x40] sm:$0xff]  ;;  %v13835_v34 = vld [vmem:[%s17832_s14 + $0x110] sm:$0xff]  ;;  %s17853_s3 = smov 96  }
0x1bb4   : > { %14918 = vmatpush3.msra.mxu1 %v13773_v35  ;;  %14947 = vmatprep.subr.mxu0 %v13820_v26  ;;  %v13834_v35 = vld [vmem:[%s17832_s14 + $0x108] sm:$0xff] }
0x1bb5   : > { %14948 = vmatpush3.msra.mxu0 %v13820_v26 }
0x1bb6   : > { %14979 = vmatprep.subr.mxu0 %v15970_v33 }
0x1bb7   : > { %v15772_v38 = vpop.eup %15771 }
0x1bb8   : > { %v5352_v40 = vsel %vm1420_vm4, %v15772_v38, 0.0 }
0x1bc4   : > { %5360 = vrot.lane.b32.xlu1 %v16591_v62, %s17754_s26 }
0x1bc5   : > { %5358 = vrot.lane.b32.xlu0 %v16593_v63, %s17754_s26  ;;  %s17843_s26 = sld [smem:[#allocation19_spill]] }
0x1bd4   : > { %v5345_v58 = vpop.xlane.xlu0 %5344 }
0x1bd5   : > { %v5347_v24 = vsub.f32 %v5337_v23, %v5345_v58  ;;  %v13830_v58 = vld [vmem:[%s17832_s14 + $0xe8] sm:$0xff] }
0x1bd7   : > { %v5350_v27 = vmul.f32 1.442695, %v5347_v24  ;;  %v13829_v24 = vld [vmem:[%s17832_s14 + $0xe0] sm:$0xff] }
0x1bd9   : > { %15773 = vpow2.f32 %v5350_v27 }
0x1be6   : > { %v15774_v39 = vpop.eup %15773 }
0x1be7   : > { %v5355_v41 = vsel %vm1424_vm3, %v15774_v39, 0.0 }
0x1be8   : > { %5353 = vadd.xlane.f32.xlu1 %v5352_v40  ;;  %5356 = vadd.xlane.f32.xlu0 %v5355_v41 }
0x1c38   : > { %v5073_v63 = vpop.xlane.xlu0 %5072 }
0x1c3c   : > { %v5070_v62 = vpop.xlane.xlu1 %5069  ;;  %v5359_v50 = vpop.permute.xlu0 %5358 }
0x1c3d   : > { %15775 = vrcp.f32 %v5070_v62 }
0x1c3e   : > { %15777 = vrcp.f32 %v5073_v63  ;;  %v13818_v63 = vld [vmem:[%s17828_s24 + $0x2] ss:$0 sm:$0xff]  ;;  %s17865_s24 = sld [smem:[#allocation29_spill]] }
0x1c40   : > { %v5361_v42 = vpop.permute.xlu1 %5360 }
0x1c41   : > { %14929 = vmatprep.subr.msk.mxu1 %vm1451_vm2, %v5361_v42 }
0x1c4a   : > { %v15776_v44 = vpop.eup %15775 }
0x1c4b   : > { %v15778_v45 = vpop.eup %15777 }
0x1c71   : > { %v5354_v52 = vpop.xlane.xlu1 %5353  ;;  %v5357_v53 = vpop.xlane.xlu0 %5356 }
0x1c72   : > { %15779 = vrcp.f32 %v5354_v52  ;;  %v5881_v52 = vld [vmem:[%s17843_s26 + $0x10] sm:$0xff] }
0x1c73   : > { %v14916_v5 = vpop.f32.mrf.mxu1  ;;  %15781 = vrcp.f32 %v5357_v53  ;;  %v5880_v53 = vld [vmem:[%s17843_s26 + $0x8] sm:$0xff] }
0x1c74   : > { %v5165_v49 = vmul.f32 %v15778_v45, %v14916_v5  ;;  %v13819_v45 = vld [vmem:[%s17825_s30 + $0x2] ss:$0 sm:$0xff]  ;;  %s17868_s30 = sld [smem:[#allocation28_spill]] }
0x1c75   : > { %v5153_v4 = vpop.f32.mrf.mxu1 }
0x1c76   : > { %v5164_v46 = vmul.f32 %v15776_v44, %v5153_v4 }
0x1c78   : > { %14919 = vmatprep.mubr.msk.f32.mxu1 %vm1334_vm1, %v5164_v46 }
0x1c79   : > { %14920 = vmatmul.mubr.msk.f32.vlgmr.msra.gmra.mxu1 %vm1334_vm1, %v5165_v49 }
0x1c7a   : > { %14930 = vmatpush3.msk.msra.mxu1 %vm1451_vm2, %v5361_v42  ;;  %14933 = vmatprep.mubr.msk.f32.mxu1 %vm1420_vm4, %v15772_v38 }
0x1c7b   : > { %14931 = vmatprep.subr.mxu1 %v5359_v50 }
0x1c7c   : > { %14932 = vmatpush3.msra.mxu1 %v5359_v50 }
0x1c7d   : > { %14934 = vmatmul.mubr.msk.f32.vlgmr.msra.gmra.mxu1 %vm1420_vm4, %v15774_v39  ;;  %14936 = vmatprep.subr.mxu1 %v13774_v51 }
0x1c7e   : > { %14937 = vmatpush3.msra.mxu1 %v13774_v51  ;;  %v5882_v51 = vld [vmem:[%s17843_s26 + $0x18] sm:$0xff] }
0x1c7f   : > { %v15780_v8 = vpop.eup %15779  ;;  %14952 = vmatprep.subr.mxu1 %v13836_v17 }
0x1c80   : > { %v15782_v0 = vpop.eup %15781 }
0x1d39   : > { %v14921_v54 = vpop.f32.mrf.mxu1 }
0x1d3a   : > { %v5248_v56 = vadd.f32 %v14921_v54, %v16701_v22  ;;  %v5879_v54 = vld [vmem:[%s17843_s26] sm:$0xff] }
0x1d3b   : > { %v5238_v57 = vpop.f32.mrf.mxu1 }
0x1d3c   : > { %v5247_v60 = vadd.f32 %v5238_v57, %v4957_v55  ;;  %v16771_v55 = vld [vmem:[%s1204_s0] sm:$0xff]  ;;  %v13827_v57 = vld [vmem:[%s17832_s14 + $0xd0] sm:$0xff]  ;;  %s17846_s0 = sld [smem:[#allocation21_spill]] }
0x1d3d   : > { %v14935_v61 = vpop.f32.mrf.mxu1 }
0x1d3e   : > { %v5449_v2 = vmul.f32 %v15782_v0, %v14935_v61  ;;  %v13825_v61 = vld [vmem:[%s17832_s14 + $0xc0] sm:$0xff] }
0x1d3f   : > { %v5437_v10 = vpop.f32.mrf.mxu1 }
0x1d40   : > { %v5448_v1 = vmul.f32 %v15780_v8, %v5437_v10  ;;  %v13838_v8 = vld [vmem:[%s17834_s8 + $0x2] ss:$0 sm:$0xff]  ;;  %s17856_s8 = sld [smem:[#allocation18_spill]] }
0x1d42   : > { %14938 = vmatprep.mubr.msk.f32.mxu1 %vm1334_vm1, %v5448_v1 }
0x1d43   : > { %14939 = vmatmul.mubr.msk.f32.vlgmr.msra.gmra.mxu1 %vm1334_vm1, %v5449_v2 }
0x1d44   : > { %14953 = vmatpush3.msra.mxu1 %v13836_v17 }
0x1d45   : > { %14954 = vmatprep.subr.mxu1 %v13835_v34 }
0x1d46   : > { %14955 = vmatpush3.msra.mxu1 %v13835_v34 }
0x1d47   : > { %14956 = vmatprep.subr.mxu1 %v13834_v35 }
0x1d48   : > { %14957 = vmatpush3.msra.mxu1 %v13834_v35 }
0x1d49   : > { %14958 = vmatprep.subr.mxu1 %v13833_v36 }
0x1d4a   : > { %14959 = vmatpush3.msra.mxu1 %v13833_v36 }
0x1d4b   : > { %14960 = vmatprep.subr.mxu1 %v13832_v59 }
0x1d4c   : > { %14961 = vmatpush3.msra.mxu1 %v13832_v59 }
0x1d4d   : > { %14962 = vmatprep.subr.mxu1 %v13831_v37 }
0x1d4e   : > { %14963 = vmatpush3.msra.mxu1 %v13831_v37 }
0x1d4f   : > { %14964 = vmatprep.subr.mxu1 %v13830_v58 }
0x1d50   : > { %14965 = vmatpush3.msra.mxu1 %v13830_v58 }
0x1d51   : > { %14966 = vmatprep.subr.mxu1 %v13829_v24 }
0x1d52   : > { %14967 = vmatpush3.msra.mxu1 %v13829_v24 }
0x1e03   : > { %v14940_v7 = vpop.f32.mrf.mxu1 }
0x1e04   : > { %v5532_v9 = vadd.f32 %v14940_v7, %v5248_v56  ;;  %v13828_v56 = vld [vmem:[%s17832_s14 + $0xd8] sm:$0xff] }
0x1e05   : > { %v5522_v11 = vpop.f32.mrf.mxu1  ;;  %14968 = vmatprep.subr.mxu1 %v13828_v56 }
0x1e06   : > { %v5540_v12 = vadd.f32 %v13815_v6, %v5532_v9  ;;  %v5531_v3 = vadd.f32 %v5522_v11, %v5247_v60  ;;  %14969 = vmatpush3.msra.mxu1 %v13828_v56  ;;  %v13826_v60 = vld [vmem:[%s17832_s14 + $0xc8] sm:$0xff]  ;;  %v13850_v9 = vld [vmem:[%s17845_s18] ss:$0 sm:$0xff]  ;;  %s17861_s14 = sld [smem:[#allocation25_spill]] }
0x1e07   : > { %14970 = vmatprep.subr.mxu1 %v13827_v57 }
0x1e08   : > { %v5539_v13 = vadd.f32 %v13815_v6, %v5531_v3  ;;  %v5542_v14 = vadd.f32 %v5540_v12, %v16584_v48  ;;  %14971 = vmatpush3.msra.mxu1 %v13827_v57 }
0x1e09   : > { %14972 = vmatprep.subr.mxu1 %v13826_v60 }
0x1e0a   : > { %v5550_v16 = vsel %vm2479_vm5, %v5542_v14, 0.0  ;;  %v5541_v18 = vadd.f32 %v5539_v13, %v16582_v47  ;;  %14973 = vmatpush3.msra.mxu1 %v13826_v60 }
0x1e0b   : > { %5551 = vadd.xlane.f32.xlu0 %v5550_v16  ;;  %14974 = vmatprep.subr.mxu1 %v13825_v61  ;;  %v1216_v16 = vlaneseq }
0x1e0c   : > { %v5547_v19 = vsel %vm1238_vm0, %v5541_v18, 0.0  ;;  %14975 = vmatpush3.msra.mxu1 %v13825_v61 }
0x1e0d   : > { %5548 = vadd.xlane.f32.xlu1 %v5547_v19  ;;  %15005 = vmatprep.subr.mxu1 %v15970_v33  ;;  %v1219_v19 = vand.u32 127, %v1216_v16 }
0x1e94   : > { %v5552_v21 = vpop.xlane.xlu0 %5551 }
0x1e95   : > { %v5554_v22 = vmul.f32 0.03125, %v5552_v21 }
0x1e96   : > { %v5549_v23 = vpop.xlane.xlu1 %5548 }
0x1e97   : > { %v5556_v25 = vsub.f32 %v5542_v14, %v5554_v22  ;;  %v5553_v28 = vmul.f32 0.03125, %v5549_v23 }
0x1e99   : > { %v5555_v29 = vsub.f32 %v5541_v18, %v5553_v28  ;;  %v5558_v30 = vmul.f32 %v5556_v25, %v5556_v25  ;;  %v1217_v18 = vshrl.u32 %v1216_v16, 7 }
0x1e9b   : > { %v5562_v48 = vsel %vm2479_vm5, %v5558_v30, 0.0  ;;  %v5557_v31 = vmul.f32 %v5555_v29, %v5555_v29  ;;  %vm1220_vm8 = vcmp.gt.s32.totalorder %v1219_v19, %v1217_v18 }
0x1e9c   : > { %5563 = vadd.xlane.f32.xlu0 %v5562_v48  ;;  %v16804_v21 = vsel %vm1220_vm8, -1e+30, %v15970_v33 }
0x1e9d   : > { %v5559_v47 = vsel %vm1238_vm0, %v5557_v31, 0.0 }
0x1e9e   : > { %5560 = vadd.xlane.f32.xlu1 %v5559_v47 }
0x1f25   : > { %v5564_v27 = vpop.xlane.xlu0 %5563 }
0x1f26   : > { %v5566_v38 = vmul.f32 0.03125, %v5564_v27 }
0x1f27   : > { %v5561_v39 = vpop.xlane.xlu1 %5560 }
0x1f28   : > { %v5568_v40 = vadd.f32 1e-05, %v5566_v38  ;;  %v5565_v41 = vmul.f32 0.03125, %v5561_v39  ;;  %v5884_v38 = vld [vmem:[%s17846_s0] sm:$0xff] }
0x1f2a   : > { %15783 = vrsqrt.f32 %v5568_v40  ;;  %v5567_v62 = vadd.f32 1e-05, %v5565_v41 }
0x1f2c   : > { %15785 = vrsqrt.f32 %v5567_v62 }
0x1f37   : > { %v15784_v42 = vpop.eup %15783 }
0x1f38   : > { %v5572_v43 = vmul.f32 %v15784_v42, %v5556_v25 }
0x1f39   : > { %v15786_v5 = vpop.eup %15785 }
0x1f3a   : > { %v5571_v44 = vmul.f32 %v15786_v5, %v5555_v29  ;;  %v5580_v4 = vmul.f32 %v13818_v63, %v5572_v43  ;;  %v5885_v5 = vld [vmem:[%s17846_s0 + $0x8] sm:$0xff] }
0x1f3c   : > { %v5579_v46 = vmul.f32 %v13818_v63, %v5571_v44  ;;  %v16753_v50 = vadd.f32 %v13819_v45, %v5580_v4 }
0x1f3e   : > { %v16751_v49 = vadd.f32 %v13819_v45, %v5579_v46 }
0x1f40   : > { %14949 = vmatprep.mubr.msk.f32.mxu0 %vm1238_vm0, %v16751_v49 }
0x1f41   : > { %14950 = vmatmul.mubr.msk.f32.vlgmr.msra.gmra.mxu0 %vm1238_vm0, %v16753_v50 }
0x1f42   : > { %14980 = vmatpush3.msra.mxu0 %v5882_v51  ;;  %14987 = vmatprep.mubr.msk.f32.mxu0 %vm15971_vm7, %v15970_v33 }
0x1f43   : > { %14981 = vmatprep.subr.mxu0 %v15970_v33 }
0x1f44   : > { %14982 = vmatpush3.msra.mxu0 %v5881_v52 }
0x1f45   : > { %14983 = vmatprep.subr.mxu0 %v15970_v33 }
0x1f46   : > { %14984 = vmatpush3.msra.mxu0 %v5880_v53 }
0x1f47   : > { %14985 = vmatprep.subr.mxu0 %v15970_v33 }
0x1f48   : > { %14986 = vmatpush3.msra.mxu0 %v5879_v54 }
0x1f49   : > { %14988 = vmatmul.mubr.msk.f32.vlgmr.msra.gmra.mxu0 %vm1238_vm0, %v16771_v55  ;;  %14990 = vmatprep.subr.mxu0 %v15970_v33 }
0x1f4a   : > { %14992 = vmatprep.mubr.msk.f32.mxu0 %vm15971_vm7, %v15970_v33 }
0x2001   : > { %v14951_v10 = vpop.f32.mrf.mxu0 }
0x2002   : > { %v5695_v0 = vadd.f32 %v14951_v10, %v13838_v8 }
0x2003   : > { %v5689_v1 = vpop.f32.mrf.mxu0 }
0x2004   : > { %v5690_v2 = vadd.f32 %v13838_v8, %v5689_v1  ;;  %v5699_v7 = vmax.f32 %v5695_v0, 0.0 }
0x2006   : > { %v5698_v6 = vmax.f32 %v5690_v2, 0.0 }
0x2008   : > { %14976 = vmatprep.mubr.msk.f32.mxu1 %vm2633_vm6, %v5698_v6 }
0x2009   : > { %v5964_v11 = vpop.f32.mrf.mxu0  ;;  %14977 = vmatmul.mubr.msk.f32.vlgmr.msra.gmra.mxu1 %vm2633_vm6, %v5699_v7 }
0x200a   : > { %v16788_v12 = vadd.f32 %v13850_v9, %v5964_v11  ;;  %15007 = vmatprep.mubr.msk.f32.mxu1 %vm15971_vm7, %v15970_v33 }
0x200b   : > { %v14989_v3 = vpop.f32.mrf.mxu0 }
0x200c   : > { %5970 = vrot.lane.b32.xlu1 %v16788_v12, %s17771_s1  ;;  %v5968_v13 = vmul.f32 0.35355338, %v16788_v12  ;;  %s17852_s1 = sld [smem:[#allocation22_spill]] }
0x2010   : > { %6136 = vrot.lane.b32.xlu1 %v16788_v12, %s17767_s28  ;;  %s17850_s28 = smov 40  }
0x2014   : > { %6134 = vrot.lane.b32.xlu1 %v5968_v13, %s17769_s2  ;;  %s17851_s2 = sld [smem:[#allocation23_spill]] }
0x207e   : > { %v5971_v14 = vpop.permute.xlu1 %5970 }
0x207f   : > { %14991 = vmatpush3.xpose.msk.msra.mxu0 %vm1334_vm1, %v5971_v14  ;;  %v5886_v14 = vld [vmem:[%s17846_s0 + $0x10] sm:$0xff] }
0x2080   : > { %14995 = vmatprep.subr.mxu0 %v15970_v33 }
0x2082   : > { %14993 = vmatmul.mubr.msk.f32.vlgmr.msra.gmra.mxu0 %vm1334_vm1, %v5968_v13  ;;  %v6137_v20 = vpop.permute.xlu1 %6136 }
0x2083   : > { %14997 = vmatprep.mubr.msk.f32.mxu0 %vm15971_vm7, %v15970_v33 }
0x2086   : > { %v6135_v32 = vpop.permute.xlu1 %6134 }
0x20c9   : > { %v16843_v4 = vpop.f32.mrf.mxu1 }
0x20cb   : > { %v5778_v45 = vpop.f32.mrf.mxu1 }
0x2142   : > { %v6043_v22 = vpop.f32.mrf.mxu0 }
0x2143   : > { %v6044_v23 = vadd.f32 %v6043_v22, %v16804_v21 }
0x2144   : > { %v14994_v25 = vpop.f32.mrf.mxu0 }
0x2145   : > { %v6047_v28 = vsel %vm1334_vm1, %v6044_v23, -inf }
0x2146   : > { %6048 = vmax.xlane.f32.xlu0 %v6047_v28 }
0x215c   : > { %6056 = vrot.lane.b32.xlu0 %v16788_v12, %s17763_s7  ;;  %s17848_s7 = smov 112  }
0x2160   : > { %6221 = vrot.lane.b32.xlu0 %v16788_v12, %s17842_s10 }
0x21cf   : > { %v6049_v29 = vpop.xlane.xlu0 %6048 }
0x21d0   : > { %v6050_v30 = vsub.f32 %v6044_v23, %v6049_v29 }
0x21d2   : > { %v6051_v48 = vmul.f32 1.442695, %v6050_v30 }
0x21d3   : > { %v6057_v31 = vpop.permute.xlu0 %6056 }
0x21d4   : > { %15787 = vpow2.f32 %v6051_v48  ;;  %14996 = vmatpush3.msra.mxu0 %v6057_v31 }
0x21d5   : > { %15000 = vmatprep.subr.mxu0 %v15970_v33 }
0x21d7   : > { %v6222_v47 = vpop.permute.xlu0 %6221 }
0x21d8   : > { %15006 = vmatpush3.msra.mxu1 %v6222_v47 }
0x21d9   : > { %15015 = vmatprep.subr.mxu1 %v15970_v33 }
0x21e1   : > { %v15788_v15 = vpop.eup %15787 }
0x21e2   : > { %14998 = vmatmul.mubr.msk.f32.vlgmr.msra.gmra.mxu0 %vm1334_vm1, %v15788_v15  ;;  %v6053_v37 = vsel %vm1334_vm1, %v15788_v15, 0.0  ;;  %v13841_v15 = vld [vmem:[%s17830_s19 + $0x2] ss:$0 sm:$0xff]  ;;  %s17863_s19 = sld [smem:[#allocation26_spill]] }
0x21e3   : > { %15001 = vmatpush3.xpose.msk.msra.mxu0 %vm1334_vm1, %v6137_v20  ;;  %15002 = vmatprep.mubr.msk.f32.mxu0 %vm15971_vm7, %v15970_v33 }
0x21e4   : > { %15010 = vmatprep.subr.mxu0 %v15970_v33 }
0x21e6   : > { %15003 = vmatmul.mubr.msk.f32.vlgmr.msra.gmra.mxu0 %vm1334_vm1, %v6135_v32  ;;  %v5779_v32 = vadd.f32 %v13841_v15, %v5778_v45 }
0x21e7   : > { %15012 = vmatprep.mubr.msk.f32.mxu0 %vm15971_vm7, %v15970_v33  ;;  %15011 = vmatpush3.msra.mxu0 %v5885_v5 }
0x21e8   : > { %15020 = vmatprep.subr.mxu0 %v15970_v33 }
0x22a2   : > { %v6128_v26 = vpop.f32.mrf.mxu0 }
0x22a4   : > { %v14999_v17 = vpop.f32.mrf.mxu0 }
0x22a5   : > { %v5784_v17 = vadd.f32 %v16843_v4, %v13841_v15 }
0x22a6   : > { %v6208_v34 = vpop.f32.mrf.mxu0 }
0x22a7   : > { %v6209_v35 = vadd.f32 %v6208_v34, %v16804_v21  ;;  %v5787_v34 = vadd.f32 %v5779_v32, %v16751_v49 }
0x22a8   : > { %v15004_v36 = vpop.f32.mrf.mxu0 }
0x22a9   : > { %v6212_v59 = vsel %vm1334_vm1, %v6209_v35, -inf  ;;  %v5793_v36 = vsel %vm1238_vm0, %v5787_v34, 0.0 }
0x22aa   : > { %6213 = vmax.xlane.f32.xlu1 %v6212_v59 }
0x22bb   : > { %6447 = vrot.lane.b32.xlu1 %v16788_v12, %s17765_s15  ;;  %s17849_s15 = smov 72  }
0x22df   : > { %6054 = vadd.xlane.f32.xlu1 %v6053_v37 }
0x22f0   : > { %6532 = vrot.lane.b32.xlu1 %v16788_v12, %s17841_s11 }
0x22f4   : > { %6684 = vrot.lane.b32.xlu1 %v5968_v13, %s17847_s16 }
0x2333   : > { %v6214_v58 = vpop.xlane.xlu1 %6213 }
0x2334   : > { %v6215_v24 = vsub.f32 %v6209_v35, %v6214_v58  ;;  %v5788_v35 = vadd.f32 %v5784_v17, %v16753_v50 }
0x2336   : > { %v6216_v27 = vmul.f32 1.442695, %v6215_v24  ;;  %v5796_v59 = vsel %vm2479_vm5, %v5788_v35, 0.0 }
0x2337   : > { %v6448_v41 = vpop.permute.xlu1 %6447 }
0x2338   : > { %15789 = vpow2.f32 %v6216_v27  ;;  %v5887_v27 = vld [vmem:[%s17846_s0 + $0x18] sm:$0xff] }
0x2345   : > { %v15790_v39 = vpop.eup %15789 }
0x2346   : > { %15008 = vmatmul.mubr.msk.f32.vlgmr.msra.gmra.mxu1 %vm1334_vm1, %v15790_v39  ;;  %v6218_v40 = vsel %vm1334_vm1, %v15790_v39, 0.0 }
0x2347   : > { %6219 = vadd.xlane.f32.xlu0 %v6218_v40  ;;  %15016 = vmatpush3.msra.mxu1 %v5884_v38 }
0x2348   : > { %15017 = vmatprep.mubr.msk.f32.mxu1 %vm15971_vm7, %v15970_v33  ;;  %15025 = vmatprep.subr.mxu1 %v15970_v33 }
0x235d   : > { %6445 = vrot.lane.b32.xlu0 %v5968_v13, %s17848_s7 }
0x2368   : > { %v6055_v62 = vpop.xlane.xlu1 %6054 }
0x2369   : > { %15791 = vrcp.f32 %v6055_v62 }
0x236c   : > { %v6533_v43 = vpop.permute.xlu1 %6532 }
0x2370   : > { %v6685_v13 = vpop.permute.xlu1 %6684 }
0x2376   : > { %v15792_v42 = vpop.eup %15791 }
0x2377   : > { %v6133_v63 = vmul.f32 %v15792_v42, %v6128_v26 }
0x2379   : > { %15018 = vmatmul.mubr.msk.f32.vlgmr.msra.gmra.mxu1 %vm1334_vm1, %v6133_v63 }
0x237a   : > { %15026 = vmatpush3.msra.mxu1 %v6533_v43  ;;  %15027 = vmatprep.mubr.msk.f32.mxu1 %vm15971_vm7, %v15970_v33 }
0x237b   : > { %15035 = vmatprep.subr.mxu1 %v15970_v33 }
0x23d0   : > { %v6220_v44 = vpop.xlane.xlu0 %6219 }
0x23d1   : > { %15793 = vrcp.f32 %v6220_v44 }
0x23d4   : > { %v6446_v54 = vpop.permute.xlu0 %6445 }
0x23de   : > { %v15794_v46 = vpop.eup %15793 }
0x2406   : > { %v6293_v51 = vpop.f32.mrf.mxu1 }
0x2407   : > { %v6298_v52 = vmul.f32 %v15794_v46, %v6293_v51 }
0x2408   : > { %v15009_v53 = vpop.f32.mrf.mxu1 }
0x2409   : > { %15013 = vmatmul.mubr.msk.f32.vlgmr.msra.gmra.mxu0 %vm1334_vm1, %v6298_v52 }
0x240a   : > { %15021 = vmatpush3.xpose.msk.msra.mxu0 %vm1334_vm1, %v6448_v41  ;;  %15022 = vmatprep.mubr.msk.f32.mxu0 %vm15971_vm7, %v15970_v33 }
0x240b   : > { %15030 = vmatprep.subr.mxu0 %v15970_v33 }
0x240d   : > { %15023 = vmatmul.mubr.msk.f32.vlgmr.msra.gmra.mxu0 %vm1334_vm1, %v6446_v54 }
0x240e   : > { %15032 = vmatprep.mubr.msk.f32.mxu0 %vm15971_vm7, %v15970_v33  ;;  %15031 = vmatpush3.msra.mxu0 %v5886_v14  ;;  %v6963_v14 = vld [vmem:[%s17851_s2 + $0x18] sm:$0xff] }
0x240f   : > { %15040 = vmatprep.subr.mxu0 %v15970_v33 }
0x2439   : > { %v16853_v56 = vpop.f32.mrf.mxu1 }
0x243b   : > { %v15019_v57 = vpop.f32.mrf.mxu1 }
0x24c9   : > { %v6368_v60 = vpop.f32.mrf.mxu0 }
0x24ca   : > { %v6442_v37 = vadd.f32 %v16853_v56, %v6368_v60 }
0x24cb   : > { %v15014_v61 = vpop.f32.mrf.mxu0 }
0x24cd   : > { %v6519_v8 = vpop.f32.mrf.mxu0 }
0x24ce   : > { %v6520_v10 = vadd.f32 %v6519_v8, %v16804_v21  ;;  %v13846_v8 = vld [vmem:[%s17835_s6 + $0x2] ss:$0 sm:$0xff]  ;;  %s17855_s6 = sld [smem:[#allocation17_spill]] }
0x24cf   : > { %v15024_v0 = vpop.f32.mrf.mxu0 }
0x24d0   : > { %v6523_v1 = vsel %vm1334_vm1, %v6520_v10, -inf  ;;  %v13847_v0 = vld [vmem:[%s17833_s12 + $0x2] ss:$0 sm:$0xff]  ;;  %s17857_s12 = sld [smem:[#allocation31_spill]] }
0x24d1   : > { %6524 = vmax.xlane.f32.xlu0 %v6523_v1 }
0x24e7   : > { %6686 = vrot.lane.b32.xlu0 %v16788_v12, %s17849_s15 }
0x255a   : > { %v6525_v2 = vpop.xlane.xlu0 %6524 }
0x255b   : > { %v6526_v6 = vsub.f32 %v6520_v10, %v6525_v2 }
0x255d   : > { %v6527_v7 = vmul.f32 1.442695, %v6526_v6 }
0x255e   : > { %v6687_v11 = vpop.permute.xlu0 %6686 }
0x255f   : > { %15795 = vpow2.f32 %v6527_v7 }
0x256c   : > { %v15796_v9 = vpop.eup %15795 }
0x256d   : > { %15028 = vmatmul.mubr.msk.f32.vlgmr.msra.gmra.mxu1 %vm1334_vm1, %v15796_v9  ;;  %v6529_v3 = vsel %vm1334_vm1, %v15796_v9, 0.0 }
0x256e   : > { %15036 = vmatpush3.xpose.msk.msra.mxu1 %vm1334_vm1, %v6687_v11  ;;  %6530 = vadd.xlane.f32.xlu1 %v6529_v3 }
0x256f   : > { %15037 = vmatprep.mubr.msk.f32.mxu1 %vm15971_vm7, %v15970_v33  ;;  %15045 = vmatprep.subr.mxu1 %v15970_v33 }
0x2571   : > { %15038 = vmatmul.mubr.msk.f32.vlgmr.msra.gmra.mxu1 %vm1334_vm1, %v6685_v13 }
0x2572   : > { %15047 = vmatprep.mubr.msk.f32.mxu1 %vm15971_vm7, %v15970_v33  ;;  %15046 = vmatpush3.msra.mxu1 %v5887_v27 }
0x25f7   : > { %v6531_v16 = vpop.xlane.xlu1 %6530 }
0x25f8   : > { %15797 = vrcp.f32 %v6531_v16  ;;  %v6962_v16 = vld [vmem:[%s17851_s2 + $0x10] sm:$0xff] }
0x2605   : > { %v15798_v18 = vpop.eup %15797 }
0x262d   : > { %v6604_v19 = vpop.f32.mrf.mxu1 }
0x262e   : > { %v6609_v22 = vmul.f32 %v15798_v18, %v6604_v19  ;;  %v6961_v18 = vld [vmem:[%s17851_s2 + $0x8] sm:$0xff]  ;;  %v13868_v19 = vld [vmem:[%s17852_s1] ss:$0 sm:$0xff] }
0x262f   : > { %v15029_v23 = vpop.f32.mrf.mxu1 }
0x2630   : > { %15033 = vmatmul.mubr.msk.f32.vlgmr.msra.gmra.mxu0 %vm1334_vm1, %v6609_v22 }
0x2631   : > { %v6758_v25 = vpop.f32.mrf.mxu1  ;;  %15042 = vmatprep.mubr.msk.f32.mxu0 %vm15971_vm7, %v15970_v33 }
0x2632   : > { %v6759_v28 = vadd.f32 %v6758_v25, %v16804_v21 }
0x2633   : > { %v15039_v29 = vpop.f32.mrf.mxu1 }
0x2634   : > { %v6762_v30 = vsel %vm1334_vm1, %v6759_v28, -inf }
0x2635   : > { %6763 = vmax.xlane.f32.xlu0 %v6762_v30 }
0x264b   : > { %6771 = vrot.lane.b32.xlu0 %v16788_v12, %s17850_s28 }
0x26be   : > { %v6764_v48 = vpop.xlane.xlu0 %6763 }
0x26bf   : > { %v6765_v31 = vsub.f32 %v6759_v28, %v6764_v48  ;;  %v6960_v48 = vld [vmem:[%s17851_s2] sm:$0xff] }
0x26c1   : > { %v6766_v47 = vmul.f32 1.442695, %v6765_v31 }
0x26c2   : > { %v6772_v20 = vpop.permute.xlu0 %6771 }
0x26c3   : > { %15799 = vpow2.f32 %v6766_v47  ;;  %15041 = vmatpush3.msra.mxu0 %v6772_v20 }
0x26c4   : > { %15050 = vmatprep.subr.mxu0 %v15970_v33 }
0x26d0   : > { %v15800_v26 = vpop.eup %15799 }
0x26d1   : > { %15043 = vmatmul.mubr.msk.f32.vlgmr.msra.gmra.mxu0 %vm1334_vm1, %v15800_v26  ;;  %v6768_v12 = vsel %vm1334_vm1, %v15800_v26, 0.0 }
0x26d2   : > { %6769 = vadd.xlane.f32.xlu1 %v6768_v12  ;;  %15058 = vmatprep.mubr.msk.f32.mxu0 %vm15971_vm7, %v15970_v33 }
0x26d3   : > { %15051 = vmatpush3.msra.mxu0 %v6963_v14 }
0x26d4   : > { %15052 = vmatprep.subr.mxu0 %v15970_v33 }
0x26d5   : > { %15053 = vmatpush3.msra.mxu0 %v6962_v16 }
0x26d6   : > { %5794 = vadd.xlane.f32.xlu1 %v5793_v36  ;;  %15054 = vmatprep.subr.mxu0 %v15970_v33 }
0x26d7   : > { %15055 = vmatpush3.msra.mxu0 %v6961_v18 }
0x26d8   : > { %15056 = vmatprep.subr.mxu0 %v15970_v33 }
0x26d9   : > { %15057 = vmatpush3.msra.mxu0 %v6960_v48 }
0x26da   : > { %5797 = vadd.xlane.f32.xlu1 %v5796_v59  ;;  %15072 = vmatprep.subr.mxu0 %v15970_v33 }
0x26f0   : > { %v6679_v58 = vpop.f32.mrf.mxu0 }
0x26f1   : > { %v6683_v49 = vadd.f32 %v6679_v58, %v6442_v37 }
0x26f2   : > { %v15034_v24 = vpop.f32.mrf.mxu0 }
0x275b   : > { %v6770_v38 = vpop.xlane.xlu1 %6769 }
0x275c   : > { %15801 = vrcp.f32 %v6770_v38 }
0x275f   : > { %v5795_v39 = vpop.xlane.xlu1 %5794 }
0x2760   : > { %v5799_v40 = vmul.f32 0.03125, %v5795_v39 }
0x2762   : > { %v5801_v41 = vsub.f32 %v5787_v34, %v5799_v40 }
0x2763   : > { %v5798_v62 = vpop.xlane.xlu1 %5797 }
0x2764   : > { %v5800_v42 = vmul.f32 0.03125, %v5798_v62  ;;  %v5803_v50 = vmul.f32 %v5801_v41, %v5801_v41 }
0x2766   : > { %v5802_v63 = vsub.f32 %v5788_v35, %v5800_v42  ;;  %v5805_v43 = vsel %vm1238_vm0, %v5803_v50, 0.0 }
0x2767   : > { %5806 = vadd.xlane.f32.xlu1 %v5805_v43  ;;  %v13848_v43 = vld [vmem:[%s17855_s6] ss:$0 sm:$0xff]  ;;  %s17860_s6 = smov 88  }
0x2768   : > { %v5804_v5 = vmul.f32 %v5802_v63, %v5802_v63 }
0x2769   : > { %v15802_v4 = vpop.eup %15801 }
0x276a   : > { %v5808_v44 = vsel %vm2479_vm5, %v5804_v5, 0.0 }
0x276b   : > { %5809 = vadd.xlane.f32.xlu1 %v5808_v44  ;;  %v13849_v44 = vld [vmem:[%s17856_s8] ss:$0 sm:$0xff]  ;;  %s17859_s8 = smov 120  }
0x2791   : > { %v6843_v45 = vpop.f32.mrf.mxu0 }
0x2792   : > { %v6848_v46 = vmul.f32 %v15802_v4, %v6843_v45 }
0x2793   : > { %v15044_v51 = vpop.f32.mrf.mxu0 }
0x2794   : > { %15048 = vmatmul.mubr.msk.f32.vlgmr.msra.gmra.mxu1 %vm1334_vm1, %v6848_v46 }
0x27f0   : > { %v5807_v52 = vpop.xlane.xlu1 %5806 }
0x27f1   : > { %v5811_v53 = vmul.f32 0.03125, %v5807_v52 }
0x27f3   : > { %v5813_v54 = vadd.f32 1e-05, %v5811_v53 }
0x27f4   : > { %v5810_v56 = vpop.xlane.xlu1 %5809 }
0x27f5   : > { %15803 = vrsqrt.f32 %v5813_v54  ;;  %v5812_v57 = vmul.f32 0.03125, %v5810_v56 }
0x27f7   : > { %v5814_v60 = vadd.f32 1e-05, %v5812_v57 }
0x27f9   : > { %15805 = vrsqrt.f32 %v5814_v60 }
0x2802   : > { %v15804_v61 = vpop.eup %15803 }
0x2803   : > { %v5817_v10 = vmul.f32 %v15804_v61, %v5801_v41 }
0x2805   : > { %v5825_v1 = vmul.f32 %v13846_v8, %v5817_v10 }
0x2806   : > { %v15806_v2 = vpop.eup %15805 }
0x2807   : > { %v5833_v6 = vadd.f32 %v13847_v0, %v5825_v1  ;;  %v5818_v7 = vmul.f32 %v15806_v2, %v5802_v63 }
0x2809   : > { %v5837_v9 = vsel %vm1238_vm0, %v5833_v6, 0.0  ;;  %v5826_v11 = vmul.f32 %v13846_v8, %v5818_v7  ;;  %v13869_v8 = vld [vmem:[%s17857_s12] ss:$0 sm:$0xff] }
0x280a   : > { %5838 = vadd.xlane.f32.xlu1 %v5837_v9 }
0x280b   : > { %v5834_v3 = vadd.f32 %v13847_v0, %v5826_v11  ;;  %v13870_v0 = vld [vmem:[%s17858_s13] ss:$0 sm:$0xff] }
0x280d   : > { %v5840_v13 = vsel %vm2479_vm5, %v5834_v3, 0.0 }
0x280e   : > { %5841 = vadd.xlane.f32.xlu0 %v5840_v13 }
0x2824   : > { %7057 = vrot.lane.b32.xlu0 %v6962_v16, %s17853_s3 }
0x2854   : > { %v6918_v22 = vpop.f32.mrf.mxu1 }
0x2855   : > { %v6922_v23 = vadd.f32 %v6918_v22, %v6683_v49  ;;  %v13871_v49 = vld [vmem:[%s17854_s5] ss:$0 sm:$0xff] }
0x2856   : > { %v15049_v25 = vpop.f32.mrf.mxu1 }
0x2857   : > { %v6929_v28 = vadd.f32 %v13868_v19, %v6922_v23 }
0x2859   : > { %v6930_v29 = vadd.f32 %v6929_v28, %v16771_v55 }
0x285b   : > { %v6933_v30 = vsel %vm1238_vm0, %v6930_v29, 0.0 }
0x285c   : > { %6934 = vadd.xlane.f32.xlu1 %v6933_v30 }
0x2893   : > { %v5839_v31 = vpop.xlane.xlu1 %5838 }
0x2894   : > { %v5843_v47 = vmul.f32 0.03125, %v5839_v31 }
0x2896   : > { %v5845_v20 = vsub.f32 %v5833_v6, %v5843_v47 }
0x2897   : > { %v5842_v15 = vpop.xlane.xlu0 %5841 }
0x2898   : > { %v5844_v32 = vmul.f32 0.03125, %v5842_v15  ;;  %v5847_v26 = vmul.f32 %v5845_v20, %v5845_v20 }
0x289a   : > { %v5846_v17 = vsub.f32 %v5834_v3, %v5844_v32  ;;  %v5849_v34 = vsel %vm1238_vm0, %v5847_v26, 0.0 }
0x289b   : > { %5850 = vadd.xlane.f32.xlu1 %v5849_v34  ;;  %v7058_v42 = vpop.permute.xlu0 %7057  ;;  %v6965_v34 = vld [vmem:[%s17861_s14] sm:$0xff] }
0x289c   : > { %v5848_v12 = vmul.f32 %v5846_v17, %v5846_v17 }
0x289e   : > { %v5852_v55 = vsel %vm2479_vm5, %v5848_v12, 0.0 }
0x289f   : > { %5853 = vadd.xlane.f32.xlu1 %v5852_v55 }
0x28b0   : > { %7059 = vrot.lane.b32.xlu1 %v6963_v14, %s17853_s3 }
0x28b4   : > { %7055 = vrot.lane.b32.xlu1 %v6961_v18, %s17853_s3 }
0x28e5   : > { %v6935_v35 = vpop.xlane.xlu1 %6934 }
0x28e6   : > { %v6936_v36 = vmul.f32 0.03125, %v6935_v35 }
0x28e8   : > { %v6937_v59 = vsub.f32 %v6930_v29, %v6936_v36 }
0x28ea   : > { %v6938_v37 = vmul.f32 %v6937_v59, %v6937_v59 }
0x28ec   : > { %v6939_v58 = vsel %vm1238_vm0, %v6938_v37, 0.0 }
0x28ed   : > { %6940 = vadd.xlane.f32.xlu1 %v6939_v58 }
0x28fe   : > { %7053 = vrot.lane.b32.xlu1 %v6960_v48, %s17853_s3 }
0x2902   : > { %7065 = vrot.lane.b32.xlu1 %v13871_v49, %s17853_s3 }
0x2924   : > { %v5851_v24 = vpop.xlane.xlu1 %5850 }
0x2925   : > { %v5855_v27 = vmul.f32 0.03125, %v5851_v24 }
0x2927   : > { %v5857_v38 = vadd.f32 1e-05, %v5855_v27 }
0x2928   : > { %v5854_v39 = vpop.xlane.xlu1 %5853 }
0x2929   : > { %15807 = vrsqrt.f32 %v5857_v38  ;;  %v5856_v40 = vmul.f32 0.03125, %v5854_v39 }
0x292b   : > { %v5858_v41 = vadd.f32 1e-05, %v5856_v40 }
0x292c   : > { %v7060_v62 = vpop.permute.xlu1 %7059 }
0x292d   : > { %15809 = vrsqrt.f32 %v5858_v41  ;;  %15061 = vmatprep.subr.mxu1 %v7060_v62 }
0x292e   : > { %15062 = vmatpush3.msra.mxu1 %v7060_v62 }
0x292f   : > { %15063 = vmatprep.subr.mxu1 %v7058_v42 }
0x2930   : > { %15064 = vmatpush3.msra.mxu1 %v7058_v42  ;;  %v7056_v50 = vpop.permute.xlu1 %7055 }
0x2931   : > { %15065 = vmatprep.subr.mxu1 %v7056_v50 }
0x2932   : > { %15066 = vmatpush3.msra.mxu1 %v7056_v50 }
0x2936   : > { %v15808_v63 = vpop.eup %15807 }
0x2937   : > { %v5861_v5 = vmul.f32 %v15808_v63, %v5845_v20 }
0x2939   : > { %v5869_v4 = vmul.f32 %v13848_v43, %v5861_v5 }
0x293a   : > { %v15810_v45 = vpop.eup %15809 }
0x293b   : > { %v5862_v46 = vmul.f32 %v15810_v45, %v5846_v17  ;;  %v16919_v51 = vadd.f32 %v13849_v44, %v5869_v4 }
0x293d   : > { %v5870_v52 = vmul.f32 %v13848_v43, %v5862_v46  ;;  %15069 = vmatprep.mubr.msk.f32.mxu1 %vm1238_vm0, %v16919_v51 }
0x293f   : > { %v16923_v53 = vadd.f32 %v13849_v44, %v5870_v52  ;;  %v6966_v44 = vld [vmem:[%s17861_s14 + $0x8] sm:$0xff] }
0x2976   : > { %v6941_v54 = vpop.xlane.xlu1 %6940 }
0x2977   : > { %v6942_v56 = vmul.f32 0.03125, %v6941_v54 }
0x2979   : > { %v6943_v57 = vadd.f32 1e-05, %v6942_v56 }
0x297a   : > { %v7054_v60 = vpop.permute.xlu1 %7053 }
0x297b   : > { %15811 = vrsqrt.f32 %v6943_v57  ;;  %15067 = vmatprep.subr.mxu1 %v7054_v60 }
0x297c   : > { %15068 = vmatpush3.msra.mxu1 %v7054_v60 }
0x297d   : > { %15070 = vmatmul.mubr.msk.f32.vlgmr.msra.gmra.mxu1 %vm1238_vm0, %v16923_v53  ;;  %15079 = vmatprep.subr.mxu1 %v15970_v33 }
0x297e   : > { %15083 = vmatprep.mubr.msk.f32.mxu1 %vm15971_vm7, %v15970_v33  ;;  %v7066_v6 = vpop.permute.xlu1 %7065 }
0x2988   : > { %v15812_v61 = vpop.eup %15811 }
0x2989   : > { %v6945_v10 = vmul.f32 %v15812_v61, %v6937_v59 }
0x298b   : > { %v6952_v1 = vmul.f32 %v13869_v8, %v6945_v10 }
0x298d   : > { %v16932_v2 = vadd.f32 %v13870_v0, %v6952_v1 }
0x298f   : > { %15059 = vmatmul.mubr.msk.f32.vlgmr.msra.gmra.mxu0 %vm1238_vm0, %v16932_v2 }
0x2990   : > { %15076 = vmatprep.mubr.msk.f32.mxu0 %vm15971_vm7, %v15970_v33 }
0x2a3d   : > { %v15071_v7 = vpop.f32.mrf.mxu1 }
0x2a3e   : > { %v16938_v9 = vadd.f32 %v15071_v7, %v7066_v6 }
0x2a3f   : > { %v7140_v11 = vpop.f32.mrf.mxu1 }
0x2a40   : > { %7240 = vrot.lane.b32.xlu0 %v16938_v9, %s17853_s3  ;;  %15073 = vmatpush3.xpose.msk.msra.mxu0 %vm1334_vm1, %v16938_v9  ;;  %v16945_v3 = vadd.f32 %v7140_v11, %v7066_v6 }
0x2a41   : > { %15074 = vmatprep.subr.mxu0 %v15970_v33 }
0x2a44   : > { %7238 = vrot.lane.b32.xlu0 %v16945_v3, %s17853_s3  ;;  %15075 = vmatpush3.xpose.msk.msra.mxu0 %vm1334_vm1, %v16945_v3 }
0x2a45   : > { %15093 = vmatprep.subr.mxu0 %v15970_v33 }
0x2a48   : > { %7324 = vrot.lane.b32.xlu0 %v16938_v9, %s17859_s8 }
0x2a4c   : > { %7322 = vrot.lane.b32.xlu0 %v16945_v3, %s17859_s8 }
0x2a4f   : > { %v7045_v13 = vpop.f32.mrf.mxu0 }
0x2a50   : > { %v7046_v14 = vadd.f32 %v13871_v49, %v7045_v13 }
0x2a51   : > { %v15060_v16 = vpop.f32.mrf.mxu0 }
0x2a52   : > { %v7149_v18 = vmul.f32 0.35355338, %v7046_v14 }
0x2a54   : > { %7320 = vrot.lane.b32.xlu0 %v7149_v18, %s17859_s8  ;;  %15077 = vmatmul.mubr.msk.f32.vlgmr.msra.gmra.mxu0 %vm1334_vm1, %v7149_v18 }
0x2a55   : > { %15097 = vmatprep.mubr.msk.f32.mxu0 %vm15971_vm7, %v15970_v33 }
0x2ab2   : > { %v7241_v19 = vpop.permute.xlu0 %7240 }
0x2ab3   : > { %15080 = vmatpush3.msk.msra.mxu1 %vm1451_vm2, %v7241_v19 }
0x2ab4   : > { %15081 = vmatprep.subr.mxu1 %v15970_v33 }
0x2ab6   : > { %v7239_v22 = vpop.permute.xlu0 %7238 }
0x2ab7   : > { %15082 = vmatpush3.msra.mxu1 %v7239_v22 }
0x2ab8   : > { %15086 = vmatprep.subr.mxu1 %v15970_v33 }
0x2aba   : > { %v7325_v20 = vpop.permute.xlu0 %7324 }
0x2abe   : > { %v7323_v26 = vpop.permute.xlu0 %7322 }
0x2ac6   : > { %v7321_v17 = vpop.permute.xlu0 %7320 }
0x2b14   : > { %v7225_v23 = vpop.f32.mrf.mxu0 }
0x2b15   : > { %v7229_v25 = vsel %vm1420_vm4, %v7225_v23, -inf }
0x2b16   : > { %7230 = vmax.xlane.f32.xlu1 %v7229_v25  ;;  %v15078_v28 = vpop.f32.mrf.mxu0 }
0x2b27   : > { %7413 = vrot.lane.b32.xlu1 %v16938_v9, %s17860_s6 }
0x2b2b   : > { %7411 = vrot.lane.b32.xlu1 %v16945_v3, %s17860_s6 }
0x2b2f   : > { %7643 = vrot.lane.b32.xlu1 %v16938_v9, %s17848_s7 }
0x2b33   : > { %7639 = vrot.lane.b32.xlu1 %v7149_v18, %s17848_s7 }
0x2b37   : > { %7890 = vrot.lane.b32.xlu1 %v16938_v9, %s17847_s16 }
0x2b3b   : > { %7888 = vrot.lane.b32.xlu1 %v16945_v3, %s17847_s16 }
0x2b3f   : > { %7886 = vrot.lane.b32.xlu1 %v7149_v18, %s17847_s16 }
0x2b9f   : > { %v7231_v29 = vpop.xlane.xlu1 %7230 }
0x2ba0   : > { %v7232_v30 = vsub.f32 %v7225_v23, %v7231_v29  ;;  %v6967_v29 = vld [vmem:[%s17861_s14 + $0x10] sm:$0xff] }
0x2ba2   : > { %v7233_v48 = vmul.f32 1.442695, %v7232_v30 }
0x2ba3   : > { %v7414_v31 = vpop.permute.xlu1 %7413 }
0x2ba4   : > { %15813 = vpow2.f32 %v7233_v48  ;;  %15094 = vmatpush3.msk.msra.mxu0 %vm1451_vm2, %v7414_v31 }
0x2ba5   : > { %15095 = vmatprep.subr.mxu0 %v15970_v33 }
0x2ba7   : > { %v7412_v47 = vpop.permute.xlu1 %7411 }
0x2ba8   : > { %15096 = vmatpush3.msra.mxu0 %v7412_v47 }
0x2ba9   : > { %15100 = vmatprep.subr.mxu0 %v15970_v33 }
0x2bab   : > { %v7644_v12 = vpop.permute.xlu1 %7643 }
0x2baf   : > { %v7640_v55 = vpop.permute.xlu1 %7639 }
0x2bb1   : > { %v15814_v15 = vpop.eup %15813 }
0x2bb2   : > { %15084 = vmatmul.mubr.msk.f32.vlgmr.msra.gmra.mxu1 %vm1420_vm4, %v15814_v15  ;;  %v7235_v32 = vsel %vm1420_vm4, %v15814_v15, 0.0 }
0x2bb3   : > { %15087 = vmatpush3.xpose.msk.msra.mxu1 %vm1334_vm1, %v7325_v20  ;;  %7236 = vadd.xlane.f32.xlu1 %v7235_v32  ;;  %v7891_v35 = vpop.permute.xlu1 %7890  ;;  %v6968_v32 = vld [vmem:[%s17861_s14 + $0x18] sm:$0xff] }
0x2bb4   : > { %15088 = vmatprep.subr.mxu1 %v15970_v33  ;;  %15090 = vmatprep.mubr.msk.f32.mxu1 %vm15971_vm7, %v15970_v33 }
0x2bb7   : > { %15089 = vmatpush3.xpose.msk.msra.mxu1 %vm1334_vm1, %v7323_v26  ;;  %v7889_v36 = vpop.permute.xlu1 %7888 }
0x2bb8   : > { %15105 = vmatprep.subr.mxu1 %v15970_v33 }
0x2bba   : > { %15091 = vmatmul.mubr.msk.f32.vlgmr.msra.gmra.mxu1 %vm1334_vm1, %v7321_v17 }
0x2bbb   : > { %15107 = vmatprep.mubr.msk.f32.mxu1 %vm15971_vm7, %v15970_v33  ;;  %15106 = vmatpush3.msra.mxu1 %v6965_v34  ;;  %v7887_v59 = vpop.permute.xlu1 %7886 }
0x2bbc   : > { %15117 = vmatprep.subr.mxu1 %v15970_v33 }
0x2bc4   : > { %7730 = vrot.lane.b32.xlu1 %v16945_v3, %s17862_s17 }
0x2c3c   : > { %v7237_v37 = vpop.xlane.xlu1 %7236 }
0x2c3d   : > { %15815 = vrcp.f32 %v7237_v37 }
0x2c40   : > { %v7731_v16 = vpop.permute.xlu1 %7730 }
0x2c4a   : > { %v15816_v58 = vpop.eup %15815 }
0x2c72   : > { %v7314_v49 = vpop.f32.mrf.mxu1 }
0x2c73   : > { %v7319_v24 = vmul.f32 %v15816_v58, %v7314_v49  ;;  %v13899_v58 = vld [vmem:[%s17863_s19] ss:$0 sm:$0xff] }
0x2c74   : > { %v15085_v27 = vpop.f32.mrf.mxu1 }
0x2c75   : > { %15108 = vmatmul.mubr.msk.f32.vlgmr.msra.gmra.mxu1 %vm1334_vm1, %v7319_v24 }
0x2c76   : > { %15121 = vmatprep.mubr.msk.f32.mxu1 %vm15971_vm7, %v15970_v33 }
0x2c7a   : > { %v7398_v38 = vpop.f32.mrf.mxu1 }
0x2c7b   : > { %v7402_v39 = vsel %vm1420_vm4, %v7398_v38, -inf }
0x2c7c   : > { %7403 = vmax.xlane.f32.xlu0 %v7402_v39  ;;  %v15092_v40 = vpop.f32.mrf.mxu1 }
0x2d05   : > { %v7404_v41 = vpop.xlane.xlu0 %7403 }
0x2d06   : > { %v7405_v62 = vsub.f32 %v7398_v38, %v7404_v41 }
0x2d08   : > { %v7406_v42 = vmul.f32 1.442695, %v7405_v62 }
0x2d0a   : > { %15817 = vpow2.f32 %v7406_v42 }
0x2d17   : > { %v15818_v50 = vpop.eup %15817 }
0x2d18   : > { %15098 = vmatmul.mubr.msk.f32.vlgmr.msra.gmra.mxu0 %vm1420_vm4, %v15818_v50  ;;  %v7408_v63 = vsel %vm1420_vm4, %v15818_v50, 0.0 }
0x2d19   : > { %7409 = vadd.xlane.f32.xlu0 %v7408_v63  ;;  %15102 = vmatprep.mubr.msk.f32.mxu0 %vm15971_vm7, %v15970_v33 }
0x2d1a   : > { %15101 = vmatpush3.msra.mxu0 %v6966_v44  ;;  %v8170_v44 = vld [vmem:[%s17864_s21] sm:$0xff] }
0x2d1b   : > { %15110 = vmatprep.subr.mxu0 %v15970_v33 }
0x2d2f   : > { %7641 = vrot.lane.b32.xlu0 %v16945_v3, %s17848_s7 }
0x2d35   : > { %v17004_v43 = vpop.f32.mrf.mxu1 }
0x2d37   : > { %v15109_v5 = vpop.f32.mrf.mxu1 }
0x2d38   : > { %v8172_v5 = vld [vmem:[%s17864_s21 + $0x10] sm:$0xff] }
0x2da2   : > { %v7410_v4 = vpop.xlane.xlu0 %7409 }
0x2da3   : > { %15819 = vrcp.f32 %v7410_v4  ;;  %v8186_v4 = vld [vmem:[%s17865_s24 + $0x58] sm:$0xff] }
0x2da6   : > { %v7642_v56 = vpop.permute.xlu0 %7641 }
0x2db0   : > { %v15820_v45 = vpop.eup %15819 }
0x2dd8   : > { %v7487_v46 = vpop.f32.mrf.mxu0 }
0x2dd9   : > { %v7492_v52 = vmul.f32 %v15820_v45, %v7487_v46  ;;  %v8185_v45 = vld [vmem:[%s17865_s24 + $0x50] sm:$0xff]  ;;  %v8184_v46 = vld [vmem:[%s17865_s24 + $0x48] sm:$0xff] }
0x2dda   : > { %v15099_v54 = vpop.f32.mrf.mxu0 }
0x2ddb   : > { %15103 = vmatmul.mubr.msk.f32.vlgmr.msra.gmra.mxu0 %vm1334_vm1, %v7492_v52  ;;  %v8183_v52 = vld [vmem:[%s17865_s24 + $0x40] sm:$0xff]  ;;  %v8182_v54 = vld [vmem:[%s17865_s24 + $0x38] sm:$0xff] }
0x2ddc   : > { %15111 = vmatpush3.xpose.msk.msra.mxu0 %vm1334_vm1, %v7644_v12  ;;  %15114 = vmatprep.mubr.msk.f32.mxu0 %vm15971_vm7, %v15970_v33 }
0x2ddd   : > { %15112 = vmatprep.subr.mxu0 %v15970_v33 }
0x2de0   : > { %15113 = vmatpush3.xpose.msk.msra.mxu0 %vm1334_vm1, %v7642_v56  ;;  %v8181_v56 = vld [vmem:[%s17865_s24 + $0x30] sm:$0xff] }
0x2de1   : > { %15129 = vmatprep.subr.mxu0 %v15970_v33 }
0x2de3   : > { %15115 = vmatmul.mubr.msk.f32.vlgmr.msra.gmra.mxu0 %vm1334_vm1, %v7640_v55 }
0x2de4   : > { %15130 = vmatpush3.xpose.msk.msra.mxu0 %vm1334_vm1, %v7891_v35  ;;  %15133 = vmatprep.mubr.msk.f32.mxu0 %vm15971_vm7, %v15970_v33 }
0x2de5   : > { %15131 = vmatprep.subr.mxu0 %v15970_v33 }
0x2de8   : > { %15132 = vmatpush3.xpose.msk.msra.mxu0 %vm1334_vm1, %v7889_v36 }
0x2de9   : > { %15148 = vmatprep.subr.mxu0 %v15970_v33 }
0x2deb   : > { %15134 = vmatmul.mubr.msk.f32.vlgmr.msra.gmra.mxu0 %vm1334_vm1, %v7887_v59 }
0x2dec   : > { %15156 = vmatprep.mubr.msk.f32.mxu0 %vm15971_vm7, %v15970_v33 }
0x2e9b   : > { %v7562_v57 = vpop.f32.mrf.mxu0 }
0x2e9c   : > { %v7636_v17 = vadd.f32 %v17004_v43, %v7562_v57  ;;  %v8173_v43 = vld [vmem:[%s17864_s21 + $0x18] sm:$0xff]  ;;  %v8180_v57 = vld [vmem:[%s17865_s24 + $0x28] sm:$0xff] }
0x2e9d   : > { %v15104_v60 = vpop.f32.mrf.mxu0  ;;  %15149 = vmatpush3.msra.mxu0 %v8173_v43 }
0x2e9e   : > { %15150 = vmatprep.subr.mxu0 %v15970_v33  ;;  %v8179_v60 = vld [vmem:[%s17865_s24 + $0x20] sm:$0xff] }
0x2e9f   : > { %15151 = vmatpush3.msra.mxu0 %v8172_v5 }
0x2ea0   : > { %15152 = vmatprep.subr.mxu0 %v15970_v33 }
0x2ea3   : > { %v7717_v61 = vpop.f32.mrf.mxu0 }
0x2ea4   : > { %v7721_v8 = vsel %vm1420_vm4, %v7717_v61, -inf }
0x2ea5   : > { %7722 = vmax.xlane.f32.xlu0 %v7721_v8  ;;  %v15116_v10 = vpop.f32.mrf.mxu0 }
0x2eab   : > { %v7964_v0 = vpop.f32.mrf.mxu0 }
0x2eac   : > { %v7968_v6 = vsel %vm1420_vm4, %v7964_v0, -inf }
0x2ead   : > { %v15135_v1 = vpop.f32.mrf.mxu0 }
0x2ebb   : > { %7732 = vrot.lane.b32.xlu0 %v16938_v9, %s17862_s17 }
0x2eda   : > { %7969 = vmax.xlane.f32.xlu0 %v7968_v6  ;;  %v13900_v6 = vld [vmem:[%s17866_s25] ss:$0 sm:$0xff] }
0x2ef0   : > { %7979 = vrot.lane.b32.xlu0 %v16938_v9, %s17849_s15 }
0x2f2e   : > { %v7723_v7 = vpop.xlane.xlu0 %7722 }
0x2f2f   : > { %v7724_v11 = vsub.f32 %v7717_v61, %v7723_v7  ;;  %v8178_v61 = vld [vmem:[%s17865_s24 + $0x18] sm:$0xff] }
0x2f31   : > { %v7725_v13 = vmul.f32 1.442695, %v7724_v11  ;;  %v13901_v11 = vld [vmem:[%s17867_s29] ss:$0 sm:$0xff] }
0x2f32   : > { %v7733_v14 = vpop.permute.xlu0 %7732 }
0x2f33   : > { %15821 = vpow2.f32 %v7725_v13  ;;  %15118 = vmatpush3.msk.msra.mxu1 %vm1451_vm2, %v7733_v14 }
0x2f34   : > { %15119 = vmatprep.subr.mxu1 %v15970_v33 }
0x2f35   : > { %15120 = vmatpush3.msra.mxu1 %v7731_v16  ;;  %v8177_v16 = vld [vmem:[%s17865_s24 + $0x10] sm:$0xff] }
0x2f36   : > { %15124 = vmatprep.subr.mxu1 %v15970_v33 }
0x2f40   : > { %v15822_v18 = vpop.eup %15821 }
0x2f41   : > { %15122 = vmatmul.mubr.msk.f32.vlgmr.msra.gmra.mxu1 %vm1420_vm4, %v15822_v18  ;;  %v7727_v19 = vsel %vm1420_vm4, %v15822_v18, 0.0  ;;  %v8176_v18 = vld [vmem:[%s17865_s24 + $0x8] sm:$0xff] }
0x2f42   : > { %7728 = vadd.xlane.f32.xlu1 %v7727_v19  ;;  %15126 = vmatprep.mubr.msk.f32.mxu1 %vm15971_vm7, %v15970_v33  ;;  %v8175_v19 = vld [vmem:[%s17865_s24] sm:$0xff] }
0x2f43   : > { %15125 = vmatpush3.msra.mxu1 %v6967_v29  ;;  %v13904_v29 = vld [vmem:[%s17869_s22] ss:$0 sm:$0xff]  ;;  %s17872_s22 = sld [smem:[#allocation36_spill]] }
0x2f44   : > { %15136 = vmatprep.subr.mxu1 %v15970_v33 }
0x2f49   : > { %s17873_s9 = smov %s17872_s22 }
0x2f53   : > { %7977 = vrot.lane.b32.xlu1 %v16945_v3, %s17849_s15 }
0x2f63   : > { %v7970_v9 = vpop.xlane.xlu0 %7969 }
0x2f64   : > { %v7971_v22 = vsub.f32 %v7964_v0, %v7970_v9  ;;  %v13902_v9 = vld [vmem:[%s17868_s30] ss:$0 sm:$0xff] }
0x2f66   : > { %v7972_v23 = vmul.f32 1.442695, %v7971_v22 }
0x2f67   : > { %v7980_v3 = vpop.permute.xlu0 %7979 }
0x2f68   : > { %15823 = vpow2.f32 %v7972_v23 }
0x2f75   : > { %v15824_v25 = vpop.eup %15823 }
0x2f76   : > { %v7974_v28 = vsel %vm1420_vm4, %v15824_v25, 0.0 }
0x2f77   : > { %7975 = vadd.xlane.f32.xlu1 %v7974_v28 }
0x2fcb   : > { %v7729_v30 = vpop.xlane.xlu1 %7728 }
0x2fcc   : > { %15825 = vrcp.f32 %v7729_v30 }
0x2fcf   : > { %v7978_v15 = vpop.permute.xlu1 %7977 }
0x2fd9   : > { %v15826_v48 = vpop.eup %15825 }
0x3000   : > { %v7976_v26 = vpop.xlane.xlu1 %7975 }
0x3001   : > { %v7806_v31 = vpop.f32.mrf.mxu1  ;;  %15827 = vrcp.f32 %v7976_v26 }
0x3002   : > { %v7811_v47 = vmul.f32 %v15826_v48, %v7806_v31 }
0x3003   : > { %v15123_v20 = vpop.f32.mrf.mxu1 }
0x3004   : > { %15127 = vmatmul.mubr.msk.f32.vlgmr.msra.gmra.mxu1 %vm1334_vm1, %v7811_v47 }
0x3005   : > { %15137 = vmatpush3.msk.msra.mxu1 %vm1451_vm2, %v7980_v3  ;;  %15140 = vmatprep.mubr.msk.f32.mxu1 %vm15971_vm7, %v15970_v33 }
0x3006   : > { %15138 = vmatprep.subr.mxu1 %v15970_v33 }
0x3007   : > { %15139 = vmatpush3.msra.mxu1 %v7978_v15 }
0x3008   : > { %15141 = vmatmul.mubr.msk.f32.vlgmr.msra.gmra.mxu1 %vm1420_vm4, %v15824_v25  ;;  %15143 = vmatprep.subr.mxu1 %v15970_v33 }
0x3009   : > { %15145 = vmatprep.mubr.msk.f32.mxu1 %vm15971_vm7, %v15970_v33  ;;  %15144 = vmatpush3.msra.mxu1 %v6968_v32 }
0x300a   : > { %15159 = vmatprep.subr.mxu1 %v15970_v33 }
0x300e   : > { %v15828_v35 = vpop.eup %15827 }
0x30c4   : > { %v7881_v34 = vpop.f32.mrf.mxu1 }
0x30c5   : > { %v7885_v12 = vadd.f32 %v7881_v34, %v7636_v17  ;;  %v13911_v34 = vld [vmem:[%s17843_s26 + $0x38] sm:$0xff] }
0x30c6   : > { %v15128_v55 = vpop.f32.mrf.mxu1 }
0x30c7   : > { %v13909_v55 = vld [vmem:[%s17843_s26 + $0x28] sm:$0xff] }
0x30c8   : > { %v8053_v36 = vpop.f32.mrf.mxu1 }
0x30c9   : > { %v8058_v59 = vmul.f32 %v15828_v35, %v8053_v36  ;;  %v13908_v35 = vld [vmem:[%s17843_s26 + $0x20] sm:$0xff] }
0x30ca   : > { %v15142_v37 = vpop.f32.mrf.mxu1 }
0x30cb   : > { %15146 = vmatmul.mubr.msk.f32.vlgmr.msra.gmra.mxu1 %vm1334_vm1, %v8058_v59 }
0x30cc   : > { %15183 = vmatprep.mubr.msk.f32.mxu1 %vm15971_vm7, %v15970_v33  ;;  %15160 = vmatpush3.msra.mxu1 %v8186_v4 }
0x30cd   : > { %15161 = vmatprep.subr.mxu1 %v15970_v33 }
0x30ce   : > { %15162 = vmatpush3.msra.mxu1 %v8185_v45 }
0x30cf   : > { %15163 = vmatprep.subr.mxu1 %v15970_v33 }
0x30d0   : > { %15164 = vmatpush3.msra.mxu1 %v8184_v46 }
0x30d1   : > { %15165 = vmatprep.subr.mxu1 %v15970_v33 }
0x30d2   : > { %15166 = vmatpush3.msra.mxu1 %v8183_v52 }
0x30d3   : > { %15167 = vmatprep.subr.mxu1 %v15970_v33 }
0x30d4   : > { %15168 = vmatpush3.msra.mxu1 %v8182_v54 }
0x30d5   : > { %15169 = vmatprep.subr.mxu1 %v15970_v33 }
0x30d6   : > { %15170 = vmatpush3.msra.mxu1 %v8181_v56 }
0x30d7   : > { %15171 = vmatprep.subr.mxu1 %v15970_v33 }
0x30d8   : > { %15172 = vmatpush3.msra.mxu1 %v8180_v57 }
0x30d9   : > { %15173 = vmatprep.subr.mxu1 %v15970_v33 }
0x30da   : > { %15174 = vmatpush3.msra.mxu1 %v8179_v60 }
0x30db   : > { %15175 = vmatprep.subr.mxu1 %v15970_v33 }
0x30dc   : > { %15176 = vmatpush3.msra.mxu1 %v8178_v61 }
0x30dd   : > { %15177 = vmatprep.subr.mxu1 %v15970_v33 }
0x30de   : > { %15178 = vmatpush3.msra.mxu1 %v8177_v16  ;;  %v13913_v16 = vld [vmem:[%s17846_s0 + $0x20] sm:$0xff] }
0x30df   : > { %15179 = vmatprep.subr.mxu1 %v15970_v33 }
0x30e0   : > { %15180 = vmatpush3.msra.mxu1 %v8176_v18 }
0x30e1   : > { %15181 = vmatprep.subr.mxu1 %v15970_v33 }
0x30e2   : > { %15182 = vmatpush3.msra.mxu1 %v8175_v19 }
0x30e3   : > { %15212 = vmatprep.subr.mxu1 %v15970_v33 }
0x318b   : > { %v8128_v49 = vpop.f32.mrf.mxu1 }
0x318c   : > { %v8132_v24 = vadd.f32 %v8128_v49, %v7885_v12  ;;  %v13910_v12 = vld [vmem:[%s17843_s26 + $0x30] sm:$0xff]  ;;  %v13906_v49 = vld [vmem:[%s17871_s23] ss:$0 sm:$0xff] }
0x318d   : > { %v15147_v27 = vpop.f32.mrf.mxu1 }
0x318e   : > { %v8139_v38 = vadd.f32 %v13899_v58, %v8132_v24  ;;  %v13907_v27 = vld [vmem:[%s17872_s22] ss:$0 sm:$0xff]  ;;  %s17874_s22 = smov 64  }
0x3190   : > { %v8140_v39 = vadd.f32 %v8139_v38, %v16932_v2  ;;  %v8171_v2 = vld [vmem:[%s17864_s21 + $0x8] sm:$0xff] }
0x3191   : > { %15153 = vmatpush3.msra.mxu0 %v8171_v2 }
0x3192   : > { %v8143_v40 = vsel %vm1238_vm0, %v8140_v39, 0.0  ;;  %15154 = vmatprep.subr.mxu0 %v15970_v33 }
0x3193   : > { %8144 = vadd.xlane.f32.xlu0 %v8143_v40  ;;  %15155 = vmatpush3.msra.mxu0 %v8170_v44  ;;  %v13918_v40 = vld [vmem:[%s17845_s18 + $0x1] ss:$0 sm:$0xff] }
0x3194   : > { %15186 = vmatprep.subr.mxu0 %v15970_v33 }
0x321c   : > { %v8145_v41 = vpop.xlane.xlu0 %8144 }
0x321d   : > { %v8146_v62 = vmul.f32 0.03125, %v8145_v41 }
0x321f   : > { %v8147_v42 = vsub.f32 %v8140_v39, %v8146_v62 }
0x3221   : > { %v8148_v50 = vmul.f32 %v8147_v42, %v8147_v42 }
0x3223   : > { %v8149_v63 = vsel %vm1238_vm0, %v8148_v50, 0.0 }
0x3224   : > { %8150 = vadd.xlane.f32.xlu0 %v8149_v63 }
0x32ad   : > { %v8151_v8 = vpop.xlane.xlu0 %8150 }
0x32ae   : > { %v8152_v10 = vmul.f32 0.03125, %v8151_v8 }
0x32b0   : > { %v8153_v0 = vadd.f32 1e-05, %v8152_v10 }
0x32b2   : > { %15829 = vrsqrt.f32 %v8153_v0 }
0x32bf   : > { %v15830_v1 = vpop.eup %15829 }
0x32c0   : > { %v8155_v7 = vmul.f32 %v15830_v1, %v8147_v42 }
0x32c2   : > { %v8162_v13 = vmul.f32 %v13900_v6, %v8155_v7 }
0x32c4   : > { %v8169_v14 = vadd.f32 %v13901_v11, %v8162_v13 }
0x32c6   : > { %15157 = vmatmul.mubr.msk.f32.vlgmr.msra.gmra.mxu0 %vm1238_vm0, %v8169_v14 }
0x32c7   : > { %15194 = vmatprep.mubr.msk.f32.mxu0 %vm15971_vm7, %v15970_v33  ;;  %15187 = vmatpush3.msra.mxu0 %v13911_v34 }
0x32c8   : > { %15188 = vmatprep.subr.mxu0 %v15970_v33 }
0x32c9   : > { %15189 = vmatpush3.msra.mxu0 %v13910_v12 }
0x32ca   : > { %15190 = vmatprep.subr.mxu0 %v15970_v33 }
0x32cb   : > { %15191 = vmatpush3.msra.mxu0 %v13909_v55 }
0x32cc   : > { %15192 = vmatprep.subr.mxu0 %v15970_v33 }
0x32cd   : > { %15193 = vmatpush3.msra.mxu0 %v13908_v35 }
0x32ce   : > { %15197 = vmatprep.subr.mxu0 %v15970_v33 }
0x3386   : > { %v8263_v22 = vpop.f32.mrf.mxu0 }
0x3387   : > { %v8264_v23 = vadd.f32 %v13902_v9, %v8263_v22 }
0x3388   : > { %v15158_v25 = vpop.f32.mrf.mxu0 }
0x3389   : > { %v8267_v28 = vmax.f32 %v8264_v23, 0.0 }
0x338b   : > { %15184 = vmatmul.mubr.msk.f32.vlgmr.msra.gmra.mxu1 %vm2633_vm6, %v8267_v28 }
0x338c   : > { %15214 = vmatprep.mubr.msk.f32.mxu1 %vm15971_vm7, %v15970_v33 }
0x344b   : > { %v8343_v30 = vpop.f32.mrf.mxu1 }
0x344c   : > { %v8344_v48 = vadd.f32 %v13904_v29, %v8343_v30  ;;  %v13914_v29 = vld [vmem:[%s17846_s0 + $0x28] sm:$0xff] }
0x344d   : > { %v15185_v31 = vpop.f32.mrf.mxu1 }
0x344e   : > { %v8347_v47 = vadd.f32 %v8344_v48, %v8169_v14 }
0x3450   : > { %v8350_v20 = vsel %vm1238_vm0, %v8347_v47, 0.0 }
0x3451   : > { %8351 = vadd.xlane.f32.xlu1 %v8350_v20 }
0x34da   : > { %v8352_v3 = vpop.xlane.xlu1 %8351 }
0x34db   : > { %v8353_v15 = vmul.f32 0.03125, %v8352_v3 }
0x34dd   : > { %v8354_v32 = vsub.f32 %v8347_v47, %v8353_v15 }
0x34df   : > { %v8355_v26 = vmul.f32 %v8354_v32, %v8354_v32 }
0x34e1   : > { %v8356_v17 = vsel %vm1238_vm0, %v8355_v26, 0.0 }
0x34e2   : > { %8357 = vadd.xlane.f32.xlu0 %v8356_v17 }
0x356b   : > { %v8358_v36 = vpop.xlane.xlu0 %8357 }
0x356c   : > { %v8359_v59 = vmul.f32 0.03125, %v8358_v36 }
0x356e   : > { %v8360_v37 = vadd.f32 1e-05, %v8359_v59 }
0x3570   : > { %15831 = vrsqrt.f32 %v8360_v37 }
0x357d   : > { %v15832_v58 = vpop.eup %15831 }
0x357e   : > { %v8362_v24 = vmul.f32 %v15832_v58, %v8354_v32 }
0x3580   : > { %v8369_v38 = vmul.f32 %v13906_v49, %v8362_v24 }
0x3582   : > { %v17116_v39 = vadd.f32 %v13907_v27, %v8369_v38  ;;  %v13915_v38 = vld [vmem:[%s17846_s0 + $0x30] sm:$0xff] }
0x3584   : > { %15195 = vmatmul.mubr.msk.f32.vlgmr.msra.gmra.mxu0 %vm1238_vm0, %v17116_v39 }
0x3585   : > { %15199 = vmatprep.mubr.msk.f32.mxu0 %vm15971_vm7, %v15970_v33 }
0x3644   : > { %v8466_v41 = vpop.f32.mrf.mxu0 }
0x3645   : > { %v17123_v62 = vadd.f32 %v13918_v40, %v8466_v41 }
0x3646   : > { %v15196_v42 = vpop.f32.mrf.mxu0 }
0x3647   : > { %8472 = vrot.lane.b32.xlu1 %v17123_v62, %s17853_s3  ;;  %v8470_v50 = vmul.f32 0.35355338, %v17123_v62 }
0x364b   : > { %8638 = vrot.lane.b32.xlu1 %v17123_v62, %s17860_s6 }
0x364f   : > { %8636 = vrot.lane.b32.xlu1 %v8470_v50, %s17859_s8 }
0x36b9   : > { %v8473_v63 = vpop.permute.xlu1 %8472 }
0x36ba   : > { %15198 = vmatpush3.xpose.msk.msra.mxu0 %vm1334_vm1, %v8473_v63 }
0x36bb   : > { %15202 = vmatprep.subr.mxu0 %v15970_v33 }
0x36bd   : > { %15200 = vmatmul.mubr.msk.f32.vlgmr.msra.gmra.mxu0 %vm1334_vm1, %v8470_v50  ;;  %v8639_v56 = vpop.permute.xlu1 %8638 }
0x36be   : > { %15204 = vmatprep.mubr.msk.f32.mxu0 %vm15971_vm7, %v15970_v33 }
0x36c1   : > { %v8637_v60 = vpop.permute.xlu1 %8636 }
0x377d   : > { %v8545_v43 = vpop.f32.mrf.mxu0 }
0x377e   : > { %v8546_v5 = vadd.f32 %v8545_v43, %v16804_v21 }
0x377f   : > { %v15201_v2 = vpop.f32.mrf.mxu0 }
0x3780   : > { %v8549_v44 = vsel %vm1334_vm1, %v8546_v5, -inf }
0x3781   : > { %8550 = vmax.xlane.f32.xlu0 %v8549_v44 }
0x3797   : > { %8558 = vrot.lane.b32.xlu0 %v17123_v62, %s17874_s22 }
0x379b   : > { %8723 = vrot.lane.b32.xlu0 %v17123_v62, %s17842_s10 }
0x380a   : > { %v8551_v4 = vpop.xlane.xlu0 %8550 }
0x380b   : > { %v8552_v45 = vsub.f32 %v8546_v5, %v8551_v4 }
0x380d   : > { %v8553_v46 = vmul.f32 1.442695, %v8552_v45 }
0x380e   : > { %v8559_v52 = vpop.permute.xlu0 %8558 }
0x380f   : > { %15833 = vpow2.f32 %v8553_v46  ;;  %15203 = vmatpush3.msra.mxu0 %v8559_v52 }
0x3810   : > { %15207 = vmatprep.subr.mxu0 %v15970_v33 }
0x3812   : > { %v8724_v54 = vpop.permute.xlu0 %8723 }
0x3813   : > { %15213 = vmatpush3.msra.mxu1 %v8724_v54 }
0x3814   : > { %15222 = vmatprep.subr.mxu1 %v15970_v33 }
0x381c   : > { %v15834_v57 = vpop.eup %15833 }
0x381d   : > { %15205 = vmatmul.mubr.msk.f32.vlgmr.msra.gmra.mxu0 %vm1334_vm1, %v15834_v57  ;;  %v8555_v7 = vsel %vm1334_vm1, %v15834_v57, 0.0 }
0x381e   : > { %15208 = vmatpush3.xpose.msk.msra.mxu0 %vm1334_vm1, %v8639_v56  ;;  %15209 = vmatprep.mubr.msk.f32.mxu0 %vm15971_vm7, %v15970_v33 }
0x381f   : > { %15217 = vmatprep.subr.mxu0 %v15970_v33 }
0x3821   : > { %15210 = vmatmul.mubr.msk.f32.vlgmr.msra.gmra.mxu0 %vm1334_vm1, %v8637_v60 }
0x3822   : > { %15219 = vmatprep.mubr.msk.f32.mxu0 %vm15971_vm7, %v15970_v33  ;;  %15218 = vmatpush3.msra.mxu0 %v13914_v29 }
0x3823   : > { %15227 = vmatprep.subr.mxu0 %v15970_v33 }
0x38dd   : > { %v8630_v61 = vpop.f32.mrf.mxu0 }
0x38df   : > { %v15206_v8 = vpop.f32.mrf.mxu0 }
0x38e0   : > { %v13916_v8 = vld [vmem:[%s17846_s0 + $0x38] sm:$0xff] }
0x38e1   : > { %v8710_v10 = vpop.f32.mrf.mxu0 }
0x38e2   : > { %v8711_v0 = vadd.f32 %v8710_v10, %v16804_v21 }
0x38e3   : > { %v15211_v1 = vpop.f32.mrf.mxu0 }
0x38e4   : > { %v8714_v6 = vsel %vm1334_vm1, %v8711_v0, -inf }
0x38e5   : > { %8715 = vmax.xlane.f32.xlu1 %v8714_v6 }
0x38f6   : > { %8949 = vrot.lane.b32.xlu1 %v17123_v62, %s17862_s17 }
0x391a   : > { %8556 = vadd.xlane.f32.xlu1 %v8555_v7 }
0x392b   : > { %9034 = vrot.lane.b32.xlu1 %v17123_v62, %s17841_s11 }
0x392f   : > { %9186 = vrot.lane.b32.xlu1 %v8470_v50, %s17847_s16 }
0x396e   : > { %v8716_v11 = vpop.xlane.xlu1 %8715 }
0x396f   : > { %v8717_v13 = vsub.f32 %v8711_v0, %v8716_v11  ;;  %v13944_v11 = vld [vmem:[%s17851_s2 + $0x38] sm:$0xff] }
0x3971   : > { %v8718_v14 = vmul.f32 1.442695, %v8717_v13  ;;  %v13936_v13 = vld [vmem:[%s17852_s1 + $0x1] ss:$0 sm:$0xff] }
0x3972   : > { %v8950_v9 = vpop.permute.xlu1 %8949 }
0x3973   : > { %15835 = vpow2.f32 %v8718_v14 }
0x3980   : > { %v15836_v18 = vpop.eup %15835 }
0x3981   : > { %15215 = vmatmul.mubr.msk.f32.vlgmr.msra.gmra.mxu1 %vm1334_vm1, %v15836_v18  ;;  %v8720_v19 = vsel %vm1334_vm1, %v15836_v18, 0.0 }
0x3982   : > { %8721 = vadd.xlane.f32.xlu0 %v8720_v19  ;;  %15223 = vmatpush3.msra.mxu1 %v13913_v16 }
0x3983   : > { %15224 = vmatprep.mubr.msk.f32.mxu1 %vm15971_vm7, %v15970_v33  ;;  %15232 = vmatprep.subr.mxu1 %v15970_v33 }
0x3998   : > { %8947 = vrot.lane.b32.xlu0 %v8470_v50, %s17848_s7 }
0x39a3   : > { %v8557_v22 = vpop.xlane.xlu1 %8556 }
0x39a4   : > { %15837 = vrcp.f32 %v8557_v22 }
0x39a7   : > { %v9035_v28 = vpop.permute.xlu1 %9034 }
0x39ab   : > { %v9187_v27 = vpop.permute.xlu1 %9186 }
0x39b1   : > { %v15838_v23 = vpop.eup %15837 }
0x39b2   : > { %v8635_v25 = vmul.f32 %v15838_v23, %v8630_v61  ;;  %v13943_v23 = vld [vmem:[%s17851_s2 + $0x30] sm:$0xff] }
0x39b4   : > { %15225 = vmatmul.mubr.msk.f32.vlgmr.msra.gmra.mxu1 %vm1334_vm1, %v8635_v25  ;;  %v13942_v25 = vld [vmem:[%s17851_s2 + $0x28] sm:$0xff] }
0x39b5   : > { %15233 = vmatpush3.msra.mxu1 %v9035_v28  ;;  %15234 = vmatprep.mubr.msk.f32.mxu1 %vm15971_vm7, %v15970_v33  ;;  %v13941_v28 = vld [vmem:[%s17851_s2 + $0x20] sm:$0xff] }
0x39b6   : > { %15242 = vmatprep.subr.mxu1 %v15970_v33 }
0x3a0b   : > { %v8722_v30 = vpop.xlane.xlu0 %8721 }
0x3a0c   : > { %15839 = vrcp.f32 %v8722_v30 }
0x3a0f   : > { %v8948_v3 = vpop.permute.xlu0 %8947 }
0x3a19   : > { %v15840_v48 = vpop.eup %15839 }
0x3a41   : > { %v8795_v31 = vpop.f32.mrf.mxu1 }
0x3a42   : > { %v8800_v47 = vmul.f32 %v15840_v48, %v8795_v31 }
0x3a43   : > { %v15216_v20 = vpop.f32.mrf.mxu1 }
0x3a44   : > { %15220 = vmatmul.mubr.msk.f32.vlgmr.msra.gmra.mxu0 %vm1334_vm1, %v8800_v47 }
0x3a45   : > { %15228 = vmatpush3.xpose.msk.msra.mxu0 %vm1334_vm1, %v8950_v9  ;;  %15229 = vmatprep.mubr.msk.f32.mxu0 %vm15971_vm7, %v15970_v33 }
0x3a46   : > { %15237 = vmatprep.subr.mxu0 %v15970_v33 }
0x3a48   : > { %15230 = vmatmul.mubr.msk.f32.vlgmr.msra.gmra.mxu0 %vm1334_vm1, %v8948_v3 }
0x3a49   : > { %15239 = vmatprep.mubr.msk.f32.mxu0 %vm15971_vm7, %v15970_v33  ;;  %15238 = vmatpush3.msra.mxu0 %v13915_v38 }
0x3a4a   : > { %15247 = vmatprep.subr.mxu0 %v15970_v33 }
0x3a74   : > { %v8943_v15 = vpop.f32.mrf.mxu1 }
0x3a76   : > { %v15226_v32 = vpop.f32.mrf.mxu1 }
0x3b04   : > { %v8870_v26 = vpop.f32.mrf.mxu0 }
0x3b06   : > { %v15221_v17 = vpop.f32.mrf.mxu0 }
0x3b08   : > { %v9021_v34 = vpop.f32.mrf.mxu0 }
0x3b09   : > { %v9022_v12 = vadd.f32 %v9021_v34, %v16804_v21 }
0x3b0a   : > { %v15231_v55 = vpop.f32.mrf.mxu0 }
0x3b0b   : > { %v9025_v35 = vsel %vm1334_vm1, %v9022_v12, -inf  ;;  %v13939_v55 = vld [vmem:[%s17857_s12 + $0x1] ss:$0 sm:$0xff] }
0x3b0c   : > { %9026 = vmax.xlane.f32.xlu0 %v9025_v35 }
0x3b22   : > { %9188 = vrot.lane.b32.xlu0 %v17123_v62, %s17849_s15 }
0x3b95   : > { %v9027_v36 = vpop.xlane.xlu0 %9026 }
0x3b96   : > { %v9028_v59 = vsub.f32 %v9022_v12, %v9027_v36  ;;  %v13940_v36 = vld [vmem:[%s17858_s13 + $0x1] ss:$0 sm:$0xff] }
0x3b98   : > { %v9029_v37 = vmul.f32 1.442695, %v9028_v59 }
0x3b99   : > { %v9189_v49 = vpop.permute.xlu0 %9188 }
0x3b9a   : > { %15841 = vpow2.f32 %v9029_v37 }
0x3ba7   : > { %v15842_v58 = vpop.eup %15841 }
0x3ba8   : > { %15235 = vmatmul.mubr.msk.f32.vlgmr.msra.gmra.mxu1 %vm1334_vm1, %v15842_v58  ;;  %v9031_v24 = vsel %vm1334_vm1, %v15842_v58, 0.0 }
0x3ba9   : > { %15243 = vmatpush3.xpose.msk.msra.mxu1 %vm1334_vm1, %v9189_v49  ;;  %9032 = vadd.xlane.f32.xlu1 %v9031_v24 }
0x3baa   : > { %15244 = vmatprep.mubr.msk.f32.mxu1 %vm15971_vm7, %v15970_v33  ;;  %15252 = vmatprep.subr.mxu1 %v15970_v33 }
0x3bac   : > { %15245 = vmatmul.mubr.msk.f32.vlgmr.msra.gmra.mxu1 %vm1334_vm1, %v9187_v27 }
0x3bad   : > { %15254 = vmatprep.mubr.msk.f32.mxu1 %vm15971_vm7, %v15970_v33  ;;  %15253 = vmatpush3.msra.mxu1 %v13916_v8 }
0x3c32   : > { %v9033_v40 = vpop.xlane.xlu1 %9032 }
0x3c33   : > { %15843 = vrcp.f32 %v9033_v40 }
0x3c40   : > { %v15844_v41 = vpop.eup %15843 }
0x3c68   : > { %v9106_v42 = vpop.f32.mrf.mxu1 }
0x3c69   : > { %v9111_v50 = vmul.f32 %v15844_v41, %v9106_v42 }
0x3c6a   : > { %v15236_v63 = vpop.f32.mrf.mxu1 }
0x3c6b   : > { %15240 = vmatmul.mubr.msk.f32.vlgmr.msra.gmra.mxu0 %vm1334_vm1, %v9111_v50 }
0x3c6c   : > { %v9260_v43 = vpop.f32.mrf.mxu1  ;;  %15249 = vmatprep.mubr.msk.f32.mxu0 %vm15971_vm7, %v15970_v33 }
0x3c6d   : > { %v9261_v5 = vadd.f32 %v9260_v43, %v16804_v21 }
0x3c6e   : > { %v15246_v2 = vpop.f32.mrf.mxu1 }
0x3c6f   : > { %v9264_v44 = vsel %vm1334_vm1, %v9261_v5, -inf }
0x3c70   : > { %9265 = vmax.xlane.f32.xlu0 %v9264_v44 }
0x3c86   : > { %9273 = vrot.lane.b32.xlu0 %v17123_v62, %s17850_s28  ;;  %v8944_v62 = vadd.f32 %v8943_v15, %v8870_v26  ;;  %v13951_v15 = vld [vmem:[%s17854_s5 + $0x1] ss:$0 sm:$0xff] }
0x3c8a   : > { %9565 = vrot.lane.b32.xlu0 %v13943_v23, %s17853_s3 }
0x3c8e   : > { %9563 = vrot.lane.b32.xlu0 %v13942_v25, %s17853_s3 }
0x3c92   : > { %9573 = vrot.lane.b32.xlu0 %v13951_v15, %s17853_s3 }
0x3cf9   : > { %v9266_v4 = vpop.xlane.xlu0 %9265 }
0x3cfa   : > { %v9267_v45 = vsub.f32 %v9261_v5, %v9266_v4 }
0x3cfc   : > { %v9268_v46 = vmul.f32 1.442695, %v9267_v45 }
0x3cfd   : > { %v9274_v52 = vpop.permute.xlu0 %9273 }
0x3cfe   : > { %15845 = vpow2.f32 %v9268_v46  ;;  %15248 = vmatpush3.msra.mxu0 %v9274_v52 }
0x3cff   : > { %15257 = vmatprep.subr.mxu0 %v15970_v33 }
0x3d01   : > { %v9566_v47 = vpop.permute.xlu0 %9565 }
0x3d05   : > { %v9564_v3 = vpop.permute.xlu0 %9563 }
0x3d09   : > { %v9574_v58 = vpop.permute.xlu0 %9573 }
0x3d0b   : > { %v15846_v54 = vpop.eup %15845 }
0x3d0c   : > { %15250 = vmatmul.mubr.msk.f32.vlgmr.msra.gmra.mxu0 %vm1334_vm1, %v15846_v54  ;;  %v9270_v56 = vsel %vm1334_vm1, %v15846_v54, 0.0 }
0x3d0d   : > { %9271 = vadd.xlane.f32.xlu1 %v9270_v56  ;;  %15265 = vmatprep.mubr.msk.f32.mxu0 %vm15971_vm7, %v15970_v33 }
0x3d0e   : > { %15258 = vmatpush3.msra.mxu0 %v13944_v11 }
0x3d0f   : > { %15259 = vmatprep.subr.mxu0 %v15970_v33 }
0x3d10   : > { %15260 = vmatpush3.msra.mxu0 %v13943_v23 }
0x3d11   : > { %15261 = vmatprep.subr.mxu0 %v15970_v33 }
0x3d12   : > { %15262 = vmatpush3.msra.mxu0 %v13942_v25 }
0x3d13   : > { %15263 = vmatprep.subr.mxu0 %v15970_v33 }
0x3d14   : > { %15264 = vmatpush3.msra.mxu0 %v13941_v28 }
0x3d15   : > { %15279 = vmatprep.subr.mxu0 %v15970_v33 }
0x3d2b   : > { %v9181_v57 = vpop.f32.mrf.mxu0 }
0x3d2c   : > { %v9185_v60 = vadd.f32 %v9181_v57, %v8944_v62 }
0x3d2d   : > { %v15241_v61 = vpop.f32.mrf.mxu0 }
0x3d96   : > { %v9272_v10 = vpop.xlane.xlu1 %9271 }
0x3d97   : > { %15847 = vrcp.f32 %v9272_v10 }
0x3da4   : > { %v15848_v0 = vpop.eup %15847 }
0x3dcc   : > { %v9345_v1 = vpop.f32.mrf.mxu0 }
0x3dcd   : > { %v9350_v6 = vmul.f32 %v15848_v0, %v9345_v1 }
0x3dce   : > { %v15251_v7 = vpop.f32.mrf.mxu0 }
0x3dcf   : > { %15255 = vmatmul.mubr.msk.f32.vlgmr.msra.gmra.mxu1 %vm1334_vm1, %v9350_v6  ;;  %v13946_v6 = vld [vmem:[%s17861_s14 + $0x20] sm:$0xff] }
0x3dd0   : > { %15276 = vmatprep.mubr.msk.f32.mxu1 %vm1238_vm0, %v16919_v51 }
0x3e8f   : > { %v9420_v14 = vpop.f32.mrf.mxu1 }
0x3e90   : > { %v9424_v16 = vadd.f32 %v9420_v14, %v9185_v60 }
0x3e91   : > { %v15256_v18 = vpop.f32.mrf.mxu1 }
0x3e92   : > { %v9431_v19 = vadd.f32 %v13936_v13, %v9424_v16 }
0x3e94   : > { %v9432_v9 = vadd.f32 %v9431_v19, %v17116_v39 }
0x3e96   : > { %v9437_v22 = vsel %vm1238_vm0, %v9432_v9, 0.0 }
0x3e97   : > { %9438 = vadd.xlane.f32.xlu1 %v9437_v22 }
0x3ea8   : > { %9567 = vrot.lane.b32.xlu1 %v13944_v11, %s17853_s3 }
0x3f20   : > { %v9439_v39 = vpop.xlane.xlu1 %9438 }
0x3f21   : > { %v9440_v29 = vmul.f32 0.03125, %v9439_v39  ;;  %v13947_v39 = vld [vmem:[%s17861_s14 + $0x28] sm:$0xff] }
0x3f23   : > { %v9441_v30 = vsub.f32 %v9432_v9, %v9440_v29 }
0x3f24   : > { %v9568_v48 = vpop.permute.xlu1 %9567 }
0x3f25   : > { %v9442_v31 = vmul.f32 %v9441_v30, %v9441_v30  ;;  %15268 = vmatprep.subr.mxu1 %v9568_v48 }
0x3f26   : > { %15269 = vmatpush3.msra.mxu1 %v9568_v48 }
0x3f27   : > { %v9443_v20 = vsel %vm1238_vm0, %v9442_v31, 0.0  ;;  %15270 = vmatprep.subr.mxu1 %v9566_v47 }
0x3f28   : > { %9444 = vadd.xlane.f32.xlu1 %v9443_v20  ;;  %15271 = vmatpush3.msra.mxu1 %v9566_v47 }
0x3f29   : > { %15272 = vmatprep.subr.mxu1 %v9564_v3 }
0x3f2a   : > { %15273 = vmatpush3.msra.mxu1 %v9564_v3 }
0x3f39   : > { %9561 = vrot.lane.b32.xlu1 %v13941_v28, %s17853_s3 }
0x3fb1   : > { %v9445_v32 = vpop.xlane.xlu1 %9444 }
0x3fb2   : > { %v9446_v26 = vmul.f32 0.03125, %v9445_v32 }
0x3fb4   : > { %v9447_v17 = vadd.f32 1e-05, %v9446_v26 }
0x3fb5   : > { %v9562_v34 = vpop.permute.xlu1 %9561 }
0x3fb6   : > { %15849 = vrsqrt.f32 %v9447_v17  ;;  %15274 = vmatprep.subr.mxu1 %v9562_v34 }
0x3fb7   : > { %15275 = vmatpush3.msra.mxu1 %v9562_v34 }
0x3fb8   : > { %15277 = vmatmul.mubr.msk.f32.vlgmr.msra.gmra.mxu1 %vm1238_vm0, %v16923_v53  ;;  %15286 = vmatprep.subr.mxu1 %v15970_v33 }
0x3fb9   : > { %15290 = vmatprep.mubr.msk.f32.mxu1 %vm15971_vm7, %v15970_v33 }
0x3fc3   : > { %v15850_v12 = vpop.eup %15849 }
0x3fc4   : > { %v9449_v35 = vmul.f32 %v15850_v12, %v9441_v30 }
0x3fc6   : > { %v9456_v59 = vmul.f32 %v13939_v55, %v9449_v35 }
0x3fc8   : > { %v17237_v37 = vadd.f32 %v13940_v36, %v9456_v59 }
0x3fca   : > { %15266 = vmatmul.mubr.msk.f32.vlgmr.msra.gmra.mxu0 %vm1238_vm0, %v17237_v37 }
0x3fcb   : > { %15283 = vmatprep.mubr.msk.f32.mxu0 %vm15971_vm7, %v15970_v33 }
0x4078   : > { %v15278_v49 = vpop.f32.mrf.mxu1 }
0x4079   : > { %v17243_v24 = vadd.f32 %v15278_v49, %v9574_v58 }
0x407a   : > { %v9642_v27 = vpop.f32.mrf.mxu1 }
0x407b   : > { %9742 = vrot.lane.b32.xlu0 %v17243_v24, %s17853_s3  ;;  %15280 = vmatpush3.xpose.msk.msra.mxu0 %vm1334_vm1, %v17243_v24  ;;  %v17250_v38 = vadd.f32 %v9642_v27, %v9574_v58 }
0x407c   : > { %15281 = vmatprep.subr.mxu0 %v15970_v33 }
0x407f   : > { %9740 = vrot.lane.b32.xlu0 %v17250_v38, %s17853_s3  ;;  %15282 = vmatpush3.xpose.msk.msra.mxu0 %vm1334_vm1, %v17250_v38 }
0x4080   : > { %15300 = vmatprep.subr.mxu0 %v15970_v33 }
0x4083   : > { %9826 = vrot.lane.b32.xlu0 %v17243_v24, %s17859_s8 }
0x4087   : > { %9824 = vrot.lane.b32.xlu0 %v17250_v38, %s17859_s8 }
0x408a   : > { %v9553_v40 = vpop.f32.mrf.mxu0 }
0x408b   : > { %v9554_v41 = vadd.f32 %v13951_v15, %v9553_v40 }
0x408c   : > { %v15267_v42 = vpop.f32.mrf.mxu0 }
0x408d   : > { %v9651_v50 = vmul.f32 0.35355338, %v9554_v41 }
0x408f   : > { %9822 = vrot.lane.b32.xlu0 %v9651_v50, %s17859_s8  ;;  %15284 = vmatmul.mubr.msk.f32.vlgmr.msra.gmra.mxu0 %vm1334_vm1, %v9651_v50 }
0x4090   : > { %15304 = vmatprep.mubr.msk.f32.mxu0 %vm15971_vm7, %v15970_v33 }
0x40ed   : > { %v9743_v63 = vpop.permute.xlu0 %9742 }
0x40ee   : > { %15287 = vmatpush3.msk.msra.mxu1 %vm1451_vm2, %v9743_v63 }
0x40ef   : > { %15288 = vmatprep.subr.mxu1 %v15970_v33 }
0x40f1   : > { %v9741_v43 = vpop.permute.xlu0 %9740 }
0x40f2   : > { %15289 = vmatpush3.msra.mxu1 %v9741_v43 }
0x40f3   : > { %15293 = vmatprep.subr.mxu1 %v15970_v33 }
0x40f5   : > { %v9827_v54 = vpop.permute.xlu0 %9826 }
0x40f9   : > { %v9825_v62 = vpop.permute.xlu0 %9824 }
0x4101   : > { %v9823_v57 = vpop.permute.xlu0 %9822 }
0x414f   : > { %v9727_v5 = vpop.f32.mrf.mxu0 }
0x4150   : > { %v9731_v2 = vsel %vm1420_vm4, %v9727_v5, -inf }
0x4151   : > { %9732 = vmax.xlane.f32.xlu1 %v9731_v2  ;;  %v15285_v44 = vpop.f32.mrf.mxu0 }
0x4162   : > { %9915 = vrot.lane.b32.xlu1 %v17243_v24, %s17860_s6 }
0x41da   : > { %v9733_v4 = vpop.xlane.xlu1 %9732 }
0x41db   : > { %v9734_v45 = vsub.f32 %v9727_v5, %v9733_v4  ;;  %v13948_v4 = vld [vmem:[%s17861_s14 + $0x30] sm:$0xff] }
0x41dd   : > { %v9735_v46 = vmul.f32 1.442695, %v9734_v45 }
0x41de   : > { %v9916_v52 = vpop.permute.xlu1 %9915 }
0x41df   : > { %15851 = vpow2.f32 %v9735_v46  ;;  %15301 = vmatpush3.msk.msra.mxu0 %vm1451_vm2, %v9916_v52 }
0x41e0   : > { %15302 = vmatprep.subr.mxu0 %v15970_v33 }
0x41ec   : > { %v15852_v56 = vpop.eup %15851 }
0x41ed   : > { %15291 = vmatmul.mubr.msk.f32.vlgmr.msra.gmra.mxu1 %vm1420_vm4, %v15852_v56  ;;  %v9737_v1 = vsel %vm1420_vm4, %v15852_v56, 0.0 }
0x41ee   : > { %15294 = vmatpush3.xpose.msk.msra.mxu1 %vm1334_vm1, %v9827_v54  ;;  %15297 = vmatprep.mubr.msk.f32.mxu1 %vm15971_vm7, %v15970_v33 }
0x41ef   : > { %15295 = vmatprep.subr.mxu1 %v15970_v33 }
0x41f2   : > { %15296 = vmatpush3.xpose.msk.msra.mxu1 %vm1334_vm1, %v9825_v62 }
0x41f3   : > { %15312 = vmatprep.subr.mxu1 %v15970_v33 }
0x41f5   : > { %15298 = vmatmul.mubr.msk.f32.vlgmr.msra.gmra.mxu1 %vm1334_vm1, %v9823_v57  ;;  %v13949_v57 = vld [vmem:[%s17861_s14 + $0x38] sm:$0xff] }
0x41f6   : > { %15314 = vmatprep.mubr.msk.f32.mxu1 %vm15971_vm7, %v15970_v33  ;;  %15313 = vmatpush3.msra.mxu1 %v13946_v6 }
0x41f7   : > { %15324 = vmatprep.subr.mxu1 %v15970_v33 }
0x42ad   : > { %v9816_v60 = vpop.f32.mrf.mxu1 }
0x42af   : > { %v15292_v61 = vpop.f32.mrf.mxu1 }
0x42b5   : > { %v9900_v8 = vpop.f32.mrf.mxu1 }
0x42b6   : > { %v9904_v10 = vsel %vm1420_vm4, %v9900_v8, -inf }
0x42b7   : > { %9905 = vmax.xlane.f32.xlu0 %v9904_v10  ;;  %v15299_v0 = vpop.f32.mrf.mxu1 }
0x42cd   : > { %9913 = vrot.lane.b32.xlu0 %v17250_v38, %s17860_s6 }
0x42d1   : > { %10145 = vrot.lane.b32.xlu0 %v17243_v24, %s17848_s7 }
0x42d5   : > { %10143 = vrot.lane.b32.xlu0 %v17250_v38, %s17848_s7 }
0x42d9   : > { %10141 = vrot.lane.b32.xlu0 %v9651_v50, %s17848_s7 }
0x42dd   : > { %10392 = vrot.lane.b32.xlu0 %v17243_v24, %s17847_s16 }
0x42e1   : > { %10388 = vrot.lane.b32.xlu0 %v9651_v50, %s17847_s16 }
0x4300   : > { %9738 = vadd.xlane.f32.xlu0 %v9737_v1 }
0x4316   : > { %10234 = vrot.lane.b32.xlu0 %v17243_v24, %s17862_s17 }
0x4340   : > { %v9906_v7 = vpop.xlane.xlu0 %9905 }
0x4341   : > { %v9907_v11 = vsub.f32 %v9900_v8, %v9906_v7 }
0x4343   : > { %v9908_v13 = vmul.f32 1.442695, %v9907_v11 }
0x4344   : > { %v9914_v14 = vpop.permute.xlu0 %9913 }
0x4345   : > { %15853 = vpow2.f32 %v9908_v13  ;;  %15303 = vmatpush3.msra.mxu0 %v9914_v14  ;;  %v13979_v13 = vld [vmem:[%s17863_s19 + $0x1] ss:$0 sm:$0xff] }
0x4346   : > { %15307 = vmatprep.subr.mxu0 %v15970_v33 }
0x4348   : > { %v10146_v19 = vpop.permute.xlu0 %10145 }
0x434c   : > { %v10144_v9 = vpop.permute.xlu0 %10143 }
0x4350   : > { %v10142_v22 = vpop.permute.xlu0 %10141 }
0x4352   : > { %v15854_v16 = vpop.eup %15853 }
0x4353   : > { %15305 = vmatmul.mubr.msk.f32.vlgmr.msra.gmra.mxu0 %vm1420_vm4, %v15854_v16  ;;  %v9910_v18 = vsel %vm1420_vm4, %v15854_v16, 0.0 }
0x4354   : > { %9911 = vadd.xlane.f32.xlu1 %v9910_v18  ;;  %15309 = vmatprep.mubr.msk.f32.mxu0 %vm15971_vm7, %v15970_v33  ;;  %v10393_v23 = vpop.permute.xlu0 %10392 }
0x4355   : > { %15308 = vmatpush3.msra.mxu0 %v13947_v39 }
0x4356   : > { %15317 = vmatprep.subr.mxu0 %v15970_v33 }
0x4358   : > { %v10389_v25 = vpop.permute.xlu0 %10388 }
0x4365   : > { %10390 = vrot.lane.b32.xlu1 %v17250_v38, %s17847_s16 }
0x4389   : > { %v9739_v28 = vpop.xlane.xlu0 %9738 }
0x438a   : > { %15855 = vrcp.f32 %v9739_v28 }
0x438d   : > { %v10235_v48 = vpop.permute.xlu0 %10234 }
0x4397   : > { %v15856_v29 = vpop.eup %15855 }
0x4398   : > { %v9821_v30 = vmul.f32 %v15856_v29, %v9816_v60 }
0x439a   : > { %15315 = vmatmul.mubr.msk.f32.vlgmr.msra.gmra.mxu1 %vm1334_vm1, %v9821_v30  ;;  %v13987_v30 = vld [vmem:[%s17864_s21 + $0x38] sm:$0xff] }
0x439b   : > { %15325 = vmatpush3.msk.msra.mxu1 %vm1451_vm2, %v10235_v48  ;;  %15328 = vmatprep.mubr.msk.f32.mxu1 %vm15971_vm7, %v15970_v33  ;;  %v13986_v48 = vld [vmem:[%s17864_s21 + $0x30] sm:$0xff] }
0x439c   : > { %15326 = vmatprep.subr.mxu1 %v15970_v33 }
0x43dd   : > { %v9912_v31 = vpop.xlane.xlu1 %9911 }
0x43de   : > { %15857 = vrcp.f32 %v9912_v31  ;;  %v13984_v31 = vld [vmem:[%s17864_s21 + $0x20] sm:$0xff] }
0x43e1   : > { %v10391_v32 = vpop.permute.xlu1 %10390 }
0x43eb   : > { %v15858_v47 = vpop.eup %15857 }
0x4413   : > { %v9989_v20 = vpop.f32.mrf.mxu0 }
0x4414   : > { %v9994_v3 = vmul.f32 %v15858_v47, %v9989_v20  ;;  %v14000_v47 = vld [vmem:[%s17865_s24 + $0xb8] sm:$0xff]  ;;  %v13999_v20 = vld [vmem:[%s17865_s24 + $0xb0] sm:$0xff] }
0x4415   : > { %v15306_v15 = vpop.f32.mrf.mxu0 }
0x4416   : > { %15310 = vmatmul.mubr.msk.f32.vlgmr.msra.gmra.mxu0 %vm1334_vm1, %v9994_v3  ;;  %v13998_v3 = vld [vmem:[%s17865_s24 + $0xa8] sm:$0xff]  ;;  %v13997_v15 = vld [vmem:[%s17865_s24 + $0xa0] sm:$0xff] }
0x4417   : > { %15318 = vmatpush3.xpose.msk.msra.mxu0 %vm1334_vm1, %v10146_v19  ;;  %15321 = vmatprep.mubr.msk.f32.mxu0 %vm15971_vm7, %v15970_v33 }
0x4418   : > { %15319 = vmatprep.subr.mxu0 %v15970_v33 }
0x441b   : > { %15320 = vmatpush3.xpose.msk.msra.mxu0 %vm1334_vm1, %v10144_v9 }
0x441c   : > { %15336 = vmatprep.subr.mxu0 %v15970_v33 }
0x441e   : > { %15322 = vmatmul.mubr.msk.f32.vlgmr.msra.gmra.mxu0 %vm1334_vm1, %v10142_v22 }
0x441f   : > { %15337 = vmatpush3.xpose.msk.msra.mxu0 %vm1334_vm1, %v10393_v23  ;;  %15340 = vmatprep.mubr.msk.f32.mxu0 %vm15971_vm7, %v15970_v33 }
0x4420   : > { %15338 = vmatprep.subr.mxu0 %v15970_v33 }
0x4423   : > { %15339 = vmatpush3.xpose.msk.msra.mxu0 %vm1334_vm1, %v10391_v32  ;;  %v13996_v32 = vld [vmem:[%s17865_s24 + $0x98] sm:$0xff] }
0x4424   : > { %15355 = vmatprep.subr.mxu0 %v15970_v33 }
0x4426   : > { %15341 = vmatmul.mubr.msk.f32.vlgmr.msra.gmra.mxu0 %vm1334_vm1, %v10389_v25 }
0x4427   : > { %15363 = vmatprep.mubr.msk.f32.mxu0 %vm15971_vm7, %v15970_v33  ;;  %15356 = vmatpush3.msra.mxu0 %v13987_v30 }
0x4428   : > { %15357 = vmatprep.subr.mxu0 %v15970_v33 }
0x4429   : > { %15358 = vmatpush3.msra.mxu0 %v13986_v48 }
0x442a   : > { %15359 = vmatprep.subr.mxu0 %v15970_v33 }
0x445a   : > { %v10137_v26 = vpop.f32.mrf.mxu1 }
0x445c   : > { %v15316_v17 = vpop.f32.mrf.mxu1 }
0x445d   : > { %v13994_v17 = vld [vmem:[%s17865_s24 + $0x88] sm:$0xff] }
0x44d6   : > { %v10064_v34 = vpop.f32.mrf.mxu0 }
0x44d7   : > { %v10138_v61 = vadd.f32 %v10137_v26, %v10064_v34  ;;  %v13995_v26 = vld [vmem:[%s17865_s24 + $0x90] sm:$0xff]  ;;  %v13993_v34 = vld [vmem:[%s17865_s24 + $0x80] sm:$0xff] }
0x44d8   : > { %v15311_v12 = vpop.f32.mrf.mxu0 }
0x44d9   : > { %v13992_v12 = vld [vmem:[%s17865_s24 + $0x78] sm:$0xff] }
0x44de   : > { %v10219_v55 = vpop.f32.mrf.mxu0 }
0x44df   : > { %v10223_v35 = vsel %vm1420_vm4, %v10219_v55, -inf }
0x44e0   : > { %10224 = vmax.xlane.f32.xlu1 %v10223_v35  ;;  %v15323_v36 = vpop.f32.mrf.mxu0 }
0x44e6   : > { %v10466_v59 = vpop.f32.mrf.mxu0 }
0x44e7   : > { %v10470_v49 = vsel %vm1420_vm4, %v10466_v59, -inf }
0x44e8   : > { %v15342_v58 = vpop.f32.mrf.mxu0 }
0x44e9   : > { %v13982_v58 = vld [vmem:[%s17866_s25 + $0x1] ss:$0 sm:$0xff] }
0x44f1   : > { %10232 = vrot.lane.b32.xlu1 %v17250_v38, %s17862_s17 }
0x4515   : > { %10471 = vmax.xlane.f32.xlu1 %v10470_v49 }
0x4526   : > { %10479 = vrot.lane.b32.xlu1 %v17250_v38, %s17849_s15 }
0x4569   : > { %v10225_v27 = vpop.xlane.xlu1 %10224 }
0x456a   : > { %v10226_v40 = vsub.f32 %v10219_v55, %v10225_v27  ;;  %v13983_v27 = vld [vmem:[%s17867_s29 + $0x1] ss:$0 sm:$0xff] }
0x456c   : > { %v10227_v41 = vmul.f32 1.442695, %v10226_v40 }
0x456d   : > { %v10233_v42 = vpop.permute.xlu1 %10232 }
0x456e   : > { %15859 = vpow2.f32 %v10227_v41  ;;  %15327 = vmatpush3.msra.mxu1 %v10233_v42  ;;  %v13991_v42 = vld [vmem:[%s17865_s24 + $0x70] sm:$0xff] }
0x456f   : > { %15331 = vmatprep.subr.mxu1 %v15970_v33 }
0x457b   : > { %v15860_v50 = vpop.eup %15859 }
0x457c   : > { %15329 = vmatmul.mubr.msk.f32.vlgmr.msra.gmra.mxu1 %vm1420_vm4, %v15860_v50  ;;  %v10229_v63 = vsel %vm1420_vm4, %v15860_v50, 0.0  ;;  %v13990_v50 = vld [vmem:[%s17865_s24 + $0x68] sm:$0xff] }
0x457d   : > { %10230 = vadd.xlane.f32.xlu0 %v10229_v63  ;;  %15333 = vmatprep.mubr.msk.f32.mxu1 %vm15971_vm7, %v15970_v33  ;;  %v13989_v63 = vld [vmem:[%s17865_s24 + $0x60] sm:$0xff] }
0x457e   : > { %15332 = vmatpush3.msra.mxu1 %v13948_v4  ;;  %v14004_v4 = vld [vmem:[%s17870_s20 + $0x1] ss:$0 sm:$0xff] }
0x457f   : > { %15343 = vmatprep.subr.mxu1 %v15970_v33 }
0x4593   : > { %10481 = vrot.lane.b32.xlu0 %v17243_v24, %s17849_s15 }
0x459e   : > { %v10472_v38 = vpop.xlane.xlu1 %10471 }
0x459f   : > { %v10473_v43 = vsub.f32 %v10466_v59, %v10472_v38  ;;  %v14002_v38 = vld [vmem:[%s17868_s30 + $0x1] ss:$0 sm:$0xff] }
0x45a1   : > { %v10474_v5 = vmul.f32 1.442695, %v10473_v43 }
0x45a2   : > { %v10480_v62 = vpop.permute.xlu1 %10479 }
0x45a3   : > { %15861 = vpow2.f32 %v10474_v5 }
0x45b0   : > { %v15862_v2 = vpop.eup %15861 }
0x45b1   : > { %v10476_v44 = vsel %vm1420_vm4, %v15862_v2, 0.0 }
0x45b2   : > { %10477 = vadd.xlane.f32.xlu0 %v10476_v44 }
0x4606   : > { %v10231_v45 = vpop.xlane.xlu0 %10230 }
0x4607   : > { %15863 = vrcp.f32 %v10231_v45 }
0x460a   : > { %v10482_v24 = vpop.permute.xlu0 %10481 }
0x4614   : > { %v15864_v46 = vpop.eup %15863 }
0x463b   : > { %v10478_v60 = vpop.xlane.xlu0 %10477 }
0x463c   : > { %v10308_v52 = vpop.f32.mrf.mxu1  ;;  %15865 = vrcp.f32 %v10478_v60 }
0x463d   : > { %v10313_v54 = vmul.f32 %v15864_v46, %v10308_v52 }
0x463e   : > { %v15330_v56 = vpop.f32.mrf.mxu1 }
0x463f   : > { %15334 = vmatmul.mubr.msk.f32.vlgmr.msra.gmra.mxu1 %vm1334_vm1, %v10313_v54 }
0x4640   : > { %15344 = vmatpush3.msk.msra.mxu1 %vm1451_vm2, %v10482_v24  ;;  %15347 = vmatprep.mubr.msk.f32.mxu1 %vm15971_vm7, %v15970_v33 }
0x4641   : > { %15345 = vmatprep.subr.mxu1 %v15970_v33 }
0x4642   : > { %15346 = vmatpush3.msra.mxu1 %v10480_v62 }
0x4643   : > { %15348 = vmatmul.mubr.msk.f32.vlgmr.msra.gmra.mxu1 %vm1420_vm4, %v15862_v2  ;;  %15350 = vmatprep.subr.mxu1 %v15970_v33 }
0x4644   : > { %15352 = vmatprep.mubr.msk.f32.mxu1 %vm15971_vm7, %v15970_v33  ;;  %15351 = vmatpush3.msra.mxu1 %v13949_v57 }
0x4645   : > { %15366 = vmatprep.subr.mxu1 %v15970_v33 }
0x4649   : > { %v15866_v1 = vpop.eup %15865 }
0x46ff   : > { %v10383_v8 = vpop.f32.mrf.mxu1 }
0x4700   : > { %v10387_v10 = vadd.f32 %v10383_v8, %v10138_v61  ;;  %v14013_v8 = vld [vmem:[%s17843_s26 + $0x58] sm:$0xff] }
0x4701   : > { %v15335_v0 = vpop.f32.mrf.mxu1 }
0x4702   : > { %v14011_v0 = vld [vmem:[%s17843_s26 + $0x48] sm:$0xff] }
0x4703   : > { %v10555_v6 = vpop.f32.mrf.mxu1 }
0x4704   : > { %v10560_v7 = vmul.f32 %v15866_v1, %v10555_v6  ;;  %v14010_v1 = vld [vmem:[%s17843_s26 + $0x40] sm:$0xff] }
0x4705   : > { %v15349_v11 = vpop.f32.mrf.mxu1 }
0x4706   : > { %15353 = vmatmul.mubr.msk.f32.vlgmr.msra.gmra.mxu1 %vm1334_vm1, %v10560_v7 }
0x4707   : > { %15390 = vmatprep.mubr.msk.f32.mxu1 %vm15971_vm7, %v15970_v33  ;;  %15367 = vmatpush3.msra.mxu1 %v14000_v47 }
0x4708   : > { %15368 = vmatprep.subr.mxu1 %v15970_v33 }
0x4709   : > { %15369 = vmatpush3.msra.mxu1 %v13999_v20 }
0x470a   : > { %15370 = vmatprep.subr.mxu1 %v15970_v33 }
0x470b   : > { %15371 = vmatpush3.msra.mxu1 %v13998_v3 }
0x470c   : > { %15372 = vmatprep.subr.mxu1 %v15970_v33 }
0x470d   : > { %15373 = vmatpush3.msra.mxu1 %v13997_v15 }
0x470e   : > { %15374 = vmatprep.subr.mxu1 %v15970_v33 }
0x470f   : > { %15375 = vmatpush3.msra.mxu1 %v13996_v32 }
0x4710   : > { %15376 = vmatprep.subr.mxu1 %v15970_v33 }
0x4711   : > { %15377 = vmatpush3.msra.mxu1 %v13995_v26 }
0x4712   : > { %15378 = vmatprep.subr.mxu1 %v15970_v33 }
0x4713   : > { %15379 = vmatpush3.msra.mxu1 %v13994_v17 }
0x4714   : > { %15380 = vmatprep.subr.mxu1 %v15970_v33 }
0x4715   : > { %15381 = vmatpush3.msra.mxu1 %v13993_v34 }
0x4716   : > { %15382 = vmatprep.subr.mxu1 %v15970_v33 }
0x4717   : > { %15383 = vmatpush3.msra.mxu1 %v13992_v12 }
0x4718   : > { %15384 = vmatprep.subr.mxu1 %v15970_v33 }
0x4719   : > { %15385 = vmatpush3.msra.mxu1 %v13991_v42  ;;  %v14015_v42 = vld [vmem:[%s17846_s0 + $0x40] sm:$0xff] }
0x471a   : > { %15386 = vmatprep.subr.mxu1 %v15970_v33 }
0x471b   : > { %15387 = vmatpush3.msra.mxu1 %v13990_v50 }
0x471c   : > { %15388 = vmatprep.subr.mxu1 %v15970_v33 }
0x471d   : > { %15389 = vmatpush3.msra.mxu1 %v13989_v63 }
0x471e   : > { %15419 = vmatprep.subr.mxu1 %v15970_v33 }
0x47c6   : > { %v10630_v14 = vpop.f32.mrf.mxu1 }
0x47c7   : > { %v10634_v16 = vadd.f32 %v10630_v14, %v10387_v10  ;;  %v14012_v10 = vld [vmem:[%s17843_s26 + $0x50] sm:$0xff]  ;;  %v14008_v14 = vld [vmem:[%s17871_s23 + $0x1] ss:$0 sm:$0xff] }
0x47c8   : > { %v15354_v18 = vpop.f32.mrf.mxu1 }
0x47c9   : > { %v10641_v19 = vadd.f32 %v13979_v13, %v10634_v16  ;;  %v14009_v18 = vld [vmem:[%s17873_s9 + $0x1] ss:$0 sm:$0xff] }
0x47cb   : > { %v10642_v9 = vadd.f32 %v10641_v19, %v17237_v37  ;;  %v13985_v37 = vld [vmem:[%s17864_s21 + $0x28] sm:$0xff] }
0x47cc   : > { %15360 = vmatpush3.msra.mxu0 %v13985_v37 }
0x47cd   : > { %v10647_v22 = vsel %vm1238_vm0, %v10642_v9, 0.0  ;;  %15361 = vmatprep.subr.mxu0 %v15970_v33 }
0x47ce   : > { %10648 = vadd.xlane.f32.xlu1 %v10647_v22  ;;  %15362 = vmatpush3.msra.mxu0 %v13984_v31  ;;  %v14020_v22 = vld [vmem:[%s17845_s18 + $0x2] ss:$0 sm:$0xff] }
0x47cf   : > { %15393 = vmatprep.subr.mxu0 %v15970_v33 }
0x4857   : > { %v10649_v23 = vpop.xlane.xlu1 %10648 }
0x4858   : > { %v10650_v25 = vmul.f32 0.03125, %v10649_v23 }
0x485a   : > { %v10651_v28 = vsub.f32 %v10642_v9, %v10650_v25 }
0x485c   : > { %v10652_v39 = vmul.f32 %v10651_v28, %v10651_v28 }
0x485e   : > { %v10653_v29 = vsel %vm1238_vm0, %v10652_v39, 0.0 }
0x485f   : > { %10654 = vadd.xlane.f32.xlu0 %v10653_v29 }
0x48e8   : > { %v10655_v55 = vpop.xlane.xlu0 %10654 }
0x48e9   : > { %v10656_v35 = vmul.f32 0.03125, %v10655_v55 }
0x48eb   : > { %v10657_v36 = vadd.f32 1e-05, %v10656_v35 }
0x48ed   : > { %15867 = vrsqrt.f32 %v10657_v36 }
0x48fa   : > { %v15868_v59 = vpop.eup %15867 }
0x48fb   : > { %v10659_v49 = vmul.f32 %v15868_v59, %v10651_v28 }
0x48fd   : > { %v10666_v40 = vmul.f32 %v13982_v58, %v10659_v49 }
0x48ff   : > { %v10673_v41 = vadd.f32 %v13983_v27, %v10666_v40 }
0x4901   : > { %15364 = vmatmul.mubr.msk.f32.vlgmr.msra.gmra.mxu0 %vm1238_vm0, %v10673_v41 }
0x4902   : > { %15401 = vmatprep.mubr.msk.f32.mxu0 %vm15971_vm7, %v15970_v33  ;;  %15394 = vmatpush3.msra.mxu0 %v14013_v8 }
0x4903   : > { %15395 = vmatprep.subr.mxu0 %v15970_v33 }
0x4904   : > { %15396 = vmatpush3.msra.mxu0 %v14012_v10 }
0x4905   : > { %15397 = vmatprep.subr.mxu0 %v15970_v33 }
0x4906   : > { %15398 = vmatpush3.msra.mxu0 %v14011_v0 }
0x4907   : > { %15399 = vmatprep.subr.mxu0 %v15970_v33 }
0x4908   : > { %15400 = vmatpush3.msra.mxu0 %v14010_v1 }
0x4909   : > { %15404 = vmatprep.subr.mxu0 %v15970_v33 }
0x49c1   : > { %v10771_v43 = vpop.f32.mrf.mxu0 }
0x49c2   : > { %v10772_v5 = vadd.f32 %v14002_v38, %v10771_v43 }
0x49c3   : > { %v15365_v2 = vpop.f32.mrf.mxu0 }
0x49c4   : > { %v10775_v44 = vmax.f32 %v10772_v5, 0.0 }
0x49c6   : > { %15391 = vmatmul.mubr.msk.f32.vlgmr.msra.gmra.mxu1 %vm2633_vm6, %v10775_v44 }
0x49c7   : > { %15421 = vmatprep.mubr.msk.f32.mxu1 %vm15971_vm7, %v15970_v33 }
0x4a86   : > { %v10851_v45 = vpop.f32.mrf.mxu1 }
0x4a87   : > { %v10852_v46 = vadd.f32 %v14004_v4, %v10851_v45  ;;  %v14016_v4 = vld [vmem:[%s17846_s0 + $0x48] sm:$0xff] }
0x4a88   : > { %v15392_v52 = vpop.f32.mrf.mxu1 }
0x4a89   : > { %v10855_v54 = vadd.f32 %v10852_v46, %v10673_v41 }
0x4a8b   : > { %v10860_v56 = vsel %vm1238_vm0, %v10855_v54, 0.0 }
0x4a8c   : > { %10861 = vadd.xlane.f32.xlu0 %v10860_v56 }
0x4b15   : > { %v10862_v24 = vpop.xlane.xlu0 %10861 }
0x4b16   : > { %v10863_v62 = vmul.f32 0.03125, %v10862_v24 }
0x4b18   : > { %v10864_v57 = vsub.f32 %v10855_v54, %v10863_v62 }
0x4b1a   : > { %v10865_v60 = vmul.f32 %v10864_v57, %v10864_v57 }
0x4b1c   : > { %v10866_v61 = vsel %vm1238_vm0, %v10865_v60, 0.0 }
0x4b1d   : > { %10867 = vadd.xlane.f32.xlu0 %v10866_v61 }
0x4ba6   : > { %v10868_v6 = vpop.xlane.xlu0 %10867 }
0x4ba7   : > { %v10869_v7 = vmul.f32 0.03125, %v10868_v6 }
0x4ba9   : > { %v10870_v11 = vadd.f32 1e-05, %v10869_v7 }
0x4bab   : > { %15869 = vrsqrt.f32 %v10870_v11 }
0x4bb8   : > { %v15870_v13 = vpop.eup %15869 }
0x4bb9   : > { %v10872_v16 = vmul.f32 %v15870_v13, %v10864_v57 }
0x4bbb   : > { %v10879_v19 = vmul.f32 %v14008_v14, %v10872_v16 }
0x4bbd   : > { %v17418_v9 = vadd.f32 %v14009_v18, %v10879_v19  ;;  %v14017_v19 = vld [vmem:[%s17846_s0 + $0x50] sm:$0xff] }
0x4bbf   : > { %15402 = vmatmul.mubr.msk.f32.vlgmr.msra.gmra.mxu0 %vm1238_vm0, %v17418_v9 }
0x4bc0   : > { %15406 = vmatprep.mubr.msk.f32.mxu0 %vm15971_vm7, %v15970_v33 }
0x4c7f   : > { %v10976_v23 = vpop.f32.mrf.mxu0 }
0x4c80   : > { %v17425_v25 = vadd.f32 %v14020_v22, %v10976_v23 }
0x4c81   : > { %v15403_v28 = vpop.f32.mrf.mxu0 }
0x4c82   : > { %10982 = vrot.lane.b32.xlu0 %v17425_v25, %s17853_s3  ;;  %v10980_v39 = vmul.f32 0.35355338, %v17425_v25 }
0x4c86   : > { %11148 = vrot.lane.b32.xlu0 %v17425_v25, %s17860_s6 }
0x4c8a   : > { %11146 = vrot.lane.b32.xlu0 %v10980_v39, %s17859_s8 }
0x4c8e   : > { %11233 = vrot.lane.b32.xlu0 %v17425_v25, %s17842_s10 }
0x4cf4   : > { %v10983_v29 = vpop.permute.xlu0 %10982 }
0x4cf5   : > { %15405 = vmatpush3.xpose.msk.msra.mxu0 %vm1334_vm1, %v10983_v29 }
0x4cf6   : > { %15409 = vmatprep.subr.mxu0 %v15970_v33 }
0x4cf8   : > { %v11149_v30 = vpop.permute.xlu0 %11148  ;;  %15407 = vmatmul.mubr.msk.f32.vlgmr.msra.gmra.mxu0 %vm1334_vm1, %v10980_v39 }
0x4cf9   : > { %15411 = vmatprep.mubr.msk.f32.mxu0 %vm15971_vm7, %v15970_v33 }
0x4cfc   : > { %v11147_v48 = vpop.permute.xlu0 %11146 }
0x4d00   : > { %v11234_v37 = vpop.permute.xlu0 %11233 }
0x4d01   : > { %15420 = vmatpush3.msra.mxu1 %v11234_v37 }
0x4d02   : > { %15429 = vmatprep.subr.mxu1 %v15970_v33 }
0x4db8   : > { %v11055_v31 = vpop.f32.mrf.mxu0 }
0x4db9   : > { %v11056_v47 = vadd.f32 %v11055_v31, %v16804_v21 }
0x4dba   : > { %v15408_v20 = vpop.f32.mrf.mxu0 }
0x4dbb   : > { %v11059_v3 = vsel %vm1334_vm1, %v11056_v47, -inf }
0x4dbc   : > { %11060 = vmax.xlane.f32.xlu1 %v11059_v3 }
0x4dcd   : > { %11068 = vrot.lane.b32.xlu1 %v17425_v25, %s17874_s22 }
0x4e45   : > { %v11061_v15 = vpop.xlane.xlu1 %11060 }
0x4e46   : > { %v11062_v32 = vsub.f32 %v11056_v47, %v11061_v15 }
0x4e48   : > { %v11063_v26 = vmul.f32 1.442695, %v11062_v32 }
0x4e49   : > { %v11069_v17 = vpop.permute.xlu1 %11068 }
0x4e4a   : > { %15871 = vpow2.f32 %v11063_v26  ;;  %15410 = vmatpush3.msra.mxu0 %v11069_v17 }
0x4e4b   : > { %15414 = vmatprep.subr.mxu0 %v15970_v33 }
0x4e57   : > { %v15872_v34 = vpop.eup %15871 }
0x4e58   : > { %15412 = vmatmul.mubr.msk.f32.vlgmr.msra.gmra.mxu0 %vm1334_vm1, %v15872_v34  ;;  %v11065_v49 = vsel %vm1334_vm1, %v15872_v34, 0.0 }
0x4e59   : > { %15415 = vmatpush3.xpose.msk.msra.mxu0 %vm1334_vm1, %v11149_v30  ;;  %15416 = vmatprep.mubr.msk.f32.mxu0 %vm15971_vm7, %v15970_v33 }
0x4e5a   : > { %15424 = vmatprep.subr.mxu0 %v15970_v33 }
0x4e5c   : > { %15417 = vmatmul.mubr.msk.f32.vlgmr.msra.gmra.mxu0 %vm1334_vm1, %v11147_v48 }
0x4e5d   : > { %15426 = vmatprep.mubr.msk.f32.mxu0 %vm15971_vm7, %v15970_v33  ;;  %15425 = vmatpush3.msra.mxu0 %v14016_v4 }
0x4e5e   : > { %15434 = vmatprep.subr.mxu0 %v15970_v33 }
0x4f18   : > { %v11140_v12 = vpop.f32.mrf.mxu0 }
0x4f1a   : > { %v15413_v55 = vpop.f32.mrf.mxu0 }
0x4f1c   : > { %v11220_v35 = vpop.f32.mrf.mxu0 }
0x4f1d   : > { %v11221_v36 = vadd.f32 %v11220_v35, %v16804_v21 }
0x4f1e   : > { %v15418_v59 = vpop.f32.mrf.mxu0 }
0x4f1f   : > { %v11224_v58 = vsel %vm1334_vm1, %v11221_v36, -inf }
0x4f20   : > { %11225 = vmax.xlane.f32.xlu1 %v11224_v58 }
0x4f31   : > { %11459 = vrot.lane.b32.xlu1 %v17425_v25, %s17862_s17 }
0x4f55   : > { %11066 = vadd.xlane.f32.xlu1 %v11065_v49  ;;  %v14038_v49 = vld [vmem:[%s17852_s1 + $0x2] ss:$0 sm:$0xff] }
0x4f66   : > { %11544 = vrot.lane.b32.xlu1 %v17425_v25, %s17841_s11 }
0x4f6a   : > { %11696 = vrot.lane.b32.xlu1 %v10980_v39, %s17847_s16 }
0x4fa9   : > { %v11226_v27 = vpop.xlane.xlu1 %11225 }
0x4faa   : > { %v11227_v40 = vsub.f32 %v11221_v36, %v11226_v27 }
0x4fac   : > { %v11228_v41 = vmul.f32 1.442695, %v11227_v40 }
0x4fad   : > { %v11460_v38 = vpop.permute.xlu1 %11459 }
0x4fae   : > { %15873 = vpow2.f32 %v11228_v41 }
0x4fbb   : > { %v15874_v50 = vpop.eup %15873 }
0x4fbc   : > { %15422 = vmatmul.mubr.msk.f32.vlgmr.msra.gmra.mxu1 %vm1334_vm1, %v15874_v50  ;;  %v11230_v63 = vsel %vm1334_vm1, %v15874_v50, 0.0 }
0x4fbd   : > { %11231 = vadd.xlane.f32.xlu0 %v11230_v63  ;;  %15430 = vmatpush3.msra.mxu1 %v14015_v42 }
0x4fbe   : > { %15431 = vmatprep.mubr.msk.f32.mxu1 %vm15971_vm7, %v15970_v33  ;;  %15439 = vmatprep.subr.mxu1 %v15970_v33 }
0x4fd3   : > { %11457 = vrot.lane.b32.xlu0 %v10980_v39, %s17848_s7 }
0x4fde   : > { %v11067_v43 = vpop.xlane.xlu1 %11066 }
0x4fdf   : > { %15875 = vrcp.f32 %v11067_v43  ;;  %v14046_v43 = vld [vmem:[%s17851_s2 + $0x58] sm:$0xff] }
0x4fe2   : > { %v11545_v44 = vpop.permute.xlu1 %11544 }
0x4fe6   : > { %v11697_v18 = vpop.permute.xlu1 %11696 }
0x4fec   : > { %v15876_v5 = vpop.eup %15875 }
0x4fed   : > { %v11145_v2 = vmul.f32 %v15876_v5, %v11140_v12  ;;  %v14018_v12 = vld [vmem:[%s17846_s0 + $0x58] sm:$0xff]  ;;  %v14043_v5 = vld [vmem:[%s17851_s2 + $0x40] sm:$0xff] }
0x4fef   : > { %15432 = vmatmul.mubr.msk.f32.vlgmr.msra.gmra.mxu1 %vm1334_vm1, %v11145_v2 }
0x4ff0   : > { %15440 = vmatpush3.msra.mxu1 %v11545_v44  ;;  %15441 = vmatprep.mubr.msk.f32.mxu1 %vm15971_vm7, %v15970_v33 }
0x4ff1   : > { %15449 = vmatprep.subr.mxu1 %v15970_v33 }
0x5046   : > { %v11232_v45 = vpop.xlane.xlu0 %11231 }
0x5047   : > { %15877 = vrcp.f32 %v11232_v45 }
0x504a   : > { %v11458_v24 = vpop.permute.xlu0 %11457 }
0x5054   : > { %v15878_v46 = vpop.eup %15877 }
0x507c   : > { %v11305_v52 = vpop.f32.mrf.mxu1 }
0x507d   : > { %v11310_v54 = vmul.f32 %v15878_v46, %v11305_v52  ;;  %v14053_v46 = vld [vmem:[%s17854_s5 + $0x2] ss:$0 sm:$0xff] }
0x507e   : > { %v15423_v56 = vpop.f32.mrf.mxu1 }
0x507f   : > { %15427 = vmatmul.mubr.msk.f32.vlgmr.msra.gmra.mxu0 %vm1334_vm1, %v11310_v54 }
0x5080   : > { %15435 = vmatpush3.xpose.msk.msra.mxu0 %vm1334_vm1, %v11460_v38  ;;  %15436 = vmatprep.mubr.msk.f32.mxu0 %vm15971_vm7, %v15970_v33  ;;  %v14045_v38 = vld [vmem:[%s17851_s2 + $0x50] sm:$0xff] }
0x5081   : > { %15444 = vmatprep.subr.mxu0 %v15970_v33 }
0x5083   : > { %15437 = vmatmul.mubr.msk.f32.vlgmr.msra.gmra.mxu0 %vm1334_vm1, %v11458_v24 }
0x5084   : > { %15446 = vmatprep.mubr.msk.f32.mxu0 %vm15971_vm7, %v15970_v33  ;;  %15445 = vmatpush3.msra.mxu0 %v14017_v19 }
0x5085   : > { %15454 = vmatprep.subr.mxu0 %v15970_v33 }
0x50af   : > { %v11453_v62 = vpop.f32.mrf.mxu1 }
0x50b1   : > { %v15433_v57 = vpop.f32.mrf.mxu1 }
0x513f   : > { %v11380_v60 = vpop.f32.mrf.mxu0 }
0x5141   : > { %v15428_v61 = vpop.f32.mrf.mxu0 }
0x5143   : > { %v11531_v8 = vpop.f32.mrf.mxu0 }
0x5144   : > { %v11532_v10 = vadd.f32 %v11531_v8, %v16804_v21  ;;  %v14041_v8 = vld [vmem:[%s17857_s12 + $0x2] ss:$0 sm:$0xff] }
0x5145   : > { %v15438_v0 = vpop.f32.mrf.mxu0 }
0x5146   : > { %v11535_v1 = vsel %vm1334_vm1, %v11532_v10, -inf  ;;  %v14042_v0 = vld [vmem:[%s17858_s13 + $0x2] ss:$0 sm:$0xff] }
0x5147   : > { %11536 = vmax.xlane.f32.xlu0 %v11535_v1 }
0x515d   : > { %11698 = vrot.lane.b32.xlu0 %v17425_v25, %s17849_s15 }
0x51d0   : > { %v11537_v6 = vpop.xlane.xlu0 %11536 }
0x51d1   : > { %v11538_v7 = vsub.f32 %v11532_v10, %v11537_v6 }
0x51d3   : > { %v11539_v11 = vmul.f32 1.442695, %v11538_v7 }
0x51d4   : > { %v11699_v14 = vpop.permute.xlu0 %11698 }
0x51d5   : > { %15879 = vpow2.f32 %v11539_v11 }
0x51e2   : > { %v15880_v13 = vpop.eup %15879 }
0x51e3   : > { %15442 = vmatmul.mubr.msk.f32.vlgmr.msra.gmra.mxu1 %vm1334_vm1, %v15880_v13  ;;  %v11541_v16 = vsel %vm1334_vm1, %v15880_v13, 0.0 }
0x51e4   : > { %15450 = vmatpush3.xpose.msk.msra.mxu1 %vm1334_vm1, %v11699_v14  ;;  %11542 = vadd.xlane.f32.xlu1 %v11541_v16 }
0x51e5   : > { %15451 = vmatprep.mubr.msk.f32.mxu1 %vm15971_vm7, %v15970_v33  ;;  %15459 = vmatprep.subr.mxu1 %v15970_v33 }
0x51e7   : > { %15452 = vmatmul.mubr.msk.f32.vlgmr.msra.gmra.mxu1 %vm1334_vm1, %v11697_v18 }
0x51e8   : > { %15461 = vmatprep.mubr.msk.f32.mxu1 %vm15971_vm7, %v15970_v33  ;;  %15460 = vmatpush3.msra.mxu1 %v14018_v12 }
0x526d   : > { %v11543_v22 = vpop.xlane.xlu1 %11542 }
0x526e   : > { %15881 = vrcp.f32 %v11543_v22 }
0x527b   : > { %v15882_v23 = vpop.eup %15881 }
0x52a3   : > { %v11616_v28 = vpop.f32.mrf.mxu1 }
0x52a4   : > { %v11621_v39 = vmul.f32 %v15882_v23, %v11616_v28 }
0x52a5   : > { %v15443_v29 = vpop.f32.mrf.mxu1 }
0x52a6   : > { %15447 = vmatmul.mubr.msk.f32.vlgmr.msra.gmra.mxu0 %vm1334_vm1, %v11621_v39 }
0x52a7   : > { %v11770_v30 = vpop.f32.mrf.mxu1  ;;  %15456 = vmatprep.mubr.msk.f32.mxu0 %vm15971_vm7, %v15970_v33 }
0x52a8   : > { %v11771_v48 = vadd.f32 %v11770_v30, %v16804_v21 }
0x52a9   : > { %v15453_v37 = vpop.f32.mrf.mxu1 }
0x52aa   : > { %v11774_v31 = vsel %vm1334_vm1, %v11771_v48, -inf }
0x52ab   : > { %11775 = vmax.xlane.f32.xlu0 %v11774_v31 }
0x52c1   : > { %11783 = vrot.lane.b32.xlu0 %v17425_v25, %s17850_s28  ;;  %v11454_v25 = vadd.f32 %v11453_v62, %v11380_v60  ;;  %s17877_s28 = sld [smem:[#allocation41_spill]] }
0x52c5   : > { %12075 = vrot.lane.b32.xlu0 %v14045_v38, %s17853_s3 }
0x52c7   : > { %s17879_s11 = sshll.u32 %s17877_s28, 3 }
0x5334   : > { %v11776_v47 = vpop.xlane.xlu0 %11775 }
0x5335   : > { %v11777_v20 = vsub.f32 %v11771_v48, %v11776_v47 }
0x5337   : > { %v11778_v3 = vmul.f32 1.442695, %v11777_v20 }
0x5338   : > { %v11784_v15 = vpop.permute.xlu0 %11783 }
0x5339   : > { %15883 = vpow2.f32 %v11778_v3  ;;  %15455 = vmatpush3.msra.mxu0 %v11784_v15 }
0x533a   : > { %15464 = vmatprep.subr.mxu0 %v15970_v33 }
0x533c   : > { %v12076_v52 = vpop.permute.xlu0 %12075 }
0x5346   : > { %v15884_v32 = vpop.eup %15883 }
0x5347   : > { %15457 = vmatmul.mubr.msk.f32.vlgmr.msra.gmra.mxu0 %vm1334_vm1, %v15884_v32  ;;  %v11780_v21 = vsel %vm1334_vm1, %v15884_v32, 0.0 }
0x5348   : > { %11781 = vadd.xlane.f32.xlu1 %v11780_v21  ;;  %15472 = vmatprep.mubr.msk.f32.mxu0 %vm15971_vm7, %v15970_v33 }
0x5349   : > { %15465 = vmatpush3.msra.mxu0 %v14046_v43 }
0x534a   : > { %15466 = vmatprep.subr.mxu0 %v15970_v33 }
0x534b   : > { %15467 = vmatpush3.msra.mxu0 %v14045_v38 }
0x534c   : > { %15468 = vmatprep.subr.mxu0 %v15970_v33 }
0x5366   : > { %v11691_v26 = vpop.f32.mrf.mxu0 }
0x5367   : > { %v11695_v17 = vadd.f32 %v11691_v26, %v11454_v25  ;;  %v14048_v26 = vld [vmem:[%s17861_s14 + $0x40] sm:$0xff] }
0x5368   : > { %v15448_v34 = vpop.f32.mrf.mxu0 }
0x53d1   : > { %v11782_v55 = vpop.xlane.xlu1 %11781 }
0x53d2   : > { %15885 = vrcp.f32 %v11782_v55 }
0x53df   : > { %v15886_v35 = vpop.eup %15885 }
0x5407   : > { %v11855_v36 = vpop.f32.mrf.mxu0 }
0x5408   : > { %v11860_v59 = vmul.f32 %v15886_v35, %v11855_v36 }
0x5409   : > { %v15458_v58 = vpop.f32.mrf.mxu0 }
0x540a   : > { %15462 = vmatmul.mubr.msk.f32.vlgmr.msra.gmra.mxu1 %vm1334_vm1, %v11860_v59 }
0x540b   : > { %15483 = vmatprep.mubr.msk.f32.mxu1 %vm1238_vm0, %v16919_v51  ;;  %v14044_v51 = vld [vmem:[%s17851_s2 + $0x48] sm:$0xff] }
0x540c   : > { %12073 = vrot.lane.b32.xlu0 %v14044_v51, %s17853_s3  ;;  %15469 = vmatpush3.msra.mxu0 %v14044_v51 }
0x540d   : > { %15470 = vmatprep.subr.mxu0 %v15970_v33 }
0x540e   : > { %15471 = vmatpush3.msra.mxu0 %v14043_v5 }
0x540f   : > { %15486 = vmatprep.subr.mxu0 %v15970_v33 }
0x5410   : > { %12071 = vrot.lane.b32.xlu0 %v14043_v5, %s17853_s3 }
0x547e   : > { %v12074_v24 = vpop.permute.xlu0 %12073 }
0x5482   : > { %v12072_v60 = vpop.permute.xlu0 %12071 }
0x54ca   : > { %v11930_v27 = vpop.f32.mrf.mxu1 }
0x54cb   : > { %v11934_v40 = vadd.f32 %v11930_v27, %v11695_v17 }
0x54cc   : > { %v15463_v41 = vpop.f32.mrf.mxu1 }
0x54cd   : > { %v11941_v42 = vadd.f32 %v14038_v49, %v11934_v40 }
0x54cf   : > { %v11942_v50 = vadd.f32 %v11941_v42, %v17418_v9 }
0x54d1   : > { %v11947_v63 = vsel %vm1238_vm0, %v11942_v50, 0.0 }
0x54d2   : > { %11948 = vadd.xlane.f32.xlu1 %v11947_v63 }
0x555b   : > { %v11949_v9 = vpop.xlane.xlu1 %11948 }
0x555c   : > { %v11950_v2 = vmul.f32 0.03125, %v11949_v9 }
0x555e   : > { %v11951_v44 = vsub.f32 %v11942_v50, %v11950_v2 }
0x5560   : > { %v11952_v4 = vmul.f32 %v11951_v44, %v11951_v44 }
0x5562   : > { %v11953_v45 = vsel %vm1238_vm0, %v11952_v4, 0.0 }
0x5563   : > { %11954 = vadd.xlane.f32.xlu1 %v11953_v45 }
0x5574   : > { %12077 = vrot.lane.b32.xlu1 %v14046_v43, %s17853_s3 }
0x5578   : > { %12083 = vrot.lane.b32.xlu1 %v14053_v46, %s17853_s3 }
0x55ec   : > { %v11955_v54 = vpop.xlane.xlu1 %11954 }
0x55ed   : > { %v11956_v56 = vmul.f32 0.03125, %v11955_v54 }
0x55ef   : > { %v11957_v62 = vadd.f32 1e-05, %v11956_v56 }
0x55f0   : > { %v12078_v57 = vpop.permute.xlu1 %12077 }
0x55f1   : > { %15887 = vrsqrt.f32 %v11957_v62  ;;  %15475 = vmatprep.subr.mxu1 %v12078_v57 }
0x55f2   : > { %15476 = vmatpush3.msra.mxu1 %v12078_v57 }
0x55f3   : > { %15477 = vmatprep.subr.mxu1 %v12076_v52 }
0x55f4   : > { %15478 = vmatpush3.msra.mxu1 %v12076_v52  ;;  %v12084_v7 = vpop.permute.xlu1 %12083 }
0x55f5   : > { %15479 = vmatprep.subr.mxu1 %v12074_v24 }
0x55f6   : > { %15480 = vmatpush3.msra.mxu1 %v12074_v24 }
0x55f7   : > { %15481 = vmatprep.subr.mxu1 %v12072_v60 }
0x55f8   : > { %15482 = vmatpush3.msra.mxu1 %v12072_v60 }
0x55f9   : > { %15484 = vmatmul.mubr.msk.f32.vlgmr.msra.gmra.mxu1 %vm1238_vm0, %v16923_v53  ;;  %15493 = vmatprep.subr.mxu1 %v15970_v33 }
0x55fa   : > { %15497 = vmatprep.mubr.msk.f32.mxu1 %vm15971_vm7, %v15970_v33 }
0x55fe   : > { %v15888_v61 = vpop.eup %15887 }
0x55ff   : > { %v11959_v10 = vmul.f32 %v15888_v61, %v11951_v44  ;;  %v14049_v44 = vld [vmem:[%s17861_s14 + $0x48] sm:$0xff] }
0x5601   : > { %v11966_v1 = vmul.f32 %v14041_v8, %v11959_v10 }
0x5603   : > { %v17539_v6 = vadd.f32 %v14042_v0, %v11966_v1 }
0x5605   : > { %15473 = vmatmul.mubr.msk.f32.vlgmr.msra.gmra.mxu0 %vm1238_vm0, %v17539_v6 }
0x5606   : > { %15490 = vmatprep.mubr.msk.f32.mxu0 %vm15971_vm7, %v15970_v33 }
0x56b9   : > { %v15485_v53 = vpop.f32.mrf.mxu1 }
0x56ba   : > { %v17545_v11 = vadd.f32 %v15485_v53, %v12084_v7 }
0x56bb   : > { %v12152_v13 = vpop.f32.mrf.mxu1 }
0x56bc   : > { %12252 = vrot.lane.b32.xlu1 %v17545_v11, %s17853_s3  ;;  %15487 = vmatpush3.xpose.msk.msra.mxu0 %vm1334_vm1, %v17545_v11  ;;  %v17552_v14 = vadd.f32 %v12152_v13, %v12084_v7 }
0x56bd   : > { %15488 = vmatprep.subr.mxu0 %v15970_v33 }
0x56c0   : > { %12250 = vrot.lane.b32.xlu1 %v17552_v14, %s17853_s3  ;;  %15489 = vmatpush3.xpose.msk.msra.mxu0 %vm1334_vm1, %v17552_v14  ;;  %s17876_s3 = sld [smem:[#allocation38_spill]] }
0x56c1   : > { %15507 = vmatprep.subr.mxu0 %v15970_v33 }
0x56c4   : > { %12336 = vrot.lane.b32.xlu1 %v17545_v11, %s17859_s8 }
0x56c5   : > { %v12063_v16 = vpop.f32.mrf.mxu0 }
0x56c6   : > { %v12064_v18 = vadd.f32 %v14053_v46, %v12063_v16 }
0x56c7   : > { %v15474_v19 = vpop.f32.mrf.mxu0 }
0x56c8   : > { %v12161_v22 = vmul.f32 0.35355338, %v12064_v18  ;;  %12334 = vrot.lane.b32.xlu1 %v17552_v14, %s17859_s8 }
0x56ca   : > { %15491 = vmatmul.mubr.msk.f32.vlgmr.msra.gmra.mxu0 %vm1334_vm1, %v12161_v22 }
0x56cb   : > { %15511 = vmatprep.mubr.msk.f32.mxu0 %vm15971_vm7, %v15970_v33 }
0x56cc   : > { %12332 = vrot.lane.b32.xlu1 %v12161_v22, %s17859_s8 }
0x572e   : > { %v12253_v23 = vpop.permute.xlu1 %12252 }
0x572f   : > { %15494 = vmatpush3.msk.msra.mxu1 %vm1451_vm2, %v12253_v23 }
0x5730   : > { %15495 = vmatprep.subr.mxu1 %v15970_v33 }
0x5732   : > { %v12251_v28 = vpop.permute.xlu1 %12250 }
0x5733   : > { %15496 = vmatpush3.msra.mxu1 %v12251_v28 }
0x5734   : > { %15500 = vmatprep.subr.mxu1 %v15970_v33 }
0x5736   : > { %v12337_v3 = vpop.permute.xlu1 %12336 }
0x573a   : > { %v12335_v21 = vpop.permute.xlu1 %12334 }
0x573e   : > { %v12333_v25 = vpop.permute.xlu1 %12332 }
0x578a   : > { %v12237_v39 = vpop.f32.mrf.mxu0 }
0x578b   : > { %v12241_v29 = vsel %vm1420_vm4, %v12237_v39, -inf }
0x578c   : > { %12242 = vmax.xlane.f32.xlu0 %v12241_v29  ;;  %v15492_v30 = vpop.f32.mrf.mxu0 }
0x57a2   : > { %12425 = vrot.lane.b32.xlu0 %v17545_v11, %s17860_s6 }
0x57a6   : > { %12423 = vrot.lane.b32.xlu0 %v17552_v14, %s17860_s6 }
0x57aa   : > { %12655 = vrot.lane.b32.xlu0 %v17545_v11, %s17848_s7 }
0x57ae   : > { %12651 = vrot.lane.b32.xlu0 %v12161_v22, %s17848_s7 }
0x57b2   : > { %12902 = vrot.lane.b32.xlu0 %v17545_v11, %s17847_s16 }
0x57b6   : > { %12900 = vrot.lane.b32.xlu0 %v17552_v14, %s17847_s16 }
0x57ba   : > { %12898 = vrot.lane.b32.xlu0 %v12161_v22, %s17847_s16 }
0x5815   : > { %v12243_v48 = vpop.xlane.xlu0 %12242 }
0x5816   : > { %v12244_v37 = vsub.f32 %v12237_v39, %v12243_v48  ;;  %v14050_v39 = vld [vmem:[%s17861_s14 + $0x50] sm:$0xff] }
0x5818   : > { %v12245_v31 = vmul.f32 1.442695, %v12244_v37 }
0x5819   : > { %v12426_v47 = vpop.permute.xlu0 %12425 }
0x581a   : > { %15889 = vpow2.f32 %v12245_v31  ;;  %15508 = vmatpush3.msk.msra.mxu0 %vm1451_vm2, %v12426_v47 }
0x581b   : > { %15509 = vmatprep.subr.mxu0 %v15970_v33 }
0x581d   : > { %v12424_v20 = vpop.permute.xlu0 %12423 }
0x581e   : > { %15510 = vmatpush3.msra.mxu0 %v12424_v20  ;;  %v14051_v20 = vld [vmem:[%s17861_s14 + $0x58] sm:$0xff] }
0x581f   : > { %15514 = vmatprep.subr.mxu0 %v15970_v33 }
0x5821   : > { %v12656_v17 = vpop.permute.xlu0 %12655 }
0x5825   : > { %v12652_v34 = vpop.permute.xlu0 %12651 }
0x5827   : > { %v15890_v15 = vpop.eup %15889 }
0x5828   : > { %15498 = vmatmul.mubr.msk.f32.vlgmr.msra.gmra.mxu1 %vm1420_vm4, %v15890_v15  ;;  %v12247_v32 = vsel %vm1420_vm4, %v15890_v15, 0.0 }
0x5829   : > { %15501 = vmatpush3.xpose.msk.msra.mxu1 %vm1334_vm1, %v12337_v3  ;;  %12248 = vadd.xlane.f32.xlu0 %v12247_v32  ;;  %v12903_v12 = vpop.permute.xlu0 %12902 }
0x582a   : > { %15502 = vmatprep.subr.mxu1 %v15970_v33  ;;  %15504 = vmatprep.mubr.msk.f32.mxu1 %vm15971_vm7, %v15970_v33 }
0x582d   : > { %15503 = vmatpush3.xpose.msk.msra.mxu1 %vm1334_vm1, %v12335_v21  ;;  %v12901_v55 = vpop.permute.xlu0 %12900 }
0x582e   : > { %15519 = vmatprep.subr.mxu1 %v15970_v33 }
0x5830   : > { %15505 = vmatmul.mubr.msk.f32.vlgmr.msra.gmra.mxu1 %vm1334_vm1, %v12333_v25 }
0x5831   : > { %15521 = vmatprep.mubr.msk.f32.mxu1 %vm15971_vm7, %v15970_v33  ;;  %15520 = vmatpush3.msra.mxu1 %v14048_v26  ;;  %v12899_v35 = vpop.permute.xlu0 %12898 }
0x5832   : > { %15531 = vmatprep.subr.mxu1 %v15970_v33 }
0x583f   : > { %12744 = vrot.lane.b32.xlu0 %v17545_v11, %s17862_s17 }
0x58b2   : > { %v12249_v36 = vpop.xlane.xlu0 %12248 }
0x58b3   : > { %15891 = vrcp.f32 %v12249_v36 }
0x58b6   : > { %v12745_v40 = vpop.permute.xlu0 %12744 }
0x58c0   : > { %v15892_v59 = vpop.eup %15891 }
0x58e8   : > { %v12326_v58 = vpop.f32.mrf.mxu1 }
0x58e9   : > { %v12331_v49 = vmul.f32 %v15892_v59, %v12326_v58 }
0x58ea   : > { %v15499_v27 = vpop.f32.mrf.mxu1 }
0x58eb   : > { %15522 = vmatmul.mubr.msk.f32.vlgmr.msra.gmra.mxu1 %vm1334_vm1, %v12331_v49 }
0x58ec   : > { %15532 = vmatpush3.msk.msra.mxu1 %vm1451_vm2, %v12745_v40  ;;  %15535 = vmatprep.mubr.msk.f32.mxu1 %vm15971_vm7, %v15970_v33 }
0x58ed   : > { %15533 = vmatprep.subr.mxu1 %v15970_v33 }
0x58f0   : > { %v12410_v41 = vpop.f32.mrf.mxu1 }
0x58f1   : > { %v12414_v42 = vsel %vm1420_vm4, %v12410_v41, -inf }
0x58f2   : > { %12415 = vmax.xlane.f32.xlu1 %v12414_v42  ;;  %v15506_v50 = vpop.f32.mrf.mxu1 }
0x597b   : > { %v12416_v63 = vpop.xlane.xlu1 %12415 }
0x597c   : > { %v12417_v38 = vsub.f32 %v12410_v41, %v12416_v63 }
0x597e   : > { %v12418_v43 = vmul.f32 1.442695, %v12417_v38  ;;  %v14089_v38 = vld [vmem:[%s17864_s21 + $0x58] sm:$0xff] }
0x5980   : > { %15893 = vpow2.f32 %v12418_v43  ;;  %v14088_v43 = vld [vmem:[%s17864_s21 + $0x50] sm:$0xff] }
0x598d   : > { %v15894_v51 = vpop.eup %15893 }
0x598e   : > { %15512 = vmatmul.mubr.msk.f32.vlgmr.msra.gmra.mxu0 %vm1420_vm4, %v15894_v51  ;;  %v12420_v5 = vsel %vm1420_vm4, %v15894_v51, 0.0  ;;  %v14086_v51 = vld [vmem:[%s17864_s21 + $0x40] sm:$0xff] }
0x598f   : > { %12421 = vadd.xlane.f32.xlu1 %v12420_v5  ;;  %15516 = vmatprep.mubr.msk.f32.mxu0 %vm15971_vm7, %v15970_v33  ;;  %v14102_v5 = vld [vmem:[%s17865_s24 + $0x118] sm:$0xff] }
0x5990   : > { %15515 = vmatpush3.msra.mxu0 %v14049_v44  ;;  %v14099_v44 = vld [vmem:[%s17865_s24 + $0x100] sm:$0xff] }
0x5991   : > { %15524 = vmatprep.subr.mxu0 %v15970_v33 }
0x59a0   : > { %12653 = vrot.lane.b32.xlu1 %v17552_v14, %s17848_s7  ;;  %s17878_s7 = sld [smem:[#allocation39_spill]] }
0x59ab   : > { %v17613_v9 = vpop.f32.mrf.mxu1 }
0x59ad   : > { %v15523_v2 = vpop.f32.mrf.mxu1 }
0x59ae   : > { %v14100_v2 = vld [vmem:[%s17865_s24 + $0x108] sm:$0xff] }
0x5a18   : > { %v12422_v4 = vpop.xlane.xlu1 %12421 }
0x5a19   : > { %15895 = vrcp.f32 %v12422_v4  ;;  %v14098_v4 = vld [vmem:[%s17865_s24 + $0xf8] sm:$0xff] }
0x5a1c   : > { %v12654_v56 = vpop.permute.xlu1 %12653 }
0x5a26   : > { %v15896_v45 = vpop.eup %15895 }
0x5a4e   : > { %v12499_v46 = vpop.f32.mrf.mxu0 }
0x5a4f   : > { %v12504_v52 = vmul.f32 %v15896_v45, %v12499_v46  ;;  %v14097_v45 = vld [vmem:[%s17865_s24 + $0xf0] sm:$0xff]  ;;  %v14096_v46 = vld [vmem:[%s17865_s24 + $0xe8] sm:$0xff] }
0x5a50   : > { %v15513_v54 = vpop.f32.mrf.mxu0 }
0x5a51   : > { %15517 = vmatmul.mubr.msk.f32.vlgmr.msra.gmra.mxu0 %vm1334_vm1, %v12504_v52  ;;  %v14095_v52 = vld [vmem:[%s17865_s24 + $0xe0] sm:$0xff]  ;;  %v14094_v54 = vld [vmem:[%s17865_s24 + $0xd8] sm:$0xff] }
0x5a52   : > { %15525 = vmatpush3.xpose.msk.msra.mxu0 %vm1334_vm1, %v12656_v17  ;;  %15528 = vmatprep.mubr.msk.f32.mxu0 %vm15971_vm7, %v15970_v33 }
0x5a53   : > { %15526 = vmatprep.subr.mxu0 %v15970_v33 }
0x5a56   : > { %15527 = vmatpush3.xpose.msk.msra.mxu0 %vm1334_vm1, %v12654_v56 }
0x5a57   : > { %15543 = vmatprep.subr.mxu0 %v15970_v33 }
0x5a59   : > { %15529 = vmatmul.mubr.msk.f32.vlgmr.msra.gmra.mxu0 %vm1334_vm1, %v12652_v34 }
0x5a5a   : > { %15544 = vmatpush3.xpose.msk.msra.mxu0 %vm1334_vm1, %v12903_v12  ;;  %15547 = vmatprep.mubr.msk.f32.mxu0 %vm15971_vm7, %v15970_v33 }
0x5a5b   : > { %15545 = vmatprep.subr.mxu0 %v15970_v33 }
0x5a5e   : > { %15546 = vmatpush3.xpose.msk.msra.mxu0 %vm1334_vm1, %v12901_v55  ;;  %v14081_v55 = vld [vmem:[%s17863_s19 + $0x2] ss:$0 sm:$0xff] }
0x5a5f   : > { %15562 = vmatprep.subr.mxu0 %v15970_v33 }
0x5a61   : > { %15548 = vmatmul.mubr.msk.f32.vlgmr.msra.gmra.mxu0 %vm1334_vm1, %v12899_v35 }
0x5a62   : > { %15570 = vmatprep.mubr.msk.f32.mxu0 %vm15971_vm7, %v15970_v33  ;;  %15563 = vmatpush3.msra.mxu0 %v14089_v38 }
0x5a63   : > { %15564 = vmatprep.subr.mxu0 %v15970_v33 }
0x5a64   : > { %15565 = vmatpush3.msra.mxu0 %v14088_v43 }
0x5a65   : > { %15566 = vmatprep.subr.mxu0 %v15970_v33 }
0x5b11   : > { %v12574_v24 = vpop.f32.mrf.mxu0 }
0x5b12   : > { %v12648_v15 = vadd.f32 %v17613_v9, %v12574_v24  ;;  %v14101_v9 = vld [vmem:[%s17865_s24 + $0x110] sm:$0xff] }
0x5b13   : > { %v15518_v62 = vpop.f32.mrf.mxu0 }
0x5b19   : > { %v12729_v57 = vpop.f32.mrf.mxu0 }
0x5b1a   : > { %v12733_v60 = vsel %vm1420_vm4, %v12729_v57, -inf }
0x5b1b   : > { %12734 = vmax.xlane.f32.xlu1 %v12733_v60  ;;  %v15530_v61 = vpop.f32.mrf.mxu0  ;;  %v14084_v60 = vld [vmem:[%s17866_s25 + $0x2] ss:$0 sm:$0xff] }
0x5b21   : > { %v12976_v8 = vpop.f32.mrf.mxu0 }
0x5b22   : > { %v12980_v0 = vsel %vm1420_vm4, %v12976_v8, -inf }
0x5b23   : > { %v15549_v10 = vpop.f32.mrf.mxu0 }
0x5b2c   : > { %12742 = vrot.lane.b32.xlu1 %v17552_v14, %s17862_s17  ;;  %s17875_s17 = sld [smem:[#allocation37_spill]] }
0x5b32   : > { %v14112_v43 = vld [vmem:[%s17875_s17] ss:$0 sm:$0xff] }
0x5b50   : > { %12981 = vmax.xlane.f32.xlu1 %v12980_v0 }
0x5b61   : > { %12989 = vrot.lane.b32.xlu1 %v17552_v14, %s17849_s15 }
0x5ba4   : > { %v12735_v1 = vpop.xlane.xlu1 %12734 }
0x5ba5   : > { %v12736_v7 = vsub.f32 %v12729_v57, %v12735_v1  ;;  %v14093_v1 = vld [vmem:[%s17865_s24 + $0xd0] sm:$0xff] }
0x5ba7   : > { %v12737_v53 = vmul.f32 1.442695, %v12736_v7  ;;  %v14092_v7 = vld [vmem:[%s17865_s24 + $0xc8] sm:$0xff] }
0x5ba8   : > { %v12743_v13 = vpop.permute.xlu1 %12742 }
0x5ba9   : > { %15897 = vpow2.f32 %v12737_v53  ;;  %15534 = vmatpush3.msra.mxu1 %v12743_v13  ;;  %v14091_v53 = vld [vmem:[%s17865_s24 + $0xc0] sm:$0xff] }
0x5baa   : > { %15538 = vmatprep.subr.mxu1 %v15970_v33  ;;  %v14104_v13 = vld [vmem:[%s17868_s30 + $0x2] ss:$0 sm:$0xff] }
0x5bb6   : > { %v15898_v16 = vpop.eup %15897 }
0x5bb7   : > { %15536 = vmatmul.mubr.msk.f32.vlgmr.msra.gmra.mxu1 %vm1420_vm4, %v15898_v16  ;;  %v12739_v18 = vsel %vm1420_vm4, %v15898_v16, 0.0 }
0x5bb8   : > { %12740 = vadd.xlane.f32.xlu0 %v12739_v18  ;;  %15540 = vmatprep.mubr.msk.f32.mxu1 %vm15971_vm7, %v15970_v33 }
0x5bb9   : > { %15539 = vmatpush3.msra.mxu1 %v14050_v39 }
0x5bba   : > { %15550 = vmatprep.subr.mxu1 %v15970_v33 }
0x5bce   : > { %12991 = vrot.lane.b32.xlu0 %v17545_v11, %s17849_s15  ;;  %s1211_s15 = scalar_lea.vmem %s17878_s7, %s17879_s11 }
0x5bd9   : > { %v12982_v14 = vpop.xlane.xlu1 %12981 }
0x5bda   : > { %v12983_v19 = vsub.f32 %v12976_v8, %v12982_v14  ;;  %v14085_v8 = vld [vmem:[%s17867_s29 + $0x2] ss:$0 sm:$0xff] }
0x5bdc   : > { %v12984_v22 = vmul.f32 1.442695, %v12983_v19 }
0x5bdd   : > { %v12990_v47 = vpop.permute.xlu1 %12989 }
0x5bde   : > { %15899 = vpow2.f32 %v12984_v22  ;;  %v14106_v22 = vld [vmem:[%s17870_s20 + $0x2] ss:$0 sm:$0xff] }
0x5beb   : > { %v15900_v23 = vpop.eup %15899 }
0x5bec   : > { %v12986_v28 = vsel %vm1420_vm4, %v15900_v23, 0.0 }
0x5bed   : > { %12987 = vadd.xlane.f32.xlu0 %v12986_v28 }
0x5c41   : > { %v12741_v29 = vpop.xlane.xlu0 %12740 }
0x5c42   : > { %15901 = vrcp.f32 %v12741_v29 }
0x5c45   : > { %v12992_v11 = vpop.permute.xlu0 %12991 }
0x5c4f   : > { %v15902_v30 = vpop.eup %15901 }
0x5c76   : > { %v12988_v3 = vpop.xlane.xlu0 %12987 }
0x5c77   : > { %v12818_v48 = vpop.f32.mrf.mxu1  ;;  %15903 = vrcp.f32 %v12988_v3 }
0x5c78   : > { %v12823_v37 = vmul.f32 %v15902_v30, %v12818_v48 }
0x5c79   : > { %v15537_v31 = vpop.f32.mrf.mxu1 }
0x5c7a   : > { %15541 = vmatmul.mubr.msk.f32.vlgmr.msra.gmra.mxu1 %vm1334_vm1, %v12823_v37 }
0x5c7b   : > { %15551 = vmatpush3.msk.msra.mxu1 %vm1451_vm2, %v12992_v11  ;;  %15554 = vmatprep.mubr.msk.f32.mxu1 %vm15971_vm7, %v15970_v33 }
0x5c7c   : > { %15552 = vmatprep.subr.mxu1 %v15970_v33 }
0x5c7d   : > { %15553 = vmatpush3.msra.mxu1 %v12990_v47 }
0x5c7e   : > { %15555 = vmatmul.mubr.msk.f32.vlgmr.msra.gmra.mxu1 %vm1420_vm4, %v15900_v23  ;;  %15557 = vmatprep.subr.mxu1 %v15970_v33 }
0x5c7f   : > { %15559 = vmatprep.mubr.msk.f32.mxu1 %vm15971_vm7, %v15970_v33  ;;  %15558 = vmatpush3.msra.mxu1 %v14051_v20 }
0x5c80   : > { %15573 = vmatprep.subr.mxu1 %v15970_v33 }
0x5c84   : > { %v15904_v26 = vpop.eup %15903 }
0x5d3a   : > { %v12893_v32 = vpop.f32.mrf.mxu1 }
0x5d3b   : > { %v12897_v21 = vadd.f32 %v12893_v32, %v12648_v15 }
0x5d3c   : > { %v15542_v25 = vpop.f32.mrf.mxu1 }
0x5d3e   : > { %v13065_v17 = vpop.f32.mrf.mxu1 }
0x5d3f   : > { %v13070_v34 = vmul.f32 %v15904_v26, %v13065_v17  ;;  %v14111_v26 = vld [vmem:[%s17873_s9 + $0x2] ss:$0 sm:$0xff] }
0x5d40   : > { %v15556_v12 = vpop.f32.mrf.mxu1 }
0x5d41   : > { %15560 = vmatmul.mubr.msk.f32.vlgmr.msra.gmra.mxu1 %vm1334_vm1, %v13070_v34 }
0x5d42   : > { %15597 = vmatprep.mubr.msk.f32.mxu1 %vm15971_vm7, %v15970_v33  ;;  %15574 = vmatpush3.msra.mxu1 %v14102_v5 }
0x5d43   : > { %15575 = vmatprep.subr.mxu1 %v15970_v33 }
0x5d44   : > { %15576 = vmatpush3.msra.mxu1 %v14101_v9 }
0x5d45   : > { %15577 = vmatprep.subr.mxu1 %v15970_v33 }
0x5d46   : > { %15578 = vmatpush3.msra.mxu1 %v14100_v2  ;;  %v14114_v2 = vld [vmem:[%s17876_s3] ss:$0 sm:$0xff] }
0x5d47   : > { %15579 = vmatprep.subr.mxu1 %v15970_v33 }
0x5d48   : > { %15580 = vmatpush3.msra.mxu1 %v14099_v44 }
0x5d49   : > { %15581 = vmatprep.subr.mxu1 %v15970_v33 }
0x5d4a   : > { %15582 = vmatpush3.msra.mxu1 %v14098_v4 }
0x5d4b   : > { %15583 = vmatprep.subr.mxu1 %v15970_v33 }
0x5d4c   : > { %15584 = vmatpush3.msra.mxu1 %v14097_v45 }
0x5d4d   : > { %15585 = vmatprep.subr.mxu1 %v15970_v33 }
0x5d4e   : > { %15586 = vmatpush3.msra.mxu1 %v14096_v46 }
0x5d4f   : > { %15587 = vmatprep.subr.mxu1 %v15970_v33 }
0x5d50   : > { %15588 = vmatpush3.msra.mxu1 %v14095_v52 }
0x5d51   : > { %15589 = vmatprep.subr.mxu1 %v15970_v33 }
0x5d52   : > { %15590 = vmatpush3.msra.mxu1 %v14094_v54 }
0x5d53   : > { %15591 = vmatprep.subr.mxu1 %v15970_v33 }
0x5d54   : > { %15592 = vmatpush3.msra.mxu1 %v14093_v1 }
0x5d55   : > { %15593 = vmatprep.subr.mxu1 %v15970_v33 }
0x5d56   : > { %15594 = vmatpush3.msra.mxu1 %v14092_v7 }
0x5d57   : > { %15595 = vmatprep.subr.mxu1 %v15970_v33 }
0x5d58   : > { %15596 = vmatpush3.msra.mxu1 %v14091_v53 }
0x5e01   : > { %v13140_v35 = vpop.f32.mrf.mxu1 }
0x5e02   : > { %v13144_v36 = vadd.f32 %v13140_v35, %v12897_v21  ;;  %v14110_v21 = vld [vmem:[%s17871_s23 + $0x2] ss:$0 sm:$0xff] }
0x5e03   : > { %v15561_v59 = vpop.f32.mrf.mxu1 }
0x5e04   : > { %v13151_v58 = vadd.f32 %v14081_v55, %v13144_v36 }
0x5e06   : > { %v13152_v49 = vadd.f32 %v13151_v58, %v17539_v6  ;;  %v14087_v6 = vld [vmem:[%s17864_s21 + $0x48] sm:$0xff] }
0x5e07   : > { %15567 = vmatpush3.msra.mxu0 %v14087_v6 }
0x5e08   : > { %v13157_v27 = vsel %vm1238_vm0, %v13152_v49, 0.0  ;;  %15568 = vmatprep.subr.mxu0 %v15970_v33 }
0x5e09   : > { %13158 = vadd.xlane.f32.xlu1 %v13157_v27  ;;  %15569 = vmatpush3.msra.mxu0 %v14086_v51  ;;  %v13428_v27 = vld [vmem:[%s16165_s4 + $0x10] sm:$0xff]  ;;  %v14113_v51 = vld [vmem:[%s16160_s27] ss:$0 sm:$0xff] }
0x5e0a   : > { %15600 = vmatprep.subr.mxu0 %v15970_v33 }
0x5e92   : > { %v13159_v40 = vpop.xlane.xlu1 %13158 }
0x5e93   : > { %v13160_v41 = vmul.f32 0.03125, %v13159_v40  ;;  %v13427_v40 = vld [vmem:[%s16165_s4 + $0x8] sm:$0xff] }
0x5e95   : > { %v13161_v42 = vsub.f32 %v13152_v49, %v13160_v41  ;;  %v13429_v49 = vld [vmem:[%s16165_s4 + $0x18] sm:$0xff]  ;;  %v13426_v41 = vld [vmem:[%s16165_s4] sm:$0xff] }
0x5e97   : > { %v13162_v50 = vmul.f32 %v13161_v42, %v13161_v42 }
0x5e99   : > { %v13163_v63 = vsel %vm1238_vm0, %v13162_v50, 0.0 }
0x5e9a   : > { %13164 = vadd.xlane.f32.xlu0 %v13163_v63 }
0x5f23   : > { %v13165_v56 = vpop.xlane.xlu0 %13164 }
0x5f24   : > { %v13166_v24 = vmul.f32 0.03125, %v13165_v56 }
0x5f26   : > { %v13167_v62 = vadd.f32 1e-05, %v13166_v24 }
0x5f28   : > { %15905 = vrsqrt.f32 %v13167_v62 }
0x5f35   : > { %v15906_v57 = vpop.eup %15905 }
0x5f36   : > { %v13169_v61 = vmul.f32 %v15906_v57, %v13161_v42 }
0x5f38   : > { %v13176_v10 = vmul.f32 %v14084_v60, %v13169_v61 }
0x5f3a   : > { %v13183_v0 = vadd.f32 %v14085_v8, %v13176_v10 }
0x5f3c   : > { %15571 = vmatmul.mubr.msk.f32.vlgmr.msra.gmra.mxu0 %vm1238_vm0, %v13183_v0 }
0x5f3d   : > { %15608 = vmatprep.mubr.msk.f32.mxu0 %vm15971_vm7, %v15970_v33  ;;  %15601 = vmatpush3.msra.mxu0 %v13429_v49 }
0x5f3e   : > { %15602 = vmatprep.subr.mxu0 %v15970_v33 }
0x5f3f   : > { %15603 = vmatpush3.msra.mxu0 %v13428_v27 }
0x5f40   : > { %15604 = vmatprep.subr.mxu0 %v15970_v33 }
0x5f41   : > { %15605 = vmatpush3.msra.mxu0 %v13427_v40 }
0x5f42   : > { %15606 = vmatprep.subr.mxu0 %v15970_v33 }
0x5f43   : > { %15607 = vmatpush3.msra.mxu0 %v13426_v41 }
0x5ffc   : > { %v13281_v16 = vpop.f32.mrf.mxu0 }
0x5ffd   : > { %v13282_v18 = vadd.f32 %v14104_v13, %v13281_v16 }
0x5ffe   : > { %v15572_v14 = vpop.f32.mrf.mxu0 }
0x5fff   : > { %v13285_v19 = vmax.f32 %v13282_v18, 0.0 }
0x6001   : > { %15598 = vmatmul.mubr.msk.f32.vlgmr.msra.gmra.mxu1 %vm2633_vm6, %v13285_v19 }
0x60c1   : > { %v13361_v23 = vpop.f32.mrf.mxu1 }
0x60c2   : > { %v13362_v28 = vadd.f32 %v14106_v22, %v13361_v23 }
0x60c3   : > { %v15599_v39 = vpop.f32.mrf.mxu1 }
0x60c4   : > { %v13365_v29 = vadd.f32 %v13362_v28, %v13183_v0 }
0x60c6   : > { %v13370_v30 = vsel %vm1238_vm0, %v13365_v29, 0.0 }
0x60c7   : > { %13371 = vadd.xlane.f32.xlu0 %v13370_v30 }
0x6150   : > { %v13372_v48 = vpop.xlane.xlu0 %13371 }
0x6151   : > { %v13373_v37 = vmul.f32 0.03125, %v13372_v48 }
0x6153   : > { %v13374_v31 = vsub.f32 %v13365_v29, %v13373_v37 }
0x6155   : > { %v13375_v11 = vmul.f32 %v13374_v31, %v13374_v31 }
0x6157   : > { %v13376_v47 = vsel %vm1238_vm0, %v13375_v11, 0.0 }
0x6158   : > { %13377 = vadd.xlane.f32.xlu1 %v13376_v47 }
0x61e1   : > { %v13378_v20 = vpop.xlane.xlu1 %13377 }
0x61e2   : > { %v13379_v3 = vmul.f32 0.03125, %v13378_v20 }
0x61e4   : > { %v13380_v15 = vadd.f32 1e-05, %v13379_v3 }
0x61e6   : > { %15907 = vrsqrt.f32 %v13380_v15 }
0x61f3   : > { %v15908_v32 = vpop.eup %15907 }
0x61f4   : > { %v13382_v25 = vmul.f32 %v15908_v32, %v13374_v31 }
0x61f6   : > { %v13389_v17 = vmul.f32 %v14110_v21, %v13382_v25 }
0x61f8   : > { %v13396_v34 = vadd.f32 %v14111_v26, %v13389_v17 }
0x61fa   : > { %v13399_v12 = vsel %vm1238_vm0, %v13396_v34, 0.0 }
0x61fb   : > { %13400 = vadd.xlane.f32.xlu0 %v13399_v12 }
0x6284   : > { %v13401_v55 = vpop.xlane.xlu0 %13400 }
0x6285   : > { %v13402_v35 = vmul.f32 0.03125, %v13401_v55 }
0x6287   : > { %v13403_v36 = vsub.f32 %v13396_v34, %v13402_v35 }
0x6289   : > { %v13404_v59 = vmul.f32 %v13403_v36, %v13403_v36 }
0x628b   : > { %v13405_v58 = vsel %vm1238_vm0, %v13404_v59, 0.0 }
0x628c   : > { %13406 = vadd.xlane.f32.xlu1 %v13405_v58 }
0x6315   : > { %v13407_v42 = vpop.xlane.xlu1 %13406 }
0x6316   : > { %v13408_v50 = vmul.f32 0.03125, %v13407_v42 }
0x6318   : > { %v13409_v63 = vadd.f32 1e-05, %v13408_v50 }
0x631a   : > { %15909 = vrsqrt.f32 %v13409_v63 }
0x6327   : > { %v15910_v38 = vpop.eup %15909 }
0x6328   : > { %v13411_v6 = vmul.f32 %v15910_v38, %v13403_v36 }
0x632a   : > { %v13418_v5 = vmul.f32 %v14112_v43, %v13411_v6 }
0x632c   : > { %v13425_v9 = vadd.f32 %v14113_v51, %v13418_v5 }
0x632e   : > { %15609 = vmatmul.mubr.msk.f32.vlgmr.msra.gmra.mxu0 %vm1238_vm0, %v13425_v9 }
0x63ee   : > { %v13506_v44 = vpop.f32.mrf.mxu0 }
0x63ef   : > { %v13507_v4 = vadd.f32 %v14114_v2, %v13506_v44 }
0x63f0   : > { %v15610_v45 = vpop.f32.mrf.mxu0 }
0x63f1   : > { %13510 = vst [vmem:[%s1211_s15] sm:$0xff] %v13507_v4 }
0x63f2 PF: > { %s17880_s16 = sld [smem:[#allocation40_spill]] }
0x63f8   : > { %s89_s22 = sadd.s32 1, %s17880_s16  }
0x63f9   : > { %p86_p4 = scmp.ge.s32.totalorder %s89_s22, 4  }
0x63fb   :  { %88 = sbr.rel (!%p86_p4) target bundleno = 93 (0x5d), region = 311 }

</bundles_post_ra>
